<compile_context>
chip_gen: v7x
topology: tpu7x:2x2x1
jax: 0.10.0
libtpu: 0.0.40
codegen_flags: <defaults>
</compile_context>

<pallas_src>
import numpy as np
import jax
import jax.numpy as jnp
from jax.experimental import pallas as pl
from jax.experimental.pallas import tpu as pltpu

B_TILE = 8          # images packed into the lane dimension per grid step
LANE_OUT = 128      # lane-dense output row width (first B_TILE lanes are real)


def _relu6(x):
    return jnp.minimum(jnp.maximum(x, 0.0), 6.0)


# --------------------------- fused Pallas kernel ----------------------------

def _dw_sep_block(x, g_ref, s_ref, r_ref, db_ref, pw_ref, pb_ref):
    """Depthwise 3x3 stride-2 (+folded BN, ReLU6) then pointwise 1x1 (+folded BN,
    ReLU6), batch packed into lanes.
      x : (N_in, Cin*B) f32        g : (9*N_out, N_in) bf16 stacked 0/1 gather
      s : (9*N_out, Cin*B) f32 per-tap depthwise scale (BN folded, batch tiled)
      r : (N_out, 9*N_out) f32 0/1 tap-reduction matrix
      pw: (Cin*B, Cout*B) bf16 batch-block-diagonal pointwise weight
    returns (N_out, Cout*B) f32."""
    t = jnp.dot(g_ref[...], x.astype(jnp.bfloat16),
                preferred_element_type=jnp.float32)            # (9*N_out, Cin*B)
    acc = jnp.dot(r_ref[...], t * s_ref[...],
                  preferred_element_type=jnp.float32)          # (N_out, Cin*B)
    h = _relu6(acc + db_ref[...])
    y = jnp.dot(h.astype(jnp.bfloat16), pw_ref[...],
                preferred_element_type=jnp.float32)            # (N_out, Cout*B)
    return _relu6(y + pb_ref[...])


def _fused_forward_kernel(x_ref, g0_ref, w0_ref, b0_ref,
                          g1_ref, s1_ref, r1_ref, db1_ref, pw1_ref, pb1_ref,
                          g2_ref, s2_ref, r2_ref, db2_ref, pw2_ref, pb2_ref,
                          g3_ref, s3_ref, r3_ref, db3_ref, pw3_ref, pb3_ref,
                          f1w_ref, f1b_ref, f2w_ref, f2b_ref, o_ref):
    # ---- stem: dense 3x3 conv (stride 1, pad 1) + folded BN + ReLU6 ----
    n0 = g0_ref.shape[0] // 9                                  # 256 positions
    xb = x_ref[0].astype(jnp.bfloat16)                         # (256, 3*B)
    t0 = jnp.dot(g0_ref[...], xb,
                 preferred_element_type=jnp.float32)           # (9*256, 3*B)
    cb = w0_ref.shape[2]                                       # 16*B
    a0 = jnp.zeros((n0, cb), jnp.float32)
    a1 = jnp.zeros((n0, cb), jnp.float32)
    a2 = jnp.zeros((n0, cb), jnp.float32)
    for k in range(9):                                         # per-tap channel mix
        part = jnp.dot(t0[k * n0:(k + 1) * n0].astype(jnp.bfloat16), w0_ref[k],
                       preferred_element_type=jnp.float32)     # (256, 16*B)
        if k % 3 == 0:
            a0 = a0 + part
        elif k % 3 == 1:
            a1 = a1 + part
        else:
            a2 = a2 + part
    x1 = _relu6(a0 + a1 + a2 + b0_ref[...])                    # (256, 16*B)

    # ---- three depthwise-separable blocks, stride 2: 16x16 -> 8 -> 4 -> 2 ----
    x2 = _dw_sep_block(x1, g1_ref, s1_ref, r1_ref, db1_ref, pw1_ref, pb1_ref)  # (64, 32B)
    x3 = _dw_sep_block(x2, g2_ref, s2_ref, r2_ref, db2_ref, pw2_ref, pb2_ref)  # (16, 64B)
    x4 = _dw_sep_block(x3, g3_ref, s3_ref, r3_ref, db3_ref, pw3_ref, pb3_ref)  # (4, 128B)

    # ---- head: AdaptiveAvgPool2d(1) + Linear(128,32) + ReLU6
    #            + Dropout(0.2)=identity at inference + Linear(32,1) + Sigmoid ----
    pooled = jnp.mean(x4, axis=0, keepdims=True)               # (1, 128*B)
    hdn = _relu6(jnp.dot(pooled.astype(jnp.bfloat16), f1w_ref[...],
                         preferred_element_type=jnp.float32) + f1b_ref[...])   # (1, 32B)
    logit = jnp.dot(hdn, f2w_ref[...],
                    preferred_element_type=jnp.float32) + f2b_ref[...]         # (1, 128)
    z = jnp.exp(-jnp.abs(logit))                               # stable sigmoid
    sig = jnp.where(logit >= 0.0, 1.0, z) / (1.0 + z)
    o_ref[...] = sig.reshape(o_ref.shape)                      # lane-dense (1,1,128) store


# ----------------------------- JAX-side glue --------------------------------

def _const_spec(a):
    """Full-array block, grid-independent index map (stays resident in VMEM)."""
    zeros = (0,) * a.ndim
    return pl.BlockSpec(a.shape, lambda *_: zeros)


def forward(params, x_nchw):
    b, c, hh, ww = x_nchw.shape
    assert c == 3 and hh == 16 and ww == 16, "model is built for (B, 3, 16, 16) inputs"
    nb = -(-b // B_TILE)
    pad = nb * B_TILE - b
    xp = jnp.pad(x_nchw.astype(jnp.float32), ((0, pad), (0, 0), (0, 0), (0, 0)))
    # (nb*B, C, H, W) -> (nb, H*W, C*B): lane index = channel*B_TILE + batch-in-block
    xp = xp.reshape(nb, B_TILE, c, hh, ww)
    xp = jnp.transpose(xp, (0, 3, 4, 2, 1)).reshape(nb, hh * ww, c * B_TILE)

    args = [xp, params['g0'], params['stem_w'], params['stem_b']]
    in_specs = [pl.BlockSpec((1, hh * ww, c * B_TILE), lambda i: (i, 0, 0)),
                _const_spec(params['g0']), _const_spec(params['stem_w']),
                _const_spec(params['stem_b'])]
    for blk in params['blocks']:
        for name in ('g', 's', 'r', 'db', 'pw', 'pb'):
            args.append(blk[name])
            in_specs.append(_const_spec(blk[name]))
    for name in ('fc1_w', 'fc1_b', 'fc2_w', 'fc2_b'):
        args.append(params[name])
        in_specs.append(_const_spec(params[name]))

    out = pl.pallas_call(
        _fused_forward_kernel,
        out_shape=jax.ShapeDtypeStruct((nb, 1, LANE_OUT), jnp.float32),
        grid=(nb,),
        in_specs=in_specs,
        out_specs=pl.BlockSpec((1, 1, LANE_OUT), lambda i: (i, 0, 0)),
        compiler_params=pltpu.CompilerParams(
            dimension_semantics=("parallel",),
            vmem_limit_bytes=48 * 1024 * 1024),
    )(*args)
    # first B_TILE lanes of each step's row hold the per-image sigmoids
    return out[:, 0, :B_TILE].reshape(nb * B_TILE)[:b, None]


# ------------------------- parameters & constants ---------------------------

def _fold_bn(key, ch, eps=1e-5):
    k1, k2, k3, k4 = jax.random.split(key, 4)
    gamma = 1.0 + 0.1 * jax.random.normal(k1, (ch,))
    beta = 0.1 * jax.random.normal(k2, (ch,))
    mean = 0.1 * jax.random.normal(k3, (ch,))
    var = 0.5 + jax.random.uniform(k4, (ch,))
    scale = gamma / jnp.sqrt(var + eps)
    shift = beta - mean * scale
    return scale, shift


def _make_gather_stacked(h, w, stride):
    """Stacked 0/1 gather matrix (9*H_out*W_out, H*W): row k*N_out + m selects tap
    k=(ky,kx) of output position m for a 3x3 conv, pad 1, given stride; zero rows
    encode the zero padding."""
    ho = (h + 2 - 3) // stride + 1
    wo = (w + 2 - 3) // stride + 1
    g = np.zeros((9, ho * wo, h * w), np.float32)
    for ky in range(3):
        for kx in range(3):
            k = ky * 3 + kx
            for oh in range(ho):
                ih = oh * stride + ky - 1
                if not (0 <= ih < h):
                    continue
                for ow in range(wo):
                    iw = ow * stride + kx - 1
                    if 0 <= iw < w:
                        g[k, oh * wo + ow, ih * w + iw] = 1.0
    return jnp.asarray(g.reshape(9 * ho * wo, h * w), dtype=jnp.bfloat16)  # exact in bf16


def _kron_batch(w):
    """(Cin, Cout) -> (Cin*B, Cout*B) batch-block-diagonal weight (lane = c*B + b)."""
    return jnp.kron(w, jnp.eye(B_TILE, dtype=w.dtype))


def _tile_batch(v):
    """(C,) per-channel vector -> (1, C*B) lane row (lane = c*B + b)."""
    return jnp.repeat(v, B_TILE)[None, :]


def init_params(key):
    """Deterministic synthetic parameters matching the PyTorch module's shapes,
    with inference-mode BatchNorm folded in, laid out for batch-packed lanes."""
    keys = jax.random.split(key, 16)
    p = {}

    # stem: Conv2d(3, 16, 3, 1, 1, bias=False) + BN(16) + ReLU6
    w = 0.2 * jax.random.normal(keys[0], (16, 3, 3, 3))              # PyTorch OIHW
    s, sh = _fold_bn(keys[1], 16)
    w = w * s[:, None, None, None]                                   # fold BN scale
    p['g0'] = _make_gather_stacked(16, 16, 1)                        # (2304, 256)
    p['stem_w'] = jnp.stack(                                         # (9, 3B, 16B)
        [_kron_batch(jnp.transpose(w[:, :, ky, kx], (1, 0)))
         for ky in range(3) for kx in range(3)], axis=0).astype(jnp.bfloat16)
    p['stem_b'] = _tile_batch(sh).astype(jnp.float32)                # (1, 16B)

    p['blocks'] = []
    spatial = 16
    for i, (cin, cout) in enumerate([(16, 32), (32, 64), (64, 128)]):
        kdw, kbn1, kpw, kbn2 = jax.random.split(keys[2 + i], 4)
        n_out = (spatial // 2) ** 2
        dw = 0.2 * jax.random.normal(kdw, (cin, 1, 3, 3))            # depthwise, groups=cin
        ds_, dsh = _fold_bn(kbn1, cin)
        dwc = dw[:, 0] * ds_[:, None, None]                          # (Cin, 3, 3), BN folded
        s_mat = jnp.concatenate(                                     # (9*N_out, Cin*B)
            [jnp.broadcast_to(_tile_batch(dwc[:, ky, kx]), (n_out, cin * B_TILE))
             for ky in range(3) for kx in range(3)], axis=0).astype(jnp.float32)
        r_mat = jnp.asarray(np.tile(np.eye(n_out, dtype=np.float32), (1, 9)))  # (N_out, 9*N_out)
        pw = 0.2 * jax.random.normal(kpw, (cout, cin, 1, 1))         # pointwise
        ps_, psh = _fold_bn(kbn2, cout)
        pww = (pw[:, :, 0, 0] * ps_[:, None]).T                      # (Cin, Cout), scale folded
        p['blocks'].append(dict(
            g=_make_gather_stacked(spatial, spatial, 2),             # (9*N_out, N_in)
            s=s_mat,
            r=r_mat,
            db=_tile_batch(dsh).astype(jnp.float32),                 # (1, Cin*B)
            pw=_kron_batch(pww).astype(jnp.bfloat16),                # (Cin*B, Cout*B)
            pb=_tile_batch(psh).astype(jnp.float32)))                # (1, Cout*B)
        spatial //= 2

    # head: Linear(128,32)+ReLU6, Dropout(0.2)=identity at inference, Linear(32,1)+Sigmoid
    k1, k2, k3, k4 = jax.random.split(keys[10], 4)
    w1 = 0.1 * jax.random.normal(k1, (32, 128))
    b1 = 0.1 * jax.random.normal(k2, (32,))
    w2 = 0.1 * jax.random.normal(k3, (1, 32))
    b2 = 0.1 * jax.random.normal(k4, (1,))
    p['fc1_w'] = _kron_batch(jnp.transpose(w1, (1, 0))).astype(jnp.bfloat16)   # (128B, 32B)
    p['fc1_b'] = _tile_batch(b1).astype(jnp.float32)                           # (1, 32B)
    f2 = jnp.kron(jnp.transpose(w2, (1, 0)), jnp.eye(B_TILE, dtype=jnp.float32))  # (32B, B)
    p['fc2_w'] = jnp.pad(f2, ((0, 0), (0, LANE_OUT - B_TILE))).astype(jnp.float32)  # (32B, 128)
    p['fc2_b'] = jnp.pad(jnp.full((B_TILE,), b2[0]),
                         (0, LANE_OUT - B_TILE))[None, :].astype(jnp.float32)       # (1, 128)
    return p


if __name__ == "__main__":
    key = jax.random.PRNGKey(0)
    pkey, xkey = jax.random.split(key)
    params = init_params(pkey)
    x = jax.random.normal(xkey, (2, 3, 16, 16), dtype=jnp.float32)   # NCHW, like PyTorch
    out = jax.jit(forward)(params, x)
    jax.block_until_ready(out)
    assert out.shape == (2, 1)
    assert bool(jnp.all((out >= 0.0) & (out <= 1.0)))
    print("KERNEL_OK")
</pallas_src>

<mosaic_0001>
module attributes {stable_mosaic.version = 11 : i64} {
  func.func @_fused_forward_kernel(%arg0: i32, %arg1: memref<1x256x24xf32, #tpu.memory_space<vmem>>, %arg2: memref<2304x256xbf16, #tpu.memory_space<vmem>>, %arg3: memref<9x24x128xbf16, #tpu.memory_space<vmem>>, %arg4: memref<1x128xf32, #tpu.memory_space<vmem>>, %arg5: memref<576x256xbf16, #tpu.memory_space<vmem>>, %arg6: memref<576x128xf32, #tpu.memory_space<vmem>>, %arg7: memref<64x576xf32, #tpu.memory_space<vmem>>, %arg8: memref<1x128xf32, #tpu.memory_space<vmem>>, %arg9: memref<128x256xbf16, #tpu.memory_space<vmem>>, %arg10: memref<1x256xf32, #tpu.memory_space<vmem>>, %arg11: memref<144x64xbf16, #tpu.memory_space<vmem>>, %arg12: memref<144x256xf32, #tpu.memory_space<vmem>>, %arg13: memref<16x144xf32, #tpu.memory_space<vmem>>, %arg14: memref<1x256xf32, #tpu.memory_space<vmem>>, %arg15: memref<256x512xbf16, #tpu.memory_space<vmem>>, %arg16: memref<1x512xf32, #tpu.memory_space<vmem>>, %arg17: memref<36x16xbf16, #tpu.memory_space<vmem>>, %arg18: memref<36x512xf32, #tpu.memory_space<vmem>>, %arg19: memref<4x36xf32, #tpu.memory_space<vmem>>, %arg20: memref<1x512xf32, #tpu.memory_space<vmem>>, %arg21: memref<512x1024xbf16, #tpu.memory_space<vmem>>, %arg22: memref<1x1024xf32, #tpu.memory_space<vmem>>, %arg23: memref<1024x256xbf16, #tpu.memory_space<vmem>>, %arg24: memref<1x256xf32, #tpu.memory_space<vmem>>, %arg25: memref<256x128xf32, #tpu.memory_space<vmem>>, %arg26: memref<1x128xf32, #tpu.memory_space<vmem>>, %arg27: memref<1x1x128xf32, #tpu.memory_space<vmem>>) attributes {dimension_semantics = [#tpu.dimension_semantics<parallel>], iteration_bounds = array<i64: 1>, scalar_prefetch = 0 : i64, scratch_operands = 0 : i64, tpu.core_type = #tpu.core_type<tc>, window_params = [{transform_indices = @transform_0, window_bounds = array<i64: 1, 256, 24>}, {pipeline_mode = #tpu.pipeline_mode<synchronous>, transform_indices = @transform_1, window_bounds = array<i64: 2304, 256>}, {pipeline_mode = #tpu.pipeline_mode<synchronous>, transform_indices = @transform_2, window_bounds = array<i64: 9, 24, 128>}, {pipeline_mode = #tpu.pipeline_mode<synchronous>, transform_indices = @transform_3, window_bounds = array<i64: 1, 128>}, {pipeline_mode = #tpu.pipeline_mode<synchronous>, transform_indices = @transform_4, window_bounds = array<i64: 576, 256>}, {pipeline_mode = #tpu.pipeline_mode<synchronous>, transform_indices = @transform_5, window_bounds = array<i64: 576, 128>}, {pipeline_mode = #tpu.pipeline_mode<synchronous>, transform_indices = @transform_6, window_bounds = array<i64: 64, 576>}, {pipeline_mode = #tpu.pipeline_mode<synchronous>, transform_indices = @transform_7, window_bounds = array<i64: 1, 128>}, {pipeline_mode = #tpu.pipeline_mode<synchronous>, transform_indices = @transform_8, window_bounds = array<i64: 128, 256>}, {pipeline_mode = #tpu.pipeline_mode<synchronous>, transform_indices = @transform_9, window_bounds = array<i64: 1, 256>}, {pipeline_mode = #tpu.pipeline_mode<synchronous>, transform_indices = @transform_10, window_bounds = array<i64: 144, 64>}, {pipeline_mode = #tpu.pipeline_mode<synchronous>, transform_indices = @transform_11, window_bounds = array<i64: 144, 256>}, {pipeline_mode = #tpu.pipeline_mode<synchronous>, transform_indices = @transform_12, window_bounds = array<i64: 16, 144>}, {pipeline_mode = #tpu.pipeline_mode<synchronous>, transform_indices = @transform_13, window_bounds = array<i64: 1, 256>}, {pipeline_mode = #tpu.pipeline_mode<synchronous>, transform_indices = @transform_14, window_bounds = array<i64: 256, 512>}, {pipeline_mode = #tpu.pipeline_mode<synchronous>, transform_indices = @transform_15, window_bounds = array<i64: 1, 512>}, {pipeline_mode = #tpu.pipeline_mode<synchronous>, transform_indices = @transform_16, window_bounds = array<i64: 36, 16>}, {pipeline_mode = #tpu.pipeline_mode<synchronous>, transform_indices = @transform_17, window_bounds = array<i64: 36, 512>}, {pipeline_mode = #tpu.pipeline_mode<synchronous>, transform_indices = @transform_18, window_bounds = array<i64: 4, 36>}, {pipeline_mode = #tpu.pipeline_mode<synchronous>, transform_indices = @transform_19, window_bounds = array<i64: 1, 512>}, {pipeline_mode = #tpu.pipeline_mode<synchronous>, transform_indices = @transform_20, window_bounds = array<i64: 512, 1024>}, {pipeline_mode = #tpu.pipeline_mode<synchronous>, transform_indices = @transform_21, window_bounds = array<i64: 1, 1024>}, {pipeline_mode = #tpu.pipeline_mode<synchronous>, transform_indices = @transform_22, window_bounds = array<i64: 1024, 256>}, {pipeline_mode = #tpu.pipeline_mode<synchronous>, transform_indices = @transform_23, window_bounds = array<i64: 1, 256>}, {pipeline_mode = #tpu.pipeline_mode<synchronous>, transform_indices = @transform_24, window_bounds = array<i64: 256, 128>}, {pipeline_mode = #tpu.pipeline_mode<synchronous>, transform_indices = @transform_25, window_bounds = array<i64: 1, 128>}, {transform_indices = @transform_26, window_bounds = array<i64: 1, 1, 128>}]} {
    %c0 = arith.constant 0 : index
    %c0_0 = arith.constant 0 : index
    %c0_1 = arith.constant 0 : index
    %0 = vector.load %arg1[%c0, %c0_0, %c0_1] : memref<1x256x24xf32, #tpu.memory_space<vmem>>, vector<1x256x24xf32>
    %1 = vector.shape_cast %0 : vector<1x256x24xf32> to vector<256x24xf32>
    %2 = arith.truncf %1 : vector<256x24xf32> to vector<256x24xbf16>
    %c0_2 = arith.constant 0 : index
    %c0_3 = arith.constant 0 : index
    %3 = vector.load %arg2[%c0_2, %c0_3] : memref<2304x256xbf16, #tpu.memory_space<vmem>>, vector<2304x256xbf16>
    %cst = arith.constant dense<0.000000e+00> : vector<2304x24xf32>
    %4 = tpu.matmul %3, %2, %cst {dimension_numbers = #tpu.dot_dimension_numbers<[1], [0], [0], [1], [0, 0, 1, 1], [], []>} : vector<2304x256xbf16>, vector<256x24xbf16>, vector<2304x24xf32> -> vector<2304x24xf32>
    %cst_4 = arith.constant 0.000000e+00 : f32
    %5 = vector.broadcast %cst_4 : f32 to vector<256x128xf32>
    %cst_5 = arith.constant 0.000000e+00 : f32
    %6 = vector.broadcast %cst_5 : f32 to vector<256x128xf32>
    %cst_6 = arith.constant 0.000000e+00 : f32
    %7 = vector.broadcast %cst_6 : f32 to vector<256x128xf32>
    %8 = vector.extract_strided_slice %4 {offsets = [0, 0], sizes = [256, 24], strides = [1, 1]} : vector<2304x24xf32> to vector<256x24xf32>
    %9 = arith.truncf %8 : vector<256x24xf32> to vector<256x24xbf16>
    %c0_7 = arith.constant 0 : index
    %c0_8 = arith.constant 0 : index
    %c0_9 = arith.constant 0 : index
    %10 = vector.load %arg3[%c0_7, %c0_8, %c0_9] : memref<9x24x128xbf16, #tpu.memory_space<vmem>>, vector<1x24x128xbf16>
    %11 = vector.shape_cast %10 : vector<1x24x128xbf16> to vector<24x128xbf16>
    %cst_10 = arith.constant dense<0.000000e+00> : vector<256x128xf32>
    %12 = tpu.matmul %9, %11, %cst_10 {dimension_numbers = #tpu.dot_dimension_numbers<[1], [0], [0], [1], [0, 0, 1, 1], [], []>} : vector<256x24xbf16>, vector<24x128xbf16>, vector<256x128xf32> -> vector<256x128xf32>
    %13 = arith.addf %5, %12 : vector<256x128xf32>
    %14 = vector.extract_strided_slice %4 {offsets = [256, 0], sizes = [256, 24], strides = [1, 1]} : vector<2304x24xf32> to vector<256x24xf32>
    %15 = arith.truncf %14 : vector<256x24xf32> to vector<256x24xbf16>
    %c1 = arith.constant 1 : index
    %c0_11 = arith.constant 0 : index
    %c0_12 = arith.constant 0 : index
    %16 = vector.load %arg3[%c1, %c0_11, %c0_12] : memref<9x24x128xbf16, #tpu.memory_space<vmem>>, vector<1x24x128xbf16>
    %17 = vector.shape_cast %16 : vector<1x24x128xbf16> to vector<24x128xbf16>
    %cst_13 = arith.constant dense<0.000000e+00> : vector<256x128xf32>
    %18 = tpu.matmul %15, %17, %cst_13 {dimension_numbers = #tpu.dot_dimension_numbers<[1], [0], [0], [1], [0, 0, 1, 1], [], []>} : vector<256x24xbf16>, vector<24x128xbf16>, vector<256x128xf32> -> vector<256x128xf32>
    %19 = arith.addf %6, %18 : vector<256x128xf32>
    %20 = vector.extract_strided_slice %4 {offsets = [512, 0], sizes = [256, 24], strides = [1, 1]} : vector<2304x24xf32> to vector<256x24xf32>
    %21 = arith.truncf %20 : vector<256x24xf32> to vector<256x24xbf16>
    %c2 = arith.constant 2 : index
    %c0_14 = arith.constant 0 : index
    %c0_15 = arith.constant 0 : index
    %22 = vector.load %arg3[%c2, %c0_14, %c0_15] : memref<9x24x128xbf16, #tpu.memory_space<vmem>>, vector<1x24x128xbf16>
    %23 = vector.shape_cast %22 : vector<1x24x128xbf16> to vector<24x128xbf16>
    %cst_16 = arith.constant dense<0.000000e+00> : vector<256x128xf32>
    %24 = tpu.matmul %21, %23, %cst_16 {dimension_numbers = #tpu.dot_dimension_numbers<[1], [0], [0], [1], [0, 0, 1, 1], [], []>} : vector<256x24xbf16>, vector<24x128xbf16>, vector<256x128xf32> -> vector<256x128xf32>
    %25 = arith.addf %7, %24 : vector<256x128xf32>
    %26 = vector.extract_strided_slice %4 {offsets = [768, 0], sizes = [256, 24], strides = [1, 1]} : vector<2304x24xf32> to vector<256x24xf32>
    %27 = arith.truncf %26 : vector<256x24xf32> to vector<256x24xbf16>
    %c3 = arith.constant 3 : index
    %c0_17 = arith.constant 0 : index
    %c0_18 = arith.constant 0 : index
    %28 = vector.load %arg3[%c3, %c0_17, %c0_18] : memref<9x24x128xbf16, #tpu.memory_space<vmem>>, vector<1x24x128xbf16>
    %29 = vector.shape_cast %28 : vector<1x24x128xbf16> to vector<24x128xbf16>
    %cst_19 = arith.constant dense<0.000000e+00> : vector<256x128xf32>
    %30 = tpu.matmul %27, %29, %cst_19 {dimension_numbers = #tpu.dot_dimension_numbers<[1], [0], [0], [1], [0, 0, 1, 1], [], []>} : vector<256x24xbf16>, vector<24x128xbf16>, vector<256x128xf32> -> vector<256x128xf32>
    %31 = arith.addf %13, %30 : vector<256x128xf32>
    %32 = vector.extract_strided_slice %4 {offsets = [1024, 0], sizes = [256, 24], strides = [1, 1]} : vector<2304x24xf32> to vector<256x24xf32>
    %33 = arith.truncf %32 : vector<256x24xf32> to vector<256x24xbf16>
    %c4 = arith.constant 4 : index
    %c0_20 = arith.constant 0 : index
    %c0_21 = arith.constant 0 : index
    %34 = vector.load %arg3[%c4, %c0_20, %c0_21] : memref<9x24x128xbf16, #tpu.memory_space<vmem>>, vector<1x24x128xbf16>
    %35 = vector.shape_cast %34 : vector<1x24x128xbf16> to vector<24x128xbf16>
    %cst_22 = arith.constant dense<0.000000e+00> : vector<256x128xf32>
    %36 = tpu.matmul %33, %35, %cst_22 {dimension_numbers = #tpu.dot_dimension_numbers<[1], [0], [0], [1], [0, 0, 1, 1], [], []>} : vector<256x24xbf16>, vector<24x128xbf16>, vector<256x128xf32> -> vector<256x128xf32>
    %37 = arith.addf %19, %36 : vector<256x128xf32>
    %38 = vector.extract_strided_slice %4 {offsets = [1280, 0], sizes = [256, 24], strides = [1, 1]} : vector<2304x24xf32> to vector<256x24xf32>
    %39 = arith.truncf %38 : vector<256x24xf32> to vector<256x24xbf16>
    %c5 = arith.constant 5 : index
    %c0_23 = arith.constant 0 : index
    %c0_24 = arith.constant 0 : index
    %40 = vector.load %arg3[%c5, %c0_23, %c0_24] : memref<9x24x128xbf16, #tpu.memory_space<vmem>>, vector<1x24x128xbf16>
    %41 = vector.shape_cast %40 : vector<1x24x128xbf16> to vector<24x128xbf16>
    %cst_25 = arith.constant dense<0.000000e+00> : vector<256x128xf32>
    %42 = tpu.matmul %39, %41, %cst_25 {dimension_numbers = #tpu.dot_dimension_numbers<[1], [0], [0], [1], [0, 0, 1, 1], [], []>} : vector<256x24xbf16>, vector<24x128xbf16>, vector<256x128xf32> -> vector<256x128xf32>
    %43 = arith.addf %25, %42 : vector<256x128xf32>
    %44 = vector.extract_strided_slice %4 {offsets = [1536, 0], sizes = [256, 24], strides = [1, 1]} : vector<2304x24xf32> to vector<256x24xf32>
    %45 = arith.truncf %44 : vector<256x24xf32> to vector<256x24xbf16>
    %c6 = arith.constant 6 : index
    %c0_26 = arith.constant 0 : index
    %c0_27 = arith.constant 0 : index
    %46 = vector.load %arg3[%c6, %c0_26, %c0_27] : memref<9x24x128xbf16, #tpu.memory_space<vmem>>, vector<1x24x128xbf16>
    %47 = vector.shape_cast %46 : vector<1x24x128xbf16> to vector<24x128xbf16>
    %cst_28 = arith.constant dense<0.000000e+00> : vector<256x128xf32>
    %48 = tpu.matmul %45, %47, %cst_28 {dimension_numbers = #tpu.dot_dimension_numbers<[1], [0], [0], [1], [0, 0, 1, 1], [], []>} : vector<256x24xbf16>, vector<24x128xbf16>, vector<256x128xf32> -> vector<256x128xf32>
    %49 = arith.addf %31, %48 : vector<256x128xf32>
    %50 = vector.extract_strided_slice %4 {offsets = [1792, 0], sizes = [256, 24], strides = [1, 1]} : vector<2304x24xf32> to vector<256x24xf32>
    %51 = arith.truncf %50 : vector<256x24xf32> to vector<256x24xbf16>
    %c7 = arith.constant 7 : index
    %c0_29 = arith.constant 0 : index
    %c0_30 = arith.constant 0 : index
    %52 = vector.load %arg3[%c7, %c0_29, %c0_30] : memref<9x24x128xbf16, #tpu.memory_space<vmem>>, vector<1x24x128xbf16>
    %53 = vector.shape_cast %52 : vector<1x24x128xbf16> to vector<24x128xbf16>
    %cst_31 = arith.constant dense<0.000000e+00> : vector<256x128xf32>
    %54 = tpu.matmul %51, %53, %cst_31 {dimension_numbers = #tpu.dot_dimension_numbers<[1], [0], [0], [1], [0, 0, 1, 1], [], []>} : vector<256x24xbf16>, vector<24x128xbf16>, vector<256x128xf32> -> vector<256x128xf32>
    %55 = arith.addf %37, %54 : vector<256x128xf32>
    %56 = vector.extract_strided_slice %4 {offsets = [2048, 0], sizes = [256, 24], strides = [1, 1]} : vector<2304x24xf32> to vector<256x24xf32>
    %57 = arith.truncf %56 : vector<256x24xf32> to vector<256x24xbf16>
    %c8 = arith.constant 8 : index
    %c0_32 = arith.constant 0 : index
    %c0_33 = arith.constant 0 : index
    %58 = vector.load %arg3[%c8, %c0_32, %c0_33] : memref<9x24x128xbf16, #tpu.memory_space<vmem>>, vector<1x24x128xbf16>
    %59 = vector.shape_cast %58 : vector<1x24x128xbf16> to vector<24x128xbf16>
    %cst_34 = arith.constant dense<0.000000e+00> : vector<256x128xf32>
    %60 = tpu.matmul %57, %59, %cst_34 {dimension_numbers = #tpu.dot_dimension_numbers<[1], [0], [0], [1], [0, 0, 1, 1], [], []>} : vector<256x24xbf16>, vector<24x128xbf16>, vector<256x128xf32> -> vector<256x128xf32>
    %61 = arith.addf %43, %60 : vector<256x128xf32>
    %62 = arith.addf %49, %55 : vector<256x128xf32>
    %63 = arith.addf %62, %61 : vector<256x128xf32>
    %c0_35 = arith.constant 0 : index
    %c0_36 = arith.constant 0 : index
    %64 = vector.load %arg4[%c0_35, %c0_36] : memref<1x128xf32, #tpu.memory_space<vmem>>, vector<1x128xf32>
    %65 = vector.broadcast %64 : vector<1x128xf32> to vector<256x128xf32>
    %66 = arith.addf %63, %65 : vector<256x128xf32>
    %cst_37 = arith.constant 0.000000e+00 : f32
    %67 = vector.broadcast %cst_37 : f32 to vector<256x128xf32>
    %68 = arith.maximumf %66, %67 : vector<256x128xf32>
    %cst_38 = arith.constant 6.000000e+00 : f32
    %69 = vector.broadcast %cst_38 : f32 to vector<256x128xf32>
    %70 = arith.minimumf %68, %69 : vector<256x128xf32>
    %c0_39 = arith.constant 0 : index
    %c0_40 = arith.constant 0 : index
    %71 = vector.load %arg5[%c0_39, %c0_40] : memref<576x256xbf16, #tpu.memory_space<vmem>>, vector<576x256xbf16>
    %72 = arith.truncf %70 : vector<256x128xf32> to vector<256x128xbf16>
    %cst_41 = arith.constant dense<0.000000e+00> : vector<576x128xf32>
    %73 = tpu.matmul %71, %72, %cst_41 {dimension_numbers = #tpu.dot_dimension_numbers<[1], [0], [0], [1], [0, 0, 1, 1], [], []>} : vector<576x256xbf16>, vector<256x128xbf16>, vector<576x128xf32> -> vector<576x128xf32>
    %c0_42 = arith.constant 0 : index
    %c0_43 = arith.constant 0 : index
    %74 = vector.load %arg7[%c0_42, %c0_43] : memref<64x576xf32, #tpu.memory_space<vmem>>, vector<64x576xf32>
    %c0_44 = arith.constant 0 : index
    %c0_45 = arith.constant 0 : index
    %75 = vector.load %arg6[%c0_44, %c0_45] : memref<576x128xf32, #tpu.memory_space<vmem>>, vector<576x128xf32>
    %76 = arith.mulf %73, %75 : vector<576x128xf32>
    %cst_46 = arith.constant dense<0.000000e+00> : vector<64x128xf32>
    %77 = tpu.matmul %74, %76, %cst_46 {dimension_numbers = #tpu.dot_dimension_numbers<[1], [0], [0], [1], [0, 0, 1, 1], [], []>} : vector<64x576xf32>, vector<576x128xf32>, vector<64x128xf32> -> vector<64x128xf32>
    %c0_47 = arith.constant 0 : index
    %c0_48 = arith.constant 0 : index
    %78 = vector.load %arg8[%c0_47, %c0_48] : memref<1x128xf32, #tpu.memory_space<vmem>>, vector<1x128xf32>
    %79 = vector.broadcast %78 : vector<1x128xf32> to vector<64x128xf32>
    %80 = arith.addf %77, %79 : vector<64x128xf32>
    %cst_49 = arith.constant 0.000000e+00 : f32
    %81 = vector.broadcast %cst_49 : f32 to vector<64x128xf32>
    %82 = arith.maximumf %80, %81 : vector<64x128xf32>
    %cst_50 = arith.constant 6.000000e+00 : f32
    %83 = vector.broadcast %cst_50 : f32 to vector<64x128xf32>
    %84 = arith.minimumf %82, %83 : vector<64x128xf32>
    %85 = arith.truncf %84 : vector<64x128xf32> to vector<64x128xbf16>
    %c0_51 = arith.constant 0 : index
    %c0_52 = arith.constant 0 : index
    %86 = vector.load %arg9[%c0_51, %c0_52] : memref<128x256xbf16, #tpu.memory_space<vmem>>, vector<128x256xbf16>
    %cst_53 = arith.constant dense<0.000000e+00> : vector<64x256xf32>
    %87 = tpu.matmul %85, %86, %cst_53 {dimension_numbers = #tpu.dot_dimension_numbers<[1], [0], [0], [1], [0, 0, 1, 1], [], []>} : vector<64x128xbf16>, vector<128x256xbf16>, vector<64x256xf32> -> vector<64x256xf32>
    %c0_54 = arith.constant 0 : index
    %c0_55 = arith.constant 0 : index
    %88 = vector.load %arg10[%c0_54, %c0_55] : memref<1x256xf32, #tpu.memory_space<vmem>>, vector<1x256xf32>
    %89 = vector.broadcast %88 : vector<1x256xf32> to vector<64x256xf32>
    %90 = arith.addf %87, %89 : vector<64x256xf32>
    %cst_56 = arith.constant 0.000000e+00 : f32
    %91 = vector.broadcast %cst_56 : f32 to vector<64x256xf32>
    %92 = arith.maximumf %90, %91 : vector<64x256xf32>
    %cst_57 = arith.constant 6.000000e+00 : f32
    %93 = vector.broadcast %cst_57 : f32 to vector<64x256xf32>
    %94 = arith.minimumf %92, %93 : vector<64x256xf32>
    %c0_58 = arith.constant 0 : index
    %c0_59 = arith.constant 0 : index
    %95 = vector.load %arg11[%c0_58, %c0_59] : memref<144x64xbf16, #tpu.memory_space<vmem>>, vector<144x64xbf16>
    %96 = arith.truncf %94 : vector<64x256xf32> to vector<64x256xbf16>
    %cst_60 = arith.constant dense<0.000000e+00> : vector<144x256xf32>
    %97 = tpu.matmul %95, %96, %cst_60 {dimension_numbers = #tpu.dot_dimension_numbers<[1], [0], [0], [1], [0, 0, 1, 1], [], []>} : vector<144x64xbf16>, vector<64x256xbf16>, vector<144x256xf32> -> vector<144x256xf32>
    %c0_61 = arith.constant 0 : index
    %c0_62 = arith.constant 0 : index
    %98 = vector.load %arg13[%c0_61, %c0_62] : memref<16x144xf32, #tpu.memory_space<vmem>>, vector<16x144xf32>
    %c0_63 = arith.constant 0 : index
    %c0_64 = arith.constant 0 : index
    %99 = vector.load %arg12[%c0_63, %c0_64] : memref<144x256xf32, #tpu.memory_space<vmem>>, vector<144x256xf32>
    %100 = arith.mulf %97, %99 : vector<144x256xf32>
    %cst_65 = arith.constant dense<0.000000e+00> : vector<16x256xf32>
    %101 = tpu.matmul %98, %100, %cst_65 {dimension_numbers = #tpu.dot_dimension_numbers<[1], [0], [0], [1], [0, 0, 1, 1], [], []>} : vector<16x144xf32>, vector<144x256xf32>, vector<16x256xf32> -> vector<16x256xf32>
    %c0_66 = arith.constant 0 : index
    %c0_67 = arith.constant 0 : index
    %102 = vector.load %arg14[%c0_66, %c0_67] : memref<1x256xf32, #tpu.memory_space<vmem>>, vector<1x256xf32>
    %103 = vector.broadcast %102 : vector<1x256xf32> to vector<16x256xf32>
    %104 = arith.addf %101, %103 : vector<16x256xf32>
    %cst_68 = arith.constant 0.000000e+00 : f32
    %105 = vector.broadcast %cst_68 : f32 to vector<16x256xf32>
    %106 = arith.maximumf %104, %105 : vector<16x256xf32>
    %cst_69 = arith.constant 6.000000e+00 : f32
    %107 = vector.broadcast %cst_69 : f32 to vector<16x256xf32>
    %108 = arith.minimumf %106, %107 : vector<16x256xf32>
    %109 = arith.truncf %108 : vector<16x256xf32> to vector<16x256xbf16>
    %c0_70 = arith.constant 0 : index
    %c0_71 = arith.constant 0 : index
    %110 = vector.load %arg15[%c0_70, %c0_71] : memref<256x512xbf16, #tpu.memory_space<vmem>>, vector<256x512xbf16>
    %cst_72 = arith.constant dense<0.000000e+00> : vector<16x512xf32>
    %111 = tpu.matmul %109, %110, %cst_72 {dimension_numbers = #tpu.dot_dimension_numbers<[1], [0], [0], [1], [0, 0, 1, 1], [], []>} : vector<16x256xbf16>, vector<256x512xbf16>, vector<16x512xf32> -> vector<16x512xf32>
    %c0_73 = arith.constant 0 : index
    %c0_74 = arith.constant 0 : index
    %112 = vector.load %arg16[%c0_73, %c0_74] : memref<1x512xf32, #tpu.memory_space<vmem>>, vector<1x512xf32>
    %113 = vector.broadcast %112 : vector<1x512xf32> to vector<16x512xf32>
    %114 = arith.addf %111, %113 : vector<16x512xf32>
    %cst_75 = arith.constant 0.000000e+00 : f32
    %115 = vector.broadcast %cst_75 : f32 to vector<16x512xf32>
    %116 = arith.maximumf %114, %115 : vector<16x512xf32>
    %cst_76 = arith.constant 6.000000e+00 : f32
    %117 = vector.broadcast %cst_76 : f32 to vector<16x512xf32>
    %118 = arith.minimumf %116, %117 : vector<16x512xf32>
    %c0_77 = arith.constant 0 : index
    %c0_78 = arith.constant 0 : index
    %119 = vector.load %arg17[%c0_77, %c0_78] : memref<36x16xbf16, #tpu.memory_space<vmem>>, vector<36x16xbf16>
    %120 = arith.truncf %118 : vector<16x512xf32> to vector<16x512xbf16>
    %cst_79 = arith.constant dense<0.000000e+00> : vector<36x512xf32>
    %121 = tpu.matmul %119, %120, %cst_79 {dimension_numbers = #tpu.dot_dimension_numbers<[1], [0], [0], [1], [0, 0, 1, 1], [], []>} : vector<36x16xbf16>, vector<16x512xbf16>, vector<36x512xf32> -> vector<36x512xf32>
    %c0_80 = arith.constant 0 : index
    %c0_81 = arith.constant 0 : index
    %122 = vector.load %arg19[%c0_80, %c0_81] : memref<4x36xf32, #tpu.memory_space<vmem>>, vector<4x36xf32>
    %c0_82 = arith.constant 0 : index
    %c0_83 = arith.constant 0 : index
    %123 = vector.load %arg18[%c0_82, %c0_83] : memref<36x512xf32, #tpu.memory_space<vmem>>, vector<36x512xf32>
    %124 = arith.mulf %121, %123 : vector<36x512xf32>
    %cst_84 = arith.constant dense<0.000000e+00> : vector<4x512xf32>
    %125 = tpu.matmul %122, %124, %cst_84 {dimension_numbers = #tpu.dot_dimension_numbers<[1], [0], [0], [1], [0, 0, 1, 1], [], []>} : vector<4x36xf32>, vector<36x512xf32>, vector<4x512xf32> -> vector<4x512xf32>
    %c0_85 = arith.constant 0 : index
    %c0_86 = arith.constant 0 : index
    %126 = vector.load %arg20[%c0_85, %c0_86] : memref<1x512xf32, #tpu.memory_space<vmem>>, vector<1x512xf32>
    %127 = vector.broadcast %126 : vector<1x512xf32> to vector<4x512xf32>
    %128 = arith.addf %125, %127 : vector<4x512xf32>
    %cst_87 = arith.constant 0.000000e+00 : f32
    %129 = vector.broadcast %cst_87 : f32 to vector<4x512xf32>
    %130 = arith.maximumf %128, %129 : vector<4x512xf32>
    %cst_88 = arith.constant 6.000000e+00 : f32
    %131 = vector.broadcast %cst_88 : f32 to vector<4x512xf32>
    %132 = arith.minimumf %130, %131 : vector<4x512xf32>
    %133 = arith.truncf %132 : vector<4x512xf32> to vector<4x512xbf16>
    %c0_89 = arith.constant 0 : index
    %c0_90 = arith.constant 0 : index
    %134 = vector.load %arg21[%c0_89, %c0_90] : memref<512x1024xbf16, #tpu.memory_space<vmem>>, vector<512x1024xbf16>
    %cst_91 = arith.constant dense<0.000000e+00> : vector<4x1024xf32>
    %135 = tpu.matmul %133, %134, %cst_91 {dimension_numbers = #tpu.dot_dimension_numbers<[1], [0], [0], [1], [0, 0, 1, 1], [], []>} : vector<4x512xbf16>, vector<512x1024xbf16>, vector<4x1024xf32> -> vector<4x1024xf32>
    %c0_92 = arith.constant 0 : index
    %c0_93 = arith.constant 0 : index
    %136 = vector.load %arg22[%c0_92, %c0_93] : memref<1x1024xf32, #tpu.memory_space<vmem>>, vector<1x1024xf32>
    %137 = vector.broadcast %136 : vector<1x1024xf32> to vector<4x1024xf32>
    %138 = arith.addf %135, %137 : vector<4x1024xf32>
    %cst_94 = arith.constant 0.000000e+00 : f32
    %139 = vector.broadcast %cst_94 : f32 to vector<4x1024xf32>
    %140 = arith.maximumf %138, %139 : vector<4x1024xf32>
    %cst_95 = arith.constant 6.000000e+00 : f32
    %141 = vector.broadcast %cst_95 : f32 to vector<4x1024xf32>
    %142 = arith.minimumf %140, %141 : vector<4x1024xf32>
    %cst_96 = arith.constant dense<0.000000e+00> : vector<1024xf32>
    %143 = vector.multi_reduction <add>, %142, %cst_96 [0] : vector<4x1024xf32> to vector<1024xf32>
    %144 = vector.shape_cast %143 : vector<1024xf32> to vector<1x1024xf32>
    %cst_97 = arith.constant 4.000000e+00 : f32
    %145 = vector.broadcast %cst_97 : f32 to vector<1x1024xf32>
    %146 = arith.divf %144, %145 : vector<1x1024xf32>
    %147 = arith.truncf %146 : vector<1x1024xf32> to vector<1x1024xbf16>
    %c0_98 = arith.constant 0 : index
    %c0_99 = arith.constant 0 : index
    %148 = vector.load %arg23[%c0_98, %c0_99] : memref<1024x256xbf16, #tpu.memory_space<vmem>>, vector<1024x256xbf16>
    %cst_100 = arith.constant dense<0.000000e+00> : vector<1x256xf32>
    %149 = tpu.matmul %147, %148, %cst_100 {dimension_numbers = #tpu.dot_dimension_numbers<[1], [0], [0], [1], [0, 0, 1, 1], [], []>} : vector<1x1024xbf16>, vector<1024x256xbf16>, vector<1x256xf32> -> vector<1x256xf32>
    %c0_101 = arith.constant 0 : index
    %c0_102 = arith.constant 0 : index
    %150 = vector.load %arg24[%c0_101, %c0_102] : memref<1x256xf32, #tpu.memory_space<vmem>>, vector<1x256xf32>
    %151 = arith.addf %149, %150 : vector<1x256xf32>
    %cst_103 = arith.constant 0.000000e+00 : f32
    %152 = vector.broadcast %cst_103 : f32 to vector<1x256xf32>
    %153 = arith.maximumf %151, %152 : vector<1x256xf32>
    %cst_104 = arith.constant 6.000000e+00 : f32
    %154 = vector.broadcast %cst_104 : f32 to vector<1x256xf32>
    %155 = arith.minimumf %153, %154 : vector<1x256xf32>
    %c0_105 = arith.constant 0 : index
    %c0_106 = arith.constant 0 : index
    %156 = vector.load %arg25[%c0_105, %c0_106] : memref<256x128xf32, #tpu.memory_space<vmem>>, vector<256x128xf32>
    %cst_107 = arith.constant dense<0.000000e+00> : vector<1x128xf32>
    %157 = tpu.matmul %155, %156, %cst_107 {dimension_numbers = #tpu.dot_dimension_numbers<[1], [0], [0], [1], [0, 0, 1, 1], [], []>} : vector<1x256xf32>, vector<256x128xf32>, vector<1x128xf32> -> vector<1x128xf32>
    %c0_108 = arith.constant 0 : index
    %c0_109 = arith.constant 0 : index
    %158 = vector.load %arg26[%c0_108, %c0_109] : memref<1x128xf32, #tpu.memory_space<vmem>>, vector<1x128xf32>
    %159 = arith.addf %157, %158 : vector<1x128xf32>
    %160 = math.absf %159 : vector<1x128xf32>
    %cst_110 = arith.constant 0.000000e+00 : f32
    %161 = vector.broadcast %cst_110 : f32 to vector<1x128xf32>
    %162 = arith.subf %161, %160 : vector<1x128xf32>
    %163 = math.exp %162 : vector<1x128xf32>
    %cst_111 = arith.constant 0.000000e+00 : f32
    %164 = vector.broadcast %cst_111 : f32 to vector<1x128xf32>
    %165 = arith.cmpf oge, %159, %164 : vector<1x128xf32>
    %cst_112 = arith.constant 1.000000e+00 : f32
    %166 = vector.broadcast %cst_112 : f32 to vector<1x128xf32>
    %167 = arith.select %165, %166, %163 : vector<1x128xi1>, vector<1x128xf32>
    %cst_113 = arith.constant 1.000000e+00 : f32
    %168 = vector.broadcast %cst_113 : f32 to vector<1x128xf32>
    %169 = arith.addf %168, %163 : vector<1x128xf32>
    %170 = arith.divf %167, %169 : vector<1x128xf32>
    %171 = vector.shape_cast %170 : vector<1x128xf32> to vector<1x1x128xf32>
    %c0_114 = arith.constant 0 : index
    %c0_115 = arith.constant 0 : index
    %c0_116 = arith.constant 0 : index
    %172 = vector.load %arg27[%c0_114, %c0_115, %c0_116] : memref<1x1x128xf32, #tpu.memory_space<vmem>>, vector<1x1x128xf32>
    tpu.vector_store %arg27[%c0_114, %c0_115, %c0_116], %171 {strides = array<i32>} : memref<1x1x128xf32, #tpu.memory_space<vmem>>, vector<1x1x128xf32>,
    return
  }
  func.func @transform_0(%arg0: i32) -> (i32, i32, i32) {
    %c0_i32 = arith.constant 0 : i32
    %c0_i32_0 = arith.constant 0 : i32
    %c0_i32_1 = arith.constant 0 : i32
    return %arg0, %c0_i32, %c0_i32_0 : i32, i32, i32
  }
  func.func @transform_1(%arg0: i32) -> (i32, i32) {
    %c0_i32 = arith.constant 0 : i32
    %c0_i32_0 = arith.constant 0 : i32
    %c0_i32_1 = arith.constant 0 : i32
    return %c0_i32, %c0_i32_0 : i32, i32
  }
  func.func @transform_2(%arg0: i32) -> (i32, i32, i32) {
    %c0_i32 = arith.constant 0 : i32
    %c0_i32_0 = arith.constant 0 : i32
    %c0_i32_1 = arith.constant 0 : i32
    %c0_i32_2 = arith.constant 0 : i32
    return %c0_i32, %c0_i32_0, %c0_i32_1 : i32, i32, i32
  }
  func.func @transform_3(%arg0: i32) -> (i32, i32) {
    %c0_i32 = arith.constant 0 : i32
    %c0_i32_0 = arith.constant 0 : i32
    %c0_i32_1 = arith.constant 0 : i32
    return %c0_i32, %c0_i32_0 : i32, i32
  }
  func.func @transform_4(%arg0: i32) -> (i32, i32) {
    %c0_i32 = arith.constant 0 : i32
    %c0_i32_0 = arith.constant 0 : i32
    %c0_i32_1 = arith.constant 0 : i32
    return %c0_i32, %c0_i32_0 : i32, i32
  }
  func.func @transform_5(%arg0: i32) -> (i32, i32) {
    %c0_i32 = arith.constant 0 : i32
    %c0_i32_0 = arith.constant 0 : i32
    %c0_i32_1 = arith.constant 0 : i32
    return %c0_i32, %c0_i32_0 : i32, i32
  }
  func.func @transform_6(%arg0: i32) -> (i32, i32) {
    %c0_i32 = arith.constant 0 : i32
    %c0_i32_0 = arith.constant 0 : i32
    %c0_i32_1 = arith.constant 0 : i32
    return %c0_i32, %c0_i32_0 : i32, i32
  }
  func.func @transform_7(%arg0: i32) -> (i32, i32) {
    %c0_i32 = arith.constant 0 : i32
    %c0_i32_0 = arith.constant 0 : i32
    %c0_i32_1 = arith.constant 0 : i32
    return %c0_i32, %c0_i32_0 : i32, i32
  }
  func.func @transform_8(%arg0: i32) -> (i32, i32) {
    %c0_i32 = arith.constant 0 : i32
    %c0_i32_0 = arith.constant 0 : i32
    %c0_i32_1 = arith.constant 0 : i32
    return %c0_i32, %c0_i32_0 : i32, i32
  }
  func.func @transform_9(%arg0: i32) -> (i32, i32) {
    %c0_i32 = arith.constant 0 : i32
    %c0_i32_0 = arith.constant 0 : i32
    %c0_i32_1 = arith.constant 0 : i32
    return %c0_i32, %c0_i32_0 : i32, i32
  }
  func.func @transform_10(%arg0: i32) -> (i32, i32) {
    %c0_i32 = arith.constant 0 : i32
    %c0_i32_0 = arith.constant 0 : i32
    %c0_i32_1 = arith.constant 0 : i32
    return %c0_i32, %c0_i32_0 : i32, i32
  }
  func.func @transform_11(%arg0: i32) -> (i32, i32) {
    %c0_i32 = arith.constant 0 : i32
    %c0_i32_0 = arith.constant 0 : i32
    %c0_i32_1 = arith.constant 0 : i32
    return %c0_i32, %c0_i32_0 : i32, i32
  }
  func.func @transform_12(%arg0: i32) -> (i32, i32) {
    %c0_i32 = arith.constant 0 : i32
    %c0_i32_0 = arith.constant 0 : i32
    %c0_i32_1 = arith.constant 0 : i32
    return %c0_i32, %c0_i32_0 : i32, i32
  }
  func.func @transform_13(%arg0: i32) -> (i32, i32) {
    %c0_i32 = arith.constant 0 : i32
    %c0_i32_0 = arith.constant 0 : i32
    %c0_i32_1 = arith.constant 0 : i32
    return %c0_i32, %c0_i32_0 : i32, i32
  }
  func.func @transform_14(%arg0: i32) -> (i32, i32) {
    %c0_i32 = arith.constant 0 : i32
    %c0_i32_0 = arith.constant 0 : i32
    %c0_i32_1 = arith.constant 0 : i32
    return %c0_i32, %c0_i32_0 : i32, i32
  }
  func.func @transform_15(%arg0: i32) -> (i32, i32) {
    %c0_i32 = arith.constant 0 : i32
    %c0_i32_0 = arith.constant 0 : i32
    %c0_i32_1 = arith.constant 0 : i32
    return %c0_i32, %c0_i32_0 : i32, i32
  }
  func.func @transform_16(%arg0: i32) -> (i32, i32) {
    %c0_i32 = arith.constant 0 : i32
    %c0_i32_0 = arith.constant 0 : i32
    %c0_i32_1 = arith.constant 0 : i32
    return %c0_i32, %c0_i32_0 : i32, i32
  }
  func.func @transform_17(%arg0: i32) -> (i32, i32) {
    %c0_i32 = arith.constant 0 : i32
    %c0_i32_0 = arith.constant 0 : i32
    %c0_i32_1 = arith.constant 0 : i32
    return %c0_i32, %c0_i32_0 : i32, i32
  }
  func.func @transform_18(%arg0: i32) -> (i32, i32) {
    %c0_i32 = arith.constant 0 : i32
    %c0_i32_0 = arith.constant 0 : i32
    %c0_i32_1 = arith.constant 0 : i32
    return %c0_i32, %c0_i32_0 : i32, i32
  }
  func.func @transform_19(%arg0: i32) -> (i32, i32) {
    %c0_i32 = arith.constant 0 : i32
    %c0_i32_0 = arith.constant 0 : i32
    %c0_i32_1 = arith.constant 0 : i32
    return %c0_i32, %c0_i32_0 : i32, i32
  }
  func.func @transform_20(%arg0: i32) -> (i32, i32) {
    %c0_i32 = arith.constant 0 : i32
    %c0_i32_0 = arith.constant 0 : i32
    %c0_i32_1 = arith.constant 0 : i32
    return %c0_i32, %c0_i32_0 : i32, i32
  }
  func.func @transform_21(%arg0: i32) -> (i32, i32) {
    %c0_i32 = arith.constant 0 : i32
    %c0_i32_0 = arith.constant 0 : i32
    %c0_i32_1 = arith.constant 0 : i32
    return %c0_i32, %c0_i32_0 : i32, i32
  }
  func.func @transform_22(%arg0: i32) -> (i32, i32) {
    %c0_i32 = arith.constant 0 : i32
    %c0_i32_0 = arith.constant 0 : i32
    %c0_i32_1 = arith.constant 0 : i32
    return %c0_i32, %c0_i32_0 : i32, i32
  }
  func.func @transform_23(%arg0: i32) -> (i32, i32) {
    %c0_i32 = arith.constant 0 : i32
    %c0_i32_0 = arith.constant 0 : i32
    %c0_i32_1 = arith.constant 0 : i32
    return %c0_i32, %c0_i32_0 : i32, i32
  }
  func.func @transform_24(%arg0: i32) -> (i32, i32) {
    %c0_i32 = arith.constant 0 : i32
    %c0_i32_0 = arith.constant 0 : i32
    %c0_i32_1 = arith.constant 0 : i32
    return %c0_i32, %c0_i32_0 : i32, i32
  }
  func.func @transform_25(%arg0: i32) -> (i32, i32) {
    %c0_i32 = arith.constant 0 : i32
    %c0_i32_0 = arith.constant 0 : i32
    %c0_i32_1 = arith.constant 0 : i32
    return %c0_i32, %c0_i32_0 : i32, i32
  }
  func.func @transform_26(%arg0: i32) -> (i32, i32, i32) {
    %c0_i32 = arith.constant 0 : i32
    %c0_i32_0 = arith.constant 0 : i32
    %c0_i32_1 = arith.constant 0 : i32
    return %arg0, %c0_i32, %c0_i32_0 : i32, i32, i32
  }
}

</mosaic_0001>

<bundles_post_ra>
// kernel: forward.1
= control target key start
LH: loop header
LB: loop body
LE: loop exit
PB: predicated region body
PF: predicated region fallthrough
CT: control target
= control target key end

     0   :  { %s17854_s0 = inlined_call_operand.vmem [shape: f32[1,256,24], index: 0, kind: input, shape index: {}]   ;;  %s17855_s1 = inlined_call_operand.hbm [shape: bf16[2304,256], index: 1, kind: input, shape index: {}]   ;;  %s17856_s2 = inlined_call_operand.hbm [shape: bf16[9,24,128], index: 2, kind: input, shape index: {}]   ;;  %s17857_s3 = inlined_call_operand.hbm [shape: f32[1,128], index: 3, kind: input, shape index: {}]   ;;  %s17858_s4 = inlined_call_operand.hbm [shape: bf16[576,256], index: 4, kind: input, shape index: {}]   ;;  %s17859_s5 = inlined_call_operand.hbm [shape: f32[576,128], index: 5, kind: input, shape index: {}]   ;;  %s17860_s6 = inlined_call_operand.hbm [shape: f32[64,576], index: 6, kind: input, shape index: {}]   ;;  %s17861_s7 = inlined_call_operand.hbm [shape: f32[1,128], index: 7, kind: input, shape index: {}]   ;;  %s17862_s8 = inlined_call_operand.vmem [shape: bf16[128,256], index: 8, kind: input, shape index: {}]   ;;  %s17863_s9 = inlined_call_operand.hbm [shape: f32[1,256], index: 9, kind: input, shape index: {}]   ;;  %s17864_s10 = inlined_call_operand.vmem [shape: bf16[144,64], index: 10, kind: input, shape index: {}]   ;;  %s17865_s11 = inlined_call_operand.hbm [shape: f32[144,256], index: 11, kind: input, shape index: {}]   ;;  %s17866_s12 = inlined_call_operand.hbm [shape: f32[16,144], index: 12, kind: input, shape index: {}]   ;;  %s17867_s13 = inlined_call_operand.hbm [shape: f32[1,256], index: 13, kind: input, shape index: {}]   ;;  %s17868_s14 = inlined_call_operand.hbm [shape: bf16[256,512], index: 14, kind: input, shape index: {}]   ;;  %s17869_s15 = inlined_call_operand.hbm [shape: f32[1,512], index: 15, kind: input, shape index: {}]   ;;  %s17870_s16 = inlined_call_operand.vmem [shape: bf16[36,16], index: 16, kind: input, shape index: {}]   ;;  %s17871_s17 = inlined_call_operand.hbm [shape: f32[36,512], index: 17, kind: input, shape index: {}]   ;;  %s17872_s18 = inlined_call_operand.hbm [shape: f32[4,36], index: 18, kind: input, shape index: {}]   ;;  %s17873_s19 = inlined_call_operand.hbm [shape: f32[1,512], index: 19, kind: input, shape index: {}]   ;;  %s17874_s20 = inlined_call_operand.vmem [shape: bf16[512,1024], index: 20, kind: input, shape index: {}]   ;;  %s17875_s21 = inlined_call_operand.hbm [shape: f32[1,1024], index: 21, kind: input, shape index: {}]   ;;  %s17876_s22 = inlined_call_operand.hbm [shape: bf16[1024,256], index: 22, kind: input, shape index: {}]   ;;  %s17877_s23 = inlined_call_operand.hbm [shape: f32[1,256], index: 23, kind: input, shape index: {}]   ;;  %s17878_s24 = inlined_call_operand.hbm [shape: f32[256,128], index: 24, kind: input, shape index: {}]   ;;  %s17879_s25 = inlined_call_operand.hbm [shape: f32[1,128], index: 25, kind: input, shape index: {}]   ;;  %s17880_s26 = inlined_call_operand.vmem [shape: f32[1,1,128], index: 26, kind: output, shape index: {}]  }
   0x1   :  { %17947 = sst [smem:[#allocation94_spill]] %s17854_s0 }
   0x2   :  { %17948 = sst [smem:[#allocation95_spill]] %s17855_s1 }
   0x3   :  { %17949 = sst [smem:[#allocation96_spill]] %s17856_s2 }
   0x4   :  { %17950 = sst [smem:[#allocation97_spill]] %s17857_s3 }
   0x5   :  { %17951 = sst [smem:[#allocation98_spill]] %s17858_s4 }
   0x6   :  { %17952 = sst [smem:[#allocation99_spill]] %s17859_s5 }
   0x7   :  { %17953 = sst [smem:[#allocation100_spill]] %s17860_s6 }
   0x8   :  { %17954 = sst [smem:[#allocation101_spill]] %s17861_s7 }
   0x9   :  { %17955 = sst [smem:[#allocation102_spill]] %s17862_s8 }
   0xa   :  { %17956 = sst [smem:[#allocation103_spill]] %s17863_s9 }
   0xb   :  { %17957 = sst [smem:[#allocation104_spill]] %s17864_s10 }
   0xc   :  { %17958 = sst [smem:[#allocation105_spill]] %s17870_s16 }
   0xd   :  { %17959 = sst [smem:[#allocation106_spill]] %s17874_s20 }
   0xe   :  { %17960 = sst [smem:[#allocation107_spill]] %s17880_s26 }
   0xf   :  { %31 = vsyncpa [#allocation3], 0 }
  0x10   :  { %32 = vsyncpa [#allocation5], 0 }
  0x11   :  { %33 = vsyncpa [#allocation8], 0 }
  0x12   :  { %34 = vsyncpa [#allocation11], 0 }
  0x13   :  { %35 = vsyncpa [#allocation14], 0 }
  0x14   :  { %36 = vsyncpa [#allocation17], 0 }
  0x15   :  { %37 = vsyncpa [#allocation20], 0 }
  0x16   :  { %38 = vsyncpa [#allocation23], 0 }
  0x17   :  { %39 = vsyncpa [#allocation26], 0 }
  0x18   :  { %40 = vsyncpa [#allocation29], 0 }
  0x19   :  { %41 = vsyncpa [#allocation32], 0  ;;  %s15269_s27 = smov [#allocation4]   ;;  %s17961_s8 = sld [smem:[#allocation96_spill]] }
  0x1a   :  { %s61_s3 = sshll.u32 %s15269_s27, 4  ;;  %s62_s3 = int_to_ptr.vmem [resolvable:$true] %s61_s3 }
  0x1f   :  { %s14785_s4 = scalar_lea.hbm %s17961_s8, 1728 }
  0x20   :  { %p14786_p0 = scmp.ne.s32.totalorder %s17961_s8, %s14785_s4  ;;  %p14789_p1 = scmp.lt.u32.totalorder %s14785_s4, %s17961_s8 }
  0x22   :  { %p14791_p2 = pnand %p14789_p1, %p14786_p0 }
  0x24   :  { %14794 = shalt.err (!%p14791_p2)
}
  0x25   :  { %s14795_s2 = scalar_lea.vmem %s62_s3, 1728  ;;  %p14800_p4 = scmp.lt.s32.totalorder %s62_s3, %s62_s3 }
  0x26   :  { %p14796_p3 = scmp.ne.s32.totalorder %s62_s3, %s14795_s2  ;;  %p14801_p5 = scmp.lt.s32.totalorder %s14795_s2, %s14795_s2 }
  0x28   :  { %p14802_p6 = por %p14801_p5, %p14800_p4 }
  0x2a   :  { %p14803_p7 = pnand %p14802_p6, %p14796_p3 }
  0x2c   :  { %14806 = shalt.err (!%p14803_p7)
}
  0x2d   :  { %s15270_s5 = smov 64   ;;  %s15271_s10 = smov 4  }
  0x2e   :  { %67 = dma.hbm_to_vmem [thread:$0]  %s17961_s8, 1728, %s62_s3, [#allocation5], %s15270_s5, %s15270_s5, %s15271_s10  }
  0x2f   :  { %s15272_s27 = smov [#allocation7]   ;;  %s15273_s28 = smov [#allocation10]  }
  0x30   :  { %s83_s7 = sshll.u32 %s15272_s27, 4  ;;  %s107_s4 = sshll.u32 %s15273_s28, 4  ;;  %s84_s7 = int_to_ptr.vmem [resolvable:$true] %s83_s7  ;;  %s108_s4 = int_to_ptr.vmem [resolvable:$true] %s107_s4 }
  0x31   :  { %s17962_s9 = sld [smem:[#allocation98_spill]] }
  0x37   :  { %s14807_s30 = scalar_lea.hbm %s17962_s9, 9216 }
  0x38   :  { %p14808_p8 = scmp.ne.s32.totalorder %s17962_s9, %s14807_s30  ;;  %p14811_p9 = scmp.lt.u32.totalorder %s14807_s30, %s17962_s9 }
  0x3a   :  { %p14813_p10 = pnand %p14811_p9, %p14808_p8 }
  0x3c   :  { %14816 = shalt.err (!%p14813_p10)
}
  0x3d   :  { %s14817_s3 = scalar_lea.vmem %s84_s7, 9216  ;;  %p14822_p12 = scmp.lt.s32.totalorder %s84_s7, %s84_s7 }
  0x3e   :  { %p14818_p11 = scmp.ne.s32.totalorder %s84_s7, %s14817_s3  ;;  %p14823_p13 = scmp.lt.s32.totalorder %s14817_s3, %s14817_s3 }
  0x40   :  { %p14824_p0 = por %p14823_p13, %p14822_p12 }
  0x42   :  { %p14825_p1 = pnand %p14824_p0, %p14818_p11 }
  0x44   :  { %14828 = shalt.err (!%p14825_p1)
}
  0x45   :  { %s17894_s8 = smov 128   ;;  %s15275_s5 = smov 8  }
  0x46   :  { %89 = dma.hbm_to_vmem [thread:$0]  %s17962_s9, 9216, %s84_s7, [#allocation8], %s17894_s8, %s17894_s8, %s15275_s5  }
  0x47   :  { %s17963_s6 = sld [smem:[#allocation100_spill]] }
  0x4d   :  { %s14829_s1 = scalar_lea.hbm %s17963_s6, 5120 }
  0x4e   :  { %p14830_p2 = scmp.ne.s32.totalorder %s17963_s6, %s14829_s1  ;;  %p14833_p3 = scmp.lt.u32.totalorder %s14829_s1, %s17963_s6 }
  0x50   :  { %p14835_p4 = pnand %p14833_p3, %p14830_p2 }
  0x52   :  { %14838 = shalt.err (!%p14835_p4)
}
  0x53   :  { %s14839_s30 = scalar_lea.vmem %s108_s4, 5120  ;;  %p14844_p6 = scmp.lt.s32.totalorder %s108_s4, %s108_s4 }
  0x54   :  { %p14840_p5 = scmp.ne.s32.totalorder %s108_s4, %s14839_s30  ;;  %p14845_p7 = scmp.lt.s32.totalorder %s14839_s30, %s14839_s30 }
  0x56   :  { %p14846_p8 = por %p14845_p7, %p14844_p6 }
  0x58   :  { %p14847_p9 = pnand %p14846_p8, %p14840_p5 }
  0x5a   :  { %14850 = shalt.err (!%p14847_p9)
}
  0x5b   :  { %s15276_s7 = smov 640   ;;  %s15277_s9 = smov 40  }
  0x5c   :  { %113 = dma.hbm_to_vmem [thread:$0]  %s17963_s6, 5120, %s108_s4, [#allocation11], %s15276_s7, %s15276_s7, %s15277_s9  }
  0x5d   :  { %s15278_s26 = smov [#allocation13]   ;;  %s17964_s1 = sld [smem:[#allocation103_spill]] }
  0x5e   :  { %s132_s10 = sshll.u32 %s15278_s26, 4  ;;  %s133_s10 = int_to_ptr.vmem [resolvable:$true] %s132_s10 }
  0x63   :  { %s14851_s27 = scalar_lea.hbm %s17964_s1, 32 }
  0x64   :  { %p14852_p10 = scmp.ne.s32.totalorder %s17964_s1, %s14851_s27  ;;  %p14855_p11 = scmp.lt.u32.totalorder %s14851_s27, %s17964_s1 }
  0x66   :  { %p14857_p12 = pnand %p14855_p11, %p14852_p10 }
  0x68   :  { %14860 = shalt.err (!%p14857_p12)
}
  0x69   :  { %s14861_s8 = scalar_lea.vmem %s133_s10, 32  ;;  %p14866_p0 = scmp.lt.s32.totalorder %s133_s10, %s133_s10 }
  0x6a   :  { %p14862_p13 = scmp.ne.s32.totalorder %s133_s10, %s14861_s8  ;;  %p14867_p1 = scmp.lt.s32.totalorder %s14861_s8, %s14861_s8 }
  0x6c   :  { %p14868_p2 = por %p14867_p1, %p14866_p0 }
  0x6e   :  { %p14869_p3 = pnand %p14868_p2, %p14862_p13 }
  0x70   :  { %14872 = shalt.err (!%p14869_p3)
}
  0x71   :  { %135 = dma.hbm_to_vmem [thread:$0]  %s17964_s1, 32, %s133_s10, [#allocation14]  }
  0x72   :  { %s15279_s7 = smov [#allocation16]   ;;  %s15280_s2 = smov [#allocation19]  }
  0x73   :  { %s155_s9 = sshll.u32 %s15279_s7, 4  ;;  %s177_s3 = sshll.u32 %s15280_s2, 4  ;;  %s156_s9 = int_to_ptr.vmem [resolvable:$true] %s155_s9  ;;  %s15488_s3 = int_to_ptr.vmem [resolvable:$true] %s177_s3 }
  0x74   :  { %s14873_s20 = scalar_lea.hbm %s17866_s12, 512 }
  0x75   :  { %p14874_p4 = scmp.ne.s32.totalorder %s17866_s12, %s14873_s20  ;;  %p14877_p5 = scmp.lt.u32.totalorder %s14873_s20, %s17866_s12 }
  0x77   :  { %p14879_p6 = pnand %p14877_p5, %p14874_p4 }
  0x79   :  { %14882 = shalt.err (!%p14879_p6)
}
  0x7a   :  { %s14883_s10 = scalar_lea.vmem %s156_s9, 512  ;;  %p14888_p8 = scmp.lt.s32.totalorder %s156_s9, %s156_s9 }
  0x7b   :  { %p14884_p7 = scmp.ne.s32.totalorder %s156_s9, %s14883_s10  ;;  %p14889_p9 = scmp.lt.s32.totalorder %s14883_s10, %s14883_s10 }
  0x7d   :  { %p14890_p10 = por %p14889_p9, %p14888_p8 }
  0x7f   :  { %p14891_p11 = pnand %p14890_p10, %p14884_p7 }
  0x81   :  { %14894 = shalt.err (!%p14891_p11)
}
  0x82   :  { %s15281_s1 = smov 256   ;;  %s15282_s0 = smov 16  }
  0x83   :  { %161 = dma.hbm_to_vmem [thread:$0]  %s17866_s12, 512, %s156_s9, [#allocation17], %s15281_s1, %s15281_s1, %s15282_s0  }
  0x84   :  { %s14895_s2 = scalar_lea.hbm %s17868_s14, 8192 }
  0x85   :  { %p14896_p12 = scmp.ne.s32.totalorder %s17868_s14, %s14895_s2  ;;  %p14899_p13 = scmp.lt.u32.totalorder %s14895_s2, %s17868_s14 }
  0x87   :  { %p14901_p0 = pnand %p14899_p13, %p14896_p12 }
  0x89   :  { %14904 = shalt.err (!%p14901_p0)
}
  0x8a   :  { %s14905_s8 = scalar_lea.vmem %s15488_s3, 8192  ;;  %p14910_p2 = scmp.lt.s32.totalorder %s15488_s3, %s15488_s3 }
  0x8b   :  { %p14906_p1 = scmp.ne.s32.totalorder %s15488_s3, %s14905_s8  ;;  %p14911_p3 = scmp.lt.s32.totalorder %s14905_s8, %s14905_s8 }
  0x8d   :  { %p14912_p4 = por %p14911_p3, %p14910_p2 }
  0x8f   :  { %p14913_p5 = pnand %p14912_p4, %p14906_p1 }
  0x91   :  { %14916 = shalt.err (!%p14913_p5)
}
  0x92   :  { %183 = dma.hbm_to_vmem [thread:$0]  %s17868_s14, 8192, %s15488_s3, [#allocation20], %s15281_s1, %s15281_s1, %s15282_s0  }
  0x93   :  { %s15283_s28 = smov [#allocation22]   ;;  %s14917_s4 = scalar_lea.hbm %s17871_s17, 2560 }
  0x94   :  { %s201_s29 = sshll.u32 %s15283_s28, 4  ;;  %p14918_p6 = scmp.ne.s32.totalorder %s17871_s17, %s14917_s4  ;;  %s202_s29 = int_to_ptr.vmem [resolvable:$true] %s201_s29 }
  0x95   :  { %p14921_p7 = scmp.lt.u32.totalorder %s14917_s4, %s17871_s17 }
  0x97   :  { %p14923_p8 = pnand %p14921_p7, %p14918_p6 }
  0x99   :  { %14926 = shalt.err (!%p14923_p8)
}
  0x9a   :  { %s14927_s16 = scalar_lea.vmem %s202_s29, 2560  ;;  %p14932_p10 = scmp.lt.s32.totalorder %s202_s29, %s202_s29 }
  0x9b   :  { %p14928_p9 = scmp.ne.s32.totalorder %s202_s29, %s14927_s16  ;;  %p14933_p11 = scmp.lt.s32.totalorder %s14927_s16, %s14927_s16 }
  0x9d   :  { %p14934_p12 = por %p14933_p11, %p14932_p10 }
  0x9f   :  { %p14935_p13 = pnand %p14934_p12, %p14928_p9 }
  0xa1   :  { %14938 = shalt.err (!%p14935_p13)
}
  0xa2   :  { %s15284_s14 = smov 512   ;;  %s15285_s3 = smov 32  }
  0xa3   :  { %207 = dma.hbm_to_vmem [thread:$0]  %s17871_s17, 2560, %s202_s29, [#allocation23], %s15284_s14, %s15284_s14, %s15285_s3  }
  0xa4   :  { %s15286_s8 = smov [#allocation25]   ;;  %s15287_s9 = smov [#allocation28]  }
  0xa5   :  { %s224_s12 = sshll.u32 %s15286_s8, 4  ;;  %s245_s28 = sshll.u32 %s15287_s9, 4  ;;  %s225_s12 = int_to_ptr.vmem [resolvable:$true] %s224_s12  ;;  %s246_s28 = int_to_ptr.vmem [resolvable:$true] %s245_s28 }
  0xa6   :  { %s14939_s4 = scalar_lea.hbm %s17873_s19, 64 }
  0xa7   :  { %p14940_p0 = scmp.ne.s32.totalorder %s17873_s19, %s14939_s4  ;;  %p14943_p1 = scmp.lt.u32.totalorder %s14939_s4, %s17873_s19 }
  0xa9   :  { %p14945_p2 = pnand %p14943_p1, %p14940_p0 }
  0xab   :  { %14948 = shalt.err (!%p14945_p2)
}
  0xac   :  { %s14949_s17 = scalar_lea.vmem %s225_s12, 64  ;;  %p14954_p4 = scmp.lt.s32.totalorder %s225_s12, %s225_s12 }
  0xad   :  { %p14950_p3 = scmp.ne.s32.totalorder %s225_s12, %s14949_s17  ;;  %p14955_p5 = scmp.lt.s32.totalorder %s14949_s17, %s14949_s17 }
  0xaf   :  { %p14956_p6 = por %p14955_p5, %p14954_p4 }
  0xb1   :  { %p14957_p7 = pnand %p14956_p6, %p14950_p3 }
  0xb3   :  { %14960 = shalt.err (!%p14957_p7)
}
  0xb4   :  { %227 = dma.hbm_to_vmem [thread:$0]  %s17873_s19, 64, %s225_s12, [#allocation26]  }
  0xb5   :  { %s14961_s20 = scalar_lea.hbm %s17876_s22, 16384 }
  0xb6   :  { %p14962_p8 = scmp.ne.s32.totalorder %s17876_s22, %s14961_s20  ;;  %p14965_p9 = scmp.lt.u32.totalorder %s14961_s20, %s17876_s22 }
  0xb8   :  { %p14967_p10 = pnand %p14965_p9, %p14962_p8 }
  0xba   :  { %14970 = shalt.err (!%p14967_p10)
}
  0xbb   :  { %s14971_s30 = scalar_lea.vmem %s246_s28, 16384  ;;  %p14976_p12 = scmp.lt.s32.totalorder %s246_s28, %s246_s28 }
  0xbc   :  { %p14972_p11 = scmp.ne.s32.totalorder %s246_s28, %s14971_s30  ;;  %p14977_p13 = scmp.lt.s32.totalorder %s14971_s30, %s14971_s30 }
  0xbe   :  { %p14978_p0 = por %p14977_p13, %p14976_p12 }
  0xc0   :  { %p14979_p1 = pnand %p14978_p0, %p14972_p11 }
  0xc2   :  { %14982 = shalt.err (!%p14979_p1)
}
  0xc3   :  { %s17965_s19 = smov 128   ;;  %s15288_s6 = smov [#allocation31]  }
  0xc4   :  { %251 = dma.hbm_to_vmem [thread:$0]  %s17876_s22, 16384, %s246_s28, [#allocation29], %s17965_s19, %s17965_s19, %s15275_s5  }
  0xc5   :  { %s267_s7 = sshll.u32 %s15288_s6, 4  ;;  %s15289_s2 = smov [#allocation2]   ;;  %s268_s7 = int_to_ptr.vmem [resolvable:$true] %s267_s7 }
  0xc6   :  { %s49_s26 = sshll.u32 %s15289_s2, 4  ;;  %s14983_s16 = scalar_lea.hbm %s17878_s24, 4096  ;;  %s50_s26 = int_to_ptr.vmem [resolvable:$true] %s49_s26 }
  0xc7   :  { %p14984_p2 = scmp.ne.s32.totalorder %s17878_s24, %s14983_s16  ;;  %p14987_p3 = scmp.lt.u32.totalorder %s14983_s16, %s17878_s24 }
  0xc9   :  { %p14989_p4 = pnand %p14987_p3, %p14984_p2 }
  0xcb   :  { %14992 = shalt.err (!%p14989_p4)
}
  0xcc   :  { %s14993_s22 = scalar_lea.vmem %s268_s7, 4096  ;;  %p14998_p6 = scmp.lt.s32.totalorder %s268_s7, %s268_s7 }
  0xcd   :  { %p14994_p5 = scmp.ne.s32.totalorder %s268_s7, %s14993_s22  ;;  %p14999_p7 = scmp.lt.s32.totalorder %s14993_s22, %s14993_s22 }
  0xcf   :  { %p15000_p8 = por %p14999_p7, %p14998_p6 }
  0xd1   :  { %p15001_p9 = pnand %p15000_p8, %p14994_p5 }
  0xd3   :  { %15004 = shalt.err (!%p15001_p9)
}
  0xd4   :  { %273 = dma.hbm_to_vmem [thread:$0]  %s17878_s24, 4096, %s268_s7, [#allocation32], %s17965_s19, %s17965_s19, %s15275_s5  }
  0xd5   :  { %s17966_s30 = sld [smem:[#allocation95_spill]] }
  0xdb   :  { %s15005_s12 = scalar_lea.hbm %s17966_s30, 36864 }
  0xdc   :  { %p15006_p10 = scmp.ne.s32.totalorder %s17966_s30, %s15005_s12  ;;  %p15009_p11 = scmp.lt.u32.totalorder %s15005_s12, %s17966_s30 }
  0xde   :  { %p15011_p12 = pnand %p15009_p11, %p15006_p10 }
  0xe0   :  { %15014 = shalt.err (!%p15011_p12)
}
  0xe1   :  { %s15015_s29 = scalar_lea.vmem %s50_s26, 36864  ;;  %p15020_p0 = scmp.lt.s32.totalorder %s50_s26, %s50_s26 }
  0xe2   :  { %p15016_p13 = scmp.ne.s32.totalorder %s50_s26, %s15015_s29  ;;  %p15021_p1 = scmp.lt.s32.totalorder %s15015_s29, %s15015_s29 }
  0xe4   :  { %p15022_p2 = por %p15021_p1, %p15020_p0 }
  0xe6   :  { %p15023_p3 = pnand %p15022_p2, %p15016_p13 }
  0xe8   :  { %15026 = shalt.err (!%p15023_p3)
}
  0xe9   :  { %55 = dma.hbm_to_vmem [thread:$0]  %s17966_s30, 36864, %s50_s26, [#allocation3], %s17965_s19, %s17965_s19, %s15275_s5  }
  0xea   :  { %s15290_s16 = smov [#allocation6]   ;;  %s15291_s3 = smov [#allocation9]  }
  0xeb   :  { %s74_s14 = sshll.u32 %s15290_s16, 4  ;;  %s95_s20 = sshll.u32 %s15291_s3, 4  ;;  %s75_s14 = int_to_ptr.vmem [resolvable:$true] %s74_s14  ;;  %s96_s20 = int_to_ptr.vmem [resolvable:$true] %s95_s20 }
  0xec   :  { %s17967_s28 = sld [smem:[#allocation97_spill]] }
  0xf2   :  { %s15027_s8 = scalar_lea.hbm %s17967_s28, 16 }
  0xf3   :  { %p15028_p4 = scmp.ne.s32.totalorder %s17967_s28, %s15027_s8  ;;  %p15031_p5 = scmp.lt.u32.totalorder %s15027_s8, %s17967_s28 }
  0xf5   :  { %p15033_p6 = pnand %p15031_p5, %p15028_p4 }
  0xf7   :  { %15036 = shalt.err (!%p15033_p6)
}
  0xf8   :  { %s15037_s26 = scalar_lea.vmem %s75_s14, 16  ;;  %s15041_s30 = scalar_lea.vmem %s75_s14, 32 }
  0xf9   :  { %p15038_p7 = scmp.ne.s32.totalorder %s75_s14, %s15037_s26  ;;  %p15042_p8 = scmp.lt.s32.totalorder %s75_s14, %s75_s14 }
  0xfa   :  { %p15043_p9 = scmp.lt.s32.totalorder %s15041_s30, %s15037_s26 }
  0xfc   :  { %p15044_p10 = por %p15043_p9, %p15042_p8 }
  0xfe   :  { %p15045_p11 = pnand %p15044_p10, %p15038_p7 }
 0x100   :  { %15048 = shalt.err (!%p15045_p11)
}
 0x101   :  { %77 = dma.hbm_to_vmem [thread:$0]  %s17967_s28, 16, %s75_s14, [#allocation5]  }
 0x102   :  { %s17968_s24 = sld [smem:[#allocation99_spill]] }
 0x108   :  { %s15049_s7 = scalar_lea.hbm %s17968_s24, 9216 }
 0x109   :  { %p15050_p12 = scmp.ne.s32.totalorder %s17968_s24, %s15049_s7  ;;  %p15053_p13 = scmp.lt.u32.totalorder %s15049_s7, %s17968_s24 }
 0x10b   :  { %p15055_p0 = pnand %p15053_p13, %p15050_p12 }
 0x10d   :  { %15058 = shalt.err (!%p15055_p0)
}
 0x10e   :  { %s15059_s8 = scalar_lea.vmem %s96_s20, 9216  ;;  %p15064_p2 = scmp.lt.s32.totalorder %s96_s20, %s96_s20 }
 0x10f   :  { %p15060_p1 = scmp.ne.s32.totalorder %s96_s20, %s15059_s8  ;;  %p15065_p3 = scmp.lt.s32.totalorder %s15059_s8, %s15059_s8 }
 0x111   :  { %p15066_p4 = por %p15065_p3, %p15064_p2 }
 0x113   :  { %p15067_p5 = pnand %p15066_p4, %p15060_p1 }
 0x115   :  { %15070 = shalt.err (!%p15067_p5)
}
 0x116   :  { %101 = dma.hbm_to_vmem [thread:$0]  %s17968_s24, 9216, %s96_s20, [#allocation8], %s17965_s19, %s17965_s19, %s15275_s5  }
 0x117   :  { %s15292_s9 = smov [#allocation12]   ;;  %s15293_s12 = smov [#allocation15]  }
 0x118   :  { %s120_s10 = sshll.u32 %s15292_s9, 4  ;;  %s143_s4 = sshll.u32 %s15293_s12, 4  ;;  %s121_s10 = int_to_ptr.vmem [resolvable:$true] %s120_s10  ;;  %s144_s4 = int_to_ptr.vmem [resolvable:$true] %s143_s4 }
 0x119   :  { %s17969_s6 = sld [smem:[#allocation101_spill]] }
 0x11f   :  { %s15071_s2 = scalar_lea.hbm %s17969_s6, 16 }
 0x120   :  { %p15072_p6 = scmp.ne.s32.totalorder %s17969_s6, %s15071_s2  ;;  %p15075_p7 = scmp.lt.u32.totalorder %s15071_s2, %s17969_s6 }
 0x122   :  { %p15077_p8 = pnand %p15075_p7, %p15072_p6 }
 0x124   :  { %15080 = shalt.err (!%p15077_p8)
}
 0x125   :  { %s15081_s5 = scalar_lea.vmem %s121_s10, 16  ;;  %s15085_s19 = scalar_lea.vmem %s121_s10, 32 }
 0x126   :  { %p15082_p9 = scmp.ne.s32.totalorder %s121_s10, %s15081_s5  ;;  %p15086_p10 = scmp.lt.s32.totalorder %s121_s10, %s121_s10 }
 0x127   :  { %p15087_p11 = scmp.lt.s32.totalorder %s15085_s19, %s15081_s5 }
 0x129   :  { %p15088_p12 = por %p15087_p11, %p15086_p10 }
 0x12b   :  { %p15089_p13 = pnand %p15088_p12, %p15082_p9 }
 0x12d   :  { %15092 = shalt.err (!%p15089_p13)
}
 0x12e   :  { %123 = dma.hbm_to_vmem [thread:$0]  %s17969_s6, 16, %s121_s10, [#allocation11]  }
 0x12f   :  { %s15093_s22 = scalar_lea.hbm %s17865_s11, 4608 }
 0x130   :  { %p15094_p0 = scmp.ne.s32.totalorder %s17865_s11, %s15093_s22  ;;  %p15097_p1 = scmp.lt.u32.totalorder %s15093_s22, %s17865_s11 }
 0x132   :  { %p15099_p2 = pnand %p15097_p1, %p15094_p0 }
 0x134   :  { %15102 = shalt.err (!%p15099_p2)
}
 0x135   :  { %s15103_s12 = scalar_lea.vmem %s144_s4, 4608  ;;  %p15108_p4 = scmp.lt.s32.totalorder %s144_s4, %s144_s4 }
 0x136   :  { %p15104_p3 = scmp.ne.s32.totalorder %s144_s4, %s15103_s12  ;;  %p15109_p5 = scmp.lt.s32.totalorder %s15103_s12, %s15103_s12 }
 0x138   :  { %p15110_p6 = por %p15109_p5, %p15108_p4 }
 0x13a   :  { %p15111_p7 = pnand %p15110_p6, %p15104_p3 }
 0x13c   :  { %15114 = shalt.err (!%p15111_p7)
}
 0x13d   :  { %149 = dma.hbm_to_vmem [thread:$0]  %s17865_s11, 4608, %s144_s4, [#allocation14], %s15281_s1, %s15281_s1, %s15282_s0  }
 0x13e   :  { %s15294_s30 = smov [#allocation18]   ;;  %s15295_s2 = smov [#allocation21]  }
 0x13f   :  { %s168_s6 = sshll.u32 %s15294_s30, 4  ;;  %s190_s17 = sshll.u32 %s15295_s2, 4  ;;  %s169_s6 = int_to_ptr.vmem [resolvable:$true] %s168_s6  ;;  %s191_s17 = int_to_ptr.vmem [resolvable:$true] %s190_s17 }
 0x140   :  { %s15115_s16 = scalar_lea.hbm %s17867_s13, 32 }
 0x141   :  { %p15116_p8 = scmp.ne.s32.totalorder %s17867_s13, %s15115_s16  ;;  %p15119_p9 = scmp.lt.u32.totalorder %s15115_s16, %s17867_s13 }
 0x143   :  { %p15121_p10 = pnand %p15119_p9, %p15116_p8 }
 0x145   :  { %15124 = shalt.err (!%p15121_p10)
}
 0x146   :  { %s15125_s11 = scalar_lea.vmem %s169_s6, 32  ;;  %p15130_p12 = scmp.lt.s32.totalorder %s169_s6, %s169_s6 }
 0x147   :  { %p15126_p11 = scmp.ne.s32.totalorder %s169_s6, %s15125_s11  ;;  %p15131_p13 = scmp.lt.s32.totalorder %s15125_s11, %s15125_s11 }
 0x149   :  { %p15132_p0 = por %p15131_p13, %p15130_p12 }
 0x14b   :  { %p15133_p1 = pnand %p15132_p0, %p15126_p11 }
 0x14d   :  { %15136 = shalt.err (!%p15133_p1)
}
 0x14e   :  { %171 = dma.hbm_to_vmem [thread:$0]  %s17867_s13, 32, %s169_s6, [#allocation17]  }
 0x14f   :  { %s15137_s27 = scalar_lea.hbm %s17869_s15, 64 }
 0x150   :  { %p15138_p2 = scmp.ne.s32.totalorder %s17869_s15, %s15137_s27  ;;  %p15141_p3 = scmp.lt.u32.totalorder %s15137_s27, %s17869_s15 }
 0x152   :  { %p15143_p4 = pnand %p15141_p3, %p15138_p2 }
 0x154   :  { %15146 = shalt.err (!%p15143_p4)
}
 0x155   :  { %s15147_s9 = scalar_lea.vmem %s191_s17, 64  ;;  %p15152_p6 = scmp.lt.s32.totalorder %s191_s17, %s191_s17 }
 0x156   :  { %p15148_p5 = scmp.ne.s32.totalorder %s191_s17, %s15147_s9  ;;  %p15153_p7 = scmp.lt.s32.totalorder %s15147_s9, %s15147_s9 }
 0x158   :  { %p15154_p8 = por %p15153_p7, %p15152_p6 }
 0x15a   :  { %p15155_p9 = pnand %p15154_p8, %p15148_p5 }
 0x15c   :  { %15158 = shalt.err (!%p15155_p9)
}
 0x15d   :  { %193 = dma.hbm_to_vmem [thread:$0]  %s17869_s15, 64, %s191_s17, [#allocation20]  }
 0x15e   :  { %s15296_s10 = smov [#allocation24]   ;;  %s15297_s30 = smov [#allocation27]  }
 0x15f   :  { %s214_s26 = sshll.u32 %s15296_s10, 4  ;;  %s236_s6 = sshll.u32 %s15297_s30, 4  ;;  %s215_s26 = int_to_ptr.vmem [resolvable:$true] %s214_s26  ;;  %s237_s6 = int_to_ptr.vmem [resolvable:$true] %s236_s6 }
 0x160   :  { %s15159_s7 = scalar_lea.hbm %s17872_s18, 64 }
 0x161   :  { %p15160_p10 = scmp.ne.s32.totalorder %s17872_s18, %s15159_s7  ;;  %p15163_p11 = scmp.lt.u32.totalorder %s15159_s7, %s17872_s18 }
 0x163   :  { %p15165_p12 = pnand %p15163_p11, %p15160_p10 }
 0x165   :  { %15168 = shalt.err (!%p15165_p12)
}
 0x166   :  { %s15169_s15 = scalar_lea.vmem %s215_s26, 64  ;;  %p15174_p0 = scmp.lt.s32.totalorder %s215_s26, %s215_s26 }
 0x167   :  { %p15170_p13 = scmp.ne.s32.totalorder %s215_s26, %s15169_s15  ;;  %p15175_p1 = scmp.lt.s32.totalorder %s15169_s15, %s15169_s15 }
 0x169   :  { %p15176_p2 = por %p15175_p1, %p15174_p0 }
 0x16b   :  { %p15177_p3 = pnand %p15176_p2, %p15170_p13 }
 0x16d   :  { %15180 = shalt.err (!%p15177_p3)
}
 0x16e   :  { %217 = dma.hbm_to_vmem [thread:$0]  %s17872_s18, 64, %s215_s26, [#allocation23]  }
 0x16f   :  { %s15181_s0 = scalar_lea.hbm %s17875_s21, 128 }
 0x170   :  { %p15182_p4 = scmp.ne.s32.totalorder %s17875_s21, %s15181_s0  ;;  %p15185_p5 = scmp.lt.u32.totalorder %s15181_s0, %s17875_s21 }
 0x172   :  { %p15187_p6 = pnand %p15185_p5, %p15182_p4 }
 0x174   :  { %15190 = shalt.err (!%p15187_p6)
}
 0x175   :  { %s15191_s8 = scalar_lea.vmem %s237_s6, 128  ;;  %p15196_p8 = scmp.lt.s32.totalorder %s237_s6, %s237_s6 }
 0x176   :  { %p15192_p7 = scmp.ne.s32.totalorder %s237_s6, %s15191_s8  ;;  %p15197_p9 = scmp.lt.s32.totalorder %s15191_s8, %s15191_s8 }
 0x178   :  { %p15198_p10 = por %p15197_p9, %p15196_p8 }
 0x17a   :  { %p15199_p11 = pnand %p15198_p10, %p15192_p7 }
 0x17c   :  { %15202 = shalt.err (!%p15199_p11)
}
 0x17d   :  { %239 = dma.hbm_to_vmem [thread:$0]  %s17875_s21, 128, %s237_s6, [#allocation26]  }
 0x17e   :  { %s15298_s28 = smov [#allocation30]   ;;  %s15299_s13 = smov [#allocation33]  }
 0x17f   :  { %s258_s9 = sshll.u32 %s15298_s28, 4  ;;  %s280_s12 = sshll.u32 %s15299_s13, 4  ;;  %s259_s9 = int_to_ptr.vmem [resolvable:$true] %s258_s9  ;;  %s281_s12 = int_to_ptr.vmem [resolvable:$true] %s280_s12 }
 0x180   :  { %s15203_s30 = scalar_lea.hbm %s17877_s23, 32 }
 0x181   :  { %p15204_p12 = scmp.ne.s32.totalorder %s17877_s23, %s15203_s30  ;;  %p15207_p13 = scmp.lt.u32.totalorder %s15203_s30, %s17877_s23 }
 0x183   :  { %p15209_p0 = pnand %p15207_p13, %p15204_p12 }
 0x185   :  { %15212 = shalt.err (!%p15209_p0)
}
 0x186   :  { %s15213_s21 = scalar_lea.vmem %s259_s9, 32  ;;  %p15218_p2 = scmp.lt.s32.totalorder %s259_s9, %s259_s9 }
 0x187   :  { %p15214_p1 = scmp.ne.s32.totalorder %s259_s9, %s15213_s21  ;;  %p15219_p3 = scmp.lt.s32.totalorder %s15213_s21, %s15213_s21 }
 0x189   :  { %p15220_p4 = por %p15219_p3, %p15218_p2 }
 0x18b   :  { %p15221_p5 = pnand %p15220_p4, %p15214_p1 }
 0x18d   :  { %15224 = shalt.err (!%p15221_p5)
}
 0x18e   :  { %261 = dma.hbm_to_vmem [thread:$0]  %s17877_s23, 32, %s259_s9, [#allocation29]  }
 0x18f   :  { %s15225_s15 = scalar_lea.hbm %s17879_s25, 16 }
 0x190   :  { %p15226_p6 = scmp.ne.s32.totalorder %s17879_s25, %s15225_s15  ;;  %p15229_p7 = scmp.lt.u32.totalorder %s15225_s15, %s17879_s25 }
 0x192   :  { %p15231_p8 = pnand %p15229_p7, %p15226_p6 }
 0x194   :  { %15234 = shalt.err (!%p15231_p8)
}
 0x195   :  { %s15235_s0 = scalar_lea.vmem %s281_s12, 16  ;;  %s15239_s4 = scalar_lea.vmem %s281_s12, 32 }
 0x196   :  { %p15236_p9 = scmp.ne.s32.totalorder %s281_s12, %s15235_s0  ;;  %p15240_p10 = scmp.lt.s32.totalorder %s281_s12, %s281_s12 }
 0x197   :  { %p15241_p11 = scmp.lt.s32.totalorder %s15239_s4, %s15235_s0 }
 0x199   :  { %p15242_p12 = por %p15241_p11, %p15240_p10 }
 0x19b   :  { %p15243_p13 = pnand %p15242_p12, %p15236_p9 }
 0x19d   :  { %15246 = shalt.err (!%p15243_p13)
}
 0x19e   :  { %283 = dma.hbm_to_vmem [thread:$0]  %s17879_s25, 16, %s281_s12, [#allocation32]  }
 0x19f   :  { %15247 = dma.done.wait [#allocation3], 36864  }
 0x1a0   :  { %15248 = vsyncadd [#allocation3], 4294930432 }
 0x1a1   :  { %15249 = dma.done.wait [#allocation5], 1744  }
 0x1a2   :  { %15250 = vsyncadd [#allocation5], 4294965552 }
 0x1a3   :  { %15251 = dma.done.wait [#allocation8], 18432  }
 0x1a4   :  { %15252 = vsyncadd [#allocation8], 4294948864 }
 0x1a5   :  { %15253 = dma.done.wait [#allocation11], 5136  }
 0x1a6   :  { %15254 = vsyncadd [#allocation11], 4294962160 }
 0x1a7   :  { %15255 = dma.done.wait [#allocation14], 4640  }
 0x1a8   :  { %15256 = vsyncadd [#allocation14], 4294962656 }
 0x1a9   :  { %15257 = dma.done.wait [#allocation17], 544  }
 0x1aa   :  { %15258 = vsyncadd [#allocation17], 4294966752 }
 0x1ab   :  { %15259 = dma.done.wait [#allocation20], 8256  }
 0x1ac   :  { %15260 = vsyncadd [#allocation20], 4294959040 }
 0x1ad   :  { %15261 = dma.done.wait [#allocation23], 2624  }
 0x1ae   :  { %15262 = vsyncadd [#allocation23], 4294964672 }
 0x1af   :  { %15263 = dma.done.wait [#allocation26], 192  }
 0x1b0   :  { %15264 = vsyncadd [#allocation26], 4294967104 }
 0x1b1   :  { %15265 = dma.done.wait [#allocation29], 16416  }
 0x1b2   :  { %15266 = vsyncadd [#allocation29], 4294950880 }
 0x1b3   :  { %15267 = dma.done.wait [#allocation32], 4112  }
 0x1b4   :  { %15268 = vsyncadd [#allocation32], 4294963184  ;;  %v17896_v0 = vmov 0   ;;  %s17970_s22 = sld [smem:[#allocation94_spill]]  ;;  %v13901_v14 = vld [vmem:[#allocation2 + $0x4] ss:$8 sps:$4 sm:$0xff]  }
 0x1b5   :  { %2124 = vmatprep.subr.bf16.mxu0 %v17896_v0  ;;  %2156 = vmatprep.mubr.bf16.mxu0 %v13901_v14  ;;  %v13899_v50 = vld [vmem:[#allocation2] ss:$8 sps:$4 sm:$0xff]   ;;  %v13902_v51 = vld [vmem:[#allocation2 + $0x14] ss:$8 sps:$4 sm:$0xff]   ;;  %v13904_v52 = vld [vmem:[#allocation2 + $0x10] ss:$8 sps:$4 sm:$0xff]  }
 0x1b6   :  { %v13905_v53 = vld [vmem:[#allocation2 + $0x24] ss:$8 sps:$4 sm:$0xff]   ;;  %v13907_v54 = vld [vmem:[#allocation2 + $0x20] ss:$8 sps:$4 sm:$0xff]   ;;  %v13908_v55 = vld [vmem:[#allocation2 + $0x34] ss:$8 sps:$4 sm:$0xff]  }
 0x1b7   :  { %v13910_v56 = vld [vmem:[#allocation2 + $0x30] ss:$8 sps:$4 sm:$0xff]   ;;  %v13911_v57 = vld [vmem:[#allocation2 + $0x44] ss:$8 sps:$4 sm:$0xff]   ;;  %v13913_v58 = vld [vmem:[#allocation2 + $0x40] ss:$8 sps:$4 sm:$0xff]  }
 0x1b8   :  { %v13914_v59 = vld [vmem:[#allocation2 + $0x54] ss:$8 sps:$4 sm:$0xff]   ;;  %v13916_v60 = vld [vmem:[#allocation2 + $0x50] ss:$8 sps:$4 sm:$0xff]   ;;  %v13917_v61 = vld [vmem:[#allocation2 + $0x64] ss:$8 sps:$4 sm:$0xff]  }
 0x1b9   :  { %v13919_v62 = vld [vmem:[#allocation2 + $0x60] ss:$8 sps:$4 sm:$0xff]   ;;  %v13920_v63 = vld [vmem:[#allocation2 + $0x74] ss:$8 sps:$4 sm:$0xff]   ;;  %v13941_v14 = vld [vmem:[#allocation2 + $0xe4] ss:$8 sps:$4 sm:$0xff]  }
 0x1ba   :  { %v348_v1 = vld [vmem:[%s17970_s22] sm:$0xff]  ;;  %v349_v2 = vld [vmem:[%s17970_s22 + $0x8] sm:$0xff]  ;;  %v350_v3 = vld [vmem:[%s17970_s22 + $0x10] sm:$0xff]  ;;  %vm3446_vm0 = vcmask 1043456   ;;  %vm3397_vm1 = vcmask 195584   ;;  %vm6702_vm2 = vcmask 523264  }
 0x1bb   :  { %v380_v4 = vpack.c.bf16 %v349_v2, %v348_v1  ;;  %v351_v5 = vld [vmem:[%s17970_s22 + $0x18] sm:$0xff]  ;;  %v352_v7 = vld [vmem:[%s17970_s22 + $0x20] sm:$0xff]  ;;  %v353_v8 = vld [vmem:[%s17970_s22 + $0x28] sm:$0xff]  ;;  %s18118_s28 = sld [smem:[#allocation102_spill]]  ;;  %s18119_s13 = sld [smem:[#allocation104_spill]]  ;;  %vm7584_vm3 = vcmask 130048  }
 0x1bc   :  { %v381_v6 = vpack.c.bf16 %v351_v5, %v350_v3  ;;  %v382_v9 = vpack.c.bf16 %v353_v8, %v352_v7  ;;  %v354_v10 = vld [vmem:[%s17970_s22 + $0x30] sm:$0xff]  ;;  %v355_v11 = vld [vmem:[%s17970_s22 + $0x38] sm:$0xff]  ;;  %v356_v13 = vld [vmem:[%s17970_s22 + $0x40] sm:$0xff]  ;;  %s18120_s0 = sld [smem:[#allocation105_spill]]  ;;  %s18121_s18 = sld [smem:[#allocation106_spill]]  ;;  %vm8402_vm4 = vcmask 293888  }
 0x1bd   :  { %2125 = vmatpush1.bf16.msra.mxu0 %v380_v4  ;;  %v383_v12 = vpack.c.bf16 %v355_v11, %v354_v10  ;;  %v357_v15 = vld [vmem:[%s17970_s22 + $0x48] sm:$0xff]  ;;  %v358_v17 = vld [vmem:[%s17970_s22 + $0x50] sm:$0xff]  ;;  %v359_v18 = vld [vmem:[%s17970_s22 + $0x58] sm:$0xff]  ;;  %s18122_s14 = sld [smem:[#allocation107_spill]] }
 0x1be   :  { %2126 = vmatprep.subr.bf16.mxu0 %v17896_v0  ;;  %v384_v16 = vpack.c.bf16 %v357_v15, %v356_v13  ;;  %v385_v19 = vpack.c.bf16 %v359_v18, %v358_v17  ;;  %v360_v20 = vld [vmem:[%s17970_s22 + $0x60] sm:$0xff]  ;;  %v361_v21 = vld [vmem:[%s17970_s22 + $0x68] sm:$0xff]  ;;  %v362_v23 = vld [vmem:[%s17970_s22 + $0x70] sm:$0xff] }
 0x1bf   :  { %v386_v22 = vpack.c.bf16 %v361_v21, %v360_v20  ;;  %v363_v24 = vld [vmem:[%s17970_s22 + $0x78] sm:$0xff]  ;;  %v364_v26 = vld [vmem:[%s17970_s22 + $0x80] sm:$0xff]  ;;  %v365_v27 = vld [vmem:[%s17970_s22 + $0x88] sm:$0xff] }
 0x1c0   :  { %v387_v25 = vpack.c.bf16 %v363_v24, %v362_v23  ;;  %v366_v28 = vld [vmem:[%s17970_s22 + $0x90] sm:$0xff]  ;;  %v367_v29 = vld [vmem:[%s17970_s22 + $0x98] sm:$0xff]  ;;  %v388_v30 = vpack.c.bf16 %v365_v27, %v364_v26  ;;  %v368_v31 = vld [vmem:[%s17970_s22 + $0xa0] sm:$0xff] }
 0x1c1   :  { %2127 = vmatpush1.bf16.msra.mxu0 %v381_v6  ;;  %v389_v32 = vpack.c.bf16 %v367_v29, %v366_v28  ;;  %v369_v33 = vld [vmem:[%s17970_s22 + $0xa8] sm:$0xff]  ;;  %v370_v34 = vld [vmem:[%s17970_s22 + $0xb0] sm:$0xff]  ;;  %v371_v35 = vld [vmem:[%s17970_s22 + $0xb8] sm:$0xff] }
 0x1c2   :  { %2128 = vmatprep.subr.bf16.mxu0 %v17896_v0  ;;  %v390_v36 = vpack.c.bf16 %v369_v33, %v368_v31  ;;  %v372_v37 = vld [vmem:[%s17970_s22 + $0xc0] sm:$0xff]  ;;  %v391_v38 = vpack.c.bf16 %v371_v35, %v370_v34  ;;  %v373_v39 = vld [vmem:[%s17970_s22 + $0xc8] sm:$0xff]  ;;  %v374_v40 = vld [vmem:[%s17970_s22 + $0xd0] sm:$0xff] }
 0x1c3   :  { %v375_v41 = vld [vmem:[%s17970_s22 + $0xd8] sm:$0xff]  ;;  %v392_v42 = vpack.c.bf16 %v373_v39, %v372_v37  ;;  %v376_v43 = vld [vmem:[%s17970_s22 + $0xe0] sm:$0xff]  ;;  %v377_v45 = vld [vmem:[%s17970_s22 + $0xe8] sm:$0xff] }
 0x1c4   :  { %v393_v44 = vpack.c.bf16 %v375_v41, %v374_v40  ;;  %v378_v46 = vld [vmem:[%s17970_s22 + $0xf0] sm:$0xff]  ;;  %v379_v47 = vld [vmem:[%s17970_s22 + $0xf8] sm:$0xff]  ;;  %v394_v48 = vpack.c.bf16 %v377_v45, %v376_v43  ;;  %v13923_v2 = vld [vmem:[#allocation2 + $0x84] ss:$8 sps:$4 sm:$0xff]  }
 0x1c5   :  { %2129 = vmatpush1.bf16.msra.mxu0 %v382_v9  ;;  %v395_v49 = vpack.c.bf16 %v379_v47, %v378_v46  ;;  %v13922_v1 = vld [vmem:[#allocation2 + $0x70] ss:$8 sps:$4 sm:$0xff]   ;;  %v13925_v3 = vld [vmem:[#allocation2 + $0x80] ss:$8 sps:$4 sm:$0xff]   ;;  %v13926_v4 = vld [vmem:[#allocation2 + $0x94] ss:$8 sps:$4 sm:$0xff]  }
 0x1c6   :  { %2130 = vmatprep.subr.bf16.mxu0 %v17896_v0  ;;  %v13928_v5 = vld [vmem:[#allocation2 + $0x90] ss:$8 sps:$4 sm:$0xff]   ;;  %v13929_v6 = vld [vmem:[#allocation2 + $0xa4] ss:$8 sps:$4 sm:$0xff]   ;;  %v13931_v7 = vld [vmem:[#allocation2 + $0xa0] ss:$8 sps:$4 sm:$0xff]  }
 0x1c7   :  { %v13932_v8 = vld [vmem:[#allocation2 + $0xb4] ss:$8 sps:$4 sm:$0xff]   ;;  %v13934_v9 = vld [vmem:[#allocation2 + $0xb0] ss:$8 sps:$4 sm:$0xff]   ;;  %v13935_v10 = vld [vmem:[#allocation2 + $0xc4] ss:$8 sps:$4 sm:$0xff]  }
 0x1c8   :  { %v13937_v11 = vld [vmem:[#allocation2 + $0xc0] ss:$8 sps:$4 sm:$0xff]   ;;  %v13940_v13 = vld [vmem:[#allocation2 + $0xd0] ss:$8 sps:$4 sm:$0xff]   ;;  %v13947_v18 = vld [vmem:[#allocation2 + $0x104] ss:$8 sps:$4 sm:$0xff]  }
 0x1c9   :  { %2131 = vmatpush1.bf16.msra.mxu0 %v383_v12  ;;  %v13938_v12 = vld [vmem:[#allocation2 + $0xd4] ss:$8 sps:$4 sm:$0xff]   ;;  %v13943_v15 = vld [vmem:[#allocation2 + $0xe0] ss:$8 sps:$4 sm:$0xff]   ;;  %v13946_v17 = vld [vmem:[#allocation2 + $0xf0] ss:$8 sps:$4 sm:$0xff]  }
 0x1ca   :  { %2132 = vmatprep.subr.bf16.mxu0 %v17896_v0  ;;  %v13950_v20 = vld [vmem:[#allocation2 + $0x114] ss:$8 sps:$4 sm:$0xff]   ;;  %v13952_v21 = vld [vmem:[#allocation2 + $0x110] ss:$8 sps:$4 sm:$0xff]   ;;  %v13955_v23 = vld [vmem:[#allocation2 + $0x120] ss:$8 sps:$4 sm:$0xff]  }
 0x1cb   :  { %v13956_v24 = vld [vmem:[#allocation2 + $0x134] ss:$8 sps:$4 sm:$0xff]   ;;  %v13959_v26 = vld [vmem:[#allocation2 + $0x144] ss:$8 sps:$4 sm:$0xff]   ;;  %v13961_v27 = vld [vmem:[#allocation2 + $0x140] ss:$8 sps:$4 sm:$0xff]  }
 0x1cc   :  { %v13962_v28 = vld [vmem:[#allocation2 + $0x154] ss:$8 sps:$4 sm:$0xff]   ;;  %v13964_v29 = vld [vmem:[#allocation2 + $0x150] ss:$8 sps:$4 sm:$0xff]   ;;  %v13967_v31 = vld [vmem:[#allocation2 + $0x160] ss:$8 sps:$4 sm:$0xff]  }
 0x1cd   :  { %2133 = vmatpush1.bf16.msra.mxu0 %v384_v16  ;;  %v13944_v16 = vld [vmem:[#allocation2 + $0xf4] ss:$8 sps:$4 sm:$0xff]   ;;  %v13970_v33 = vld [vmem:[#allocation2 + $0x170] ss:$8 sps:$4 sm:$0xff]   ;;  %v13971_v34 = vld [vmem:[#allocation2 + $0x184] ss:$8 sps:$4 sm:$0xff]  }
 0x1ce   :  { %2134 = vmatprep.subr.bf16.mxu0 %v17896_v0  ;;  %v13973_v35 = vld [vmem:[#allocation2 + $0x180] ss:$8 sps:$4 sm:$0xff]   ;;  %v13976_v37 = vld [vmem:[#allocation2 + $0x190] ss:$8 sps:$4 sm:$0xff]   ;;  %v13980_v40 = vld [vmem:[#allocation2 + $0x1b4] ss:$8 sps:$4 sm:$0xff]  }
 0x1cf   :  { %v13979_v39 = vld [vmem:[#allocation2 + $0x1a0] ss:$8 sps:$4 sm:$0xff]   ;;  %v13982_v43 = vld [vmem:[#allocation2 + $0x1b0] ss:$8 sps:$4 sm:$0xff]   ;;  %v13983_v45 = vld [vmem:[#allocation2 + $0x1c4] ss:$8 sps:$4 sm:$0xff]  }
 0x1d1   :  { %2135 = vmatpush1.bf16.msra.mxu0 %v385_v19  ;;  %v13949_v19 = vld [vmem:[#allocation2 + $0x100] ss:$8 sps:$4 sm:$0xff]  }
 0x1d2   :  { %2136 = vmatprep.subr.bf16.mxu0 %v17896_v0 }
 0x1d5   :  { %2137 = vmatpush1.bf16.msra.mxu0 %v386_v22  ;;  %v13953_v22 = vld [vmem:[#allocation2 + $0x124] ss:$8 sps:$4 sm:$0xff]  }
 0x1d6   :  { %2138 = vmatprep.subr.bf16.mxu0 %v17896_v0 }
 0x1d9   :  { %2139 = vmatpush1.bf16.msra.mxu0 %v387_v25  ;;  %v13958_v25 = vld [vmem:[#allocation2 + $0x130] ss:$8 sps:$4 sm:$0xff]  }
 0x1da   :  { %2140 = vmatprep.subr.bf16.mxu0 %v17896_v0 }
 0x1dd   :  { %2141 = vmatpush1.bf16.msra.mxu0 %v388_v30  ;;  %v13965_v30 = vld [vmem:[#allocation2 + $0x164] ss:$8 sps:$4 sm:$0xff]  }
 0x1de   :  { %2142 = vmatprep.subr.bf16.mxu0 %v17896_v0 }
 0x1e1   :  { %2143 = vmatpush1.bf16.msra.mxu0 %v389_v32  ;;  %v13968_v32 = vld [vmem:[#allocation2 + $0x174] ss:$8 sps:$4 sm:$0xff]  }
 0x1e2   :  { %2144 = vmatprep.subr.bf16.mxu0 %v17896_v0 }
 0x1e5   :  { %2145 = vmatpush1.bf16.msra.mxu0 %v390_v36  ;;  %v13974_v36 = vld [vmem:[#allocation2 + $0x194] ss:$8 sps:$4 sm:$0xff]  }
 0x1e6   :  { %2146 = vmatprep.subr.bf16.mxu0 %v17896_v0 }
 0x1e9   :  { %2147 = vmatpush1.bf16.msra.mxu0 %v391_v38  ;;  %v13977_v38 = vld [vmem:[#allocation2 + $0x1a4] ss:$8 sps:$4 sm:$0xff]  }
 0x1ea   :  { %2148 = vmatprep.subr.bf16.mxu0 %v17896_v0 }
 0x1ed   :  { %2149 = vmatpush1.bf16.msra.mxu0 %v392_v42 }
 0x1ee   :  { %2150 = vmatprep.subr.bf16.mxu0 %v17896_v0 }
 0x1f1   :  { %2151 = vmatpush1.bf16.msra.mxu0 %v393_v44 }
 0x1f2   :  { %2152 = vmatprep.subr.bf16.mxu0 %v17896_v0 }
 0x1f5   :  { %2153 = vmatpush1.bf16.msra.mxu0 %v394_v48 }
 0x1f6   :  { %2154 = vmatprep.subr.bf16.mxu0 %v17896_v0 }
 0x1f9   :  { %2155 = vmatpush1.bf16.msra.mxu0 %v395_v49 }
 0x1fa   :  { %6190 = vmatprep.subr.bf16.mxu0 %v17896_v0  ;;  %v14036_v0 = vld [vmem:[#allocation2 + $0x2d0] ss:$8 sps:$4 sm:$0xff]  }
 0x1fc   :  { %2157 = vmatmul.mubr.bf16.vlgmr.msra.gmra.mrb[0].mxu0 %v13899_v50  ;;  %v13985_v50 = vld [vmem:[#allocation2 + $0x1c0] ss:$8 sps:$4 sm:$0xff]  }
 0x1fd   :  { %2164 = vmatprep.mubr.bf16.mxu0 %v13902_v51 }
 0x204   :  { %2165 = vmatmul.mubr.bf16.gmra.mrb[4].mxu0 %v13904_v52  ;;  %v13986_v52 = vld [vmem:[#allocation2 + $0x1d4] ss:$8 sps:$4 sm:$0xff]  }
 0x205   :  { %2172 = vmatprep.mubr.bf16.mxu0 %v13905_v53 }
 0x20c   :  { %2173 = vmatmul.mubr.bf16.gmra.mrb[8].mxu0 %v13907_v54 }
 0x20d   :  { %2180 = vmatprep.mubr.bf16.mxu0 %v13908_v55 }
 0x214   :  { %2181 = vmatmul.mubr.bf16.gmra.mrb[12].mxu0 %v13910_v56 }
 0x215   :  { %2188 = vmatprep.mubr.bf16.mxu0 %v13911_v57  ;;  %v13988_v57 = vld [vmem:[#allocation2 + $0x1d0] ss:$8 sps:$4 sm:$0xff]  }
 0x21c   :  { %2189 = vmatmul.mubr.bf16.gmra.mrb[16].mxu0 %v13913_v58 }
 0x21d   :  { %2196 = vmatprep.mubr.bf16.mxu0 %v13914_v59  ;;  %v13989_v59 = vld [vmem:[#allocation2 + $0x1e4] ss:$8 sps:$4 sm:$0xff]  }
 0x224   :  { %2197 = vmatmul.mubr.bf16.gmra.mrb[20].mxu0 %v13916_v60 }
 0x225   :  { %2204 = vmatprep.mubr.bf16.mxu0 %v13917_v61 }
 0x22c   :  { %2205 = vmatmul.mubr.bf16.gmra.mrb[24].mxu0 %v13919_v62 }
 0x22d   :  { %2212 = vmatprep.mubr.bf16.mxu0 %v13920_v63 }
 0x234   :  { %2213 = vmatmul.mubr.bf16.gmra.mrb[28].mxu0 %v13922_v1  ;;  %v13991_v1 = vld [vmem:[#allocation2 + $0x1e0] ss:$8 sps:$4 sm:$0xff]  }
 0x235   :  { %2220 = vmatprep.mubr.bf16.mxu0 %v13923_v2 }
 0x23c   :  { %2221 = vmatmul.mubr.bf16.gmra.mrb[32].mxu0 %v13925_v3  ;;  %v13992_v3 = vld [vmem:[#allocation2 + $0x1f4] ss:$8 sps:$4 sm:$0xff]  }
 0x23d   :  { %2228 = vmatprep.mubr.bf16.mxu0 %v13926_v4 }
 0x244   :  { %2229 = vmatmul.mubr.bf16.gmra.mrb[36].mxu0 %v13928_v5 }
 0x245   :  { %2236 = vmatprep.mubr.bf16.mxu0 %v13929_v6 }
 0x24c   :  { %2237 = vmatmul.mubr.bf16.gmra.mrb[40].mxu0 %v13931_v7 }
 0x24d   :  { %2244 = vmatprep.mubr.bf16.mxu0 %v13932_v8  ;;  %v13994_v8 = vld [vmem:[#allocation2 + $0x1f0] ss:$8 sps:$4 sm:$0xff]  }
 0x254   :  { %2245 = vmatmul.mubr.bf16.gmra.mrb[44].mxu0 %v13934_v9 }
 0x255   :  { %2252 = vmatprep.mubr.bf16.mxu0 %v13935_v10  ;;  %v13995_v10 = vld [vmem:[#allocation2 + $0x204] ss:$8 sps:$4 sm:$0xff]  }
 0x25c   :  { %2253 = vmatmul.mubr.bf16.gmra.mrb[48].mxu0 %v13937_v11 }
 0x25d   :  { %2260 = vmatprep.mubr.bf16.mxu0 %v13938_v12 }
 0x264   :  { %2261 = vmatmul.mubr.bf16.gmra.mrb[52].mxu0 %v13940_v13 }
 0x265   :  { %2268 = vmatprep.mubr.bf16.mxu0 %v13941_v14 }
 0x26c   :  { %2269 = vmatmul.mubr.bf16.gmra.mrb[56].mxu0 %v13943_v15  ;;  %v13997_v15 = vld [vmem:[#allocation2 + $0x200] ss:$8 sps:$4 sm:$0xff]  }
 0x26d   :  { %2276 = vmatprep.mubr.bf16.mxu0 %v13944_v16 }
 0x274   :  { %2277 = vmatmul.mubr.bf16.gmra.mrb[60].mxu0 %v13946_v17  ;;  %v13998_v17 = vld [vmem:[#allocation2 + $0x214] ss:$8 sps:$4 sm:$0xff]  }
 0x275   :  { %2284 = vmatprep.mubr.bf16.mxu0 %v13947_v18 }
 0x27c   :  { %2285 = vmatmul.mubr.bf16.gmra.mrb[64].mxu0 %v13949_v19 }
 0x27d   :  { %2292 = vmatprep.mubr.bf16.mxu0 %v13950_v20 }
 0x284   :  { %2293 = vmatmul.mubr.bf16.gmra.mrb[68].mxu0 %v13952_v21 }
 0x285   :  { %2300 = vmatprep.mubr.bf16.mxu0 %v13953_v22  ;;  %v14000_v22 = vld [vmem:[#allocation2 + $0x210] ss:$8 sps:$4 sm:$0xff]  }
 0x28c   :  { %2301 = vmatmul.mubr.bf16.gmra.mrb[72].mxu0 %v13955_v23 }
 0x28d   :  { %2308 = vmatprep.mubr.bf16.mxu0 %v13956_v24  ;;  %v14001_v24 = vld [vmem:[#allocation2 + $0x224] ss:$8 sps:$4 sm:$0xff]  }
 0x294   :  { %2309 = vmatmul.mubr.bf16.gmra.mrb[76].mxu0 %v13958_v25 }
 0x295   :  { %2316 = vmatprep.mubr.bf16.mxu0 %v13959_v26 }
 0x29c   :  { %2317 = vmatmul.mubr.bf16.gmra.mrb[80].mxu0 %v13961_v27 }
 0x29d   :  { %2324 = vmatprep.mubr.bf16.mxu0 %v13962_v28 }
 0x2a4   :  { %2325 = vmatmul.mubr.bf16.gmra.mrb[84].mxu0 %v13964_v29  ;;  %v14003_v29 = vld [vmem:[#allocation2 + $0x220] ss:$8 sps:$4 sm:$0xff]  }
 0x2a5   :  { %2332 = vmatprep.mubr.bf16.mxu0 %v13965_v30 }
 0x2ac   :  { %2333 = vmatmul.mubr.bf16.gmra.mrb[88].mxu0 %v13967_v31  ;;  %v14004_v31 = vld [vmem:[#allocation2 + $0x234] ss:$8 sps:$4 sm:$0xff]  }
 0x2ad   :  { %2340 = vmatprep.mubr.bf16.mxu0 %v13968_v32 }
 0x2b4   :  { %2341 = vmatmul.mubr.bf16.gmra.mrb[92].mxu0 %v13970_v33 }
 0x2b5   :  { %2348 = vmatprep.mubr.bf16.mxu0 %v13971_v34 }
 0x2bc   :  { %2349 = vmatmul.mubr.bf16.gmra.mrb[96].mxu0 %v13973_v35 }
 0x2bd   :  { %2356 = vmatprep.mubr.bf16.mxu0 %v13974_v36  ;;  %v14006_v36 = vld [vmem:[#allocation2 + $0x230] ss:$8 sps:$4 sm:$0xff]  }
 0x2c4   :  { %2357 = vmatmul.mubr.bf16.gmra.mrb[100].mxu0 %v13976_v37 }
 0x2c5   :  { %2364 = vmatprep.mubr.bf16.mxu0 %v13977_v38  ;;  %v14007_v38 = vld [vmem:[#allocation2 + $0x244] ss:$8 sps:$4 sm:$0xff]  }
 0x2cc   :  { %2365 = vmatmul.mubr.bf16.gmra.mrb[104].mxu0 %v13979_v39 }
 0x2cd   :  { %2372 = vmatprep.mubr.bf16.mxu0 %v13980_v40 }
 0x2cf   :  { %v15833_v41 = vpop.f32.mrb[0].mxu0 }
 0x2d0   :  { %v2160_v42 = vpop.f32.mrb[1].mxu0 }
 0x2d1   :  { %v15835_v44 = vpop.f32.mrb[2].mxu0 }
 0x2d2   :  { %v2163_v47 = vpop.f32.mrb[3].mxu0 }
 0x2d4   :  { %2373 = vmatmul.mubr.bf16.gmra.mrb[108].mxu0 %v13982_v43 }
 0x2d5   :  { %2380 = vmatprep.mubr.bf16.mxu0 %v13983_v45  ;;  %v14009_v45 = vld [vmem:[#allocation2 + $0x240] ss:$8 sps:$4 sm:$0xff]  }
 0x2d7   :  { %v15839_v48 = vpop.f32.mrb[4].mxu0 }
 0x2d8   :  { %v2168_v49 = vpop.f32.mrb[5].mxu0 }
 0x2d9   :  { %v15841_v51 = vpop.f32.mrb[6].mxu0  ;;  %v14010_v49 = vld [vmem:[#allocation2 + $0x254] ss:$8 sps:$4 sm:$0xff]  }
 0x2da   :  { %v2171_v54 = vpop.f32.mrb[7].mxu0 }
 0x2dc   :  { %2381 = vmatmul.mubr.bf16.gmra.mrb[112].mxu0 %v13985_v50 }
 0x2dd   :  { %2388 = vmatprep.mubr.bf16.mxu0 %v13986_v52 }
 0x2df   :  { %v15845_v55 = vpop.f32.mrb[8].mxu0 }
 0x2e0   :  { %v2176_v56 = vpop.f32.mrb[9].mxu0 }
 0x2e1   :  { %v15847_v58 = vpop.f32.mrb[10].mxu0 }
 0x2e2   :  { %v2179_v61 = vpop.f32.mrb[11].mxu0 }
 0x2e3   :  { %v14013_v61 = vld [vmem:[#allocation2 + $0x264] ss:$8 sps:$4 sm:$0xff]  }
 0x2e4   :  { %2389 = vmatmul.mubr.bf16.gmra.mrb[116].mxu0 %v13988_v57  ;;  %v14012_v57 = vld [vmem:[#allocation2 + $0x250] ss:$8 sps:$4 sm:$0xff]  }
 0x2e5   :  { %2396 = vmatprep.mubr.bf16.mxu0 %v13989_v59 }
 0x2e7   :  { %v15851_v62 = vpop.f32.mrb[12].mxu0 }
 0x2e8   :  { %v2184_v63 = vpop.f32.mrb[13].mxu0 }
 0x2e9   :  { %v15853_v2 = vpop.f32.mrb[14].mxu0 }
 0x2ea   :  { %v2187_v5 = vpop.f32.mrb[15].mxu0 }
 0x2ec   :  { %2397 = vmatmul.mubr.bf16.gmra.mrb[120].mxu0 %v13991_v1 }
 0x2ed   :  { %2404 = vmatprep.mubr.bf16.mxu0 %v13992_v3 }
 0x2ef   :  { %v15857_v6 = vpop.f32.mrb[16].mxu0 }
 0x2f0   :  { %v2192_v7 = vpop.f32.mrb[17].mxu0 }
 0x2f1   :  { %v15859_v9 = vpop.f32.mrb[18].mxu0  ;;  %v14015_v7 = vld [vmem:[#allocation2 + $0x260] ss:$8 sps:$4 sm:$0xff]  }
 0x2f2   :  { %v2195_v12 = vpop.f32.mrb[19].mxu0 }
 0x2f4   :  { %2405 = vmatmul.mubr.bf16.gmra.mrb[124].mxu0 %v13994_v8 }
 0x2f5   :  { %2412 = vmatprep.mubr.bf16.mxu0 %v13995_v10  ;;  %v14016_v10 = vld [vmem:[#allocation2 + $0x274] ss:$8 sps:$4 sm:$0xff]  }
 0x2f7   :  { %v15863_v13 = vpop.f32.mrb[20].mxu0 }
 0x2f8   :  { %v2200_v14 = vpop.f32.mrb[21].mxu0 }
 0x2f9   :  { %v15865_v16 = vpop.f32.mrb[22].mxu0 }
 0x2fa   :  { %v2203_v19 = vpop.f32.mrb[23].mxu0 }
 0x2fb   :  { %v14018_v19 = vld [vmem:[#allocation2 + $0x270] ss:$8 sps:$4 sm:$0xff]  }
 0x2fc   :  { %2413 = vmatmul.mubr.bf16.gmra.mrb[128].mxu0 %v13997_v15 }
 0x2fd   :  { %2420 = vmatprep.mubr.bf16.mxu0 %v13998_v17 }
 0x2ff   :  { %v15869_v20 = vpop.f32.mrb[24].mxu0 }
 0x300   :  { %v2208_v21 = vpop.f32.mrb[25].mxu0 }
 0x301   :  { %v15871_v23 = vpop.f32.mrb[26].mxu0 }
 0x302   :  { %v2211_v26 = vpop.f32.mrb[27].mxu0 }
 0x304   :  { %2421 = vmatmul.mubr.bf16.gmra.mrb[132].mxu0 %v14000_v22  ;;  %v14019_v22 = vld [vmem:[#allocation2 + $0x284] ss:$8 sps:$4 sm:$0xff]  }
 0x305   :  { %2428 = vmatprep.mubr.bf16.mxu0 %v14001_v24 }
 0x307   :  { %v15875_v27 = vpop.f32.mrb[28].mxu0 }
 0x308   :  { %v2216_v28 = vpop.f32.mrb[29].mxu0 }
 0x309   :  { %v15877_v30 = vpop.f32.mrb[30].mxu0 }
 0x30a   :  { %v2219_v33 = vpop.f32.mrb[31].mxu0 }
 0x30c   :  { %2429 = vmatmul.mubr.bf16.gmra.mrb[136].mxu0 %v14003_v29 }
 0x30d   :  { %2436 = vmatprep.mubr.bf16.mxu0 %v14004_v31  ;;  %v14021_v31 = vld [vmem:[#allocation2 + $0x280] ss:$8 sps:$4 sm:$0xff]  }
 0x30f   :  { %v15881_v34 = vpop.f32.mrb[32].mxu0 }
 0x310   :  { %v2224_v35 = vpop.f32.mrb[33].mxu0 }
 0x311   :  { %v15883_v37 = vpop.f32.mrb[34].mxu0  ;;  %v14022_v35 = vld [vmem:[#allocation2 + $0x294] ss:$8 sps:$4 sm:$0xff]  }
 0x312   :  { %v2227_v40 = vpop.f32.mrb[35].mxu0 }
 0x314   :  { %2437 = vmatmul.mubr.bf16.gmra.mrb[140].mxu0 %v14006_v36 }
 0x315   :  { %2444 = vmatprep.mubr.bf16.mxu0 %v14007_v38 }
 0x317   :  { %v15887_v42 = vpop.f32.mrb[36].mxu0 }
 0x318   :  { %v2232_v43 = vpop.f32.mrb[37].mxu0 }
 0x319   :  { %v15889_v47 = vpop.f32.mrb[38].mxu0 }
 0x31a   :  { %v2235_v52 = vpop.f32.mrb[39].mxu0 }
 0x31b   :  { %v14025_v52 = vld [vmem:[#allocation2 + $0x2a4] ss:$8 sps:$4 sm:$0xff]  }
 0x31c   :  { %2445 = vmatmul.mubr.bf16.gmra.mrb[144].mxu0 %v14009_v45  ;;  %v14024_v45 = vld [vmem:[#allocation2 + $0x290] ss:$8 sps:$4 sm:$0xff]  }
 0x31d   :  { %2452 = vmatprep.mubr.bf16.mxu0 %v14010_v49 }
 0x31f   :  { %v15893_v54 = vpop.f32.mrb[40].mxu0 }
 0x320   :  { %v2240_v56 = vpop.f32.mrb[41].mxu0 }
 0x321   :  { %v15895_v59 = vpop.f32.mrb[42].mxu0 }
 0x322   :  { %v2243_v1 = vpop.f32.mrb[43].mxu0 }
 0x324   :  { %2453 = vmatmul.mubr.bf16.gmra.mrb[148].mxu0 %v14012_v57 }
 0x325   :  { %2460 = vmatprep.mubr.bf16.mxu0 %v14013_v61 }
 0x327   :  { %v15899_v3 = vpop.f32.mrb[44].mxu0 }
 0x328   :  { %v2248_v5 = vpop.f32.mrb[45].mxu0 }
 0x329   :  { %v15901_v8 = vpop.f32.mrb[46].mxu0  ;;  %v14027_v5 = vld [vmem:[#allocation2 + $0x2a0] ss:$8 sps:$4 sm:$0xff]  }
 0x32a   :  { %v2251_v14 = vpop.f32.mrb[47].mxu0 }
 0x32c   :  { %2461 = vmatmul.mubr.bf16.gmra.mrb[152].mxu0 %v14015_v7 }
 0x32d   :  { %2468 = vmatprep.mubr.bf16.mxu0 %v14016_v10  ;;  %v14028_v10 = vld [vmem:[#allocation2 + $0x2b4] ss:$8 sps:$4 sm:$0xff]  }
 0x32f   :  { %v15905_v15 = vpop.f32.mrb[48].mxu0 }
 0x330   :  { %v2256_v17 = vpop.f32.mrb[49].mxu0 }
 0x331   :  { %v15907_v21 = vpop.f32.mrb[50].mxu0 }
 0x332   :  { %v2259_v26 = vpop.f32.mrb[51].mxu0 }
 0x333   :  { %v14030_v26 = vld [vmem:[#allocation2 + $0x2b0] ss:$8 sps:$4 sm:$0xff]  }
 0x334   :  { %2469 = vmatmul.mubr.bf16.gmra.mrb[156].mxu0 %v14018_v19 }
 0x335   :  { %2476 = vmatprep.mubr.bf16.mxu0 %v14019_v22 }
 0x337   :  { %v15911_v28 = vpop.f32.mrb[52].mxu0 }
 0x338   :  { %v2264_v29 = vpop.f32.mrb[53].mxu0 }
 0x339   :  { %v15913_v33 = vpop.f32.mrb[54].mxu0 }
 0x33a   :  { %v2267_v38 = vpop.f32.mrb[55].mxu0 }
 0x33c   :  { %2477 = vmatmul.mubr.bf16.gmra.mrb[160].mxu0 %v14021_v31  ;;  %v14031_v31 = vld [vmem:[#allocation2 + $0x2c4] ss:$8 sps:$4 sm:$0xff]  }
 0x33d   :  { %2484 = vmatprep.mubr.bf16.mxu0 %v14022_v35 }
 0x33f   :  { %v15917_v40 = vpop.f32.mrb[56].mxu0 }
 0x340   :  { %v2272_v43 = vpop.f32.mrb[57].mxu0 }
 0x341   :  { %v15919_v49 = vpop.f32.mrb[58].mxu0 }
 0x342   :  { %v2275_v57 = vpop.f32.mrb[59].mxu0 }
 0x344   :  { %2485 = vmatmul.mubr.bf16.gmra.mrb[164].mxu0 %v14024_v45 }
 0x345   :  { %2492 = vmatprep.mubr.bf16.mxu0 %v14025_v52  ;;  %v14033_v52 = vld [vmem:[#allocation2 + $0x2c0] ss:$8 sps:$4 sm:$0xff]  }
 0x347   :  { %v15923_v61 = vpop.f32.mrb[60].mxu0 }
 0x348   :  { %v2280_v1 = vpop.f32.mrb[61].mxu0 }
 0x349   :  { %v15925_v7 = vpop.f32.mrb[62].mxu0  ;;  %v14034_v1 = vld [vmem:[#allocation2 + $0x2d4] ss:$8 sps:$4 sm:$0xff]  }
 0x34a   :  { %v2283_v17 = vpop.f32.mrb[63].mxu0 }
 0x34c   :  { %2493 = vmatmul.mubr.bf16.gmra.mrb[168].mxu0 %v14027_v5  ;;  %v14039_v5 = vld [vmem:[#allocation2 + $0x2e0] ss:$8 sps:$4 sm:$0xff]  }
 0x34d   :  { %2500 = vmatprep.mubr.bf16.mxu0 %v14028_v10 }
 0x34f   :  { %v15929_v19 = vpop.f32.mrb[64].mxu0 }
 0x350   :  { %v2288_v22 = vpop.f32.mrb[65].mxu0 }
 0x351   :  { %v15931_v29 = vpop.f32.mrb[66].mxu0 }
 0x352   :  { %v2291_v38 = vpop.f32.mrb[67].mxu0 }
 0x354   :  { %2501 = vmatmul.mubr.bf16.gmra.mrb[172].mxu0 %v14030_v26  ;;  %v14037_v26 = vld [vmem:[#allocation2 + $0x2e4] ss:$8 sps:$4 sm:$0xff]  }
 0x355   :  { %2508 = vmatprep.mubr.bf16.mxu0 %v14031_v31  ;;  %v14042_v31 = vld [vmem:[#allocation2 + $0x2f0] ss:$8 sps:$4 sm:$0xff]  }
 0x357   :  { %v15935_v43 = vpop.f32.mrb[68].mxu0 }
 0x358   :  { %v2296_v45 = vpop.f32.mrb[69].mxu0 }
 0x359   :  { %v15937_v57 = vpop.f32.mrb[70].mxu0 }
 0x35a   :  { %v2299_v10 = vpop.f32.mrb[71].mxu0 }
 0x35c   :  { %2509 = vmatmul.mubr.bf16.gmra.mrb[176].mxu0 %v14033_v52  ;;  %v14040_v52 = vld [vmem:[#allocation2 + $0x2f4] ss:$8 sps:$4 sm:$0xff]  }
 0x35d   :  { %2516 = vmatprep.mubr.bf16.mxu0 %v14034_v1  ;;  %v14045_v1 = vld [vmem:[#allocation2 + $0x300] ss:$8 sps:$4 sm:$0xff]  }
 0x35f   :  { %v15941_v17 = vpop.f32.mrb[72].mxu0 }
 0x360   :  { %v2304_v22 = vpop.f32.mrb[73].mxu0 }
 0x361   :  { %v15943_v38 = vpop.f32.mrb[74].mxu0 }
 0x362   :  { %v2307_v45 = vpop.f32.mrb[75].mxu0 }
 0x364   :  { %2517 = vmatmul.mubr.bf16.gmra.mrb[180].mxu0 %v14036_v0  ;;  %v14043_v0 = vld [vmem:[#allocation2 + $0x304] ss:$8 sps:$4 sm:$0xff]  }
 0x365   :  { %2524 = vmatprep.mubr.bf16.mxu0 %v14037_v26 }
 0x367   :  { %v15947_v35 = vpop.f32.mrb[76].mxu0 }
 0x368   :  { %v2312_v14 = vpop.f32.mrb[77].mxu0 }
 0x369   :  { %v15949_v10 = vpop.f32.mrb[78].mxu0  ;;  %v14048_v14 = vld [vmem:[#allocation2 + $0x310] ss:$8 sps:$4 sm:$0xff]  }
 0x36a   :  { %v2315_v22 = vpop.f32.mrb[79].mxu0 }
 0x36c   :  { %2525 = vmatmul.mubr.bf16.gmra.mrb[184].mxu0 %v14039_v5  ;;  %v14046_v5 = vld [vmem:[#allocation2 + $0x314] ss:$8 sps:$4 sm:$0xff]  }
 0x36d   :  { %2532 = vmatprep.mubr.bf16.mxu0 %v14040_v52 }
 0x36f   :  { %v15953_v56 = vpop.f32.mrb[80].mxu0 }
 0x370   :  { %v2320_v36 = vpop.f32.mrb[81].mxu0 }
 0x371   :  { %v15955_v45 = vpop.f32.mrb[82].mxu0  ;;  %v14051_v36 = vld [vmem:[#allocation2 + $0x320] ss:$8 sps:$4 sm:$0xff]  }
 0x372   :  { %v2323_v26 = vpop.f32.mrb[83].mxu0 }
 0x374   :  { %2533 = vmatmul.mubr.bf16.gmra.mrb[188].mxu0 %v14042_v31  ;;  %v14049_v31 = vld [vmem:[#allocation2 + $0x324] ss:$8 sps:$4 sm:$0xff]  }
 0x375   :  { %2540 = vmatprep.mubr.bf16.mxu0 %v14043_v0 }
 0x377   :  { %v15959_v24 = vpop.f32.mrb[84].mxu0 }
 0x378   :  { %v2328_v12 = vpop.f32.mrb[85].mxu0 }
 0x379   :  { %v15961_v22 = vpop.f32.mrb[86].mxu0  ;;  %v14054_v12 = vld [vmem:[#allocation2 + $0x330] ss:$8 sps:$4 sm:$0xff]  }
 0x37a   :  { %v2331_v52 = vpop.f32.mrb[87].mxu0 }
 0x37c   :  { %2541 = vmatmul.mubr.bf16.gmra.mrb[192].mxu0 %v14045_v1  ;;  %v14052_v1 = vld [vmem:[#allocation2 + $0x334] ss:$8 sps:$4 sm:$0xff]  }
 0x37d   :  { %2548 = vmatprep.mubr.bf16.mxu0 %v14046_v5 }
 0x37f   :  { %v15965_v63 = vpop.f32.mrb[88].mxu0 }
 0x380   :  { %v2336_v50 = vpop.f32.mrb[89].mxu0 }
 0x381   :  { %v15967_v26 = vpop.f32.mrb[90].mxu0  ;;  %v14057_v50 = vld [vmem:[#allocation2 + $0x340] ss:$8 sps:$4 sm:$0xff]  }
 0x382   :  { %v2339_v0 = vpop.f32.mrb[91].mxu0 }
 0x384   :  { %2549 = vmatmul.mubr.bf16.gmra.mrb[196].mxu0 %v14048_v14  ;;  %v14055_v14 = vld [vmem:[#allocation2 + $0x344] ss:$8 sps:$4 sm:$0xff]  }
 0x385   :  { %2556 = vmatprep.mubr.bf16.mxu0 %v14049_v31 }
 0x387   :  { %v15971_v39 = vpop.f32.mrb[92].mxu0 }
 0x388   :  { %17971 = vst [vmem:[#allocation45_spill] sm:$0xff] %v15971_v39  ;;  %v2344_v32 = vpop.f32.mrb[93].mxu0  ;;  %v14156_v39 = vld [vmem:[#allocation2 + $0x550] ss:$8 sps:$4 sm:$0xff]  }
 0x389   :  { %v15973_v52 = vpop.f32.mrb[94].mxu0  ;;  %v14060_v32 = vld [vmem:[#allocation2 + $0x350] ss:$8 sps:$4 sm:$0xff]  }
 0x38a   :  { %v2347_v5 = vpop.f32.mrb[95].mxu0 }
 0x38c   :  { %2557 = vmatmul.mubr.bf16.gmra.mrb[200].mxu0 %v14051_v36  ;;  %v14058_v36 = vld [vmem:[#allocation2 + $0x354] ss:$8 sps:$4 sm:$0xff]  }
 0x38d   :  { %2564 = vmatprep.mubr.bf16.mxu0 %v14052_v1 }
 0x38f   :  { %v15977_v25 = vpop.f32.mrb[96].mxu0 }
 0x390   :  { %17972 = vst [vmem:[#allocation46_spill] sm:$0xff] %v15977_v25  ;;  %v2352_v18 = vpop.f32.mrb[97].mxu0 }
 0x391   :  { %v15979_v0 = vpop.f32.mrb[98].mxu0  ;;  %v14063_v18 = vld [vmem:[#allocation2 + $0x360] ss:$8 sps:$4 sm:$0xff]  }
 0x392   :  { %17973 = vst [vmem:[#allocation47_spill] sm:$0xff] %v15979_v0  ;;  %v2355_v31 = vpop.f32.mrb[99].mxu0 }
 0x394   :  { %2565 = vmatmul.mubr.bf16.gmra.mrb[204].mxu0 %v14054_v12  ;;  %v14061_v12 = vld [vmem:[#allocation2 + $0x364] ss:$8 sps:$4 sm:$0xff]  }
 0x395   :  { %2572 = vmatprep.mubr.bf16.mxu0 %v14055_v14 }
 0x397   :  { %v15983_v11 = vpop.f32.mrb[100].mxu0 }
 0x398   :  { %17974 = vst [vmem:[#allocation48_spill] sm:$0xff] %v15983_v11  ;;  %v2360_v4 = vpop.f32.mrb[101].mxu0 }
 0x399   :  { %v15985_v5 = vpop.f32.mrb[102].mxu0  ;;  %v14066_v4 = vld [vmem:[#allocation2 + $0x370] ss:$8 sps:$4 sm:$0xff]  }
 0x39a   :  { %17975 = vst [vmem:[#allocation49_spill] sm:$0xff] %v15985_v5  ;;  %v2363_v1 = vpop.f32.mrb[103].mxu0 }
 0x39c   :  { %2573 = vmatmul.mubr.bf16.gmra.mrb[208].mxu0 %v14057_v50  ;;  %v14064_v50 = vld [vmem:[#allocation2 + $0x374] ss:$8 sps:$4 sm:$0xff]  }
 0x39d   :  { %2580 = vmatprep.mubr.bf16.mxu0 %v14058_v36 }
 0x39f   :  { %v15989_v60 = vpop.f32.mrb[104].mxu0 }
 0x3a0   :  { %17976 = vst [vmem:[#allocation50_spill] sm:$0xff] %v15989_v60  ;;  %v2368_v53 = vpop.f32.mrb[105].mxu0 }
 0x3a1   :  { %v15991_v31 = vpop.f32.mrb[106].mxu0  ;;  %v14069_v53 = vld [vmem:[#allocation2 + $0x380] ss:$8 sps:$4 sm:$0xff]  }
 0x3a2   :  { %17977 = vst [vmem:[#allocation51_spill] sm:$0xff] %v15991_v31  ;;  %v2371_v14 = vpop.f32.mrb[107].mxu0 }
 0x3a4   :  { %2581 = vmatmul.mubr.bf16.gmra.mrb[212].mxu0 %v14060_v32  ;;  %v14067_v32 = vld [vmem:[#allocation2 + $0x384] ss:$8 sps:$4 sm:$0xff]  }
 0x3a5   :  { %2588 = vmatprep.mubr.bf16.mxu0 %v14061_v12 }
 0x3a7   :  { %v15995_v46 = vpop.f32.mrb[108].mxu0 }
 0x3a8   :  { %17978 = vst [vmem:[#allocation52_spill] sm:$0xff] %v15995_v46  ;;  %v2376_v25 = vpop.f32.mrb[109].mxu0 }
 0x3a9   :  { %v15997_v1 = vpop.f32.mrb[110].mxu0  ;;  %v14072_v25 = vld [vmem:[#allocation2 + $0x390] ss:$8 sps:$4 sm:$0xff]  }
 0x3aa   :  { %17979 = vst [vmem:[#allocation53_spill] sm:$0xff] %v15997_v1  ;;  %v2379_v36 = vpop.f32.mrb[111].mxu0 }
 0x3ac   :  { %2589 = vmatmul.mubr.bf16.gmra.mrb[216].mxu0 %v14063_v18  ;;  %v14070_v18 = vld [vmem:[#allocation2 + $0x394] ss:$8 sps:$4 sm:$0xff]  }
 0x3ad   :  { %2596 = vmatprep.mubr.bf16.mxu0 %v14064_v50 }
 0x3af   :  { %v16001_v11 = vpop.f32.mrb[112].mxu0 }
 0x3b0   :  { %17980 = vst [vmem:[#allocation54_spill] sm:$0xff] %v16001_v11  ;;  %v2384_v5 = vpop.f32.mrb[113].mxu0 }
 0x3b1   :  { %v16003_v14 = vpop.f32.mrb[114].mxu0  ;;  %v14075_v5 = vld [vmem:[#allocation2 + $0x3a0] ss:$8 sps:$4 sm:$0xff]  }
 0x3b2   :  { %17981 = vst [vmem:[#allocation55_spill] sm:$0xff] %v16003_v14  ;;  %v2387_v12 = vpop.f32.mrb[115].mxu0 }
 0x3b4   :  { %2597 = vmatmul.mubr.bf16.gmra.mrb[220].mxu0 %v14066_v4  ;;  %v14073_v4 = vld [vmem:[#allocation2 + $0x3a4] ss:$8 sps:$4 sm:$0xff]  }
 0x3b5   :  { %2604 = vmatprep.mubr.bf16.mxu0 %v14067_v32 }
 0x3b7   :  { %v16007_v60 = vpop.f32.mrb[116].mxu0 }
 0x3b8   :  { %17982 = vst [vmem:[#allocation56_spill] sm:$0xff] %v16007_v60  ;;  %v2392_v31 = vpop.f32.mrb[117].mxu0 }
 0x3b9   :  { %v16009_v36 = vpop.f32.mrb[118].mxu0  ;;  %v14078_v31 = vld [vmem:[#allocation2 + $0x3b0] ss:$8 sps:$4 sm:$0xff]  }
 0x3ba   :  { %17983 = vst [vmem:[#allocation57_spill] sm:$0xff] %v16009_v36  ;;  %v2395_v50 = vpop.f32.mrb[119].mxu0 }
 0x3bc   :  { %2605 = vmatmul.mubr.bf16.gmra.mrb[224].mxu0 %v14069_v53  ;;  %v14076_v53 = vld [vmem:[#allocation2 + $0x3b4] ss:$8 sps:$4 sm:$0xff]  }
 0x3bd   :  { %2612 = vmatprep.mubr.bf16.mxu0 %v14070_v18 }
 0x3bf   :  { %v16013_v46 = vpop.f32.mrb[120].mxu0 }
 0x3c0   :  { %17984 = vst [vmem:[#allocation58_spill] sm:$0xff] %v16013_v46  ;;  %v2400_v1 = vpop.f32.mrb[121].mxu0  ;;  %v14127_v46 = vld [vmem:[#allocation4 + $0x24] sm:$0xff]  }
 0x3c1   :  { %v16015_v12 = vpop.f32.mrb[122].mxu0  ;;  %12999 = vmatprep.subr.bf16.mxu1 %v14127_v46  ;;  %v14128_v1 = vld [vmem:[#allocation4 + $0x2c] ss:$0 sps:$4 sm:$0xff]  }
 0x3c2   :  { %17985 = vst [vmem:[#allocation59_spill] sm:$0xff] %v16015_v12  ;;  %v2403_v32 = vpop.f32.mrb[123].mxu0  ;;  %13000 = vmatpush3.bf16.msra.mxu1 %v14127_v46 }
 0x3c3   :  { %13857 = vmatprep.subr.msk.bf16.mxu1 %vm3446_vm0, %v14128_v1 }
 0x3c4   :  { %2613 = vmatmul.mubr.bf16.gmra.mrb[228].mxu0 %v14072_v25  ;;  %v14079_v25 = vld [vmem:[#allocation2 + $0x3c4] ss:$8 sps:$4 sm:$0xff]  }
 0x3c5   :  { %2620 = vmatprep.mubr.bf16.mxu0 %v14073_v4 }
 0x3c7   :  { %v16019_v11 = vpop.f32.mrb[124].mxu0 }
 0x3c8   :  { %17986 = vst [vmem:[#allocation60_spill] sm:$0xff] %v16019_v11  ;;  %v2408_v14 = vpop.f32.mrb[125].mxu0 }
 0x3c9   :  { %v16021_v50 = vpop.f32.mrb[126].mxu0  ;;  %v14084_v14 = vld [vmem:[#allocation2 + $0x3d0] ss:$8 sps:$4 sm:$0xff]  }
 0x3ca   :  { %17987 = vst [vmem:[#allocation61_spill] sm:$0xff] %v16021_v50  ;;  %v2411_v18 = vpop.f32.mrb[127].mxu0  ;;  %v14082_v50 = vld [vmem:[#allocation2 + $0x3d4] ss:$8 sps:$4 sm:$0xff]  }
 0x3cc   :  { %2621 = vmatmul.mubr.bf16.gmra.mrb[232].mxu0 %v14075_v5 }
 0x3cd   :  { %2628 = vmatprep.mubr.bf16.mxu0 %v14076_v53  ;;  %v14081_v53 = vld [vmem:[#allocation2 + $0x3c0] ss:$8 sps:$4 sm:$0xff]  }
 0x3cf   :  { %v16025_v60 = vpop.f32.mrb[128].mxu0 }
 0x3d0   :  { %17988 = vst [vmem:[#allocation62_spill] sm:$0xff] %v16025_v60  ;;  %v2416_v36 = vpop.f32.mrb[129].mxu0  ;;  %v14085_v60 = vld [vmem:[#allocation2 + $0x3e4] ss:$8 sps:$4 sm:$0xff]  }
 0x3d1   :  { %v16027_v32 = vpop.f32.mrb[130].mxu0  ;;  %v3448_v36 = vsel %vm3446_vm0, %v14128_v1, 0  ;;  %v14090_v1 = vld [vmem:[#allocation2 + $0x3f0] ss:$8 sps:$4 sm:$0xff]  }
 0x3d2   :  { %17989 = vst [vmem:[#allocation63_spill] sm:$0xff] %v16027_v32  ;;  %v2419_v4 = vpop.f32.mrb[131].mxu0  ;;  %13002 = vmatpush3.bf16.msra.mxu1 %v3448_v36 }
 0x3d4   :  { %2629 = vmatmul.mubr.bf16.gmra.mrb[236].mxu0 %v14078_v31  ;;  %v14087_v31 = vld [vmem:[#allocation2 + $0x3e0] ss:$8 sps:$4 sm:$0xff]  }
 0x3d5   :  { %2636 = vmatprep.mubr.bf16.mxu0 %v14079_v25 }
 0x3d7   :  { %v16031_v18 = vpop.f32.mrb[132].mxu0 }
 0x3d8   :  { %17990 = vst [vmem:[#allocation64_spill] sm:$0xff] %v16031_v18  ;;  %v2424_v5 = vpop.f32.mrb[133].mxu0 }
 0x3d9   :  { %v16035_v11 = vpop.f32.mrb[134].mxu0 }
 0x3da   :  { %17991 = vst [vmem:[#allocation65_spill] sm:$0xff] %v16035_v11  ;;  %v2427_v4 = vpop.f32.mrb[135].mxu0 }
 0x3dc   :  { %2637 = vmatmul.mubr.bf16.gmra.mrb[240].mxu0 %v14081_v53  ;;  %v14091_v53 = vld [vmem:[#allocation2 + $0x400] ss:$8 sps:$4 sm:$0xff]  }
 0x3dd   :  { %2644 = vmatprep.mubr.bf16.mxu0 %v14082_v50  ;;  %v14088_v50 = vld [vmem:[#allocation2 + $0x3f4] ss:$8 sps:$4 sm:$0xff]  }
 0x3df   :  { %v16039_v46 = vpop.f32.mrb[136].mxu0 }
 0x3e0   :  { %17992 = vst [vmem:[#allocation66_spill] sm:$0xff] %v16039_v46  ;;  %v2432_v25 = vpop.f32.mrb[137].mxu0 }
 0x3e1   :  { %v16041_v5 = vpop.f32.mrb[138].mxu0 }
 0x3e2   :  { %17993 = vst [vmem:[#allocation67_spill] sm:$0xff] %v16041_v5  ;;  %v2435_v32 = vpop.f32.mrb[139].mxu0 }
 0x3e4   :  { %2645 = vmatmul.mubr.bf16.gmra.mrb[244].mxu0 %v14084_v14 }
 0x3e5   :  { %2652 = vmatprep.mubr.bf16.mxu0 %v14085_v60  ;;  %v14093_v60 = vld [vmem:[#allocation2 + $0x404] ss:$8 sps:$4 sm:$0xff]  }
 0x3e7   :  { %v16045_v36 = vpop.f32.mrb[140].mxu0 }
 0x3e8   :  { %17994 = vst [vmem:[#allocation68_spill] sm:$0xff] %v16045_v36  ;;  %v2440_v12 = vpop.f32.mrb[141].mxu0 }
 0x3e9   :  { %v16047_v4 = vpop.f32.mrb[142].mxu0  ;;  %v14094_v12 = vld [vmem:[#allocation2 + $0x410] ss:$8 sps:$4 sm:$0xff]  }
 0x3ea   :  { %17995 = vst [vmem:[#allocation69_spill] sm:$0xff] %v16047_v4  ;;  %v2443_v25 = vpop.f32.mrb[143].mxu0 }
 0x3ec   :  { %2653 = vmatmul.mubr.bf16.gmra.mrb[248].mxu0 %v14087_v31  ;;  %v14096_v31 = vld [vmem:[#allocation2 + $0x414] ss:$8 sps:$4 sm:$0xff]  }
 0x3ed   :  { %2660 = vmatprep.mubr.bf16.mxu0 %v14088_v50 }
 0x3ef   :  { %v16051_v18 = vpop.f32.mrb[144].mxu0 }
 0x3f0   :  { %17996 = vst [vmem:[#allocation70_spill] sm:$0xff] %v16051_v18  ;;  %v2448_v11 = vpop.f32.mrb[145].mxu0 }
 0x3f1   :  { %v16053_v32 = vpop.f32.mrb[146].mxu0  ;;  %v14097_v11 = vld [vmem:[#allocation2 + $0x420] ss:$8 sps:$4 sm:$0xff]  }
 0x3f2   :  { %17997 = vst [vmem:[#allocation71_spill] sm:$0xff] %v16053_v32  ;;  %v2451_v14 = vpop.f32.mrb[147].mxu0 }
 0x3f4   :  { %2661 = vmatmul.mubr.bf16.gmra.mrb[252].mxu0 %v14090_v1  ;;  %v14099_v1 = vld [vmem:[#allocation2 + $0x424] ss:$8 sps:$4 sm:$0xff]  }
 0x3f5   :  { %2668 = vmatprep.mubr.bf16.mxu0 %v14093_v60 }
 0x3f7   :  { %v16057_v46 = vpop.f32.mrb[148].mxu0 }
 0x3f8   :  { %17998 = vst [vmem:[#allocation72_spill] sm:$0xff] %v16057_v46  ;;  %v2456_v5 = vpop.f32.mrb[149].mxu0 }
 0x3f9   :  { %v16059_v25 = vpop.f32.mrb[150].mxu0  ;;  %v14100_v5 = vld [vmem:[#allocation2 + $0x430] ss:$8 sps:$4 sm:$0xff]  }
 0x3fa   :  { %17999 = vst [vmem:[#allocation73_spill] sm:$0xff] %v16059_v25  ;;  %v2459_v50 = vpop.f32.mrb[151].mxu0 }
 0x3fc   :  { %2669 = vmatmul.mubr.bf16.gmra.mrb[0].mxu0 %v14091_v53  ;;  %v14102_v53 = vld [vmem:[#allocation2 + $0x434] ss:$8 sps:$4 sm:$0xff]  }
 0x3fd   :  { %2676 = vmatprep.mubr.bf16.mxu0 %v14096_v31 }
 0x3ff   :  { %v16063_v36 = vpop.f32.mrb[152].mxu0 }
 0x400   :  { %18000 = vst [vmem:[#allocation74_spill] sm:$0xff] %v16063_v36  ;;  %v2464_v4 = vpop.f32.mrb[153].mxu0 }
 0x401   :  { %v16065_v14 = vpop.f32.mrb[154].mxu0  ;;  %v14103_v4 = vld [vmem:[#allocation2 + $0x440] ss:$8 sps:$4 sm:$0xff]  }
 0x402   :  { %18001 = vst [vmem:[#allocation75_spill] sm:$0xff] %v16065_v14  ;;  %v2467_v60 = vpop.f32.mrb[155].mxu0 }
 0x404   :  { %2677 = vmatmul.mubr.bf16.gmra.mrb[4].mxu0 %v14094_v12  ;;  %v14105_v12 = vld [vmem:[#allocation2 + $0x444] ss:$8 sps:$4 sm:$0xff]  }
 0x405   :  { %2684 = vmatprep.mubr.bf16.mxu0 %v14099_v1 }
 0x407   :  { %v16069_v18 = vpop.f32.mrb[156].mxu0 }
 0x408   :  { %18002 = vst [vmem:[#allocation76_spill] sm:$0xff] %v16069_v18  ;;  %v2472_v32 = vpop.f32.mrb[157].mxu0 }
 0x409   :  { %v16071_v50 = vpop.f32.mrb[158].mxu0  ;;  %v14106_v32 = vld [vmem:[#allocation2 + $0x450] ss:$8 sps:$4 sm:$0xff]  }
 0x40a   :  { %18003 = vst [vmem:[#allocation77_spill] sm:$0xff] %v16071_v50  ;;  %v2475_v31 = vpop.f32.mrb[159].mxu0 }
 0x40c   :  { %2685 = vmatmul.mubr.bf16.gmra.mrb[8].mxu0 %v14097_v11  ;;  %v14108_v11 = vld [vmem:[#allocation2 + $0x454] ss:$8 sps:$4 sm:$0xff]  }
 0x40d   :  { %2692 = vmatprep.mubr.bf16.mxu0 %v14102_v53 }
 0x40f   :  { %v16075_v46 = vpop.f32.mrb[160].mxu0 }
 0x410   :  { %18004 = vst [vmem:[#allocation78_spill] sm:$0xff] %v16075_v46  ;;  %v2480_v25 = vpop.f32.mrb[161].mxu0 }
 0x411   :  { %v16077_v60 = vpop.f32.mrb[162].mxu0  ;;  %v14109_v25 = vld [vmem:[#allocation2 + $0x460] ss:$8 sps:$4 sm:$0xff]  }
 0x412   :  { %18005 = vst [vmem:[#allocation79_spill] sm:$0xff] %v16077_v60  ;;  %v2483_v1 = vpop.f32.mrb[163].mxu0 }
 0x414   :  { %2693 = vmatmul.mubr.bf16.gmra.mrb[12].mxu0 %v14100_v5  ;;  %v14111_v5 = vld [vmem:[#allocation2 + $0x464] ss:$8 sps:$4 sm:$0xff]  }
 0x415   :  { %2700 = vmatprep.mubr.bf16.mxu0 %v14105_v12 }
 0x417   :  { %v16081_v36 = vpop.f32.mrb[164].mxu0 }
 0x418   :  { %18006 = vst [vmem:[#allocation80_spill] sm:$0xff] %v16081_v36  ;;  %v2488_v14 = vpop.f32.mrb[165].mxu0 }
 0x419   :  { %v16083_v31 = vpop.f32.mrb[166].mxu0  ;;  %v14112_v14 = vld [vmem:[#allocation2 + $0x470] ss:$8 sps:$4 sm:$0xff]  }
 0x41a   :  { %18007 = vst [vmem:[#allocation81_spill] sm:$0xff] %v16083_v31  ;;  %v2491_v53 = vpop.f32.mrb[167].mxu0 }
 0x41c   :  { %2701 = vmatmul.mubr.bf16.gmra.mrb[16].mxu0 %v14103_v4  ;;  %v14114_v4 = vld [vmem:[#allocation2 + $0x474] ss:$8 sps:$4 sm:$0xff]  }
 0x41d   :  { %2708 = vmatprep.mubr.bf16.mxu0 %v14108_v11 }
 0x41f   :  { %v16087_v18 = vpop.f32.mrb[168].mxu0 }
 0x420   :  { %18008 = vst [vmem:[#allocation82_spill] sm:$0xff] %v16087_v18  ;;  %v2496_v50 = vpop.f32.mrb[169].mxu0 }
 0x421   :  { %v16089_v1 = vpop.f32.mrb[170].mxu0  ;;  %v14115_v50 = vld [vmem:[#allocation2 + $0x480] ss:$8 sps:$4 sm:$0xff]  }
 0x422   :  { %18009 = vst [vmem:[#allocation83_spill] sm:$0xff] %v16089_v1  ;;  %v2499_v12 = vpop.f32.mrb[171].mxu0 }
 0x424   :  { %2709 = vmatmul.mubr.bf16.gmra.mrb[20].mxu0 %v14106_v32  ;;  %v14117_v32 = vld [vmem:[#allocation2 + $0x484] ss:$8 sps:$4 sm:$0xff]  }
 0x425   :  { %2716 = vmatprep.mubr.bf16.mxu0 %v14111_v5 }
 0x427   :  { %v16093_v46 = vpop.f32.mrb[172].mxu0 }
 0x428   :  { %18010 = vst [vmem:[#allocation84_spill] sm:$0xff] %v16093_v46  ;;  %v2504_v60 = vpop.f32.mrb[173].mxu0 }
 0x429   :  { %v16095_v53 = vpop.f32.mrb[174].mxu0  ;;  %v14118_v60 = vld [vmem:[#allocation2 + $0x490] ss:$8 sps:$4 sm:$0xff]  }
 0x42a   :  { %18011 = vst [vmem:[#allocation85_spill] sm:$0xff] %v16095_v53  ;;  %v2507_v11 = vpop.f32.mrb[175].mxu0 }
 0x42c   :  { %2717 = vmatmul.mubr.bf16.gmra.mrb[24].mxu0 %v14109_v25  ;;  %v14120_v25 = vld [vmem:[#allocation2 + $0x494] ss:$8 sps:$4 sm:$0xff]  }
 0x42d   :  { %2724 = vmatprep.mubr.bf16.mxu0 %v14114_v4 }
 0x42f   :  { %v16099_v36 = vpop.f32.mrb[176].mxu0 }
 0x430   :  { %18012 = vst [vmem:[#allocation86_spill] sm:$0xff] %v16099_v36  ;;  %v2512_v31 = vpop.f32.mrb[177].mxu0 }
 0x431   :  { %v16101_v12 = vpop.f32.mrb[178].mxu0  ;;  %v14121_v31 = vld [vmem:[#allocation2 + $0x4a0] ss:$8 sps:$4 sm:$0xff]  }
 0x432   :  { %18013 = vst [vmem:[#allocation87_spill] sm:$0xff] %v16101_v12  ;;  %v2515_v5 = vpop.f32.mrb[179].mxu0 }
 0x434   :  { %2725 = vmatmul.mubr.bf16.gmra.mrb[28].mxu0 %v14112_v14  ;;  %v14123_v14 = vld [vmem:[#allocation2 + $0x4a4] ss:$8 sps:$4 sm:$0xff]  }
 0x435   :  { %2732 = vmatprep.mubr.bf16.mxu0 %v14117_v32 }
 0x437   :  { %v16105_v18 = vpop.f32.mrb[180].mxu0 }
 0x438   :  { %18014 = vst [vmem:[#allocation88_spill] sm:$0xff] %v16105_v18  ;;  %v2520_v1 = vpop.f32.mrb[181].mxu0  ;;  %v14174_v18 = vld [vmem:[#allocation4] sm:$0xff]  }
 0x439   :  { %v16107_v11 = vpop.f32.mrb[182].mxu0  ;;  %13035 = vmatprep.subr.bf16.mxu1 %v14174_v18 }
 0x43a   :  { %18015 = vst [vmem:[#allocation89_spill] sm:$0xff] %v16107_v11  ;;  %v2523_v4 = vpop.f32.mrb[183].mxu0 }
 0x43c   :  { %2733 = vmatmul.mubr.bf16.gmra.mrb[32].mxu0 %v14115_v50  ;;  %v14126_v50 = vld [vmem:[#allocation2 + $0x4b4] ss:$8 sps:$4 sm:$0xff]  }
 0x43d   :  { %2740 = vmatprep.mubr.bf16.mxu0 %v14120_v25 }
 0x43f   :  { %v16111_v46 = vpop.f32.mrb[184].mxu0 }
 0x440   :  { %18016 = vst [vmem:[#allocation90_spill] sm:$0xff] %v16111_v46  ;;  %v2528_v53 = vpop.f32.mrb[185].mxu0 }
 0x441   :  { %v16113_v5 = vpop.f32.mrb[186].mxu0  ;;  %v14129_v53 = vld [vmem:[#allocation2 + $0x4c0] ss:$8 sps:$4 sm:$0xff]  }
 0x442   :  { %18017 = vst [vmem:[#allocation91_spill] sm:$0xff] %v16113_v5  ;;  %v2531_v32 = vpop.f32.mrb[187].mxu0 }
 0x443   :  { %v14124_v32 = vld [vmem:[#allocation2 + $0x4b0] ss:$8 sps:$4 sm:$0xff]  }
 0x444   :  { %2741 = vmatmul.mubr.bf16.gmra.mrb[36].mxu0 %v14118_v60 }
 0x445   :  { %2748 = vmatprep.mubr.bf16.mxu0 %v14123_v14  ;;  %v14131_v14 = vld [vmem:[#allocation2 + $0x4c4] ss:$8 sps:$4 sm:$0xff]  }
 0x447   :  { %v16117_v36 = vpop.f32.mrb[188].mxu0 }
 0x448   :  { %18018 = vst [vmem:[#allocation92_spill] sm:$0xff] %v16117_v36  ;;  %v2536_v12 = vpop.f32.mrb[189].mxu0  ;;  %v14134_v36 = vld [vmem:[#allocation2 + $0x4d4] ss:$8 sps:$4 sm:$0xff]  }
 0x449   :  { %v16119_v4 = vpop.f32.mrb[190].mxu0 }
 0x44a   :  { %18019 = vst [vmem:[#allocation93_spill] sm:$0xff] %v16119_v4  ;;  %v2539_v25 = vpop.f32.mrb[191].mxu0 }
 0x44c   :  { %2749 = vmatmul.mubr.bf16.gmra.mrb[40].mxu0 %v14121_v31 }
 0x44d   :  { %2756 = vmatprep.mubr.bf16.mxu0 %v14126_v50  ;;  %v14175_v50 = vld [vmem:[#allocation4 + $0x8] ss:$0 sps:$4 sm:$0xff]  }
 0x44f   :  { %v2542_v11 = vpop.f32.mrb[192].mxu0 }
 0x450   :  { %v2544_v1 = vpop.f32.mrb[193].mxu0 }
 0x451   :  { %v2545_v60 = vpop.f32.mrb[194].mxu0 }
 0x452   :  { %v2547_v46 = vpop.f32.mrb[195].mxu0  ;;  %v3368_v12 = vpack.c.bf16 %v2545_v60, %v2542_v11 }
 0x453   :  { %v3669_v46 = vsel %vm3446_vm0, %v14175_v50, 0 }
 0x454   :  { %2757 = vmatmul.mubr.bf16.gmra.mrb[44].mxu0 %v14124_v32  ;;  %13003 = vmatprep.mubr.msk.bf16.mxu1 %vm3397_vm1, %v3368_v12  ;;  %v14132_v32 = vld [vmem:[#allocation2 + $0x4d0] ss:$8 sps:$4 sm:$0xff]  }
 0x455   :  { %2764 = vmatprep.mubr.bf16.mxu0 %v14131_v14 }
 0x457   :  { %v2550_v5 = vpop.f32.mrb[196].mxu0 }
 0x458   :  { %v2552_v0 = vpop.f32.mrb[197].mxu0 }
 0x459   :  { %v2553_v25 = vpop.f32.mrb[198].mxu0  ;;  %v14137_v0 = vld [vmem:[#allocation2 + $0x4e4] ss:$8 sps:$4 sm:$0xff]  }
 0x45a   :  { %v3369_v31 = vpack.c.bf16 %v2553_v25, %v2550_v5  ;;  %v2555_v4 = vpop.f32.mrb[199].mxu0 }
 0x45c   :  { %2765 = vmatmul.mubr.bf16.gmra.mrb[48].mxu0 %v14129_v53  ;;  %13004 = vmatmul.mubr.msk.bf16.vlgmr.msra.gmra.mrb[0].mxu1 %vm3397_vm1, %v3369_v31  ;;  %v14140_v53 = vld [vmem:[#allocation2 + $0x4f4] ss:$8 sps:$4 sm:$0xff]  }
 0x45d   :  { %2772 = vmatprep.mubr.bf16.mxu0 %v14134_v36  ;;  %13036 = vmatpush3.bf16.msra.mxu1 %v14174_v18  ;;  %v14135_v36 = vld [vmem:[#allocation2 + $0x4e0] ss:$8 sps:$4 sm:$0xff]  }
 0x45e   :  { %13858 = vmatprep.subr.msk.bf16.mxu1 %vm3446_vm0, %v14175_v50 }
 0x45f   :  { %v2558_v11 = vpop.f32.mrb[200].mxu0 }
 0x460   :  { %v2560_v1 = vpop.f32.mrb[201].mxu0 }
 0x461   :  { %v2561_v60 = vpop.f32.mrb[202].mxu0  ;;  %13038 = vmatpush3.bf16.msra.mxu1 %v3669_v46  ;;  %v14138_v46 = vld [vmem:[#allocation2 + $0x4f0] ss:$8 sps:$4 sm:$0xff]  }
 0x462   :  { %v3370_v14 = vpack.c.bf16 %v2561_v60, %v2558_v11  ;;  %v2563_v12 = vpop.f32.mrb[203].mxu0  ;;  %v14143_v60 = vld [vmem:[#allocation2 + $0x504] ss:$8 sps:$4 sm:$0xff]  }
 0x464   :  { %2773 = vmatmul.mubr.bf16.gmra.mrb[52].mxu0 %v14132_v32  ;;  %13007 = vmatprep.mubr.msk.bf16.mxu1 %vm3397_vm1, %v3370_v14 }
 0x465   :  { %2780 = vmatprep.mubr.bf16.mxu0 %v14137_v0 }
 0x467   :  { %v2566_v5 = vpop.f32.mrb[204].mxu0 }
 0x468   :  { %v2568_v4 = vpop.f32.mrb[205].mxu0 }
 0x469   :  { %v2569_v18 = vpop.f32.mrb[206].mxu0  ;;  %v14141_v4 = vld [vmem:[#allocation2 + $0x500] ss:$8 sps:$4 sm:$0xff]  }
 0x46a   :  { %v3371_v25 = vpack.c.bf16 %v2569_v18, %v2566_v5  ;;  %v2571_v31 = vpop.f32.mrb[207].mxu0  ;;  %v14146_v18 = vld [vmem:[#allocation2 + $0x514] ss:$8 sps:$4 sm:$0xff]  }
 0x46c   :  { %2781 = vmatmul.mubr.bf16.gmra.mrb[56].mxu0 %v14135_v36  ;;  %13008 = vmatmul.mubr.msk.bf16.gmra.mrb[4].mxu1 %vm3397_vm1, %v3371_v25 }
 0x46d   :  { %2788 = vmatprep.mubr.bf16.mxu0 %v14140_v53 }
 0x46f   :  { %v2574_v50 = vpop.f32.mrb[208].mxu0 }
 0x470   :  { %v2576_v1 = vpop.f32.mrb[209].mxu0 }
 0x471   :  { %v2577_v11 = vpop.f32.mrb[210].mxu0  ;;  %v14144_v1 = vld [vmem:[#allocation2 + $0x510] ss:$8 sps:$4 sm:$0xff]  }
 0x472   :  { %v3372_v32 = vpack.c.bf16 %v2577_v11, %v2574_v50  ;;  %v2579_v12 = vpop.f32.mrb[211].mxu0  ;;  %v14149_v11 = vld [vmem:[#allocation2 + $0x524] ss:$8 sps:$4 sm:$0xff]  }
 0x474   :  { %2789 = vmatmul.mubr.bf16.gmra.mrb[60].mxu0 %v14138_v46  ;;  %13011 = vmatprep.mubr.msk.bf16.mxu1 %vm3397_vm1, %v3372_v32 }
 0x475   :  { %2796 = vmatprep.mubr.bf16.mxu0 %v14143_v60 }
 0x477   :  { %v2582_v0 = vpop.f32.mrb[212].mxu0 }
 0x478   :  { %v2584_v14 = vpop.f32.mrb[213].mxu0 }
 0x479   :  { %v2585_v5 = vpop.f32.mrb[214].mxu0  ;;  %v14147_v14 = vld [vmem:[#allocation2 + $0x520] ss:$8 sps:$4 sm:$0xff]  }
 0x47a   :  { %v3373_v36 = vpack.c.bf16 %v2585_v5, %v2582_v0  ;;  %v2587_v31 = vpop.f32.mrb[215].mxu0  ;;  %v14152_v5 = vld [vmem:[#allocation2 + $0x534] ss:$8 sps:$4 sm:$0xff]  }
 0x47c   :  { %2797 = vmatmul.mubr.bf16.gmra.mrb[64].mxu0 %v14141_v4  ;;  %13012 = vmatmul.mubr.msk.bf16.gmra.mrb[8].mxu1 %vm3397_vm1, %v3373_v36  ;;  %v16132_v36 = vld [vmem:[#allocation4 + $0x30] sm:$0xff]  }
 0x47d   :  { %2804 = vmatprep.mubr.bf16.mxu0 %v14146_v18  ;;  %13071 = vmatprep.subr.bf16.mxu1 %v16132_v36 }
 0x47f   :  { %v2590_v53 = vpop.f32.mrb[216].mxu0 }
 0x480   :  { %v2592_v25 = vpop.f32.mrb[217].mxu0 }
 0x481   :  { %v2593_v50 = vpop.f32.mrb[218].mxu0  ;;  %v14150_v25 = vld [vmem:[#allocation2 + $0x530] ss:$8 sps:$4 sm:$0xff]  }
 0x482   :  { %v3374_v46 = vpack.c.bf16 %v2593_v50, %v2590_v53  ;;  %v2595_v12 = vpop.f32.mrb[219].mxu0  ;;  %v14155_v50 = vld [vmem:[#allocation2 + $0x544] ss:$8 sps:$4 sm:$0xff]  }
 0x484   :  { %2805 = vmatmul.mubr.bf16.gmra.mrb[68].mxu0 %v14144_v1  ;;  %13015 = vmatprep.mubr.msk.bf16.mxu1 %vm3397_vm1, %v3374_v46 }
 0x485   :  { %2812 = vmatprep.mubr.bf16.mxu0 %v14149_v11 }
 0x487   :  { %v2598_v60 = vpop.f32.mrb[220].mxu0 }
 0x488   :  { %v2600_v32 = vpop.f32.mrb[221].mxu0 }
 0x489   :  { %v2601_v0 = vpop.f32.mrb[222].mxu0  ;;  %v14153_v32 = vld [vmem:[#allocation2 + $0x540] ss:$8 sps:$4 sm:$0xff]  }
 0x48a   :  { %v3375_v4 = vpack.c.bf16 %v2601_v0, %v2598_v60  ;;  %v2603_v31 = vpop.f32.mrb[223].mxu0  ;;  %v14158_v0 = vld [vmem:[#allocation2 + $0x554] ss:$8 sps:$4 sm:$0xff]  }
 0x48c   :  { %2813 = vmatmul.mubr.bf16.gmra.mrb[72].mxu0 %v14147_v14  ;;  %13016 = vmatmul.mubr.msk.bf16.gmra.mrb[12].mxu1 %vm3397_vm1, %v3375_v4 }
 0x48d   :  { %2820 = vmatprep.mubr.bf16.mxu0 %v14152_v5 }
 0x48f   :  { %v2606_v18 = vpop.f32.mrb[224].mxu0 }
 0x490   :  { %v2608_v53 = vpop.f32.mrb[225].mxu0 }
 0x491   :  { %v2609_v1 = vpop.f32.mrb[226].mxu0 }
 0x492   :  { %v3376_v11 = vpack.c.bf16 %v2609_v1, %v2606_v18  ;;  %v2611_v46 = vpop.f32.mrb[227].mxu0  ;;  %v14161_v1 = vld [vmem:[#allocation2 + $0x564] ss:$8 sps:$4 sm:$0xff]  }
 0x494   :  { %2821 = vmatmul.mubr.bf16.gmra.mrb[76].mxu0 %v14150_v25  ;;  %13019 = vmatprep.mubr.msk.bf16.mxu1 %vm3397_vm1, %v3376_v11 }
 0x495   :  { %2828 = vmatprep.mubr.bf16.mxu0 %v14155_v50 }
 0x497   :  { %v2614_v12 = vpop.f32.mrb[228].mxu0 }
 0x498   :  { %v2616_v60 = vpop.f32.mrb[229].mxu0 }
 0x499   :  { %v2617_v14 = vpop.f32.mrb[230].mxu0  ;;  %v14159_v60 = vld [vmem:[#allocation2 + $0x560] ss:$8 sps:$4 sm:$0xff]  }
 0x49a   :  { %v3377_v4 = vpack.c.bf16 %v2617_v14, %v2614_v12  ;;  %v2619_v5 = vpop.f32.mrb[231].mxu0  ;;  %v14164_v14 = vld [vmem:[#allocation2 + $0x574] ss:$8 sps:$4 sm:$0xff]  }
 0x49c   :  { %2829 = vmatmul.mubr.bf16.gmra.mrb[80].mxu0 %v14153_v32  ;;  %13020 = vmatmul.mubr.msk.bf16.gmra.mrb[16].mxu1 %vm3397_vm1, %v3377_v4 }
 0x49d   :  { %2836 = vmatprep.mubr.bf16.mxu0 %v14158_v0 }
 0x49f   :  { %v2622_v31 = vpop.f32.mrb[232].mxu0 }
 0x4a0   :  { %v2624_v53 = vpop.f32.mrb[233].mxu0 }
 0x4a1   :  { %v2625_v18 = vpop.f32.mrb[234].mxu0  ;;  %v14162_v53 = vld [vmem:[#allocation2 + $0x570] ss:$8 sps:$4 sm:$0xff]  }
 0x4a2   :  { %v3378_v25 = vpack.c.bf16 %v2625_v18, %v2622_v31  ;;  %v2627_v46 = vpop.f32.mrb[235].mxu0  ;;  %v14167_v18 = vld [vmem:[#allocation2 + $0x584] ss:$8 sps:$4 sm:$0xff]  }
 0x4a4   :  { %2837 = vmatmul.mubr.bf16.gmra.mrb[84].mxu0 %v14156_v39  ;;  %13023 = vmatprep.mubr.msk.bf16.mxu1 %vm3397_vm1, %v3378_v25 }
 0x4a5   :  { %2844 = vmatprep.mubr.bf16.mxu0 %v14161_v1 }
 0x4a7   :  { %v2630_v50 = vpop.f32.mrb[236].mxu0 }
 0x4a8   :  { %v2632_v11 = vpop.f32.mrb[237].mxu0 }
 0x4a9   :  { %v2633_v12 = vpop.f32.mrb[238].mxu0  ;;  %v14165_v11 = vld [vmem:[#allocation2 + $0x580] ss:$8 sps:$4 sm:$0xff]  }
 0x4aa   :  { %v3379_v32 = vpack.c.bf16 %v2633_v12, %v2630_v50  ;;  %v2635_v5 = vpop.f32.mrb[239].mxu0  ;;  %v14170_v12 = vld [vmem:[#allocation2 + $0x594] ss:$8 sps:$4 sm:$0xff]  }
 0x4ac   :  { %2845 = vmatmul.mubr.bf16.gmra.mrb[88].mxu0 %v14159_v60  ;;  %13024 = vmatmul.mubr.msk.bf16.gmra.mrb[20].mxu1 %vm3397_vm1, %v3379_v32 }
 0x4ad   :  { %2852 = vmatprep.mubr.bf16.mxu0 %v14164_v14 }
 0x4af   :  { %v2638_v0 = vpop.f32.mrb[240].mxu0 }
 0x4b0   :  { %v2640_v4 = vpop.f32.mrb[241].mxu0 }
 0x4b1   :  { %v2641_v31 = vpop.f32.mrb[242].mxu0  ;;  %v14168_v4 = vld [vmem:[#allocation2 + $0x590] ss:$8 sps:$4 sm:$0xff]  }
 0x4b2   :  { %v3380_v39 = vpack.c.bf16 %v2641_v31, %v2638_v0  ;;  %v2643_v46 = vpop.f32.mrb[243].mxu0  ;;  %v14173_v31 = vld [vmem:[#allocation2 + $0x5a4] ss:$8 sps:$4 sm:$0xff]  }
 0x4b4   :  { %2853 = vmatmul.mubr.bf16.gmra.mrb[92].mxu0 %v14162_v53  ;;  %13027 = vmatprep.mubr.msk.bf16.mxu1 %vm3397_vm1, %v3380_v39 }
 0x4b5   :  { %2860 = vmatprep.mubr.bf16.mxu0 %v14167_v18 }
 0x4b7   :  { %v2646_v1 = vpop.f32.mrb[244].mxu0 }
 0x4b8   :  { %v2648_v25 = vpop.f32.mrb[245].mxu0 }
 0x4b9   :  { %v2649_v50 = vpop.f32.mrb[246].mxu0  ;;  %v14171_v25 = vld [vmem:[#allocation2 + $0x5a0] ss:$8 sps:$4 sm:$0xff]  }
 0x4ba   :  { %v3381_v60 = vpack.c.bf16 %v2649_v50, %v2646_v1  ;;  %v2651_v5 = vpop.f32.mrb[247].mxu0  ;;  %v14178_v50 = vld [vmem:[#allocation2 + $0x5b4] ss:$8 sps:$4 sm:$0xff]  }
 0x4bc   :  { %2861 = vmatmul.mubr.bf16.gmra.mrb[96].mxu0 %v14165_v11  ;;  %13028 = vmatmul.mubr.msk.bf16.gmra.mrb[24].mxu1 %vm3397_vm1, %v3381_v60 }
 0x4bd   :  { %2868 = vmatprep.mubr.bf16.mxu0 %v14170_v12  ;;  %v18020_v12 = vpack.c.bf16 %v15835_v44, %v15833_v41  ;;  %v18022_v41 = vpack.c.bf16 %v15847_v58, %v15845_v55 }
 0x4bf   :  { %v2654_v14 = vpop.f32.mrb[248].mxu0 }
 0x4c0   :  { %v2656_v32 = vpop.f32.mrb[249].mxu0 }
 0x4c1   :  { %v2657_v0 = vpop.f32.mrb[250].mxu0  ;;  %v14176_v32 = vld [vmem:[#allocation2 + $0x5b0] ss:$8 sps:$4 sm:$0xff]  }
 0x4c2   :  { %v3382_v53 = vpack.c.bf16 %v2657_v0, %v2654_v14  ;;  %v2659_v46 = vpop.f32.mrb[251].mxu0  ;;  %v14181_v0 = vld [vmem:[#allocation2 + $0x5c4] ss:$8 sps:$4 sm:$0xff]  }
 0x4c3   :  { %v14201_v46 = vld [vmem:[#allocation4 + $0x38] ss:$0 sps:$4 sm:$0xff]  }
 0x4c4   :  { %2869 = vmatmul.mubr.bf16.gmra.mrb[100].mxu0 %v14168_v4  ;;  %13031 = vmatprep.mubr.msk.bf16.mxu1 %vm3397_vm1, %v3382_v53 }
 0x4c5   :  { %2876 = vmatprep.mubr.bf16.mxu0 %v14173_v31 }
 0x4c7   :  { %v2662_v18 = vpop.f32.mrb[252].mxu0 }
 0x4c8   :  { %v2664_v39 = vpop.f32.mrb[253].mxu0 }
 0x4c9   :  { %v2665_v1 = vpop.f32.mrb[254].mxu0  ;;  %v3910_v39 = vsel %vm3446_vm0, %v14201_v46, 0 }
 0x4ca   :  { %v3383_v11 = vpack.c.bf16 %v2665_v1, %v2662_v18  ;;  %v2667_v5 = vpop.f32.mrb[255].mxu0  ;;  %v18021_v18 = vpack.c.bf16 %v15841_v51, %v15839_v48  ;;  %v14179_v48 = vld [vmem:[#allocation2 + $0x5c0] ss:$8 sps:$4 sm:$0xff]  }
 0x4cc   :  { %2877 = vmatmul.mubr.bf16.gmra.mrb[104].mxu0 %v14171_v25  ;;  %13032 = vmatmul.mubr.msk.bf16.gmra.mrb[28].mxu1 %vm3397_vm1, %v3383_v11  ;;  %v16167_v25 = vld [vmem:[#allocation4 + $0xc] sm:$0xff]   ;;  %v18024_v11 = vpack.c.bf16 %v15859_v9, %v15857_v6 }
 0x4cd   :  { %13039 = vmatprep.mubr.msk.bf16.mxu1 %vm3397_vm1, %v18020_v12  ;;  %2884 = vmatprep.mubr.bf16.mxu0 %v14178_v50  ;;  %v14184_v50 = vld [vmem:[#allocation2 + $0x5d4] ss:$8 sps:$4 sm:$0xff]  }
 0x4cf   :  { %v16148_v60 = vpop.f32.mrb[0].mxu0 }
 0x4d0   :  { %v2672_v14 = vpop.f32.mrb[1].mxu0 }
 0x4d1   :  { %v16150_v4 = vpop.f32.mrb[2].mxu0  ;;  %v14182_v14 = vld [vmem:[#allocation2 + $0x5d0] ss:$8 sps:$4 sm:$0xff]  }
 0x4d2   :  { %v3832_v31 = vpack.c.bf16 %v16150_v4, %v16148_v60  ;;  %v2675_v53 = vpop.f32.mrb[3].mxu0  ;;  %v16265_v60 = vld [vmem:[#allocation4 + $0x3c] sm:$0xff]  }
 0x4d4   :  { %2885 = vmatmul.mubr.bf16.gmra.mrb[108].mxu0 %v14176_v32  ;;  %13040 = vmatmul.mubr.msk.bf16.vlgmr.msra.gmra.mrb[0].mxu1 %vm3397_vm1, %v18021_v18  ;;  %v14185_v18 = vld [vmem:[#allocation2 + $0x5e0] ss:$8 sps:$4 sm:$0xff]  }
 0x4d5   :  { %13043 = vmatprep.mubr.msk.bf16.mxu1 %vm3397_vm1, %v18022_v41  ;;  %2892 = vmatprep.mubr.bf16.mxu0 %v14181_v0  ;;  %v14187_v0 = vld [vmem:[#allocation2 + $0x5e4] ss:$8 sps:$4 sm:$0xff]  }
 0x4d6   :  { %13072 = vmatpush3.bf16.msra.mxu1 %v16132_v36  ;;  %v18023_v36 = vpack.c.bf16 %v15853_v2, %v15851_v62  ;;  %v18025_v62 = vpack.c.bf16 %v15865_v16, %v15863_v13  ;;  %v18026_v2 = vpack.c.bf16 %v15871_v23, %v15869_v20  ;;  %v18027_v13 = vpack.c.bf16 %v15877_v30, %v15875_v27 }
 0x4d7   :  { %v16163_v44 = vpop.f32.mrb[4].mxu0  ;;  %13859 = vmatprep.subr.msk.bf16.mxu1 %vm3446_vm0, %v14201_v46  ;;  %v18028_v16 = vpack.c.bf16 %v15883_v37, %v15881_v34  ;;  %v18029_v27 = vpack.c.bf16 %v15889_v47, %v15887_v42  ;;  %v18030_v30 = vpack.c.bf16 %v15895_v59, %v15893_v54  ;;  %v18031_v42 = vpack.c.bf16 %v15901_v8, %v15899_v3 }
 0x4d8   :  { %v2680_v1 = vpop.f32.mrb[5].mxu0  ;;  %v18032_v47 = vpack.c.bf16 %v15907_v21, %v15905_v15  ;;  %v18034_v3 = vpack.c.bf16 %v15919_v49, %v15917_v40  ;;  %v14197_v21 = vld [vmem:[#allocation2 + $0x620] ss:$8 sps:$4 sm:$0xff]   ;;  %v14202_v40 = vld [vmem:[#allocation2 + $0x630] ss:$8 sps:$4 sm:$0xff]  }
 0x4d9   :  { %v16169_v51 = vpop.f32.mrb[6].mxu0 }
 0x4da   :  { %v3833_v55 = vpack.c.bf16 %v16169_v51, %v16163_v44  ;;  %v2683_v58 = vpop.f32.mrb[7].mxu0  ;;  %13074 = vmatpush3.bf16.msra.mxu1 %v3910_v39  ;;  %v14190_v39 = vld [vmem:[#allocation2 + $0x5f4] ss:$8 sps:$4 sm:$0xff]  }
 0x4db   :  { %13107 = vmatprep.subr.bf16.mxu1 %v16167_v25  ;;  %v14210_v51 = vld [vmem:[#allocation2 + $0x654] ss:$8 sps:$4 sm:$0xff]  }
 0x4dc   :  { %2893 = vmatmul.mubr.bf16.gmra.mrb[112].mxu0 %v14179_v48  ;;  %13044 = vmatmul.mubr.msk.bf16.gmra.mrb[4].mxu1 %vm3397_vm1, %v18023_v36  ;;  %v14193_v36 = vld [vmem:[#allocation2 + $0x604] ss:$8 sps:$4 sm:$0xff]  }
 0x4dd   :  { %13047 = vmatprep.mubr.msk.bf16.mxu1 %vm3397_vm1, %v18024_v11  ;;  %2900 = vmatprep.mubr.bf16.mxu0 %v14184_v50  ;;  %v14188_v50 = vld [vmem:[#allocation2 + $0x5f0] ss:$8 sps:$4 sm:$0xff]  }
 0x4df   :  { %v16182_v5 = vpop.f32.mrb[8].mxu0 }
 0x4e0   :  { %v2688_v12 = vpop.f32.mrb[9].mxu0 }
 0x4e1   :  { %v16184_v32 = vpop.f32.mrb[10].mxu0 }
 0x4e2   :  { %v3834_v53 = vpack.c.bf16 %v16184_v32, %v16182_v5  ;;  %v2691_v46 = vpop.f32.mrb[11].mxu0  ;;  %v14208_v32 = vld [vmem:[#allocation2 + $0x650] ss:$8 sps:$4 sm:$0xff]  }
 0x4e3   :  { %v14196_v46 = vld [vmem:[#allocation2 + $0x614] ss:$8 sps:$4 sm:$0xff]  }
 0x4e4   :  { %2901 = vmatmul.mubr.bf16.gmra.mrb[116].mxu0 %v14182_v14  ;;  %13048 = vmatmul.mubr.msk.bf16.gmra.mrb[8].mxu1 %vm3397_vm1, %v18025_v62  ;;  %v14191_v14 = vld [vmem:[#allocation2 + $0x600] ss:$8 sps:$4 sm:$0xff]  }
 0x4e5   :  { %13051 = vmatprep.mubr.msk.bf16.mxu1 %vm3397_vm1, %v18026_v2  ;;  %2908 = vmatprep.mubr.bf16.mxu0 %v14187_v0 }
 0x4e7   :  { %v16196_v6 = vpop.f32.mrb[12].mxu0 }
 0x4e8   :  { %v2696_v9 = vpop.f32.mrb[13].mxu0 }
 0x4e9   :  { %v16198_v41 = vpop.f32.mrb[14].mxu0  ;;  %v14194_v9 = vld [vmem:[#allocation2 + $0x610] ss:$8 sps:$4 sm:$0xff]  }
 0x4ea   :  { %v3835_v1 = vpack.c.bf16 %v16198_v41, %v16196_v6  ;;  %v2699_v48 = vpop.f32.mrb[15].mxu0 }
 0x4ec   :  { %2909 = vmatmul.mubr.bf16.gmra.mrb[120].mxu0 %v14185_v18  ;;  %13052 = vmatmul.mubr.msk.bf16.gmra.mrb[12].mxu1 %vm3397_vm1, %v18027_v13 }
 0x4ed   :  { %13055 = vmatprep.mubr.msk.bf16.mxu1 %vm3397_vm1, %v18028_v16  ;;  %2916 = vmatprep.mubr.bf16.mxu0 %v14190_v39  ;;  %v14199_v39 = vld [vmem:[#allocation2 + $0x624] ss:$8 sps:$4 sm:$0xff]   ;;  %v18033_v16 = vpack.c.bf16 %v15913_v33, %v15911_v28 }
 0x4ef   :  { %v16210_v20 = vpop.f32.mrb[16].mxu0 }
 0x4f0   :  { %v2704_v23 = vpop.f32.mrb[17].mxu0 }
 0x4f1   :  { %v16212_v58 = vpop.f32.mrb[18].mxu0 }
 0x4f2   :  { %v3836_v11 = vpack.c.bf16 %v16212_v58, %v16210_v20  ;;  %v2707_v12 = vpop.f32.mrb[19].mxu0  ;;  %v14216_v58 = vld [vmem:[#allocation2 + $0x674] ss:$8 sps:$4 sm:$0xff]  }
 0x4f4   :  { %2917 = vmatmul.mubr.bf16.gmra.mrb[124].mxu0 %v14188_v50  ;;  %13056 = vmatmul.mubr.msk.bf16.gmra.mrb[16].mxu1 %vm3397_vm1, %v18029_v27  ;;  %v14204_v50 = vld [vmem:[#allocation2 + $0x634] ss:$8 sps:$4 sm:$0xff]   ;;  %v18035_v27 = vpack.c.bf16 %v15925_v7, %v15923_v61 }
 0x4f5   :  { %13059 = vmatprep.mubr.msk.bf16.mxu1 %vm3397_vm1, %v18030_v30  ;;  %2924 = vmatprep.mubr.bf16.mxu0 %v14193_v36  ;;  %v14207_v30 = vld [vmem:[#allocation2 + $0x644] ss:$8 sps:$4 sm:$0xff]  }
 0x4f7   :  { %v16224_v34 = vpop.f32.mrb[20].mxu0 }
 0x4f8   :  { %v2712_v37 = vpop.f32.mrb[21].mxu0 }
 0x4f9   :  { %v16226_v0 = vpop.f32.mrb[22].mxu0 }
 0x4fa   :  { %v3837_v62 = vpack.c.bf16 %v16226_v0, %v16224_v34  ;;  %v2715_v2 = vpop.f32.mrb[23].mxu0  ;;  %v14214_v0 = vld [vmem:[#allocation2 + $0x670] ss:$8 sps:$4 sm:$0xff]  }
 0x4fc   :  { %2925 = vmatmul.mubr.bf16.gmra.mrb[128].mxu0 %v14191_v14  ;;  %13060 = vmatmul.mubr.msk.bf16.gmra.mrb[20].mxu1 %vm3397_vm1, %v18031_v42  ;;  %v14213_v42 = vld [vmem:[#allocation2 + $0x664] ss:$8 sps:$4 sm:$0xff]  }
 0x4fd   :  { %13063 = vmatprep.mubr.msk.bf16.mxu1 %vm3397_vm1, %v18032_v47  ;;  %2932 = vmatprep.mubr.bf16.mxu0 %v14196_v46  ;;  %v14227_v46 = vld [vmem:[#allocation4 + $0x14] ss:$0 sps:$4 sm:$0xff]  }
 0x4fe   :  { %v4131_v7 = vsel %vm3446_vm0, %v14227_v46, 0 }
 0x4ff   :  { %v2718_v54 = vpop.f32.mrb[24].mxu0 }
 0x500   :  { %v2720_v59 = vpop.f32.mrb[25].mxu0 }
 0x501   :  { %v2721_v18 = vpop.f32.mrb[26].mxu0 }
 0x502   :  { %v3838_v48 = vpack.c.bf16 %v2721_v18, %v2718_v54  ;;  %v2723_v13 = vpop.f32.mrb[27].mxu0  ;;  %v14219_v18 = vld [vmem:[#allocation2 + $0x684] ss:$8 sps:$4 sm:$0xff]  }
 0x504   :  { %2933 = vmatmul.mubr.bf16.gmra.mrb[132].mxu0 %v14194_v9  ;;  %13064 = vmatmul.mubr.msk.bf16.gmra.mrb[24].mxu1 %vm3397_vm1, %v18033_v16 }
 0x505   :  { %13067 = vmatprep.mubr.msk.bf16.mxu1 %vm3397_vm1, %v18034_v3  ;;  %2940 = vmatprep.mubr.bf16.mxu0 %v14199_v39  ;;  %v14217_v3 = vld [vmem:[#allocation2 + $0x680] ss:$8 sps:$4 sm:$0xff]  }
 0x507   :  { %v2726_v8 = vpop.f32.mrb[28].mxu0 }
 0x508   :  { %v2728_v15 = vpop.f32.mrb[29].mxu0 }
 0x509   :  { %v2729_v23 = vpop.f32.mrb[30].mxu0  ;;  %v14222_v15 = vld [vmem:[#allocation2 + $0x694] ss:$8 sps:$4 sm:$0xff]  }
 0x50a   :  { %v3839_v36 = vpack.c.bf16 %v2729_v23, %v2726_v8  ;;  %v2731_v12 = vpop.f32.mrb[31].mxu0 }
 0x50b   :  { %v14220_v12 = vld [vmem:[#allocation2 + $0x690] ss:$8 sps:$4 sm:$0xff]  }
 0x50c   :  { %2941 = vmatmul.mubr.bf16.gmra.mrb[136].mxu0 %v14197_v21  ;;  %13068 = vmatmul.mubr.msk.bf16.gmra.mrb[28].mxu1 %vm3397_vm1, %v18035_v27 }
 0x50d   :  { %13075 = vmatprep.mubr.msk.bf16.mxu1 %vm3397_vm1, %v3832_v31  ;;  %2948 = vmatprep.mubr.bf16.mxu0 %v14204_v50  ;;  %v14205_v31 = vld [vmem:[#allocation2 + $0x640] ss:$8 sps:$4 sm:$0xff]  }
 0x50f   :  { %v2734_v28 = vpop.f32.mrb[32].mxu0 }
 0x510   :  { %v2736_v33 = vpop.f32.mrb[33].mxu0 }
 0x511   :  { %v2737_v49 = vpop.f32.mrb[34].mxu0 }
 0x512   :  { %v3840_v37 = vpack.c.bf16 %v2737_v49, %v2734_v28  ;;  %v2739_v14 = vpop.f32.mrb[35].mxu0  ;;  %v14225_v28 = vld [vmem:[#allocation2 + $0x6a4] ss:$8 sps:$4 sm:$0xff]  }
 0x514   :  { %2949 = vmatmul.mubr.bf16.gmra.mrb[140].mxu0 %v14202_v40  ;;  %13076 = vmatmul.mubr.msk.bf16.vlgmr.msra.gmra.mrb[0].mxu1 %vm3397_vm1, %v3833_v55 }
 0x515   :  { %13079 = vmatprep.mubr.msk.bf16.mxu1 %vm3397_vm1, %v3834_v53  ;;  %2956 = vmatprep.mubr.bf16.mxu0 %v14207_v30 }
 0x516   :  { %13108 = vmatpush3.bf16.msra.mxu1 %v16167_v25 }
 0x517   :  { %v2742_v61 = vpop.f32.mrb[36].mxu0  ;;  %13860 = vmatprep.subr.msk.bf16.mxu1 %vm3446_vm0, %v14227_v46  ;;  %v14230_v46 = vld [vmem:[#allocation2 + $0x6b4] ss:$8 sps:$4 sm:$0xff]  }
 0x518   :  { %v2744_v4 = vpop.f32.mrb[37].mxu0 }
 0x519   :  { %v2745_v44 = vpop.f32.mrb[38].mxu0  ;;  %v18036_v4 = vpack.c.bf16 %v15931_v29, %v15929_v19  ;;  %v18038_v19 = vpack.c.bf16 %v15943_v38, %v15941_v17 }
 0x51a   :  { %v3841_v55 = vpack.c.bf16 %v2745_v44, %v2742_v61  ;;  %v2747_v2 = vpop.f32.mrb[39].mxu0  ;;  %13110 = vmatpush3.bf16.msra.mxu1 %v4131_v7 }
 0x51b   :  { %13143 = vmatprep.subr.bf16.mxu1 %v16265_v60  ;;  %v14233_v2 = vld [vmem:[#allocation2 + $0x6c4] ss:$8 sps:$4 sm:$0xff]  }
 0x51c   :  { %2957 = vmatmul.mubr.bf16.gmra.mrb[144].mxu0 %v14205_v31  ;;  %13080 = vmatmul.mubr.msk.bf16.gmra.mrb[4].mxu1 %vm3397_vm1, %v3835_v1  ;;  %v14211_v1 = vld [vmem:[#allocation2 + $0x660] ss:$8 sps:$4 sm:$0xff]  }
 0x51d   :  { %13083 = vmatprep.mubr.msk.bf16.mxu1 %vm3397_vm1, %v3836_v11  ;;  %2964 = vmatprep.mubr.bf16.mxu0 %v14210_v51  ;;  %v14228_v51 = vld [vmem:[#allocation2 + $0x6b0] ss:$8 sps:$4 sm:$0xff]  }
 0x51f   :  { %v2750_v25 = vpop.f32.mrb[40].mxu0 }
 0x520   :  { %v2752_v5 = vpop.f32.mrb[41].mxu0 }
 0x521   :  { %v2753_v53 = vpop.f32.mrb[42].mxu0 }
 0x522   :  { %v3842_v47 = vpack.c.bf16 %v2753_v53, %v2750_v25  ;;  %v2755_v54 = vpop.f32.mrb[43].mxu0  ;;  %v18037_v53 = vpack.c.bf16 %v15937_v57, %v15935_v43  ;;  %v14231_v43 = vld [vmem:[#allocation2 + $0x6c0] ss:$8 sps:$4 sm:$0xff]  }
 0x524   :  { %2965 = vmatmul.mubr.bf16.gmra.mrb[148].mxu0 %v14208_v32  ;;  %13084 = vmatmul.mubr.msk.bf16.gmra.mrb[8].mxu1 %vm3397_vm1, %v3837_v62  ;;  %v14253_v32 = vld [vmem:[#allocation4 + $0x44] ss:$0 sps:$4 sm:$0xff]  }
 0x525   :  { %13087 = vmatprep.mubr.msk.bf16.mxu1 %vm3397_vm1, %v3838_v48  ;;  %2972 = vmatprep.mubr.bf16.mxu0 %v14213_v42  ;;  %v4372_v42 = vsel %vm3446_vm0, %v14253_v32, 0 }
 0x527   :  { %v2758_v6 = vpop.f32.mrb[44].mxu0 }
 0x528   :  { %v2760_v41 = vpop.f32.mrb[45].mxu0 }
 0x529   :  { %v2761_v20 = vpop.f32.mrb[46].mxu0  ;;  %v18040_v41 = vpack.c.bf16 %v15955_v45, %v15953_v56  ;;  %v18042_v56 = vpack.c.bf16 %v15967_v26, %v15965_v63  ;;  %v18045_v63 = vld [vmem:[#allocation47_spill] sm:$0xff]  ;;  %v18046_v26 = vld [vmem:[#allocation46_spill] sm:$0xff] }
 0x52a   :  { %v3843_v11 = vpack.c.bf16 %v2761_v20, %v2758_v6  ;;  %v2763_v59 = vpop.f32.mrb[47].mxu0  ;;  %v14236_v6 = vld [vmem:[#allocation2 + $0x6d4] ss:$8 sps:$4 sm:$0xff]  }
 0x52b   :  { %v14239_v59 = vld [vmem:[#allocation2 + $0x6e4] ss:$8 sps:$4 sm:$0xff]  }
 0x52c   :  { %2973 = vmatmul.mubr.bf16.gmra.mrb[152].mxu0 %v14211_v1  ;;  %13088 = vmatmul.mubr.msk.bf16.gmra.mrb[12].mxu1 %vm3397_vm1, %v3839_v36 }
 0x52d   :  { %13091 = vmatprep.mubr.msk.bf16.mxu1 %vm3397_vm1, %v3840_v37  ;;  %2980 = vmatprep.mubr.bf16.mxu0 %v14216_v58  ;;  %v14223_v37 = vld [vmem:[#allocation2 + $0x6a0] ss:$8 sps:$4 sm:$0xff]   ;;  %v14234_v58 = vld [vmem:[#allocation2 + $0x6d0] ss:$8 sps:$4 sm:$0xff]  }
 0x52f   :  { %v2766_v9 = vpop.f32.mrb[48].mxu0 }
 0x530   :  { %v2768_v34 = vpop.f32.mrb[49].mxu0 }
 0x531   :  { %v2769_v62 = vpop.f32.mrb[50].mxu0 }
 0x532   :  { %v3844_v39 = vpack.c.bf16 %v2769_v62, %v2766_v9  ;;  %v2771_v48 = vpop.f32.mrb[51].mxu0 }
 0x534   :  { %2981 = vmatmul.mubr.bf16.gmra.mrb[156].mxu0 %v14214_v0  ;;  %13092 = vmatmul.mubr.msk.bf16.gmra.mrb[16].mxu1 %vm3397_vm1, %v3841_v55  ;;  %v14237_v0 = vld [vmem:[#allocation2 + $0x6e0] ss:$8 sps:$4 sm:$0xff]  }
 0x535   :  { %13095 = vmatprep.mubr.msk.bf16.mxu1 %vm3397_vm1, %v3842_v47  ;;  %2988 = vmatprep.mubr.bf16.mxu0 %v14219_v18  ;;  %v16313_v47 = vld [vmem:[#allocation4 + $0x18] sm:$0xff]  }
 0x536   :  { %v14242_v18 = vld [vmem:[#allocation2 + $0x6f4] ss:$8 sps:$4 sm:$0xff]  }
 0x537   :  { %v2774_v13 = vpop.f32.mrb[52].mxu0 }
 0x538   :  { %v2776_v16 = vpop.f32.mrb[53].mxu0 }
 0x539   :  { %v2777_v8 = vpop.f32.mrb[54].mxu0 }
 0x53a   :  { %v3845_v21 = vpack.c.bf16 %v2777_v8, %v2774_v13  ;;  %v2779_v23 = vpop.f32.mrb[55].mxu0  ;;  %v18047_v13 = vpack.c.bf16 %v18045_v63, %v18046_v26  ;;  %v14240_v8 = vld [vmem:[#allocation2 + $0x6f0] ss:$8 sps:$4 sm:$0xff]  }
 0x53c   :  { %2989 = vmatmul.mubr.bf16.gmra.mrb[160].mxu0 %v14217_v3  ;;  %13096 = vmatmul.mubr.msk.bf16.gmra.mrb[20].mxu1 %vm3397_vm1, %v3843_v11 }
 0x53d   :  { %13099 = vmatprep.mubr.msk.bf16.mxu1 %vm3397_vm1, %v3844_v39  ;;  %2996 = vmatprep.mubr.bf16.mxu0 %v14222_v15 }
 0x53f   :  { %v2782_v50 = vpop.f32.mrb[56].mxu0 }
 0x540   :  { %v2784_v36 = vpop.f32.mrb[57].mxu0 }
 0x541   :  { %v2785_v27 = vpop.f32.mrb[58].mxu0  ;;  %v18049_v36 = vld [vmem:[#allocation48_spill] sm:$0xff] }
 0x542   :  { %v3846_v33 = vpack.c.bf16 %v2785_v27, %v2782_v50  ;;  %v2787_v40 = vpop.f32.mrb[59].mxu0  ;;  %v18051_v27 = vld [vmem:[#allocation51_spill] sm:$0xff] }
 0x544   :  { %2997 = vmatmul.mubr.bf16.gmra.mrb[164].mxu0 %v14220_v12  ;;  %13100 = vmatmul.mubr.msk.bf16.gmra.mrb[24].mxu1 %vm3397_vm1, %v3845_v21  ;;  %v14245_v21 = vld [vmem:[#allocation2 + $0x704] ss:$8 sps:$4 sm:$0xff]  }
 0x545   :  { %13103 = vmatprep.mubr.msk.bf16.mxu1 %vm3397_vm1, %v3846_v33  ;;  %3004 = vmatprep.mubr.bf16.mxu0 %v14225_v28  ;;  %v18052_v28 = vld [vmem:[#allocation50_spill] sm:$0xff] }
 0x546   :  { %v18053_v33 = vpack.c.bf16 %v18051_v27, %v18052_v28  ;;  %v14257_v27 = vld [vmem:[#allocation2 + $0x740] ss:$8 sps:$4 sm:$0xff]  }
 0x547   :  { %v2790_v49 = vpop.f32.mrb[60].mxu0 }
 0x548   :  { %v2792_v30 = vpop.f32.mrb[61].mxu0 }
 0x549   :  { %v2793_v14 = vpop.f32.mrb[62].mxu0  ;;  %v14243_v30 = vld [vmem:[#allocation2 + $0x700] ss:$8 sps:$4 sm:$0xff]  }
 0x54a   :  { %v3847_v61 = vpack.c.bf16 %v2793_v14, %v2790_v49  ;;  %v2795_v7 = vpop.f32.mrb[63].mxu0  ;;  %v14248_v14 = vld [vmem:[#allocation2 + $0x714] ss:$8 sps:$4 sm:$0xff]  }
 0x54b   :  { %v18054_v7 = vld [vmem:[#allocation53_spill] sm:$0xff] }
 0x54c   :  { %3005 = vmatmul.mubr.bf16.gmra.mrb[168].mxu0 %v14223_v37  ;;  %13104 = vmatmul.mubr.msk.bf16.gmra.mrb[28].mxu1 %vm3397_vm1, %v3847_v61 }
 0x54d   :  { %13111 = vmatprep.mubr.msk.bf16.mxu1 %vm3397_vm1, %v18036_v4  ;;  %3012 = vmatprep.mubr.bf16.mxu0 %v14230_v46  ;;  %v18055_v4 = vld [vmem:[#allocation52_spill] sm:$0xff] }
 0x54f   :  { %v16294_v31 = vpop.f32.mrb[64].mxu0 }
 0x550   :  { %v2800_v44 = vpop.f32.mrb[65].mxu0 }
 0x551   :  { %v16296_v55 = vpop.f32.mrb[66].mxu0  ;;  %v18056_v44 = vpack.c.bf16 %v18054_v7, %v18055_v4  ;;  %v14271_v7 = vld [vmem:[#allocation2 + $0x784] ss:$8 sps:$4 sm:$0xff]  }
 0x552   :  { %v4294_v25 = vpack.c.bf16 %v16296_v55, %v16294_v31  ;;  %v2803_v5 = vpop.f32.mrb[67].mxu0 }
 0x554   :  { %3013 = vmatmul.mubr.bf16.gmra.mrb[172].mxu0 %v14228_v51  ;;  %13112 = vmatmul.mubr.msk.bf16.vlgmr.msra.gmra.mrb[0].mxu1 %vm3397_vm1, %v18037_v53  ;;  %v18057_v51 = vld [vmem:[#allocation55_spill] sm:$0xff] }
 0x555   :  { %13115 = vmatprep.mubr.msk.bf16.mxu1 %vm3397_vm1, %v18038_v19  ;;  %3020 = vmatprep.mubr.bf16.mxu0 %v14233_v2  ;;  %v18058_v2 = vld [vmem:[#allocation54_spill] sm:$0xff] }
 0x556   :  { %13144 = vmatpush3.bf16.msra.mxu1 %v16265_v60  ;;  %v18039_v60 = vpack.c.bf16 %v15949_v10, %v15947_v35  ;;  %v18041_v35 = vpack.c.bf16 %v15961_v22, %v15959_v24  ;;  %v18043_v24 = vld [vmem:[#allocation45_spill] sm:$0xff]  ;;  %v18059_v5 = vpack.c.bf16 %v18057_v51, %v18058_v2 }
 0x557   :  { %v16309_v29 = vpop.f32.mrb[68].mxu0  ;;  %13861 = vmatprep.subr.msk.bf16.mxu1 %vm3446_vm0, %v14253_v32  ;;  %v18044_v22 = vpack.c.bf16 %v15973_v52, %v18043_v24  ;;  %v18048_v52 = vld [vmem:[#allocation49_spill] sm:$0xff] }
 0x558   :  { %v2808_v54 = vpop.f32.mrb[69].mxu0  ;;  %v18050_v12 = vpack.c.bf16 %v18048_v52, %v18049_v36  ;;  %v14246_v19 = vld [vmem:[#allocation2 + $0x710] ss:$8 sps:$4 sm:$0xff]   ;;  %v14279_v36 = vld [vmem:[#allocation4 + $0x20] ss:$0 sps:$4 sm:$0xff]  }
 0x559   :  { %v16315_v57 = vpop.f32.mrb[70].mxu0  ;;  %v14251_v54 = vld [vmem:[#allocation2 + $0x724] ss:$8 sps:$4 sm:$0xff]   ;;  %v4593_v55 = vsel %vm3446_vm0, %v14279_v36, 0 }
 0x55a   :  { %v4295_v17 = vpack.c.bf16 %v16315_v57, %v16309_v29  ;;  %v2811_v38 = vpop.f32.mrb[71].mxu0  ;;  %13146 = vmatpush3.bf16.msra.mxu1 %v4372_v42  ;;  %v18066_v24 = vld [vmem:[#allocation61_spill] sm:$0xff]  ;;  %v14262_v57 = vld [vmem:[#allocation2 + $0x754] ss:$8 sps:$4 sm:$0xff]  }
 0x55b   :  { %13179 = vmatprep.subr.bf16.mxu1 %v16313_v47  ;;  %v18060_v38 = vld [vmem:[#allocation57_spill] sm:$0xff] }
 0x55c   :  { %3021 = vmatmul.mubr.bf16.gmra.mrb[176].mxu0 %v14231_v43  ;;  %13116 = vmatmul.mubr.msk.bf16.gmra.mrb[4].mxu1 %vm3397_vm1, %v18039_v60  ;;  %v18061_v60 = vld [vmem:[#allocation56_spill] sm:$0xff] }
 0x55d   :  { %13119 = vmatprep.mubr.msk.bf16.mxu1 %vm3397_vm1, %v18040_v41  ;;  %3028 = vmatprep.mubr.bf16.mxu0 %v14236_v6  ;;  %v18062_v41 = vpack.c.bf16 %v18060_v38, %v18061_v60  ;;  %v14277_v60 = vld [vmem:[#allocation2 + $0x7a4] ss:$8 sps:$4 sm:$0xff]  }
 0x55f   :  { %v16328_v1 = vpop.f32.mrb[72].mxu0 }
 0x560   :  { %v2816_v20 = vpop.f32.mrb[73].mxu0 }
 0x561   :  { %v16330_v11 = vpop.f32.mrb[74].mxu0  ;;  %v18063_v20 = vld [vmem:[#allocation59_spill] sm:$0xff] }
 0x562   :  { %v4296_v9 = vpack.c.bf16 %v16330_v11, %v16328_v1  ;;  %v2819_v34 = vpop.f32.mrb[75].mxu0  ;;  %v14260_v11 = vld [vmem:[#allocation2 + $0x750] ss:$8 sps:$4 sm:$0xff]  }
 0x564   :  { %3029 = vmatmul.mubr.bf16.gmra.mrb[180].mxu0 %v14234_v58  ;;  %13120 = vmatmul.mubr.msk.bf16.gmra.mrb[8].mxu1 %vm3397_vm1, %v18041_v35  ;;  %v18064_v58 = vld [vmem:[#allocation58_spill] sm:$0xff] }
 0x565   :  { %13123 = vmatprep.mubr.msk.bf16.mxu1 %vm3397_vm1, %v18042_v56  ;;  %3036 = vmatprep.mubr.bf16.mxu0 %v14239_v59  ;;  %v18065_v59 = vpack.c.bf16 %v18063_v20, %v18064_v58  ;;  %v14249_v56 = vld [vmem:[#allocation2 + $0x720] ss:$8 sps:$4 sm:$0xff]  }
 0x567   :  { %v16342_v10 = vpop.f32.mrb[76].mxu0 }
 0x568   :  { %v2824_v45 = vpop.f32.mrb[77].mxu0 }
 0x569   :  { %v16344_v62 = vpop.f32.mrb[78].mxu0 }
 0x56a   :  { %v4297_v39 = vpack.c.bf16 %v16344_v62, %v16342_v10  ;;  %v2827_v48 = vpop.f32.mrb[79].mxu0 }
 0x56c   :  { %3037 = vmatmul.mubr.bf16.gmra.mrb[184].mxu0 %v14237_v0  ;;  %13124 = vmatmul.mubr.msk.bf16.gmra.mrb[12].mxu1 %vm3397_vm1, %v18044_v22  ;;  %v14256_v0 = vld [vmem:[#allocation2 + $0x734] ss:$8 sps:$4 sm:$0xff]   ;;  %v18067_v22 = vld [vmem:[#allocation60_spill] sm:$0xff] }
 0x56d   :  { %13127 = vmatprep.mubr.msk.bf16.mxu1 %vm3397_vm1, %v18047_v13  ;;  %3044 = vmatprep.mubr.bf16.mxu0 %v14242_v18  ;;  %v18068_v63 = vpack.c.bf16 %v18066_v24, %v18067_v22 }
 0x56f   :  { %v16356_v16 = vpop.f32.mrb[80].mxu0 }
 0x570   :  { %v2832_v3 = vpop.f32.mrb[81].mxu0 }
 0x571   :  { %v16358_v15 = vpop.f32.mrb[82].mxu0  ;;  %v14254_v3 = vld [vmem:[#allocation2 + $0x730] ss:$8 sps:$4 sm:$0xff]  }
 0x572   :  { %v4298_v23 = vpack.c.bf16 %v16358_v15, %v16356_v16  ;;  %v2835_v50 = vpop.f32.mrb[83].mxu0  ;;  %v14268_v15 = vld [vmem:[#allocation2 + $0x774] ss:$8 sps:$4 sm:$0xff]  }
 0x574   :  { %3045 = vmatmul.mubr.bf16.gmra.mrb[188].mxu0 %v14240_v8  ;;  %13128 = vmatmul.mubr.msk.bf16.gmra.mrb[16].mxu1 %vm3397_vm1, %v18050_v12 }
 0x575   :  { %13131 = vmatprep.mubr.msk.bf16.mxu1 %vm3397_vm1, %v18053_v33  ;;  %3052 = vmatprep.mubr.bf16.mxu0 %v14245_v21  ;;  %v14259_v21 = vld [vmem:[#allocation2 + $0x744] ss:$8 sps:$4 sm:$0xff]  }
 0x576   :  { %v14265_v33 = vld [vmem:[#allocation2 + $0x764] ss:$8 sps:$4 sm:$0xff]  }
 0x577   :  { %v16370_v40 = vpop.f32.mrb[84].mxu0 }
 0x578   :  { %v2840_v49 = vpop.f32.mrb[85].mxu0 }
 0x579   :  { %v16372_v37 = vpop.f32.mrb[86].mxu0 }
 0x57a   :  { %v4299_v46 = vpack.c.bf16 %v16372_v37, %v16370_v40  ;;  %v2843_v61 = vpop.f32.mrb[87].mxu0  ;;  %v14266_v37 = vld [vmem:[#allocation2 + $0x770] ss:$8 sps:$4 sm:$0xff]  }
 0x57c   :  { %3053 = vmatmul.mubr.bf16.gmra.mrb[192].mxu0 %v14243_v30  ;;  %13132 = vmatmul.mubr.msk.bf16.gmra.mrb[20].mxu1 %vm3397_vm1, %v18056_v44 }
 0x57d   :  { %13135 = vmatprep.mubr.msk.bf16.mxu1 %vm3397_vm1, %v18059_v5  ;;  %3060 = vmatprep.mubr.bf16.mxu0 %v14248_v14  ;;  %v14269_v5 = vld [vmem:[#allocation2 + $0x780] ss:$8 sps:$4 sm:$0xff]  }
 0x57f   :  { %v2846_v32 = vpop.f32.mrb[88].mxu0 }
 0x580   :  { %v2848_v53 = vpop.f32.mrb[89].mxu0 }
 0x581   :  { %v2849_v42 = vpop.f32.mrb[90].mxu0  ;;  %v14274_v53 = vld [vmem:[#allocation2 + $0x794] ss:$8 sps:$4 sm:$0xff]  }
 0x582   :  { %v4300_v43 = vpack.c.bf16 %v2849_v42, %v2846_v32  ;;  %v2851_v6 = vpop.f32.mrb[91].mxu0 }
 0x583   :  { %v14272_v6 = vld [vmem:[#allocation2 + $0x790] ss:$8 sps:$4 sm:$0xff]  }
 0x584   :  { %3061 = vmatmul.mubr.bf16.gmra.mrb[196].mxu0 %v14246_v19  ;;  %13136 = vmatmul.mubr.msk.bf16.gmra.mrb[24].mxu1 %vm3397_vm1, %v18062_v41 }
 0x585   :  { %13139 = vmatprep.mubr.msk.bf16.mxu1 %vm3397_vm1, %v18065_v59  ;;  %3068 = vmatprep.mubr.bf16.mxu0 %v14251_v54 }
 0x587   :  { %v2854_v34 = vpop.f32.mrb[92].mxu0 }
 0x588   :  { %v2856_v35 = vpop.f32.mrb[93].mxu0 }
 0x589   :  { %v2857_v45 = vpop.f32.mrb[94].mxu0 }
 0x58a   :  { %v4301_v18 = vpack.c.bf16 %v2857_v45, %v2854_v34  ;;  %v2859_v48 = vpop.f32.mrb[95].mxu0  ;;  %v14275_v34 = vld [vmem:[#allocation2 + $0x7a0] ss:$8 sps:$4 sm:$0xff]  }
 0x58b   :  { %v18070_v48 = vld [vmem:[#allocation62_spill] sm:$0xff] }
 0x58c   :  { %3069 = vmatmul.mubr.bf16.gmra.mrb[200].mxu0 %v14249_v56  ;;  %13140 = vmatmul.mubr.msk.bf16.gmra.mrb[28].mxu1 %vm3397_vm1, %v18068_v63  ;;  %v14282_v56 = vld [vmem:[#allocation2 + $0x7b4] ss:$8 sps:$4 sm:$0xff]  }
 0x58d   :  { %13147 = vmatprep.mubr.msk.bf16.mxu1 %vm3397_vm1, %v4294_v25  ;;  %3076 = vmatprep.mubr.bf16.mxu0 %v14256_v0  ;;  %v16411_v25 = vld [vmem:[#allocation4 + $0x48] sm:$0xff]  }
 0x58f   :  { %v2862_v26 = vpop.f32.mrb[96].mxu0 }
 0x590   :  { %v2864_v13 = vpop.f32.mrb[97].mxu0 }
 0x591   :  { %v2865_v8 = vpop.f32.mrb[98].mxu0 }
 0x592   :  { %v4302_v50 = vpack.c.bf16 %v2865_v8, %v2862_v26  ;;  %v2867_v52 = vpop.f32.mrb[99].mxu0  ;;  %v14280_v26 = vld [vmem:[#allocation2 + $0x7b0] ss:$8 sps:$4 sm:$0xff]  }
 0x593   :  { %v18072_v52 = vld [vmem:[#allocation65_spill] sm:$0xff] }
 0x594   :  { %3077 = vmatmul.mubr.bf16.gmra.mrb[204].mxu0 %v14254_v3  ;;  %13148 = vmatmul.mubr.msk.bf16.vlgmr.msra.gmra.mrb[0].mxu1 %vm3397_vm1, %v4295_v17  ;;  %v14285_v3 = vld [vmem:[#allocation2 + $0x7c4] ss:$8 sps:$4 sm:$0xff]  }
 0x595   :  { %13151 = vmatprep.mubr.msk.bf16.mxu1 %vm3397_vm1, %v4296_v9  ;;  %3084 = vmatprep.mubr.bf16.mxu0 %v14259_v21 }
 0x596   :  { %13180 = vmatpush3.bf16.msra.mxu1 %v16313_v47 }
 0x597   :  { %v2870_v31 = vpop.f32.mrb[100].mxu0  ;;  %13862 = vmatprep.subr.msk.bf16.mxu1 %vm3446_vm0, %v14279_v36  ;;  %v18073_v36 = vld [vmem:[#allocation64_spill] sm:$0xff] }
 0x598   :  { %v2872_v12 = vpop.f32.mrb[101].mxu0 }
 0x599   :  { %v2873_v29 = vpop.f32.mrb[102].mxu0  ;;  %v18076_v12 = vld [vmem:[#allocation66_spill] sm:$0xff] }
 0x59a   :  { %v4303_v17 = vpack.c.bf16 %v2873_v29, %v2870_v31  ;;  %v2875_v28 = vpop.f32.mrb[103].mxu0  ;;  %13182 = vmatpush3.bf16.msra.mxu1 %v4593_v55  ;;  %v18074_v31 = vpack.c.bf16 %v18072_v52, %v18073_v36  ;;  %v18075_v55 = vld [vmem:[#allocation67_spill] sm:$0xff] }
 0x59b   :  { %13215 = vmatprep.subr.bf16.mxu1 %v16411_v25  ;;  %v14295_v36 = vld [vmem:[#allocation2 + $0x800] ss:$8 sps:$4 sm:$0xff]  }
 0x59c   :  { %3085 = vmatmul.mubr.bf16.gmra.mrb[208].mxu0 %v14257_v27  ;;  %13152 = vmatmul.mubr.msk.bf16.gmra.mrb[4].mxu1 %vm3397_vm1, %v4297_v39  ;;  %v14263_v39 = vld [vmem:[#allocation2 + $0x760] ss:$8 sps:$4 sm:$0xff]   ;;  %v18077_v27 = vpack.c.bf16 %v18075_v55, %v18076_v12  ;;  %v14300_v55 = vld [vmem:[#allocation2 + $0x814] ss:$8 sps:$4 sm:$0xff]  }
 0x59d   :  { %13155 = vmatprep.mubr.msk.bf16.mxu1 %vm3397_vm1, %v4298_v23  ;;  %3092 = vmatprep.mubr.bf16.mxu0 %v14262_v57 }
 0x59f   :  { %v2878_v47 = vpop.f32.mrb[104].mxu0 }
 0x5a0   :  { %v2880_v1 = vpop.f32.mrb[105].mxu0 }
 0x5a1   :  { %v2881_v9 = vpop.f32.mrb[106].mxu0 }
 0x5a2   :  { %v4304_v49 = vpack.c.bf16 %v2881_v9, %v2878_v47  ;;  %v2883_v30 = vpop.f32.mrb[107].mxu0  ;;  %v14283_v47 = vld [vmem:[#allocation2 + $0x7c0] ss:$8 sps:$4 sm:$0xff]  }
 0x5a4   :  { %3093 = vmatmul.mubr.bf16.gmra.mrb[212].mxu0 %v14260_v11  ;;  %13156 = vmatmul.mubr.msk.bf16.gmra.mrb[8].mxu1 %vm3397_vm1, %v4299_v46  ;;  %v14288_v11 = vld [vmem:[#allocation2 + $0x7d4] ss:$8 sps:$4 sm:$0xff]  }
 0x5a5   :  { %13159 = vmatprep.mubr.msk.bf16.mxu1 %vm3397_vm1, %v4300_v43  ;;  %3100 = vmatprep.mubr.bf16.mxu0 %v14265_v33 }
 0x5a7   :  { %v2886_v10 = vpop.f32.mrb[108].mxu0 }
 0x5a8   :  { %v2888_v62 = vpop.f32.mrb[109].mxu0 }
 0x5a9   :  { %v2889_v16 = vpop.f32.mrb[110].mxu0  ;;  %v18082_v62 = vld [vmem:[#allocation70_spill] sm:$0xff] }
 0x5aa   :  { %v4305_v23 = vpack.c.bf16 %v2889_v16, %v2886_v10  ;;  %v2891_v14 = vpop.f32.mrb[111].mxu0  ;;  %v18081_v10 = vld [vmem:[#allocation71_spill] sm:$0xff] }
 0x5ac   :  { %3101 = vmatmul.mubr.bf16.gmra.mrb[216].mxu0 %v14263_v39  ;;  %13160 = vmatmul.mubr.msk.bf16.gmra.mrb[12].mxu1 %vm3397_vm1, %v4301_v18  ;;  %v18069_v18 = vld [vmem:[#allocation63_spill] sm:$0xff]  ;;  %v18083_v39 = vpack.c.bf16 %v18081_v10, %v18082_v62  ;;  %v14298_v10 = vld [vmem:[#allocation2 + $0x810] ss:$8 sps:$4 sm:$0xff]  }
 0x5ad   :  { %13163 = vmatprep.mubr.msk.bf16.mxu1 %vm3397_vm1, %v4302_v50  ;;  %3108 = vmatprep.mubr.bf16.mxu0 %v14268_v15  ;;  %v18071_v24 = vpack.c.bf16 %v18069_v18, %v18070_v48  ;;  %v14305_v50 = vld [vmem:[#allocation4 + $0x50] ss:$0 sps:$4 sm:$0xff]  }
 0x5ae   :  { %v4834_v57 = vsel %vm3446_vm0, %v14305_v50, 0  ;;  %v18096_v48 = vld [vmem:[#allocation81_spill] sm:$0xff] }
 0x5af   :  { %v2894_v61 = vpop.f32.mrb[112].mxu0 }
 0x5b0   :  { %v2896_v40 = vpop.f32.mrb[113].mxu0 }
 0x5b1   :  { %v2897_v46 = vpop.f32.mrb[114].mxu0 }
 0x5b2   :  { %v4306_v4 = vpack.c.bf16 %v2897_v46, %v2894_v61  ;;  %v2899_v44 = vpop.f32.mrb[115].mxu0  ;;  %v14291_v61 = vld [vmem:[#allocation2 + $0x7e4] ss:$8 sps:$4 sm:$0xff]  }
 0x5b3   :  { %v18084_v46 = vld [vmem:[#allocation73_spill] sm:$0xff]  ;;  %v18087_v44 = vld [vmem:[#allocation75_spill] sm:$0xff] }
 0x5b4   :  { %3109 = vmatmul.mubr.bf16.gmra.mrb[220].mxu0 %v14266_v37  ;;  %13164 = vmatmul.mubr.msk.bf16.gmra.mrb[16].mxu1 %vm3397_vm1, %v4303_v17  ;;  %v16459_v17 = vld [vmem:[#allocation4 + $0x54] sm:$0xff]  }
 0x5b5   :  { %13167 = vmatprep.mubr.msk.bf16.mxu1 %vm3397_vm1, %v4304_v49  ;;  %3116 = vmatprep.mubr.bf16.mxu0 %v14271_v7  ;;  %v18079_v49 = vld [vmem:[#allocation68_spill] sm:$0xff] }
 0x5b6   :  { %v18085_v7 = vld [vmem:[#allocation72_spill] sm:$0xff] }
 0x5b7   :  { %v2902_v51 = vpop.f32.mrb[116].mxu0 }
 0x5b8   :  { %v2904_v2 = vpop.f32.mrb[117].mxu0 }
 0x5b9   :  { %v2905_v32 = vpop.f32.mrb[118].mxu0 }
 0x5ba   :  { %v4307_v19 = vpack.c.bf16 %v2905_v32, %v2902_v51  ;;  %v2907_v42 = vpop.f32.mrb[119].mxu0  ;;  %v18088_v51 = vld [vmem:[#allocation74_spill] sm:$0xff] }
 0x5bb   :  { %v18089_v2 = vpack.c.bf16 %v18087_v44, %v18088_v51  ;;  %v14294_v42 = vld [vmem:[#allocation2 + $0x7f4] ss:$8 sps:$4 sm:$0xff]  }
 0x5bc   :  { %3117 = vmatmul.mubr.bf16.gmra.mrb[224].mxu0 %v14269_v5  ;;  %13168 = vmatmul.mubr.msk.bf16.gmra.mrb[20].mxu1 %vm3397_vm1, %v4305_v23  ;;  %v14286_v23 = vld [vmem:[#allocation2 + $0x7d0] ss:$8 sps:$4 sm:$0xff]  }
 0x5bd   :  { %13171 = vmatprep.mubr.msk.bf16.mxu1 %vm3397_vm1, %v4306_v4  ;;  %3124 = vmatprep.mubr.bf16.mxu0 %v14274_v53  ;;  %v18086_v4 = vpack.c.bf16 %v18084_v46, %v18085_v7  ;;  %v14289_v53 = vld [vmem:[#allocation2 + $0x7e0] ss:$8 sps:$4 sm:$0xff]  }
 0x5be   :  { %v18111_v7 = vld [vmem:[#allocation91_spill] sm:$0xff] }
 0x5bf   :  { %v2910_v54 = vpop.f32.mrb[120].mxu0 }
 0x5c0   :  { %v2912_v43 = vpop.f32.mrb[121].mxu0 }
 0x5c1   :  { %v2913_v38 = vpop.f32.mrb[122].mxu0 }
 0x5c2   :  { %v4308_v41 = vpack.c.bf16 %v2913_v38, %v2910_v54  ;;  %v2915_v20 = vpop.f32.mrb[123].mxu0  ;;  %v18091_v38 = vld [vmem:[#allocation76_spill] sm:$0xff] }
 0x5c3   :  { %v18094_v20 = vld [vmem:[#allocation78_spill] sm:$0xff] }
 0x5c4   :  { %3125 = vmatmul.mubr.bf16.gmra.mrb[228].mxu0 %v14272_v6  ;;  %13172 = vmatmul.mubr.msk.bf16.gmra.mrb[24].mxu1 %vm3397_vm1, %v4307_v19  ;;  %v18090_v6 = vld [vmem:[#allocation77_spill] sm:$0xff] }
 0x5c5   :  { %13175 = vmatprep.mubr.msk.bf16.mxu1 %vm3397_vm1, %v4308_v41  ;;  %3132 = vmatprep.mubr.bf16.mxu0 %v14277_v60  ;;  %v18092_v60 = vpack.c.bf16 %v18090_v6, %v18091_v38  ;;  %v18093_v41 = vld [vmem:[#allocation79_spill] sm:$0xff]  ;;  %v18114_v38 = vld [vmem:[#allocation93_spill] sm:$0xff] }
 0x5c7   :  { %v2918_v58 = vpop.f32.mrb[124].mxu0 }
 0x5c8   :  { %v2920_v59 = vpop.f32.mrb[125].mxu0 }
 0x5c9   :  { %v2921_v35 = vpop.f32.mrb[126].mxu0 }
 0x5ca   :  { %v4309_v45 = vpack.c.bf16 %v2921_v35, %v2918_v58  ;;  %v2923_v0 = vpop.f32.mrb[127].mxu0  ;;  %v18095_v58 = vpack.c.bf16 %v18093_v41, %v18094_v20  ;;  %v14292_v35 = vld [vmem:[#allocation2 + $0x7f0] ss:$8 sps:$4 sm:$0xff]  }
 0x5cc   :  { %3133 = vmatmul.mubr.bf16.gmra.mrb[232].mxu0 %v14275_v34  ;;  %13176 = vmatmul.mubr.msk.bf16.gmra.mrb[28].mxu1 %vm3397_vm1, %v4309_v45  ;;  %v14297_v45 = vld [vmem:[#allocation2 + $0x804] ss:$8 sps:$4 sm:$0xff]  }
 0x5cd   :  { %13183 = vmatprep.mubr.msk.bf16.mxu1 %vm3397_vm1, %v18071_v24  ;;  %3140 = vmatprep.mubr.bf16.mxu0 %v14282_v56  ;;  %v18097_v24 = vld [vmem:[#allocation80_spill] sm:$0xff] }
 0x5cf   :  { %v16440_v22 = vpop.f32.mrb[128].mxu0 }
 0x5d0   :  { %v2928_v63 = vpop.f32.mrb[129].mxu0 }
 0x5d1   :  { %v16442_v13 = vpop.f32.mrb[130].mxu0  ;;  %v18098_v63 = vpack.c.bf16 %v18096_v48, %v18097_v24  ;;  %v14334_v24 = vld [vmem:[#allocation4 + $0x5c] ss:$0 sps:$4 sm:$0xff]  }
 0x5d2   :  { %v4756_v8 = vpack.c.bf16 %v16442_v13, %v16440_v22  ;;  %v2931_v21 = vpop.f32.mrb[131].mxu0  ;;  %v5107_v13 = vsel %vm3446_vm0, %v14334_v24, 0 }
 0x5d4   :  { %3141 = vmatmul.mubr.bf16.gmra.mrb[236].mxu0 %v14280_v26  ;;  %13184 = vmatmul.mubr.msk.bf16.vlgmr.msra.gmra.mrb[0].mxu1 %vm3397_vm1, %v18074_v31  ;;  %v18099_v26 = vld [vmem:[#allocation83_spill] sm:$0xff] }
 0x5d5   :  { %13187 = vmatprep.mubr.msk.bf16.mxu1 %vm3397_vm1, %v18077_v27  ;;  %3148 = vmatprep.mubr.bf16.mxu0 %v14285_v3  ;;  %v18100_v3 = vld [vmem:[#allocation82_spill] sm:$0xff] }
 0x5d6   :  { %13216 = vmatpush3.bf16.msra.mxu1 %v16411_v25  ;;  %v18078_v25 = vld [vmem:[#allocation69_spill] sm:$0xff]  ;;  %v18101_v21 = vpack.c.bf16 %v18099_v26, %v18100_v3  ;;  %v14314_v3 = vld [vmem:[#allocation2 + $0x854] ss:$8 sps:$4 sm:$0xff]  }
 0x5d7   :  { %v16455_v29 = vpop.f32.mrb[132].mxu0  ;;  %13863 = vmatprep.subr.msk.bf16.mxu1 %vm3446_vm0, %v14305_v50  ;;  %v18080_v30 = vpack.c.bf16 %v18078_v25, %v18079_v49 }
 0x5d8   :  { %v2936_v28 = vpop.f32.mrb[133].mxu0 }
 0x5d9   :  { %v16461_v1 = vpop.f32.mrb[134].mxu0  ;;  %v18103_v28 = vld [vmem:[#allocation84_spill] sm:$0xff] }
 0x5da   :  { %v4757_v9 = vpack.c.bf16 %v16461_v1, %v16455_v29  ;;  %v2939_v33 = vpop.f32.mrb[135].mxu0  ;;  %13218 = vmatpush3.bf16.msra.mxu1 %v4834_v57  ;;  %v18102_v57 = vld [vmem:[#allocation85_spill] sm:$0xff] }
 0x5db   :  { %13251 = vmatprep.subr.bf16.mxu1 %v16459_v17  ;;  %v18106_v33 = vld [vmem:[#allocation86_spill] sm:$0xff] }
 0x5dc   :  { %3149 = vmatmul.mubr.bf16.gmra.mrb[240].mxu0 %v14283_v47  ;;  %13188 = vmatmul.mubr.msk.bf16.gmra.mrb[4].mxu1 %vm3397_vm1, %v18080_v30  ;;  %v18104_v47 = vpack.c.bf16 %v18102_v57, %v18103_v28 }
 0x5dd   :  { %13191 = vmatprep.mubr.msk.bf16.mxu1 %vm3397_vm1, %v18083_v39  ;;  %3156 = vmatprep.mubr.bf16.mxu0 %v14288_v11  ;;  %v18105_v11 = vld [vmem:[#allocation87_spill] sm:$0xff]  ;;  %v14303_v39 = vld [vmem:[#allocation2 + $0x824] ss:$8 sps:$4 sm:$0xff]  }
 0x5de   :  { %v18107_v25 = vpack.c.bf16 %v18105_v11, %v18106_v33  ;;  %v14321_v33 = vld [vmem:[#allocation2 + $0x880] ss:$8 sps:$4 sm:$0xff]  }
 0x5df   :  { %v16474_v16 = vpop.f32.mrb[136].mxu0 }
 0x5e0   :  { %v2944_v15 = vpop.f32.mrb[137].mxu0 }
 0x5e1   :  { %v16476_v14 = vpop.f32.mrb[138].mxu0 }
 0x5e2   :  { %v4758_v40 = vpack.c.bf16 %v16476_v14, %v16474_v16  ;;  %v2947_v37 = vpop.f32.mrb[139].mxu0  ;;  %v14312_v16 = vld [vmem:[#allocation2 + $0x850] ss:$8 sps:$4 sm:$0xff]  }
 0x5e3   :  { %v18109_v37 = vld [vmem:[#allocation88_spill] sm:$0xff] }
 0x5e4   :  { %3157 = vmatmul.mubr.bf16.gmra.mrb[244].mxu0 %v14286_v23  ;;  %13192 = vmatmul.mubr.msk.bf16.gmra.mrb[8].mxu1 %vm3397_vm1, %v18086_v4  ;;  %v18112_v4 = vld [vmem:[#allocation90_spill] sm:$0xff] }
 0x5e5   :  { %13195 = vmatprep.mubr.msk.bf16.mxu1 %vm3397_vm1, %v18089_v2  ;;  %3164 = vmatprep.mubr.bf16.mxu0 %v14291_v61  ;;  %v18108_v61 = vld [vmem:[#allocation89_spill] sm:$0xff]  ;;  %v18113_v44 = vpack.c.bf16 %v18111_v7, %v18112_v4 }
 0x5e6   :  { %v18110_v46 = vpack.c.bf16 %v18108_v61, %v18109_v37  ;;  %v14329_v61 = vld [vmem:[#allocation2 + $0x8a4] ss:$8 sps:$4 sm:$0xff]  }
 0x5e7   :  { %v16488_v5 = vpop.f32.mrb[140].mxu0 }
 0x5e8   :  { %v2952_v32 = vpop.f32.mrb[141].mxu0 }
 0x5e9   :  { %v16490_v19 = vpop.f32.mrb[142].mxu0  ;;  %v14301_v32 = vld [vmem:[#allocation2 + $0x820] ss:$8 sps:$4 sm:$0xff]  }
 0x5ea   :  { %v4759_v54 = vpack.c.bf16 %v16490_v19, %v16488_v5  ;;  %v2955_v43 = vpop.f32.mrb[143].mxu0 }
 0x5ec   :  { %3165 = vmatmul.mubr.bf16.gmra.mrb[248].mxu0 %v14289_v53  ;;  %13196 = vmatmul.mubr.msk.bf16.gmra.mrb[12].mxu1 %vm3397_vm1, %v18092_v60  ;;  %v18115_v60 = vld [vmem:[#allocation92_spill] sm:$0xff] }
 0x5ed   :  { %13199 = vmatprep.mubr.msk.bf16.mxu1 %vm3397_vm1, %v18095_v58  ;;  %3172 = vmatprep.mubr.bf16.mxu0 %v14294_v42  ;;  %v14308_v42 = vld [vmem:[#allocation2 + $0x834] ss:$8 sps:$4 sm:$0xff]   ;;  %v18116_v41 = vpack.c.bf16 %v18114_v38, %v18115_v60  ;;  %v14337_v60 = vld [vmem:[#allocation2 + $0x8c4] ss:$8 sps:$4 sm:$0xff]  }
 0x5ef   :  { %v16502_v59 = vpop.f32.mrb[144].mxu0 }
 0x5f0   :  { %v2960_v34 = vpop.f32.mrb[145].mxu0 }
 0x5f1   :  { %v16504_v56 = vpop.f32.mrb[146].mxu0  ;;  %v14306_v34 = vld [vmem:[#allocation2 + $0x830] ss:$8 sps:$4 sm:$0xff]  }
 0x5f2   :  { %v4760_v0 = vpack.c.bf16 %v16504_v56, %v16502_v59  ;;  %v2963_v18 = vpop.f32.mrb[147].mxu0  ;;  %v14320_v56 = vld [vmem:[#allocation2 + $0x874] ss:$8 sps:$4 sm:$0xff]  }
 0x5f4   :  { %3173 = vmatmul.mubr.bf16.gmra.mrb[252].mxu0 %v14292_v35  ;;  %13200 = vmatmul.mubr.msk.bf16.gmra.mrb[16].mxu1 %vm3397_vm1, %v18098_v63  ;;  %v14309_v63 = vld [vmem:[#allocation2 + $0x840] ss:$8 sps:$4 sm:$0xff]  }
 0x5f5   :  { %13203 = vmatprep.mubr.msk.bf16.mxu1 %vm3397_vm1, %v18101_v21  ;;  %3180 = vmatprep.mubr.bf16.mxu0 %v14297_v45  ;;  %v14311_v45 = vld [vmem:[#allocation2 + $0x844] ss:$8 sps:$4 sm:$0xff]  }
 0x5f7   :  { %v16516_v50 = vpop.f32.mrb[148].mxu0 }
 0x5f8   :  { %v2968_v52 = vpop.f32.mrb[149].mxu0 }
 0x5f9   :  { %v16518_v31 = vpop.f32.mrb[150].mxu0 }
 0x5fa   :  { %v4761_v12 = vpack.c.bf16 %v16518_v31, %v16516_v50  ;;  %v2971_v27 = vpop.f32.mrb[151].mxu0  ;;  %v14318_v31 = vld [vmem:[#allocation2 + $0x870] ss:$8 sps:$4 sm:$0xff]  }
 0x5fb   :  { %v14323_v27 = vld [vmem:[#allocation2 + $0x884] ss:$8 sps:$4 sm:$0xff]  }
 0x5fc   :  { %3181 = vmatmul.mubr.bf16.gmra.mrb[0].mxu0 %v14295_v36  ;;  %13204 = vmatmul.mubr.msk.bf16.gmra.mrb[20].mxu1 %vm3397_vm1, %v18104_v47 }
 0x5fd   :  { %13207 = vmatprep.mubr.msk.bf16.mxu1 %vm3397_vm1, %v18107_v25  ;;  %3188 = vmatprep.mubr.bf16.mxu0 %v14300_v55 }
 0x5ff   :  { %v2974_v49 = vpop.f32.mrb[152].mxu0 }
 0x600   :  { %v2976_v30 = vpop.f32.mrb[153].mxu0 }
 0x601   :  { %v2977_v62 = vpop.f32.mrb[154].mxu0 }
 0x602   :  { %v4762_v15 = vpack.c.bf16 %v2977_v62, %v2974_v49  ;;  %v2979_v23 = vpop.f32.mrb[155].mxu0  ;;  %v14326_v49 = vld [vmem:[#allocation2 + $0x894] ss:$8 sps:$4 sm:$0xff]  }
 0x604   :  { %3189 = vmatmul.mubr.bf16.gmra.mrb[4].mxu0 %v14298_v10  ;;  %13208 = vmatmul.mubr.msk.bf16.gmra.mrb[24].mxu1 %vm3397_vm1, %v18110_v46 }
 0x605   :  { %13211 = vmatprep.mubr.msk.bf16.mxu1 %vm3397_vm1, %v18113_v44  ;;  %3196 = vmatprep.mubr.bf16.mxu0 %v14303_v39  ;;  %v14327_v44 = vld [vmem:[#allocation2 + $0x8a0] ss:$8 sps:$4 sm:$0xff]  }
 0x607   :  { %v2982_v51 = vpop.f32.mrb[156].mxu0 }
 0x608   :  { %v2984_v2 = vpop.f32.mrb[157].mxu0 }
 0x609   :  { %v2985_v53 = vpop.f32.mrb[158].mxu0  ;;  %v14332_v2 = vld [vmem:[#allocation2 + $0x8b4] ss:$8 sps:$4 sm:$0xff]  }
 0x60a   :  { %v4763_v43 = vpack.c.bf16 %v2985_v53, %v2982_v51  ;;  %v2987_v6 = vpop.f32.mrb[159].mxu0 }
 0x60b   :  { %v14330_v6 = vld [vmem:[#allocation2 + $0x8b0] ss:$8 sps:$4 sm:$0xff]  }
 0x60c   :  { %3197 = vmatmul.mubr.bf16.gmra.mrb[8].mxu0 %v14301_v32  ;;  %13212 = vmatmul.mubr.msk.bf16.gmra.mrb[28].mxu1 %vm3397_vm1, %v18116_v41 }
 0x60d   :  { %13219 = vmatprep.mubr.msk.bf16.mxu1 %vm3397_vm1, %v4756_v8  ;;  %3204 = vmatprep.mubr.bf16.mxu0 %v14308_v42 }
 0x60f   :  { %v2990_v20 = vpop.f32.mrb[160].mxu0 }
 0x610   :  { %v2992_v58 = vpop.f32.mrb[161].mxu0 }
 0x611   :  { %v2993_v35 = vpop.f32.mrb[162].mxu0  ;;  %v14347_v58 = vld [vmem:[#allocation4 + $0x60] sm:$0xff]  }
 0x612   :  { %v4764_v18 = vpack.c.bf16 %v2993_v35, %v2990_v20  ;;  %v2995_v48 = vpop.f32.mrb[163].mxu0 }
 0x613   :  { %v14340_v48 = vld [vmem:[#allocation2 + $0x8d4] ss:$8 sps:$4 sm:$0xff]  }
 0x614   :  { %3205 = vmatmul.mubr.bf16.gmra.mrb[12].mxu0 %v14306_v34  ;;  %13220 = vmatmul.mubr.msk.bf16.vlgmr.msra.gmra.mrb[0].mxu1 %vm3397_vm1, %v4757_v9 }
 0x615   :  { %13223 = vmatprep.mubr.msk.bf16.mxu1 %vm3397_vm1, %v4758_v40  ;;  %3212 = vmatprep.mubr.bf16.mxu0 %v14311_v45  ;;  %v14317_v40 = vld [vmem:[#allocation2 + $0x864] ss:$8 sps:$4 sm:$0xff]   ;;  %v14335_v45 = vld [vmem:[#allocation2 + $0x8c0] ss:$8 sps:$4 sm:$0xff]  }
 0x616   :  { %13252 = vmatpush3.bf16.msra.mxu1 %v16459_v17 }
 0x617   :  { %v2998_v22 = vpop.f32.mrb[164].mxu0  ;;  %13864 = vmatprep.subr.msk.bf16.mxu1 %vm3446_vm0, %v14334_v24 }
 0x618   :  { %v3000_v8 = vpop.f32.mrb[165].mxu0 }
 0x619   :  { %v3001_v26 = vpop.f32.mrb[166].mxu0 }
 0x61a   :  { %v4765_v29 = vpack.c.bf16 %v3001_v26, %v2998_v22  ;;  %v3003_v1 = vpop.f32.mrb[167].mxu0  ;;  %13254 = vmatpush3.bf16.msra.mxu1 %v5107_v13  ;;  %v14348_v13 = vld [vmem:[#allocation4 + $0x68] ss:$0 sps:$4 sm:$0xff]  }
 0x61b   :  { %13287 = vmatprep.subr.bf16.mxu1 %v14347_v58  ;;  %v5380_v8 = vsel %vm3446_vm0, %v14348_v13, 0  ;;  %v14343_v1 = vld [vmem:[#allocation2 + $0x8e4] ss:$8 sps:$4 sm:$0xff]  }
 0x61c   :  { %3213 = vmatmul.mubr.bf16.gmra.mrb[16].mxu0 %v14309_v63  ;;  %13224 = vmatmul.mubr.msk.bf16.gmra.mrb[4].mxu1 %vm3397_vm1, %v4759_v54  ;;  %v14315_v54 = vld [vmem:[#allocation2 + $0x860] ss:$8 sps:$4 sm:$0xff]  }
 0x61d   :  { %13227 = vmatprep.mubr.msk.bf16.mxu1 %vm3397_vm1, %v4760_v0  ;;  %3220 = vmatprep.mubr.bf16.mxu0 %v14314_v3  ;;  %v14338_v3 = vld [vmem:[#allocation2 + $0x8d0] ss:$8 sps:$4 sm:$0xff]  }
 0x61f   :  { %v3006_v17 = vpop.f32.mrb[168].mxu0 }
 0x620   :  { %v3008_v9 = vpop.f32.mrb[169].mxu0 }
 0x621   :  { %v3009_v14 = vpop.f32.mrb[170].mxu0 }
 0x622   :  { %v4766_v21 = vpack.c.bf16 %v3009_v14, %v3006_v17  ;;  %v3011_v52 = vpop.f32.mrb[171].mxu0 }
 0x624   :  { %3221 = vmatmul.mubr.bf16.gmra.mrb[20].mxu0 %v14312_v16  ;;  %13228 = vmatmul.mubr.msk.bf16.gmra.mrb[8].mxu1 %vm3397_vm1, %v4761_v12  ;;  %v18117_v16 = vmov 0  }
 0x625   :  { %13231 = vmatprep.mubr.msk.bf16.mxu1 %vm3397_vm1, %v4762_v15  ;;  %3228 = vmatprep.mubr.bf16.mxu0 %v14317_v40  ;;  %v14324_v15 = vld [vmem:[#allocation2 + $0x890] ss:$8 sps:$4 sm:$0xff]  }
 0x627   :  { %v3014_v5 = vpop.f32.mrb[172].mxu0 }
 0x628   :  { %v3016_v19 = vpop.f32.mrb[173].mxu0 }
 0x629   :  { %v3017_v59 = vpop.f32.mrb[174].mxu0 }
 0x62a   :  { %v4767_v0 = vpack.c.bf16 %v3017_v59, %v3014_v5  ;;  %v3019_v36 = vpop.f32.mrb[175].mxu0  ;;  %v14346_v5 = vld [vmem:[#allocation2 + $0x8f4] ss:$8 sps:$4 sm:$0xff]  }
 0x62c   :  { %3229 = vmatmul.mubr.bf16.gmra.mrb[24].mxu0 %v14315_v54  ;;  %13232 = vmatmul.mubr.msk.bf16.gmra.mrb[12].mxu1 %vm3397_vm1, %v4763_v43 }
 0x62d   :  { %13235 = vmatprep.mubr.msk.bf16.mxu1 %vm3397_vm1, %v4764_v18  ;;  %3236 = vmatprep.mubr.bf16.mxu0 %v14320_v56 }
 0x62f   :  { %v3022_v55 = vpop.f32.mrb[176].mxu0 }
 0x630   :  { %v3024_v50 = vpop.f32.mrb[177].mxu0 }
 0x631   :  { %v3025_v12 = vpop.f32.mrb[178].mxu0 }
 0x632   :  { %v4768_v57 = vpack.c.bf16 %v3025_v12, %v3022_v55  ;;  %v3027_v28 = vpop.f32.mrb[179].mxu0 }
 0x634   :  { %3237 = vmatmul.mubr.bf16.gmra.mrb[28].mxu0 %v14318_v31  ;;  %13236 = vmatmul.mubr.msk.bf16.gmra.mrb[16].mxu1 %vm3397_vm1, %v4765_v29 }
 0x635   :  { %13239 = vmatprep.mubr.msk.bf16.mxu1 %vm3397_vm1, %v4766_v21  ;;  %3244 = vmatprep.mubr.bf16.mxu0 %v14323_v27  ;;  %v14341_v21 = vld [vmem:[#allocation2 + $0x8e0] ss:$8 sps:$4 sm:$0xff]  }
 0x637   :  { %v3030_v47 = vpop.f32.mrb[180].mxu0 }
 0x638   :  { %v3032_v11 = vpop.f32.mrb[181].mxu0 }
 0x639   :  { %v3033_v25 = vpop.f32.mrb[182].mxu0 }
 0x63a   :  { %v4769_v30 = vpack.c.bf16 %v3033_v25, %v3030_v47  ;;  %v3035_v10 = vpop.f32.mrb[183].mxu0 }
 0x63c   :  { %3245 = vmatmul.mubr.bf16.gmra.mrb[32].mxu0 %v14321_v33  ;;  %13240 = vmatmul.mubr.msk.bf16.gmra.mrb[20].mxu1 %vm3397_vm1, %v4767_v0  ;;  %v14344_v0 = vld [vmem:[#allocation2 + $0x8f0] ss:$8 sps:$4 sm:$0xff]  }
 0x63d   :  { %13243 = vmatprep.mubr.msk.bf16.mxu1 %vm3397_vm1, %v4768_v57  ;;  %3252 = vmatprep.mubr.bf16.mxu0 %v14326_v49 }
 0x63f   :  { %v3038_v62 = vpop.f32.mrb[184].mxu0 }
 0x640   :  { %v3040_v39 = vpop.f32.mrb[185].mxu0 }
 0x641   :  { %v3041_v23 = vpop.f32.mrb[186].mxu0 }
 0x642   :  { %v4770_v37 = vpack.c.bf16 %v3041_v23, %v3038_v62  ;;  %v3043_v46 = vpop.f32.mrb[187].mxu0 }
 0x644   :  { %3253 = vmatmul.mubr.bf16.gmra.mrb[36].mxu0 %v14324_v15  ;;  %13244 = vmatmul.mubr.msk.bf16.gmra.mrb[24].mxu1 %vm3397_vm1, %v4769_v30 }
 0x645   :  { %13247 = vmatprep.mubr.msk.bf16.mxu1 %vm3397_vm1, %v4770_v37  ;;  %3260 = vmatprep.mubr.bf16.mxu0 %v14329_v61 }
 0x647   :  { %v3046_v7 = vpop.f32.mrb[188].mxu0 }
 0x648   :  { %v3048_v4 = vpop.f32.mrb[189].mxu0 }
 0x649   :  { %v3049_v51 = vpop.f32.mrb[190].mxu0 }
 0x64a   :  { %v4771_v32 = vpack.c.bf16 %v3049_v51, %v3046_v7  ;;  %v3051_v53 = vpop.f32.mrb[191].mxu0 }
 0x64c   :  { %3261 = vmatmul.mubr.bf16.gmra.mrb[40].mxu0 %v14327_v44  ;;  %13248 = vmatmul.mubr.msk.bf16.gmra.mrb[28].mxu1 %vm3397_vm1, %v4771_v32 }
 0x64d   :  { %3268 = vmatprep.mubr.bf16.mxu0 %v14332_v2 }
 0x64f   :  { %v3054_v42 = vpop.f32.mrb[192].mxu0 }
 0x650   :  { %v3056_v43 = vpop.f32.mrb[193].mxu0 }
 0x651   :  { %v3057_v38 = vpop.f32.mrb[194].mxu0 }
 0x652   :  { %v5029_v41 = vpack.c.bf16 %v3057_v38, %v3054_v42  ;;  %v3059_v20 = vpop.f32.mrb[195].mxu0 }
 0x654   :  { %3269 = vmatmul.mubr.bf16.gmra.mrb[44].mxu0 %v14330_v6  ;;  %13255 = vmatprep.mubr.msk.bf16.mxu1 %vm3397_vm1, %v5029_v41 }
 0x655   :  { %3276 = vmatprep.mubr.bf16.mxu0 %v14337_v60 }
 0x657   :  { %v3062_v34 = vpop.f32.mrb[196].mxu0 }
 0x658   :  { %v3064_v35 = vpop.f32.mrb[197].mxu0 }
 0x659   :  { %v3065_v18 = vpop.f32.mrb[198].mxu0 }
 0x65a   :  { %v5030_v24 = vpack.c.bf16 %v3065_v18, %v3062_v34  ;;  %v3067_v22 = vpop.f32.mrb[199].mxu0 }
 0x65c   :  { %3277 = vmatmul.mubr.bf16.gmra.mrb[48].mxu0 %v14335_v45  ;;  %13256 = vmatmul.mubr.msk.bf16.vlgmr.msra.gmra.mrb[0].mxu1 %vm3397_vm1, %v5030_v24 }
 0x65d   :  { %3284 = vmatprep.mubr.bf16.mxu0 %v14340_v48  ;;  %13288 = vmatpush3.bf16.msra.mxu1 %v14347_v58 }
 0x65e   :  { %13865 = vmatprep.subr.msk.bf16.mxu1 %vm3446_vm0, %v14348_v13 }
 0x65f   :  { %v3070_v63 = vpop.f32.mrb[200].mxu0 }
 0x660   :  { %v3072_v26 = vpop.f32.mrb[201].mxu0 }
 0x661   :  { %v3073_v29 = vpop.f32.mrb[202].mxu0  ;;  %13290 = vmatpush3.bf16.msra.mxu1 %v5380_v8 }
 0x662   :  { %v5031_v17 = vpack.c.bf16 %v3073_v29, %v3070_v63  ;;  %v3075_v9 = vpop.f32.mrb[203].mxu0  ;;  %13515 = vmatprep.subr.bf16.mxu1 %v18117_v16 }
 0x664   :  { %3285 = vmatmul.mubr.bf16.gmra.mrb[52].mxu0 %v14338_v3  ;;  %13259 = vmatprep.mubr.msk.bf16.mxu1 %vm3397_vm1, %v5031_v17 }
 0x665   :  { %3292 = vmatprep.mubr.bf16.mxu0 %v14343_v1 }
 0x667   :  { %v3078_v14 = vpop.f32.mrb[204].mxu0 }
 0x668   :  { %v3080_v40 = vpop.f32.mrb[205].mxu0 }
 0x669   :  { %v3081_v52 = vpop.f32.mrb[206].mxu0 }
 0x66a   :  { %v5032_v19 = vpack.c.bf16 %v3081_v52, %v3078_v14  ;;  %v3083_v54 = vpop.f32.mrb[207].mxu0 }
 0x66c   :  { %3293 = vmatmul.mubr.bf16.gmra.mrb[56].mxu0 %v14341_v21  ;;  %13260 = vmatmul.mubr.msk.bf16.gmra.mrb[4].mxu1 %vm3397_vm1, %v5032_v19 }
 0x66d   :  { %3300 = vmatprep.mubr.bf16.mxu0 %v14346_v5 }
 0x66f   :  { %v3086_v59 = vpop.f32.mrb[208].mxu0 }
 0x670   :  { %v3088_v56 = vpop.f32.mrb[209].mxu0 }
 0x671   :  { %v3089_v36 = vpop.f32.mrb[210].mxu0 }
 0x672   :  { %v5033_v55 = vpack.c.bf16 %v3089_v36, %v3086_v59  ;;  %v3091_v50 = vpop.f32.mrb[211].mxu0 }
 0x674   :  { %3301 = vmatmul.mubr.bf16.gmra.mrb[60].mxu0 %v14344_v0  ;;  %13263 = vmatprep.mubr.msk.bf16.mxu1 %vm3397_vm1, %v5033_v55 }
 0x677   :  { %v3094_v31 = vpop.f32.mrb[212].mxu0 }
 0x678   :  { %v3096_v12 = vpop.f32.mrb[213].mxu0 }
 0x679   :  { %v3097_v27 = vpop.f32.mrb[214].mxu0 }
 0x67a   :  { %v5034_v57 = vpack.c.bf16 %v3097_v27, %v3094_v31  ;;  %v3099_v28 = vpop.f32.mrb[215].mxu0 }
 0x67c   :  { %13264 = vmatmul.mubr.msk.bf16.gmra.mrb[8].mxu1 %vm3397_vm1, %v5034_v57 }
 0x67f   :  { %v3102_v47 = vpop.f32.mrb[216].mxu0 }
 0x680   :  { %v3104_v11 = vpop.f32.mrb[217].mxu0 }
 0x681   :  { %v3105_v33 = vpop.f32.mrb[218].mxu0 }
 0x682   :  { %v5035_v25 = vpack.c.bf16 %v3105_v33, %v3102_v47  ;;  %v3107_v49 = vpop.f32.mrb[219].mxu0 }
 0x684   :  { %13267 = vmatprep.mubr.msk.bf16.mxu1 %vm3397_vm1, %v5035_v25 }
 0x687   :  { %v3110_v30 = vpop.f32.mrb[220].mxu0 }
 0x688   :  { %v3112_v10 = vpop.f32.mrb[221].mxu0 }
 0x689   :  { %v3113_v62 = vpop.f32.mrb[222].mxu0 }
 0x68a   :  { %v5036_v39 = vpack.c.bf16 %v3113_v62, %v3110_v30  ;;  %v3115_v15 = vpop.f32.mrb[223].mxu0 }
 0x68c   :  { %13268 = vmatmul.mubr.msk.bf16.gmra.mrb[12].mxu1 %vm3397_vm1, %v5036_v39 }
 0x68f   :  { %v3118_v23 = vpop.f32.mrb[224].mxu0 }
 0x690   :  { %v3120_v61 = vpop.f32.mrb[225].mxu0 }
 0x691   :  { %v3121_v37 = vpop.f32.mrb[226].mxu0 }
 0x692   :  { %v5037_v46 = vpack.c.bf16 %v3121_v37, %v3118_v23  ;;  %v3123_v7 = vpop.f32.mrb[227].mxu0 }
 0x694   :  { %13271 = vmatprep.mubr.msk.bf16.mxu1 %vm3397_vm1, %v5037_v46 }
 0x697   :  { %v3126_v4 = vpop.f32.mrb[228].mxu0 }
 0x698   :  { %v3128_v44 = vpop.f32.mrb[229].mxu0 }
 0x699   :  { %v3129_v51 = vpop.f32.mrb[230].mxu0 }
 0x69a   :  { %v5038_v2 = vpack.c.bf16 %v3129_v51, %v3126_v4  ;;  %v3131_v32 = vpop.f32.mrb[231].mxu0 }
 0x69c   :  { %13272 = vmatmul.mubr.msk.bf16.gmra.mrb[16].mxu1 %vm3397_vm1, %v5038_v2 }
 0x69f   :  { %v3134_v53 = vpop.f32.mrb[232].mxu0 }
 0x6a0   :  { %v3136_v42 = vpop.f32.mrb[233].mxu0 }
 0x6a1   :  { %v3137_v43 = vpop.f32.mrb[234].mxu0 }
 0x6a2   :  { %v5039_v6 = vpack.c.bf16 %v3137_v43, %v3134_v53  ;;  %v3139_v38 = vpop.f32.mrb[235].mxu0 }
 0x6a4   :  { %13275 = vmatprep.mubr.msk.bf16.mxu1 %vm3397_vm1, %v5039_v6 }
 0x6a7   :  { %v3142_v60 = vpop.f32.mrb[236].mxu0 }
 0x6a8   :  { %v3144_v41 = vpop.f32.mrb[237].mxu0 }
 0x6a9   :  { %v3145_v20 = vpop.f32.mrb[238].mxu0 }
 0x6aa   :  { %v5040_v58 = vpack.c.bf16 %v3145_v20, %v3142_v60  ;;  %v3147_v34 = vpop.f32.mrb[239].mxu0 }
 0x6ac   :  { %13276 = vmatmul.mubr.msk.bf16.gmra.mrb[20].mxu1 %vm3397_vm1, %v5040_v58 }
 0x6af   :  { %v3150_v35 = vpop.f32.mrb[240].mxu0 }
 0x6b0   :  { %v3152_v45 = vpop.f32.mrb[241].mxu0 }
 0x6b1   :  { %v3153_v18 = vpop.f32.mrb[242].mxu0 }
 0x6b2   :  { %v5041_v48 = vpack.c.bf16 %v3153_v18, %v3150_v35  ;;  %v3155_v24 = vpop.f32.mrb[243].mxu0 }
 0x6b4   :  { %13279 = vmatprep.mubr.msk.bf16.mxu1 %vm3397_vm1, %v5041_v48 }
 0x6b7   :  { %v3158_v22 = vpop.f32.mrb[244].mxu0 }
 0x6b8   :  { %v3160_v13 = vpop.f32.mrb[245].mxu0 }
 0x6b9   :  { %v3161_v8 = vpop.f32.mrb[246].mxu0 }
 0x6ba   :  { %v5042_v63 = vpack.c.bf16 %v3161_v8, %v3158_v22  ;;  %v3163_v26 = vpop.f32.mrb[247].mxu0 }
 0x6bc   :  { %13280 = vmatmul.mubr.msk.bf16.gmra.mrb[24].mxu1 %vm3397_vm1, %v5042_v63 }
 0x6bf   :  { %v3166_v3 = vpop.f32.mrb[248].mxu0 }
 0x6c0   :  { %v3168_v29 = vpop.f32.mrb[249].mxu0 }
 0x6c1   :  { %v3169_v1 = vpop.f32.mrb[250].mxu0 }
 0x6c2   :  { %v5043_v17 = vpack.c.bf16 %v3169_v1, %v3166_v3  ;;  %v3171_v9 = vpop.f32.mrb[251].mxu0 }
 0x6c4   :  { %13283 = vmatprep.mubr.msk.bf16.mxu1 %vm3397_vm1, %v5043_v17 }
 0x6c7   :  { %v3174_v14 = vpop.f32.mrb[252].mxu0 }
 0x6c8   :  { %v3176_v40 = vpop.f32.mrb[253].mxu0 }
 0x6c9   :  { %v3177_v21 = vpop.f32.mrb[254].mxu0 }
 0x6ca   :  { %v5044_v52 = vpack.c.bf16 %v3177_v21, %v3174_v14  ;;  %v3179_v5 = vpop.f32.mrb[255].mxu0 }
 0x6cc   :  { %13284 = vmatmul.mubr.msk.bf16.gmra.mrb[28].mxu1 %vm3397_vm1, %v5044_v52 }
 0x6cf   :  { %v3182_v19 = vpop.f32.mrb[0].mxu0 }
 0x6d0   :  { %v3184_v54 = vpop.f32.mrb[1].mxu0 }
 0x6d1   :  { %v3185_v59 = vpop.f32.mrb[2].mxu0 }
 0x6d2   :  { %v5302_v56 = vpack.c.bf16 %v3185_v59, %v3182_v19  ;;  %v3187_v0 = vpop.f32.mrb[3].mxu0 }
 0x6d4   :  { %13291 = vmatprep.mubr.msk.bf16.mxu1 %vm3397_vm1, %v5302_v56 }
 0x6d7   :  { %v3190_v36 = vpop.f32.mrb[4].mxu0 }
 0x6d8   :  { %v3192_v55 = vpop.f32.mrb[5].mxu0 }
 0x6d9   :  { %v3193_v50 = vpop.f32.mrb[6].mxu0 }
 0x6da   :  { %v5303_v31 = vpack.c.bf16 %v3193_v50, %v3190_v36  ;;  %v3195_v12 = vpop.f32.mrb[7].mxu0 }
 0x6dc   :  { %13292 = vmatmul.mubr.msk.bf16.vlgmr.msra.gmra.mrb[0].mxu1 %vm3397_vm1, %v5303_v31 }
 0x6df   :  { %v3198_v27 = vpop.f32.mrb[8].mxu0 }
 0x6e0   :  { %v3200_v57 = vpop.f32.mrb[9].mxu0 }
 0x6e1   :  { %v3201_v28 = vpop.f32.mrb[10].mxu0 }
 0x6e2   :  { %v5304_v47 = vpack.c.bf16 %v3201_v28, %v3198_v27  ;;  %v3203_v11 = vpop.f32.mrb[11].mxu0 }
 0x6e4   :  { %13295 = vmatprep.mubr.msk.bf16.mxu1 %vm3397_vm1, %v5304_v47 }
 0x6e7   :  { %v3206_v33 = vpop.f32.mrb[12].mxu0 }
 0x6e8   :  { %v3208_v25 = vpop.f32.mrb[13].mxu0 }
 0x6e9   :  { %v3209_v49 = vpop.f32.mrb[14].mxu0 }
 0x6ea   :  { %v5305_v30 = vpack.c.bf16 %v3209_v49, %v3206_v33  ;;  %v3211_v10 = vpop.f32.mrb[15].mxu0  ;;  %v16614_v49 = vld [vmem:[#allocation6] ss:$0 sm:$0xff] }
 0x6eb   :  { %v14351_v10 = vld [vmem:[#allocation7 + $0xd4] ss:$8 sps:$4 sm:$0xff]  }
 0x6ec   :  { %13296 = vmatmul.mubr.msk.bf16.gmra.mrb[4].mxu1 %vm3397_vm1, %v5305_v30 }
 0x6ef   :  { %v3214_v62 = vpop.f32.mrb[16].mxu0 }
 0x6f0   :  { %v3216_v39 = vpop.f32.mrb[17].mxu0 }
 0x6f1   :  { %v3217_v15 = vpop.f32.mrb[18].mxu0 }
 0x6f2   :  { %v5306_v23 = vpack.c.bf16 %v3217_v15, %v3214_v62  ;;  %v3219_v61 = vpop.f32.mrb[19].mxu0  ;;  %v14354_v15 = vld [vmem:[#allocation7 + $0x4] ss:$8 sps:$4 sm:$0xff]  }
 0x6f3   :  { %6222 = vmatprep.mubr.bf16.mxu0 %v14354_v15 }
 0x6f4   :  { %13299 = vmatprep.mubr.msk.bf16.mxu1 %vm3397_vm1, %v5306_v23 }
 0x6f7   :  { %v3222_v37 = vpop.f32.mrb[20].mxu0 }
 0x6f8   :  { %v3224_v46 = vpop.f32.mrb[21].mxu0 }
 0x6f9   :  { %v3225_v7 = vpop.f32.mrb[22].mxu0 }
 0x6fa   :  { %v5307_v4 = vpack.c.bf16 %v3225_v7, %v3222_v37  ;;  %v3227_v44 = vpop.f32.mrb[23].mxu0 }
 0x6fc   :  { %13300 = vmatmul.mubr.msk.bf16.gmra.mrb[8].mxu1 %vm3397_vm1, %v5307_v4 }
 0x6ff   :  { %v3230_v51 = vpop.f32.mrb[24].mxu0 }
 0x700   :  { %v3232_v2 = vpop.f32.mrb[25].mxu0 }
 0x701   :  { %v3233_v32 = vpop.f32.mrb[26].mxu0 }
 0x702   :  { %v5308_v53 = vpack.c.bf16 %v3233_v32, %v3230_v51  ;;  %v3235_v42 = vpop.f32.mrb[27].mxu0 }
 0x704   :  { %13303 = vmatprep.mubr.msk.bf16.mxu1 %vm3397_vm1, %v5308_v53 }
 0x707   :  { %v3238_v43 = vpop.f32.mrb[28].mxu0 }
 0x708   :  { %v3240_v6 = vpop.f32.mrb[29].mxu0 }
 0x709   :  { %v3241_v38 = vpop.f32.mrb[30].mxu0 }
 0x70a   :  { %v5309_v60 = vpack.c.bf16 %v3241_v38, %v3238_v43  ;;  %v3243_v41 = vpop.f32.mrb[31].mxu0 }
 0x70c   :  { %13304 = vmatmul.mubr.msk.bf16.gmra.mrb[12].mxu1 %vm3397_vm1, %v5309_v60 }
 0x70f   :  { %v3246_v20 = vpop.f32.mrb[32].mxu0 }
 0x710   :  { %v3248_v58 = vpop.f32.mrb[33].mxu0 }
 0x711   :  { %v3249_v34 = vpop.f32.mrb[34].mxu0 }
 0x712   :  { %v5310_v35 = vpack.c.bf16 %v3249_v34, %v3246_v20  ;;  %v3251_v45 = vpop.f32.mrb[35].mxu0 }
 0x714   :  { %13307 = vmatprep.mubr.msk.bf16.mxu1 %vm3397_vm1, %v5310_v35 }
 0x717   :  { %v3254_v18 = vpop.f32.mrb[36].mxu0 }
 0x718   :  { %v3256_v48 = vpop.f32.mrb[37].mxu0 }
 0x719   :  { %v3257_v24 = vpop.f32.mrb[38].mxu0 }
 0x71a   :  { %v5311_v22 = vpack.c.bf16 %v3257_v24, %v3254_v18  ;;  %v3259_v13 = vpop.f32.mrb[39].mxu0 }
 0x71c   :  { %13308 = vmatmul.mubr.msk.bf16.gmra.mrb[16].mxu1 %vm3397_vm1, %v5311_v22 }
 0x71f   :  { %v3262_v8 = vpop.f32.mrb[40].mxu0 }
 0x720   :  { %v3264_v63 = vpop.f32.mrb[41].mxu0 }
 0x721   :  { %v3265_v26 = vpop.f32.mrb[42].mxu0 }
 0x722   :  { %v5312_v3 = vpack.c.bf16 %v3265_v26, %v3262_v8  ;;  %v3267_v29 = vpop.f32.mrb[43].mxu0 }
 0x724   :  { %13311 = vmatprep.mubr.msk.bf16.mxu1 %vm3397_vm1, %v5312_v3 }
 0x727   :  { %v3270_v1 = vpop.f32.mrb[44].mxu0 }
 0x728   :  { %v3272_v17 = vpop.f32.mrb[45].mxu0 }
 0x729   :  { %v3273_v9 = vpop.f32.mrb[46].mxu0 }
 0x72a   :  { %v5313_v14 = vpack.c.bf16 %v3273_v9, %v3270_v1  ;;  %v3275_v40 = vpop.f32.mrb[47].mxu0 }
 0x72c   :  { %13312 = vmatmul.mubr.msk.bf16.gmra.mrb[20].mxu1 %vm3397_vm1, %v5313_v14 }
 0x72f   :  { %v3278_v21 = vpop.f32.mrb[48].mxu0 }
 0x730   :  { %v3280_v52 = vpop.f32.mrb[49].mxu0 }
 0x731   :  { %v3281_v5 = vpop.f32.mrb[50].mxu0 }
 0x732   :  { %v5314_v19 = vpack.c.bf16 %v3281_v5, %v3278_v21  ;;  %v3283_v54 = vpop.f32.mrb[51].mxu0 }
 0x734   :  { %13315 = vmatprep.mubr.msk.bf16.mxu1 %vm3397_vm1, %v5314_v19 }
 0x737   :  { %v3286_v59 = vpop.f32.mrb[52].mxu0 }
 0x738   :  { %v3288_v56 = vpop.f32.mrb[53].mxu0 }
 0x739   :  { %v3289_v0 = vpop.f32.mrb[54].mxu0 }
 0x73a   :  { %v5315_v36 = vpack.c.bf16 %v3289_v0, %v3286_v59  ;;  %v3291_v55 = vpop.f32.mrb[55].mxu0 }
 0x73c   :  { %13316 = vmatmul.mubr.msk.bf16.gmra.mrb[24].mxu1 %vm3397_vm1, %v5315_v36 }
 0x73f   :  { %v3294_v50 = vpop.f32.mrb[56].mxu0 }
 0x740   :  { %v3296_v31 = vpop.f32.mrb[57].mxu0 }
 0x741   :  { %v3297_v12 = vpop.f32.mrb[58].mxu0 }
 0x742   :  { %v5316_v27 = vpack.c.bf16 %v3297_v12, %v3294_v50  ;;  %v3299_v57 = vpop.f32.mrb[59].mxu0 }
 0x744   :  { %13319 = vmatprep.mubr.msk.bf16.mxu1 %vm3397_vm1, %v5316_v27 }
 0x747   :  { %v3302_v28 = vpop.f32.mrb[60].mxu0 }
 0x748   :  { %v3304_v47 = vpop.f32.mrb[61].mxu0 }
 0x749   :  { %v3305_v11 = vpop.f32.mrb[62].mxu0 }
 0x74a   :  { %v5317_v33 = vpack.c.bf16 %v3305_v11, %v3302_v28  ;;  %v3307_v25 = vpop.f32.mrb[63].mxu0 }
 0x74c   :  { %13320 = vmatmul.mubr.msk.bf16.gmra.mrb[28].mxu1 %vm3397_vm1, %v5317_v33 }
 0x74d   :  { %6326 = vmatprep.mubr.bf16.mxu1 %v14351_v10 }
 0x7af   :  { %v13293_v30 = vpop.f32.mrb[0].mxu1 }
 0x7b0   :  { %v5648_v62 = vadd.f32 %v13293_v30, %v16614_v49  ;;  %v5416_v39 = vpop.f32.mrb[1].mxu1 }
 0x7b1   :  { %v5646_v23 = vadd.f32 %v16614_v49, %v5416_v39  ;;  %v13294_v61 = vpop.f32.mrb[2].mxu1 }
 0x7b2   :  { %v5680_v37 = vmax.f32 %v5648_v62, 0.0  ;;  %v5649_v46 = vadd.f32 %v13294_v61, %v16614_v49  ;;  %v5419_v7 = vpop.f32.mrb[3].mxu1 }
 0x7b3   :  { %v5678_v4 = vmax.f32 %v5646_v23, 0.0  ;;  %v5647_v44 = vadd.f32 %v16614_v49, %v5419_v7 }
 0x7b4   :  { %v5681_v51 = vmax.f32 %v5649_v46, 0.0  ;;  %v5712_v32 = vmin.f32 %v5680_v37, 6.0 }
 0x7b5   :  { %v5679_v2 = vmax.f32 %v5647_v44, 0.0  ;;  %v5710_v42 = vmin.f32 %v5678_v4, 6.0 }
 0x7b6   :  { %v5713_v53 = vmin.f32 %v5681_v51, 6.0 }
 0x7b7   :  { %v5711_v43 = vmin.f32 %v5679_v2, 6.0 }
 0x7b8   :  { %v5815_v6 = vpack.c.bf16 %v5713_v53, %v5712_v32 }
 0x7b9   :  { %v5814_v38 = vpack.c.bf16 %v5711_v43, %v5710_v42 }
 0x7bb   :  { %6191 = vmatpush1.bf16.msra.mxu0 %v5814_v38  ;;  %13531 = vmatpush1.bf16.msra.mxu1 %v5814_v38 }
 0x7bc   :  { %6192 = vmatprep.subr.bf16.mxu0 %v18117_v16  ;;  %13516 = vmatprep.subr.bf16.mxu1 %v18117_v16 }
 0x7bf   :  { %v13297_v60 = vpop.f32.mrb[4].mxu1  ;;  %6193 = vmatpush1.bf16.msra.mxu0 %v5815_v6  ;;  %13532 = vmatpush1.bf16.msra.mxu1 %v5815_v6 }
 0x7c0   :  { %v5652_v41 = vadd.f32 %v13297_v60, %v16614_v49  ;;  %v5432_v20 = vpop.f32.mrb[5].mxu1  ;;  %6194 = vmatprep.subr.bf16.mxu0 %v18117_v16  ;;  %13517 = vmatprep.subr.bf16.mxu1 %v18117_v16 }
 0x7c1   :  { %v5650_v58 = vadd.f32 %v16614_v49, %v5432_v20  ;;  %v13298_v34 = vpop.f32.mrb[6].mxu1 }
 0x7c2   :  { %v5684_v35 = vmax.f32 %v5652_v41, 0.0  ;;  %v5653_v45 = vadd.f32 %v13298_v34, %v16614_v49  ;;  %v5435_v18 = vpop.f32.mrb[7].mxu1 }
 0x7c3   :  { %v5682_v48 = vmax.f32 %v5650_v58, 0.0  ;;  %v5651_v24 = vadd.f32 %v16614_v49, %v5435_v18 }
 0x7c4   :  { %v5685_v22 = vmax.f32 %v5653_v45, 0.0  ;;  %v5716_v8 = vmin.f32 %v5684_v35, 6.0 }
 0x7c5   :  { %v5683_v13 = vmax.f32 %v5651_v24, 0.0  ;;  %v5714_v26 = vmin.f32 %v5682_v48, 6.0 }
 0x7c6   :  { %v5717_v63 = vmin.f32 %v5685_v22, 6.0 }
 0x7c7   :  { %v5715_v3 = vmin.f32 %v5683_v13, 6.0 }
 0x7c8   :  { %v5817_v29 = vpack.c.bf16 %v5717_v63, %v5716_v8 }
 0x7c9   :  { %v5816_v1 = vpack.c.bf16 %v5715_v3, %v5714_v26 }
 0x7cb   :  { %6195 = vmatpush1.bf16.msra.mxu0 %v5816_v1  ;;  %13533 = vmatpush1.bf16.msra.mxu1 %v5816_v1 }
 0x7cc   :  { %6196 = vmatprep.subr.bf16.mxu0 %v18117_v16  ;;  %13518 = vmatprep.subr.bf16.mxu1 %v18117_v16 }
 0x7cf   :  { %v13301_v17 = vpop.f32.mrb[8].mxu1  ;;  %6197 = vmatpush1.bf16.msra.mxu0 %v5817_v29  ;;  %13534 = vmatpush1.bf16.msra.mxu1 %v5817_v29 }
 0x7d0   :  { %v5656_v9 = vadd.f32 %v13301_v17, %v16614_v49  ;;  %v5448_v14 = vpop.f32.mrb[9].mxu1  ;;  %6198 = vmatprep.subr.bf16.mxu0 %v18117_v16  ;;  %13519 = vmatprep.subr.bf16.mxu1 %v18117_v16 }
 0x7d1   :  { %v5654_v40 = vadd.f32 %v16614_v49, %v5448_v14  ;;  %v13302_v21 = vpop.f32.mrb[10].mxu1 }
 0x7d2   :  { %v5688_v52 = vmax.f32 %v5656_v9, 0.0  ;;  %v5657_v5 = vadd.f32 %v13302_v21, %v16614_v49  ;;  %v5451_v19 = vpop.f32.mrb[11].mxu1 }
 0x7d3   :  { %v5686_v54 = vmax.f32 %v5654_v40, 0.0  ;;  %v5655_v59 = vadd.f32 %v16614_v49, %v5451_v19 }
 0x7d4   :  { %v5689_v56 = vmax.f32 %v5657_v5, 0.0  ;;  %v5720_v36 = vmin.f32 %v5688_v52, 6.0 }
 0x7d5   :  { %v5687_v0 = vmax.f32 %v5655_v59, 0.0  ;;  %v5718_v50 = vmin.f32 %v5686_v54, 6.0 }
 0x7d6   :  { %v5721_v55 = vmin.f32 %v5689_v56, 6.0 }
 0x7d7   :  { %v5719_v31 = vmin.f32 %v5687_v0, 6.0 }
 0x7d8   :  { %v5819_v12 = vpack.c.bf16 %v5721_v55, %v5720_v36 }
 0x7d9   :  { %v5818_v27 = vpack.c.bf16 %v5719_v31, %v5718_v50 }
 0x7db   :  { %6199 = vmatpush1.bf16.msra.mxu0 %v5818_v27  ;;  %13535 = vmatpush1.bf16.msra.mxu1 %v5818_v27 }
 0x7dc   :  { %6200 = vmatprep.subr.bf16.mxu0 %v18117_v16  ;;  %13520 = vmatprep.subr.bf16.mxu1 %v18117_v16 }
 0x7df   :  { %v13305_v57 = vpop.f32.mrb[12].mxu1  ;;  %6201 = vmatpush1.bf16.msra.mxu0 %v5819_v12  ;;  %13536 = vmatpush1.bf16.msra.mxu1 %v5819_v12 }
 0x7e0   :  { %v5660_v28 = vadd.f32 %v13305_v57, %v16614_v49  ;;  %v5464_v47 = vpop.f32.mrb[13].mxu1  ;;  %6202 = vmatprep.subr.bf16.mxu0 %v18117_v16  ;;  %13521 = vmatprep.subr.bf16.mxu1 %v18117_v16 }
 0x7e1   :  { %v5658_v11 = vadd.f32 %v16614_v49, %v5464_v47  ;;  %v13306_v33 = vpop.f32.mrb[14].mxu1 }
 0x7e2   :  { %v5692_v25 = vmax.f32 %v5660_v28, 0.0  ;;  %v5661_v30 = vadd.f32 %v13306_v33, %v16614_v49  ;;  %v5467_v10 = vpop.f32.mrb[15].mxu1 }
 0x7e3   :  { %v5690_v62 = vmax.f32 %v5658_v11, 0.0  ;;  %v5659_v39 = vadd.f32 %v16614_v49, %v5467_v10 }
 0x7e4   :  { %v5693_v15 = vmax.f32 %v5661_v30, 0.0  ;;  %v5724_v61 = vmin.f32 %v5692_v25, 6.0 }
 0x7e5   :  { %v5691_v23 = vmax.f32 %v5659_v39, 0.0  ;;  %v5722_v46 = vmin.f32 %v5690_v62, 6.0 }
 0x7e6   :  { %v5725_v37 = vmin.f32 %v5693_v15, 6.0 }
 0x7e7   :  { %v5723_v7 = vmin.f32 %v5691_v23, 6.0 }
 0x7e8   :  { %v5821_v4 = vpack.c.bf16 %v5725_v37, %v5724_v61 }
 0x7e9   :  { %v5820_v44 = vpack.c.bf16 %v5723_v7, %v5722_v46 }
 0x7eb   :  { %6203 = vmatpush1.bf16.msra.mxu0 %v5820_v44  ;;  %13537 = vmatpush1.bf16.msra.mxu1 %v5820_v44 }
 0x7ec   :  { %6204 = vmatprep.subr.bf16.mxu0 %v18117_v16  ;;  %13522 = vmatprep.subr.bf16.mxu1 %v18117_v16 }
 0x7ef   :  { %v13309_v51 = vpop.f32.mrb[16].mxu1  ;;  %6205 = vmatpush1.bf16.msra.mxu0 %v5821_v4  ;;  %13538 = vmatpush1.bf16.msra.mxu1 %v5821_v4 }
 0x7f0   :  { %v5664_v2 = vadd.f32 %v13309_v51, %v16614_v49  ;;  %v5480_v32 = vpop.f32.mrb[17].mxu1  ;;  %6206 = vmatprep.subr.bf16.mxu0 %v18117_v16  ;;  %13523 = vmatprep.subr.bf16.mxu1 %v18117_v16 }
 0x7f1   :  { %v5662_v53 = vadd.f32 %v16614_v49, %v5480_v32  ;;  %v13310_v42 = vpop.f32.mrb[18].mxu1 }
 0x7f2   :  { %v5696_v43 = vmax.f32 %v5664_v2, 0.0  ;;  %v5665_v6 = vadd.f32 %v13310_v42, %v16614_v49  ;;  %v5483_v38 = vpop.f32.mrb[19].mxu1 }
 0x7f3   :  { %v5694_v60 = vmax.f32 %v5662_v53, 0.0  ;;  %v5663_v41 = vadd.f32 %v16614_v49, %v5483_v38 }
 0x7f4   :  { %v5697_v20 = vmax.f32 %v5665_v6, 0.0  ;;  %v5728_v34 = vmin.f32 %v5696_v43, 6.0 }
 0x7f5   :  { %v5695_v58 = vmax.f32 %v5663_v41, 0.0  ;;  %v5726_v45 = vmin.f32 %v5694_v60, 6.0 }
 0x7f6   :  { %v5729_v35 = vmin.f32 %v5697_v20, 6.0  ;;  %v14349_v20 = vld [vmem:[#allocation7 + $0xd0] ss:$8 sps:$4 sm:$0xff]  }
 0x7f7   :  { %v5727_v18 = vmin.f32 %v5695_v58, 6.0  ;;  %v14352_v58 = vld [vmem:[#allocation7] ss:$8 sps:$4 sm:$0xff]  }
 0x7f8   :  { %v5823_v48 = vpack.c.bf16 %v5729_v35, %v5728_v34  ;;  %v14355_v34 = vld [vmem:[#allocation7 + $0xe4] ss:$8 sps:$4 sm:$0xff]   ;;  %v14357_v35 = vld [vmem:[#allocation7 + $0xe0] ss:$8 sps:$4 sm:$0xff]  }
 0x7f9   :  { %v5822_v24 = vpack.c.bf16 %v5727_v18, %v5726_v45  ;;  %v14358_v45 = vld [vmem:[#allocation7 + $0x10] ss:$8 sps:$4 sm:$0xff]   ;;  %v14361_v18 = vld [vmem:[#allocation7 + $0xf4] ss:$8 sps:$4 sm:$0xff]  }
 0x7fb   :  { %6207 = vmatpush1.bf16.msra.mxu0 %v5822_v24  ;;  %13539 = vmatpush1.bf16.msra.mxu1 %v5822_v24  ;;  %v14363_v24 = vld [vmem:[#allocation7 + $0xf0] ss:$8 sps:$4 sm:$0xff]  }
 0x7fc   :  { %6208 = vmatprep.subr.bf16.mxu0 %v18117_v16  ;;  %13524 = vmatprep.subr.bf16.mxu1 %v18117_v16 }
 0x7ff   :  { %v13313_v22 = vpop.f32.mrb[20].mxu1  ;;  %6209 = vmatpush1.bf16.msra.mxu0 %v5823_v48  ;;  %13540 = vmatpush1.bf16.msra.mxu1 %v5823_v48  ;;  %v14366_v48 = vld [vmem:[#allocation7 + $0x24] ss:$8 sps:$4 sm:$0xff]  }
 0x800   :  { %v5668_v13 = vadd.f32 %v13313_v22, %v16614_v49  ;;  %v5496_v8 = vpop.f32.mrb[21].mxu1  ;;  %6210 = vmatprep.subr.bf16.mxu0 %v18117_v16  ;;  %13525 = vmatprep.subr.bf16.mxu1 %v18117_v16  ;;  %v14364_v22 = vld [vmem:[#allocation7 + $0x20] ss:$8 sps:$4 sm:$0xff]  }
 0x801   :  { %v5666_v63 = vadd.f32 %v16614_v49, %v5496_v8  ;;  %v13314_v26 = vpop.f32.mrb[22].mxu1  ;;  %v14372_v8 = vld [vmem:[#allocation7 + $0x34] ss:$8 sps:$4 sm:$0xff]  }
 0x802   :  { %v5700_v3 = vmax.f32 %v5668_v13, 0.0  ;;  %v5669_v29 = vadd.f32 %v13314_v26, %v16614_v49  ;;  %v5499_v1 = vpop.f32.mrb[23].mxu1  ;;  %v14367_v13 = vld [vmem:[#allocation7 + $0x104] ss:$8 sps:$4 sm:$0xff]   ;;  %v14370_v26 = vld [vmem:[#allocation7 + $0x30] ss:$8 sps:$4 sm:$0xff]  }
 0x803   :  { %v5698_v17 = vmax.f32 %v5666_v63, 0.0  ;;  %v5667_v9 = vadd.f32 %v16614_v49, %v5499_v1  ;;  %v14369_v63 = vld [vmem:[#allocation7 + $0x100] ss:$8 sps:$4 sm:$0xff]   ;;  %v14375_v1 = vld [vmem:[#allocation7 + $0x110] ss:$8 sps:$4 sm:$0xff]  }
 0x804   :  { %v5701_v14 = vmax.f32 %v5669_v29, 0.0  ;;  %v5732_v21 = vmin.f32 %v5700_v3, 6.0  ;;  %v14373_v3 = vld [vmem:[#allocation7 + $0x114] ss:$8 sps:$4 sm:$0xff]   ;;  %v14378_v29 = vld [vmem:[#allocation7 + $0x44] ss:$8 sps:$4 sm:$0xff]  }
 0x805   :  { %v5699_v40 = vmax.f32 %v5667_v9, 0.0  ;;  %v5730_v5 = vmin.f32 %v5698_v17, 6.0  ;;  %v14376_v17 = vld [vmem:[#allocation7 + $0x40] ss:$8 sps:$4 sm:$0xff]   ;;  %v14379_v9 = vld [vmem:[#allocation7 + $0x124] ss:$8 sps:$4 sm:$0xff]  }
 0x806   :  { %v5733_v52 = vmin.f32 %v5701_v14, 6.0  ;;  %v14384_v14 = vld [vmem:[#allocation7 + $0x54] ss:$8 sps:$4 sm:$0xff]  }
 0x807   :  { %v5731_v19 = vmin.f32 %v5699_v40, 6.0  ;;  %v14381_v40 = vld [vmem:[#allocation7 + $0x120] ss:$8 sps:$4 sm:$0xff]  }
 0x808   :  { %v5825_v54 = vpack.c.bf16 %v5733_v52, %v5732_v21  ;;  %v14382_v21 = vld [vmem:[#allocation7 + $0x50] ss:$8 sps:$4 sm:$0xff]   ;;  %v14385_v52 = vld [vmem:[#allocation7 + $0x134] ss:$8 sps:$4 sm:$0xff]  }
 0x809   :  { %v5824_v59 = vpack.c.bf16 %v5731_v19, %v5730_v5  ;;  %v14390_v5 = vld [vmem:[#allocation7 + $0x64] ss:$8 sps:$4 sm:$0xff]   ;;  %v14387_v19 = vld [vmem:[#allocation7 + $0x130] ss:$8 sps:$4 sm:$0xff]  }
 0x80b   :  { %6211 = vmatpush1.bf16.msra.mxu0 %v5824_v59  ;;  %13541 = vmatpush1.bf16.msra.mxu1 %v5824_v59  ;;  %v14391_v59 = vld [vmem:[#allocation7 + $0x144] ss:$8 sps:$4 sm:$0xff]  }
 0x80c   :  { %6212 = vmatprep.subr.bf16.mxu0 %v18117_v16  ;;  %13526 = vmatprep.subr.bf16.mxu1 %v18117_v16 }
 0x80f   :  { %v13317_v56 = vpop.f32.mrb[24].mxu1  ;;  %6213 = vmatpush1.bf16.msra.mxu0 %v5825_v54  ;;  %13542 = vmatpush1.bf16.msra.mxu1 %v5825_v54  ;;  %v14388_v54 = vld [vmem:[#allocation7 + $0x60] ss:$8 sps:$4 sm:$0xff]  }
 0x810   :  { %v5672_v0 = vadd.f32 %v13317_v56, %v16614_v49  ;;  %v5512_v36 = vpop.f32.mrb[25].mxu1  ;;  %6214 = vmatprep.subr.bf16.mxu0 %v18117_v16  ;;  %13527 = vmatprep.subr.bf16.mxu1 %v18117_v16  ;;  %v14396_v56 = vld [vmem:[#allocation7 + $0x74] ss:$8 sps:$4 sm:$0xff]  }
 0x811   :  { %v5670_v55 = vadd.f32 %v16614_v49, %v5512_v36  ;;  %v13318_v50 = vpop.f32.mrb[26].mxu1  ;;  %v14394_v36 = vld [vmem:[#allocation7 + $0x70] ss:$8 sps:$4 sm:$0xff]  }
 0x812   :  { %v5704_v31 = vmax.f32 %v5672_v0, 0.0  ;;  %v5673_v12 = vadd.f32 %v13318_v50, %v16614_v49  ;;  %v5515_v27 = vpop.f32.mrb[27].mxu1  ;;  %v14393_v0 = vld [vmem:[#allocation7 + $0x140] ss:$8 sps:$4 sm:$0xff]   ;;  %v14402_v50 = vld [vmem:[#allocation7 + $0x84] ss:$8 sps:$4 sm:$0xff]  }
 0x813   :  { %v5702_v57 = vmax.f32 %v5670_v55, 0.0  ;;  %v5671_v28 = vadd.f32 %v16614_v49, %v5515_v27  ;;  %v14397_v55 = vld [vmem:[#allocation7 + $0x154] ss:$8 sps:$4 sm:$0xff]   ;;  %v14403_v27 = vld [vmem:[#allocation7 + $0x164] ss:$8 sps:$4 sm:$0xff]  }
 0x814   :  { %v5705_v47 = vmax.f32 %v5673_v12, 0.0  ;;  %v5736_v33 = vmin.f32 %v5704_v31, 6.0  ;;  %v14399_v31 = vld [vmem:[#allocation7 + $0x150] ss:$8 sps:$4 sm:$0xff]   ;;  %v14400_v12 = vld [vmem:[#allocation7 + $0x80] ss:$8 sps:$4 sm:$0xff]  }
 0x815   :  { %v5703_v11 = vmax.f32 %v5671_v28, 0.0  ;;  %v5734_v30 = vmin.f32 %v5702_v57, 6.0  ;;  %v14408_v57 = vld [vmem:[#allocation7 + $0x94] ss:$8 sps:$4 sm:$0xff]   ;;  %v14405_v28 = vld [vmem:[#allocation7 + $0x160] ss:$8 sps:$4 sm:$0xff]  }
 0x816   :  { %v5737_v25 = vmin.f32 %v5705_v47, 6.0  ;;  %v14406_v47 = vld [vmem:[#allocation7 + $0x90] ss:$8 sps:$4 sm:$0xff]  }
 0x817   :  { %v5735_v10 = vmin.f32 %v5703_v11, 6.0  ;;  %v14409_v11 = vld [vmem:[#allocation7 + $0x174] ss:$8 sps:$4 sm:$0xff]  }
 0x818   :  { %v5827_v62 = vpack.c.bf16 %v5737_v25, %v5736_v33  ;;  %v14414_v33 = vld [vmem:[#allocation7 + $0xa4] ss:$8 sps:$4 sm:$0xff]   ;;  %v14411_v25 = vld [vmem:[#allocation7 + $0x170] ss:$8 sps:$4 sm:$0xff]  }
 0x819   :  { %v5826_v39 = vpack.c.bf16 %v5735_v10, %v5734_v30  ;;  %v14412_v30 = vld [vmem:[#allocation7 + $0xa0] ss:$8 sps:$4 sm:$0xff]   ;;  %v14415_v10 = vld [vmem:[#allocation7 + $0x184] ss:$8 sps:$4 sm:$0xff]  }
 0x81b   :  { %6215 = vmatpush1.bf16.msra.mxu0 %v5826_v39  ;;  %13543 = vmatpush1.bf16.msra.mxu1 %v5826_v39  ;;  %v14417_v39 = vld [vmem:[#allocation7 + $0x180] ss:$8 sps:$4 sm:$0xff]  }
 0x81c   :  { %6216 = vmatprep.subr.bf16.mxu0 %v18117_v16  ;;  %13528 = vmatprep.subr.bf16.mxu1 %v18117_v16 }
 0x81f   :  { %v13321_v15 = vpop.f32.mrb[28].mxu1  ;;  %6217 = vmatpush1.bf16.msra.mxu0 %v5827_v62  ;;  %13544 = vmatpush1.bf16.msra.mxu1 %v5827_v62  ;;  %v14420_v62 = vld [vmem:[#allocation7 + $0xb4] ss:$8 sps:$4 sm:$0xff]  }
 0x820   :  { %v5676_v23 = vadd.f32 %v13321_v15, %v16614_v49  ;;  %v5528_v61 = vpop.f32.mrb[29].mxu1  ;;  %6218 = vmatprep.subr.bf16.mxu0 %v18117_v16  ;;  %13529 = vmatprep.subr.bf16.mxu1 %v18117_v16  ;;  %v14418_v15 = vld [vmem:[#allocation7 + $0xb0] ss:$8 sps:$4 sm:$0xff]  }
 0x821   :  { %v5674_v37 = vadd.f32 %v16614_v49, %v5528_v61  ;;  %v13322_v46 = vpop.f32.mrb[30].mxu1  ;;  %v14426_v61 = vld [vmem:[#allocation7 + $0xc4] ss:$8 sps:$4 sm:$0xff]  }
 0x822   :  { %v5708_v7 = vmax.f32 %v5676_v23, 0.0  ;;  %v5677_v4 = vadd.f32 %v13322_v46, %v16614_v49  ;;  %v5531_v44 = vpop.f32.mrb[31].mxu1  ;;  %v14421_v23 = vld [vmem:[#allocation7 + $0x194] ss:$8 sps:$4 sm:$0xff]   ;;  %v14424_v46 = vld [vmem:[#allocation7 + $0xc0] ss:$8 sps:$4 sm:$0xff]  }
 0x823   :  { %v5706_v51 = vmax.f32 %v5674_v37, 0.0  ;;  %v5675_v2 = vadd.f32 %v16614_v49, %v5531_v44  ;;  %v14360_v49 = vld [vmem:[#allocation7 + $0x14] ss:$8 sps:$4 sm:$0xff]   ;;  %v14423_v37 = vld [vmem:[#allocation7 + $0x190] ss:$8 sps:$4 sm:$0xff]  }
 0x824   :  { %v5709_v32 = vmax.f32 %v5677_v4, 0.0  ;;  %v5740_v42 = vmin.f32 %v5708_v7, 6.0  ;;  %v14427_v7 = vld [vmem:[#allocation7 + $0x1a4] ss:$8 sps:$4 sm:$0xff]   ;;  %v14429_v4 = vld [vmem:[#allocation7 + $0x1a0] ss:$8 sps:$4 sm:$0xff]  }
 0x825   :  { %v5707_v53 = vmax.f32 %v5675_v2, 0.0  ;;  %v5738_v6 = vmin.f32 %v5706_v51, 6.0  ;;  %v14430_v44 = vld [vmem:[#allocation7 + $0x1b4] ss:$8 sps:$4 sm:$0xff]   ;;  %v14432_v51 = vld [vmem:[#allocation7 + $0x1b0] ss:$8 sps:$4 sm:$0xff]  }
 0x826   :  { %v5741_v43 = vmin.f32 %v5709_v32, 6.0  ;;  %v14433_v2 = vld [vmem:[#allocation7 + $0x1c4] ss:$8 sps:$4 sm:$0xff]   ;;  %v14435_v32 = vld [vmem:[#allocation7 + $0x1c0] ss:$8 sps:$4 sm:$0xff]  }
 0x827   :  { %v5739_v38 = vmin.f32 %v5707_v53, 6.0  ;;  %v14436_v53 = vld [vmem:[#allocation7 + $0x1d4] ss:$8 sps:$4 sm:$0xff]  }
 0x828   :  { %v5829_v60 = vpack.c.bf16 %v5741_v43, %v5740_v42  ;;  %v14438_v42 = vld [vmem:[#allocation7 + $0x1d0] ss:$8 sps:$4 sm:$0xff]   ;;  %v14439_v43 = vld [vmem:[#allocation7 + $0x1e4] ss:$8 sps:$4 sm:$0xff]  }
 0x829   :  { %v5828_v41 = vpack.c.bf16 %v5739_v38, %v5738_v6  ;;  %v14441_v6 = vld [vmem:[#allocation7 + $0x1e0] ss:$8 sps:$4 sm:$0xff]   ;;  %v14442_v38 = vld [vmem:[#allocation7 + $0x1f4] ss:$8 sps:$4 sm:$0xff]  }
 0x82b   :  { %6219 = vmatpush1.bf16.msra.mxu0 %v5828_v41  ;;  %13545 = vmatpush1.bf16.msra.mxu1 %v5828_v41  ;;  %v14445_v41 = vld [vmem:[#allocation7 + $0x204] ss:$8 sps:$4 sm:$0xff]  }
 0x82c   :  { %6220 = vmatprep.subr.bf16.mxu0 %v18117_v16  ;;  %13530 = vmatprep.subr.bf16.mxu1 %v18117_v16 }
 0x82f   :  { %6221 = vmatpush1.bf16.msra.mxu0 %v5829_v60  ;;  %13546 = vmatpush1.bf16.msra.mxu1 %v5829_v60  ;;  %v14444_v60 = vld [vmem:[#allocation7 + $0x1f0] ss:$8 sps:$4 sm:$0xff]  }
 0x832   :  { %6327 = vmatmul.mubr.bf16.vlgmr.msra.gmra.mrb[32].mxu1 %v14349_v20  ;;  %6223 = vmatmul.mubr.bf16.vlgmr.msra.gmra.mrb[64].mxu0 %v14352_v58  ;;  %v14447_v20 = vld [vmem:[#allocation7 + $0x200] ss:$8 sps:$4 sm:$0xff]   ;;  %v14448_v58 = vld [vmem:[#allocation7 + $0x214] ss:$8 sps:$4 sm:$0xff]  }
 0x833   :  { %6334 = vmatprep.mubr.bf16.mxu1 %v14355_v34  ;;  %6230 = vmatprep.mubr.bf16.mxu0 %v14360_v49  ;;  %v14450_v34 = vld [vmem:[#allocation7 + $0x210] ss:$8 sps:$4 sm:$0xff]   ;;  %v14451_v49 = vld [vmem:[#allocation7 + $0x224] ss:$8 sps:$4 sm:$0xff]  }
 0x83a   :  { %6335 = vmatmul.mubr.bf16.gmra.mrb[36].mxu1 %v14357_v35  ;;  %6231 = vmatmul.mubr.bf16.gmra.mrb[68].mxu0 %v14358_v45  ;;  %v14453_v35 = vld [vmem:[#allocation7 + $0x220] ss:$8 sps:$4 sm:$0xff]   ;;  %v14454_v45 = vld [vmem:[#allocation7 + $0x234] ss:$8 sps:$4 sm:$0xff]  }
 0x83b   :  { %6342 = vmatprep.mubr.bf16.mxu1 %v14361_v18  ;;  %6238 = vmatprep.mubr.bf16.mxu0 %v14366_v48  ;;  %v14456_v18 = vld [vmem:[#allocation7 + $0x230] ss:$8 sps:$4 sm:$0xff]   ;;  %v6512_v48 = vld [vmem:[#allocation10 + $0x8] sm:$0xff] }
 0x842   :  { %6343 = vmatmul.mubr.bf16.gmra.mrb[40].mxu1 %v14363_v24  ;;  %6239 = vmatmul.mubr.bf16.gmra.mrb[72].mxu0 %v14364_v22  ;;  %v6551_v24 = vld [vmem:[#allocation9] sm:$0xff] }
 0x843   :  { %6350 = vmatprep.mubr.bf16.mxu1 %v14367_v13  ;;  %6246 = vmatprep.mubr.bf16.mxu0 %v14372_v8  ;;  %v6552_v13 = vld [vmem:[#allocation9 + $0x8] sm:$0xff] }
 0x84a   :  { %6351 = vmatmul.mubr.bf16.gmra.mrb[44].mxu1 %v14369_v63  ;;  %6247 = vmatmul.mubr.bf16.gmra.mrb[76].mxu0 %v14370_v26  ;;  %v6577_v63 = vld [vmem:[#allocation9 + $0xd0] sm:$0xff]  ;;  %v6578_v26 = vld [vmem:[#allocation9 + $0xd8] sm:$0xff] }
 0x84b   :  { %6358 = vmatprep.mubr.bf16.mxu1 %v14373_v3  ;;  %6254 = vmatprep.mubr.bf16.mxu0 %v14378_v29 }
 0x852   :  { %6359 = vmatmul.mubr.bf16.gmra.mrb[48].mxu1 %v14375_v1  ;;  %6255 = vmatmul.mubr.bf16.gmra.mrb[80].mxu0 %v14376_v17 }
 0x853   :  { %6366 = vmatprep.mubr.bf16.mxu1 %v14379_v9  ;;  %6262 = vmatprep.mubr.bf16.mxu0 %v14384_v14 }
 0x85a   :  { %6367 = vmatmul.mubr.bf16.gmra.mrb[52].mxu1 %v14381_v40  ;;  %6263 = vmatmul.mubr.bf16.gmra.mrb[84].mxu0 %v14382_v21 }
 0x85b   :  { %6374 = vmatprep.mubr.bf16.mxu1 %v14385_v52  ;;  %6270 = vmatprep.mubr.bf16.mxu0 %v14390_v5 }
 0x862   :  { %6375 = vmatmul.mubr.bf16.gmra.mrb[56].mxu1 %v14387_v19  ;;  %6271 = vmatmul.mubr.bf16.gmra.mrb[88].mxu0 %v14388_v54 }
 0x863   :  { %6382 = vmatprep.mubr.bf16.mxu1 %v14391_v59  ;;  %6278 = vmatprep.mubr.bf16.mxu0 %v14396_v56  ;;  %v6553_v59 = vld [vmem:[#allocation9 + $0x10] sm:$0xff] }
 0x86a   :  { %6383 = vmatmul.mubr.bf16.gmra.mrb[60].mxu1 %v14393_v0  ;;  %6279 = vmatmul.mubr.bf16.gmra.mrb[92].mxu0 %v14394_v36  ;;  %v6554_v0 = vld [vmem:[#allocation9 + $0x18] sm:$0xff] }
 0x86b   :  { %6390 = vmatprep.mubr.bf16.mxu1 %v14397_v55  ;;  %6286 = vmatprep.mubr.bf16.mxu0 %v14402_v50  ;;  %v6579_v55 = vld [vmem:[#allocation9 + $0xe0] sm:$0xff]  ;;  %v6580_v50 = vld [vmem:[#allocation9 + $0xe8] sm:$0xff] }
 0x872   :  { %6391 = vmatmul.mubr.bf16.gmra.mrb[64].mxu1 %v14399_v31  ;;  %6287 = vmatmul.mubr.bf16.gmra.mrb[96].mxu0 %v14400_v12 }
 0x873   :  { %6398 = vmatprep.mubr.bf16.mxu1 %v14403_v27  ;;  %6294 = vmatprep.mubr.bf16.mxu0 %v14408_v57 }
 0x87a   :  { %6399 = vmatmul.mubr.bf16.gmra.mrb[68].mxu1 %v14405_v28  ;;  %6295 = vmatmul.mubr.bf16.gmra.mrb[100].mxu0 %v14406_v47 }
 0x87b   :  { %6406 = vmatprep.mubr.bf16.mxu1 %v14409_v11  ;;  %6302 = vmatprep.mubr.bf16.mxu0 %v14414_v33 }
 0x882   :  { %6407 = vmatmul.mubr.bf16.gmra.mrb[72].mxu1 %v14411_v25  ;;  %6303 = vmatmul.mubr.bf16.gmra.mrb[104].mxu0 %v14412_v30 }
 0x883   :  { %6414 = vmatprep.mubr.bf16.mxu1 %v14415_v10  ;;  %6310 = vmatprep.mubr.bf16.mxu0 %v14420_v62 }
 0x88a   :  { %6415 = vmatmul.mubr.bf16.gmra.mrb[76].mxu1 %v14417_v39  ;;  %6311 = vmatmul.mubr.bf16.gmra.mrb[108].mxu0 %v14418_v15  ;;  %v6555_v39 = vld [vmem:[#allocation9 + $0x20] sm:$0xff] }
 0x88b   :  { %6422 = vmatprep.mubr.bf16.mxu1 %v14421_v23  ;;  %6318 = vmatprep.mubr.bf16.mxu0 %v14426_v61  ;;  %v6556_v23 = vld [vmem:[#allocation9 + $0x28] sm:$0xff] }
 0x892   :  { %6423 = vmatmul.mubr.bf16.gmra.mrb[80].mxu1 %v14423_v37  ;;  %6319 = vmatmul.mubr.bf16.gmra.mrb[112].mxu0 %v14424_v46  ;;  %v6581_v37 = vld [vmem:[#allocation9 + $0xf0] sm:$0xff]  ;;  %v6582_v46 = vld [vmem:[#allocation9 + $0xf8] sm:$0xff] }
 0x893   :  { %6430 = vmatprep.mubr.bf16.mxu1 %v14427_v7 }
 0x89a   :  { %6431 = vmatmul.mubr.bf16.gmra.mrb[84].mxu1 %v14429_v4 }
 0x89b   :  { %6438 = vmatprep.mubr.bf16.mxu1 %v14430_v44 }
 0x8a2   :  { %6439 = vmatmul.mubr.bf16.gmra.mrb[88].mxu1 %v14432_v51 }
 0x8a3   :  { %6446 = vmatprep.mubr.bf16.mxu1 %v14433_v2 }
 0x8aa   :  { %6447 = vmatmul.mubr.bf16.gmra.mrb[92].mxu1 %v14435_v32 }
 0x8ab   :  { %6454 = vmatprep.mubr.bf16.mxu1 %v14436_v53 }
 0x8b2   :  { %6455 = vmatmul.mubr.bf16.gmra.mrb[96].mxu1 %v14438_v42 }
 0x8b3   :  { %6462 = vmatprep.mubr.bf16.mxu1 %v14439_v43 }
 0x8ba   :  { %6463 = vmatmul.mubr.bf16.gmra.mrb[100].mxu1 %v14441_v6 }
 0x8bb   :  { %6470 = vmatprep.mubr.bf16.mxu1 %v14442_v38 }
 0x8c2   :  { %6471 = vmatmul.mubr.bf16.gmra.mrb[104].mxu1 %v14444_v60 }
 0x8c3   :  { %6478 = vmatprep.mubr.bf16.mxu1 %v14445_v41  ;;  %v6557_v41 = vld [vmem:[#allocation9 + $0x30] sm:$0xff] }
 0x8ca   :  { %6479 = vmatmul.mubr.bf16.gmra.mrb[108].mxu1 %v14447_v20 }
 0x8cb   :  { %6486 = vmatprep.mubr.bf16.mxu1 %v14448_v58  ;;  %v6558_v58 = vld [vmem:[#allocation9 + $0x38] sm:$0xff] }
 0x8d2   :  { %6487 = vmatmul.mubr.bf16.gmra.mrb[112].mxu1 %v14450_v34 }
 0x8d3   :  { %6494 = vmatprep.mubr.bf16.mxu1 %v14451_v49  ;;  %v6583_v49 = vld [vmem:[#allocation9 + $0x100] sm:$0xff] }
 0x8da   :  { %6495 = vmatmul.mubr.bf16.gmra.mrb[116].mxu1 %v14453_v35  ;;  %v6584_v35 = vld [vmem:[#allocation9 + $0x108] sm:$0xff] }
 0x8db   :  { %6502 = vmatprep.mubr.bf16.mxu1 %v14454_v45 }
 0x8e2   :  { %6503 = vmatmul.mubr.bf16.gmra.mrb[120].mxu1 %v14456_v18 }
 0x8e3   :  { %6791 = vmatprep.mubr.f32.mxu1 %v6512_v48 }
 0x905   :  { %v6224_v22 = vpop.f32.mrb[64].mxu0  ;;  %v6328_v8 = vpop.f32.mrb[32].mxu1 }
 0x906   :  { %v16678_v3 = vmul.f32 %v6551_v24, %v6224_v22  ;;  %v6226_v29 = vpop.f32.mrb[65].mxu0  ;;  %v6330_v1 = vpop.f32.mrb[33].mxu1  ;;  %v16682_v21 = vmul.f32 %v6577_v63, %v6328_v8 }
 0x907   :  { %v6227_v17 = vpop.f32.mrb[66].mxu0  ;;  %v6331_v9 = vpop.f32.mrb[34].mxu1  ;;  %v6514_v1 = vld [vmem:[#allocation10 + $0x18] sm:$0xff] }
 0x908   :  { %v16680_v14 = vmul.f32 %v6552_v13, %v6227_v17  ;;  %v6229_v40 = vpop.f32.mrb[67].mxu0  ;;  %v16684_v52 = vmul.f32 %v6578_v26, %v6331_v9  ;;  %v6333_v5 = vpop.f32.mrb[35].mxu1  ;;  %6896 = vmatprep.mubr.f32.mxu0 %v6514_v1  ;;  %v6589_v1 = vld [vmem:[#allocation9 + $0x130] sm:$0xff] }
 0x909   :  { %v6559_v40 = vld [vmem:[#allocation9 + $0x40] sm:$0xff] }
 0x90a   :  { %v13353_v19 = vpack.c.bf16 %v16680_v14, %v16678_v3  ;;  %v13371_v54 = vpack.c.bf16 %v16684_v52, %v16682_v21  ;;  %v6572_v14 = vld [vmem:[#allocation9 + $0xa8] sm:$0xff]  ;;  %v6605_v52 = vld [vmem:[#allocation9 + $0x1b0] sm:$0xff] }
 0x90d   :  { %v6232_v56 = vpop.f32.mrb[68].mxu0  ;;  %v6336_v36 = vpop.f32.mrb[36].mxu1 }
 0x90e   :  { %v16690_v31 = vmul.f32 %v6553_v59, %v6232_v56  ;;  %v6234_v12 = vpop.f32.mrb[69].mxu0  ;;  %v6338_v27 = vpop.f32.mrb[37].mxu1  ;;  %v16694_v33 = vmul.f32 %v6579_v55, %v6336_v36  ;;  %v6560_v59 = vld [vmem:[#allocation9 + $0x48] sm:$0xff]  ;;  %v6586_v36 = vld [vmem:[#allocation9 + $0x118] sm:$0xff] }
 0x90f   :  { %v6235_v57 = vpop.f32.mrb[70].mxu0  ;;  %v6339_v28 = vpop.f32.mrb[38].mxu1 }
 0x910   :  { %v16692_v47 = vmul.f32 %v6554_v0, %v6235_v57  ;;  %v6237_v11 = vpop.f32.mrb[71].mxu0  ;;  %v16696_v25 = vmul.f32 %v6580_v50, %v6339_v28  ;;  %v6341_v30 = vpop.f32.mrb[39].mxu1  ;;  %v6585_v0 = vld [vmem:[#allocation9 + $0x110] sm:$0xff] }
 0x912   :  { %v13357_v10 = vpack.c.bf16 %v16692_v47, %v16690_v31  ;;  %v13375_v62 = vpack.c.bf16 %v16696_v25, %v16694_v33  ;;  %v6574_v47 = vld [vmem:[#allocation9 + $0xb8] sm:$0xff] }
 0x915   :  { %v6240_v15 = vpop.f32.mrb[72].mxu0  ;;  %v6344_v61 = vpop.f32.mrb[40].mxu1 }
 0x916   :  { %v16702_v7 = vmul.f32 %v6555_v39, %v6240_v15  ;;  %v6242_v4 = vpop.f32.mrb[73].mxu0  ;;  %v6346_v44 = vpop.f32.mrb[41].mxu1  ;;  %v16706_v42 = vmul.f32 %v6581_v37, %v6344_v61  ;;  %v6561_v37 = vld [vmem:[#allocation9 + $0x50] sm:$0xff] }
 0x917   :  { %v6243_v51 = vpop.f32.mrb[74].mxu0  ;;  %v6347_v2 = vpop.f32.mrb[42].mxu1  ;;  %v6562_v4 = vld [vmem:[#allocation9 + $0x58] sm:$0xff] }
 0x918   :  { %v16704_v32 = vmul.f32 %v6556_v23, %v6243_v51  ;;  %v6245_v53 = vpop.f32.mrb[75].mxu0  ;;  %v16708_v43 = vmul.f32 %v6582_v46, %v6347_v2  ;;  %v6349_v6 = vpop.f32.mrb[43].mxu1  ;;  %v6587_v51 = vld [vmem:[#allocation9 + $0x120] sm:$0xff]  ;;  %v6588_v2 = vld [vmem:[#allocation9 + $0x128] sm:$0xff] }
 0x91a   :  { %v13361_v38 = vpack.c.bf16 %v16704_v32, %v16702_v7  ;;  %v13379_v60 = vpack.c.bf16 %v16708_v43, %v16706_v42  ;;  %v6576_v32 = vld [vmem:[#allocation9 + $0xc8] sm:$0xff] }
 0x91b   :  { %v6516_v42 = vld [vmem:[#allocation10 + $0x28] sm:$0xff] }
 0x91d   :  { %v6248_v20 = vpop.f32.mrb[76].mxu0  ;;  %v6352_v34 = vpop.f32.mrb[44].mxu1 }
 0x91e   :  { %v16714_v45 = vmul.f32 %v6557_v41, %v6248_v20  ;;  %v6250_v18 = vpop.f32.mrb[77].mxu0  ;;  %v6354_v48 = vpop.f32.mrb[45].mxu1  ;;  %v6655_v63 = vmul.f32 %v6583_v49, %v6352_v34 }
 0x91f   :  { %v6251_v24 = vpop.f32.mrb[78].mxu0  ;;  %v6355_v22 = vpop.f32.mrb[46].mxu1 }
 0x920   :  { %v16716_v13 = vmul.f32 %v6558_v58, %v6251_v24  ;;  %v6253_v8 = vpop.f32.mrb[79].mxu0  ;;  %v6656_v26 = vmul.f32 %v6584_v35, %v6355_v22  ;;  %v6357_v29 = vpop.f32.mrb[47].mxu1 }
 0x921   :  { %v6563_v8 = vld [vmem:[#allocation9 + $0x60] sm:$0xff] }
 0x922   :  { %v13365_v17 = vpack.c.bf16 %v16716_v13, %v16714_v45  ;;  %v16720_v9 = vpack.c.bf16 %v6656_v26, %v6655_v63  ;;  %v6564_v26 = vld [vmem:[#allocation9 + $0x68] sm:$0xff]  ;;  %v6603_v13 = vld [vmem:[#allocation9 + $0x1a0] sm:$0xff] }
 0x925   :  { %v6256_v5 = vpop.f32.mrb[80].mxu0  ;;  %v6360_v56 = vpop.f32.mrb[48].mxu1 }
 0x926   :  { %v16722_v55 = vmul.f32 %v6559_v40, %v6256_v5  ;;  %v6258_v50 = vpop.f32.mrb[81].mxu0  ;;  %v6362_v12 = vpop.f32.mrb[49].mxu1  ;;  %v6657_v30 = vmul.f32 %v6585_v0, %v6360_v56  ;;  %v6590_v40 = vld [vmem:[#allocation9 + $0x138] sm:$0xff] }
 0x927   :  { %v6259_v27 = vpop.f32.mrb[82].mxu0  ;;  %v6363_v57 = vpop.f32.mrb[50].mxu1 }
 0x928   :  { %v16724_v28 = vmul.f32 %v6560_v59, %v6259_v27  ;;  %v6261_v11 = vpop.f32.mrb[83].mxu0  ;;  %v6658_v39 = vmul.f32 %v6586_v36, %v6363_v57  ;;  %v6365_v15 = vpop.f32.mrb[51].mxu1 }
 0x929   :  { %v6565_v15 = vld [vmem:[#allocation9 + $0x70] sm:$0xff] }
 0x92a   :  { %v13369_v23 = vpack.c.bf16 %v16724_v28, %v16722_v55  ;;  %v16728_v61 = vpack.c.bf16 %v6658_v39, %v6657_v30 }
 0x92d   :  { %v6264_v46 = vpop.f32.mrb[84].mxu0  ;;  %v6368_v44 = vpop.f32.mrb[52].mxu1 }
 0x92e   :  { %v16730_v53 = vmul.f32 %v6561_v37, %v6264_v46  ;;  %v6266_v6 = vpop.f32.mrb[85].mxu0  ;;  %v6370_v41 = vpop.f32.mrb[53].mxu1  ;;  %v6659_v35 = vmul.f32 %v6587_v51, %v6368_v44  ;;  %v6566_v46 = vld [vmem:[#allocation9 + $0x78] sm:$0xff]  ;;  %v6591_v44 = vld [vmem:[#allocation9 + $0x140] sm:$0xff]  ;;  %v6592_v51 = vld [vmem:[#allocation9 + $0x148] sm:$0xff] }
 0x92f   :  { %v6267_v20 = vpop.f32.mrb[86].mxu0  ;;  %v6371_v58 = vpop.f32.mrb[54].mxu1 }
 0x930   :  { %v16732_v34 = vmul.f32 %v6562_v4, %v6267_v20  ;;  %v6269_v49 = vpop.f32.mrb[87].mxu0  ;;  %v6660_v18 = vmul.f32 %v6588_v2, %v6371_v58  ;;  %v6373_v48 = vpop.f32.mrb[55].mxu1 }
 0x932   :  { %v13373_v24 = vpack.c.bf16 %v16732_v34, %v16730_v53  ;;  %v16736_v22 = vpack.c.bf16 %v6660_v18, %v6659_v35  ;;  %v6517_v34 = vld [vmem:[#allocation10 + $0x30] sm:$0xff] }
 0x935   :  { %v6272_v63 = vpop.f32.mrb[88].mxu0  ;;  %v6376_v29 = vpop.f32.mrb[56].mxu1 }
 0x936   :  { %v16738_v5 = vmul.f32 %v6563_v8, %v6272_v63  ;;  %v6274_v59 = vpop.f32.mrb[89].mxu0  ;;  %v6378_v56 = vpop.f32.mrb[57].mxu1  ;;  %v6661_v27 = vmul.f32 %v6589_v1, %v6376_v29  ;;  %v6567_v29 = vld [vmem:[#allocation9 + $0x80] sm:$0xff] }
 0x937   :  { %v6275_v0 = vpop.f32.mrb[90].mxu0  ;;  %v6379_v36 = vpop.f32.mrb[58].mxu1  ;;  %v6593_v56 = vld [vmem:[#allocation9 + $0x150] sm:$0xff] }
 0x938   :  { %v16740_v50 = vmul.f32 %v6564_v26, %v6275_v0  ;;  %v6277_v12 = vpop.f32.mrb[91].mxu0  ;;  %v6662_v57 = vmul.f32 %v6590_v40, %v6379_v36  ;;  %v6381_v11 = vpop.f32.mrb[59].mxu1  ;;  %v6568_v40 = vld [vmem:[#allocation9 + $0x88] sm:$0xff]  ;;  %v6594_v0 = vld [vmem:[#allocation9 + $0x158] sm:$0xff] }
 0x93a   :  { %v13377_v30 = vpack.c.bf16 %v16740_v50, %v16738_v5  ;;  %v16744_v39 = vpack.c.bf16 %v6662_v57, %v6661_v27  ;;  %v6608_v5 = vld [vmem:[#allocation9 + $0x1c8] sm:$0xff]  ;;  %v6522_v50 = vld [vmem:[#allocation10 + $0x58] sm:$0xff] }
 0x93d   :  { %v6280_v37 = vpop.f32.mrb[92].mxu0  ;;  %v6384_v4 = vpop.f32.mrb[60].mxu1 }
 0x93e   :  { %v16746_v2 = vmul.f32 %v6565_v15, %v6280_v37  ;;  %v6282_v6 = vpop.f32.mrb[93].mxu0  ;;  %v6386_v41 = vpop.f32.mrb[61].mxu1  ;;  %v6663_v18 = vmul.f32 %v6591_v44, %v6384_v4 }
 0x93f   :  { %v6283_v20 = vpop.f32.mrb[94].mxu0  ;;  %v6387_v58 = vpop.f32.mrb[62].mxu1  ;;  %v6569_v41 = vld [vmem:[#allocation9 + $0x90] sm:$0xff] }
 0x940   :  { %v16748_v49 = vmul.f32 %v6566_v46, %v6283_v20  ;;  %v6285_v35 = vpop.f32.mrb[95].mxu0  ;;  %v6664_v48 = vmul.f32 %v6592_v51, %v6387_v58  ;;  %v6389_v8 = vpop.f32.mrb[63].mxu1  ;;  %v6570_v58 = vld [vmem:[#allocation9 + $0x98] sm:$0xff] }
 0x942   :  { %v13381_v63 = vpack.c.bf16 %v16748_v49, %v16746_v2  ;;  %v16752_v26 = vpack.c.bf16 %v6664_v48, %v6663_v18  ;;  %v6595_v18 = vld [vmem:[#allocation9 + $0x160] sm:$0xff]  ;;  %v6596_v48 = vld [vmem:[#allocation9 + $0x168] sm:$0xff] }
 0x945   :  { %v6288_v1 = vpop.f32.mrb[96].mxu0  ;;  %v6392_v59 = vpop.f32.mrb[64].mxu1 }
 0x946   :  { %v6639_v36 = vmul.f32 %v6567_v29, %v6288_v1  ;;  %v6290_v12 = vpop.f32.mrb[97].mxu0  ;;  %v6394_v27 = vpop.f32.mrb[65].mxu1  ;;  %v6665_v46 = vmul.f32 %v6593_v56, %v6392_v59 }
 0x947   :  { %v6291_v57 = vpop.f32.mrb[98].mxu0  ;;  %v6395_v11 = vpop.f32.mrb[66].mxu1 }
 0x948   :  { %v6640_v15 = vmul.f32 %v6568_v40, %v6291_v57  ;;  %v6293_v37 = vpop.f32.mrb[99].mxu0  ;;  %v6666_v4 = vmul.f32 %v6594_v0, %v6395_v11  ;;  %v6397_v44 = vpop.f32.mrb[67].mxu1 }
 0x949   :  { %v6597_v37 = vld [vmem:[#allocation9 + $0x170] sm:$0xff] }
 0x94a   :  { %v13351_v51 = vpack.c.bf16 %v6640_v15, %v6639_v36  ;;  %v16754_v6 = vpack.c.bf16 %v6666_v4, %v6665_v46  ;;  %v6571_v15 = vld [vmem:[#allocation9 + $0xa0] sm:$0xff]  ;;  %v6598_v46 = vld [vmem:[#allocation9 + $0x178] sm:$0xff] }
 0x94c   :  { %13352 = vmatprep.subr.bf16.mxu1 %v13351_v51 }
 0x94d   :  { %v6296_v20 = vpop.f32.mrb[100].mxu0  ;;  %13354 = vmatpush3.bf16.msra.mxu1 %v13353_v19  ;;  %v6400_v35 = vpop.f32.mrb[68].mxu1 }
 0x94e   :  { %v6641_v8 = vmul.f32 %v6569_v41, %v6296_v20  ;;  %v6298_v29 = vpop.f32.mrb[101].mxu0  ;;  %v6402_v1 = vpop.f32.mrb[69].mxu1  ;;  %v6667_v36 = vmul.f32 %v6595_v18, %v6400_v35 }
 0x94f   :  { %v6299_v40 = vpop.f32.mrb[102].mxu0  ;;  %v6403_v59 = vpop.f32.mrb[70].mxu1 }
 0x950   :  { %v6642_v56 = vmul.f32 %v6570_v58, %v6299_v40  ;;  %v6301_v0 = vpop.f32.mrb[103].mxu0  ;;  %v6668_v12 = vmul.f32 %v6596_v48, %v6403_v59  ;;  %v6405_v27 = vpop.f32.mrb[71].mxu1  ;;  %v6573_v40 = vld [vmem:[#allocation9 + $0xb0] sm:$0xff]  ;;  %v6599_v59 = vld [vmem:[#allocation9 + $0x180] sm:$0xff] }
 0x952   :  { %v13355_v57 = vpack.c.bf16 %v6642_v56, %v6641_v8  ;;  %v16759_v11 = vpack.c.bf16 %v6668_v12, %v6667_v36  ;;  %v6600_v56 = vld [vmem:[#allocation9 + $0x188] sm:$0xff] }
 0x954   :  { %13356 = vmatprep.subr.bf16.mxu1 %v13355_v57 }
 0x955   :  { %v6304_v3 = vpop.f32.mrb[104].mxu0  ;;  %13358 = vmatpush3.bf16.msra.mxu1 %v13357_v10  ;;  %v6408_v19 = vpop.f32.mrb[72].mxu1 }
 0x956   :  { %v6643_v4 = vmul.f32 %v6571_v15, %v6304_v3  ;;  %v6306_v44 = vpop.f32.mrb[105].mxu0  ;;  %v6410_v51 = vpop.f32.mrb[73].mxu1  ;;  %v6669_v18 = vmul.f32 %v6597_v37, %v6408_v19 }
 0x957   :  { %v6307_v41 = vpop.f32.mrb[106].mxu0  ;;  %v6411_v20 = vpop.f32.mrb[74].mxu1  ;;  %v6575_v44 = vld [vmem:[#allocation9 + $0xc0] sm:$0xff]  ;;  %v6601_v51 = vld [vmem:[#allocation9 + $0x190] sm:$0xff] }
 0x958   :  { %v6644_v58 = vmul.f32 %v6572_v14, %v6307_v41  ;;  %v6309_v35 = vpop.f32.mrb[107].mxu0  ;;  %v6670_v48 = vmul.f32 %v6598_v46, %v6411_v20  ;;  %v6413_v8 = vpop.f32.mrb[75].mxu1  ;;  %v6602_v41 = vld [vmem:[#allocation9 + $0x198] sm:$0xff] }
 0x95a   :  { %v13359_v29 = vpack.c.bf16 %v6644_v58, %v6643_v4  ;;  %v16764_v1 = vpack.c.bf16 %v6670_v48, %v6669_v18 }
 0x95c   :  { %13360 = vmatprep.subr.bf16.mxu1 %v13359_v29 }
 0x95d   :  { %v6312_v31 = vpop.f32.mrb[108].mxu0  ;;  %13362 = vmatpush3.bf16.msra.mxu1 %v13361_v38  ;;  %v6416_v10 = vpop.f32.mrb[76].mxu1 }
 0x95e   :  { %v6645_v0 = vmul.f32 %v6573_v40, %v6312_v31  ;;  %v6314_v36 = vpop.f32.mrb[109].mxu0  ;;  %v6418_v12 = vpop.f32.mrb[77].mxu1  ;;  %v6671_v14 = vmul.f32 %v6599_v59, %v6416_v10 }
 0x95f   :  { %v6315_v27 = vpop.f32.mrb[110].mxu0  ;;  %v6419_v57 = vpop.f32.mrb[78].mxu1 }
 0x960   :  { %v6646_v15 = vmul.f32 %v6574_v47, %v6315_v27  ;;  %v6317_v3 = vpop.f32.mrb[111].mxu0  ;;  %v6672_v19 = vmul.f32 %v6600_v56, %v6419_v57  ;;  %v6421_v37 = vpop.f32.mrb[79].mxu1 }
 0x961   :  { %v6527_v3 = vld [vmem:[#allocation10 + $0x80] sm:$0xff]  ;;  %v6609_v37 = vld [vmem:[#allocation9 + $0x1d0] sm:$0xff] }
 0x962   :  { %v13363_v46 = vpack.c.bf16 %v6646_v15, %v6645_v0  ;;  %v13383_v4 = vpack.c.bf16 %v6672_v19, %v6671_v14  ;;  %v6521_v15 = vld [vmem:[#allocation10 + $0x50] sm:$0xff]  ;;  %v6526_v14 = vld [vmem:[#allocation10 + $0x78] sm:$0xff] }
 0x964   :  { %13364 = vmatprep.subr.bf16.mxu1 %v13363_v46  ;;  %13384 = vmatprep.subr.bf16.mxu0 %v13383_v4  ;;  %v6610_v46 = vld [vmem:[#allocation9 + $0x1d8] sm:$0xff] }
 0x965   :  { %v6320_v7 = vpop.f32.mrb[112].mxu0  ;;  %13366 = vmatpush3.bf16.msra.mxu1 %v13365_v17  ;;  %v6424_v38 = vpop.f32.mrb[80].mxu1  ;;  %13386 = vmatpush3.bf16.msra.mxu0 %v16720_v9  ;;  %v6604_v17 = vld [vmem:[#allocation9 + $0x1a8] sm:$0xff] }
 0x966   :  { %v6647_v20 = vmul.f32 %v6575_v44, %v6320_v7  ;;  %v6322_v58 = vpop.f32.mrb[113].mxu0  ;;  %v6426_v35 = vpop.f32.mrb[81].mxu1  ;;  %v6673_v29 = vmul.f32 %v6601_v51, %v6424_v38  ;;  %v6532_v44 = vld [vmem:[#allocation10 + $0xa8] sm:$0xff]  ;;  %v6531_v51 = vld [vmem:[#allocation10 + $0xa0] sm:$0xff] }
 0x967   :  { %v6323_v18 = vpop.f32.mrb[114].mxu0  ;;  %v6427_v48 = vpop.f32.mrb[82].mxu1  ;;  %v6611_v58 = vld [vmem:[#allocation9 + $0x1e0] sm:$0xff]  ;;  %v6612_v35 = vld [vmem:[#allocation9 + $0x1e8] sm:$0xff] }
 0x968   :  { %v6648_v8 = vmul.f32 %v6576_v32, %v6323_v18  ;;  %v6674_v40 = vmul.f32 %v6602_v41, %v6427_v48  ;;  %v6429_v31 = vpop.f32.mrb[83].mxu1  ;;  %v6325_v47 = vpop.f32.mrb[115].mxu0  ;;  %v6537_v41 = vld [vmem:[#allocation10 + $0xd0] sm:$0xff]  ;;  %v6536_v18 = vld [vmem:[#allocation10 + $0xc8] sm:$0xff] }
 0x969   :  { %v6541_v47 = vld [vmem:[#allocation10 + $0xf0] sm:$0xff] }
 0x96a   :  { %v13367_v10 = vpack.c.bf16 %v6648_v8, %v6647_v20  ;;  %v13387_v59 = vpack.c.bf16 %v6674_v40, %v6673_v29  ;;  %v6542_v8 = vld [vmem:[#allocation10 + $0xf8] sm:$0xff] }
 0x96c   :  { %13368 = vmatprep.subr.bf16.mxu1 %v13367_v10  ;;  %13388 = vmatprep.subr.bf16.mxu0 %v13387_v59 }
 0x96d   :  { %13370 = vmatpush3.bf16.msra.mxu1 %v13369_v23  ;;  %v6432_v45 = vpop.f32.mrb[84].mxu1  ;;  %13390 = vmatpush3.bf16.msra.mxu0 %v16728_v61 }
 0x96e   :  { %13372 = vmatprep.subr.bf16.mxu1 %v13371_v54  ;;  %v6434_v56 = vpop.f32.mrb[85].mxu1  ;;  %v6675_v36 = vmul.f32 %v6603_v13, %v6432_v45  ;;  %v6606_v54 = vld [vmem:[#allocation9 + $0x1b8] sm:$0xff]  ;;  %v6613_v45 = vld [vmem:[#allocation9 + $0x1f0] sm:$0xff] }
 0x96f   :  { %v6435_v0 = vpop.f32.mrb[86].mxu1  ;;  %v6614_v13 = vld [vmem:[#allocation9 + $0x1f8] sm:$0xff] }
 0x970   :  { %v6676_v12 = vmul.f32 %v6604_v17, %v6435_v0  ;;  %v6437_v27 = vpop.f32.mrb[87].mxu1  ;;  %v6546_v17 = vld [vmem:[#allocation10 + $0x118] sm:$0xff]  ;;  %v6519_v0 = vld [vmem:[#allocation10 + $0x40] sm:$0xff] }
 0x971   :  { %13374 = vmatpush3.bf16.msra.mxu1 %v13373_v24 }
 0x972   :  { %13376 = vmatprep.subr.bf16.mxu1 %v13375_v62  ;;  %v13391_v55 = vpack.c.bf16 %v6676_v12, %v6675_v36  ;;  %v6511_v62 = vld [vmem:[#allocation10] sm:$0xff] }
 0x974   :  { %13392 = vmatprep.subr.bf16.mxu0 %v13391_v55 }
 0x975   :  { %13378 = vmatpush3.bf16.msra.mxu1 %v13377_v30  ;;  %v6440_v21 = vpop.f32.mrb[88].mxu1  ;;  %13394 = vmatpush3.bf16.msra.mxu0 %v16736_v22 }
 0x976   :  { %13380 = vmatprep.subr.bf16.mxu1 %v13379_v60  ;;  %v6442_v28 = vpop.f32.mrb[89].mxu1  ;;  %v6677_v53 = vmul.f32 %v6605_v52, %v6440_v21  ;;  %v6607_v60 = vld [vmem:[#allocation9 + $0x1c0] sm:$0xff]  ;;  %v6518_v21 = vld [vmem:[#allocation10 + $0x38] sm:$0xff] }
 0x977   :  { %v6443_v23 = vpop.f32.mrb[90].mxu1  ;;  %v6616_v28 = vld [vmem:[#allocation9 + $0x208] sm:$0xff] }
 0x978   :  { %v6678_v33 = vmul.f32 %v6606_v54, %v6443_v23  ;;  %v6445_v25 = vpop.f32.mrb[91].mxu1  ;;  %v6615_v54 = vld [vmem:[#allocation9 + $0x200] sm:$0xff]  ;;  %v6513_v23 = vld [vmem:[#allocation10 + $0x10] sm:$0xff] }
 0x979   :  { %13382 = vmatpush3.bf16.msra.mxu1 %v13381_v63 }
 0x97a   :  { %13547 = vmatprep.subr.bf16.mxu1 %v13383_v4  ;;  %v13395_v24 = vpack.c.bf16 %v6678_v33, %v6677_v53  ;;  %v6524_v53 = vld [vmem:[#allocation10 + $0x68] sm:$0xff] }
 0x97c   :  { %6792 = vmatmul.mubr.f32.vlgmr.msra.gmra.mrb[124].mxu1 %v6511_v62  ;;  %13396 = vmatprep.subr.bf16.mxu0 %v13395_v24 }
 0x97d   :  { %13555 = vmatpush3.bf16.msra.mxu1 %v16720_v9  ;;  %6796 = vmatprep.mubr.f32.mxu1 %v6517_v34  ;;  %v6448_v43 = vpop.f32.mrb[92].mxu1 }
 0x97e   :  { %13548 = vmatprep.subr.bf16.mxu1 %v13387_v59  ;;  %v6450_v30 = vpop.f32.mrb[93].mxu1  ;;  %13398 = vmatpush3.bf16.msra.mxu0 %v16744_v39  ;;  %v6679_v49 = vmul.f32 %v6607_v60, %v6448_v43  ;;  %v6547_v59 = vld [vmem:[#allocation10 + $0x120] sm:$0xff]  ;;  %v6529_v43 = vld [vmem:[#allocation10 + $0x90] sm:$0xff]  ;;  %v6528_v60 = vld [vmem:[#allocation10 + $0x88] sm:$0xff] }
 0x97f   :  { %v6451_v2 = vpop.f32.mrb[94].mxu1 }
 0x980   :  { %6797 = vmatmul.mubr.f32.gmra.mrb[126].mxu1 %v6516_v42  ;;  %v6680_v63 = vmul.f32 %v6608_v5, %v6451_v2  ;;  %v6453_v57 = vpop.f32.mrb[95].mxu1  ;;  %v6617_v5 = vld [vmem:[#allocation9 + $0x210] sm:$0xff]  ;;  %v6534_v2 = vld [vmem:[#allocation10 + $0xb8] sm:$0xff] }
 0x981   :  { %13556 = vmatpush3.bf16.msra.mxu1 %v16728_v61  ;;  %6801 = vmatprep.mubr.f32.mxu1 %v6522_v50  ;;  %v6618_v50 = vld [vmem:[#allocation9 + $0x218] sm:$0xff] }
 0x982   :  { %13549 = vmatprep.subr.bf16.mxu1 %v13391_v55  ;;  %v13399_v9 = vpack.c.bf16 %v6680_v63, %v6679_v49 }
 0x984   :  { %6802 = vmatmul.mubr.f32.gmra.mrb[128].mxu1 %v6521_v15  ;;  %13400 = vmatprep.subr.bf16.mxu0 %v13399_v9 }
 0x985   :  { %13557 = vmatpush3.bf16.msra.mxu1 %v16736_v22  ;;  %6806 = vmatprep.mubr.f32.mxu1 %v6527_v3  ;;  %v6456_v19 = vpop.f32.mrb[96].mxu1 }
 0x986   :  { %13550 = vmatprep.subr.bf16.mxu1 %v13395_v24  ;;  %v6458_v4 = vpop.f32.mrb[97].mxu1  ;;  %13402 = vmatpush3.bf16.msra.mxu0 %v16752_v26  ;;  %v6681_v7 = vmul.f32 %v6609_v37, %v6456_v19  ;;  %v6523_v24 = vld [vmem:[#allocation10 + $0x60] sm:$0xff] }
 0x987   :  { %v6459_v61 = vpop.f32.mrb[98].mxu1  ;;  %v6619_v37 = vld [vmem:[#allocation9 + $0x220] sm:$0xff]  ;;  %v6538_v4 = vld [vmem:[#allocation10 + $0xd8] sm:$0xff] }
 0x988   :  { %6807 = vmatmul.mubr.f32.gmra.mrb[130].mxu1 %v6526_v14  ;;  %v6682_v32 = vmul.f32 %v6610_v46, %v6459_v61  ;;  %v6461_v38 = vpop.f32.mrb[99].mxu1  ;;  %v6539_v14 = vld [vmem:[#allocation10 + $0xe0] sm:$0xff]  ;;  %v6620_v46 = vld [vmem:[#allocation9 + $0x228] sm:$0xff] }
 0x989   :  { %13558 = vmatpush3.bf16.msra.mxu1 %v16744_v39  ;;  %6811 = vmatprep.mubr.f32.mxu1 %v6532_v44  ;;  %v6544_v61 = vld [vmem:[#allocation10 + $0x108] sm:$0xff] }
 0x98a   :  { %v13403_v22 = vpack.c.bf16 %v6682_v32, %v6681_v7  ;;  %13551 = vmatprep.subr.bf16.mxu1 %v13399_v9  ;;  %v6533_v9 = vld [vmem:[#allocation10 + $0xb0] sm:$0xff] }
 0x98c   :  { %6812 = vmatmul.mubr.f32.gmra.mrb[132].mxu1 %v6531_v51  ;;  %13404 = vmatprep.subr.bf16.mxu0 %v13403_v22 }
 0x98d   :  { %v6464_v20 = vpop.f32.mrb[100].mxu1  ;;  %13559 = vmatpush3.bf16.msra.mxu1 %v16752_v26  ;;  %6816 = vmatprep.mubr.f32.mxu1 %v6537_v41 }
 0x98e   :  { %v6466_v48 = vpop.f32.mrb[101].mxu1  ;;  %13552 = vmatprep.subr.bf16.mxu1 %v13403_v22  ;;  %13406 = vmatpush3.bf16.msra.mxu0 %v16754_v6  ;;  %v6683_v29 = vmul.f32 %v6611_v58, %v6464_v20  ;;  %v6543_v22 = vld [vmem:[#allocation10 + $0x100] sm:$0xff]  ;;  %v6549_v20 = vld [vmem:[#allocation10 + $0x130] sm:$0xff] }
 0x98f   :  { %v6467_v39 = vpop.f32.mrb[102].mxu1  ;;  %v6548_v48 = vld [vmem:[#allocation10 + $0x128] sm:$0xff] }
 0x990   :  { %v6684_v40 = vmul.f32 %v6612_v35, %v6467_v39  ;;  %v6469_v31 = vpop.f32.mrb[103].mxu1  ;;  %6817 = vmatmul.mubr.f32.gmra.mrb[134].mxu1 %v6536_v18  ;;  %v6621_v35 = vld [vmem:[#allocation9 + $0x230] sm:$0xff]  ;;  %v6622_v18 = vld [vmem:[#allocation9 + $0x238] sm:$0xff]  ;;  %v6515_v39 = vld [vmem:[#allocation10 + $0x20] sm:$0xff] }
 0x991   :  { %13560 = vmatpush3.bf16.msra.mxu1 %v16754_v6  ;;  %6821 = vmatprep.mubr.f32.mxu1 %v6542_v8 }
 0x992   :  { %v13407_v10 = vpack.c.bf16 %v6684_v40, %v6683_v29 }
 0x994   :  { %6822 = vmatmul.mubr.f32.gmra.mrb[136].mxu1 %v6541_v47  ;;  %13553 = vmatprep.subr.bf16.mxu1 %v13407_v10 }
 0x995   :  { %v6472_v26 = vpop.f32.mrb[104].mxu1  ;;  %13561 = vmatpush3.bf16.msra.mxu1 %v16759_v11  ;;  %6826 = vmatprep.mubr.f32.mxu1 %v6547_v59  ;;  %v6520_v59 = vld [vmem:[#allocation10 + $0x48] sm:$0xff] }
 0x996   :  { %v6474_v56 = vpop.f32.mrb[105].mxu1  ;;  %13408 = vmatprep.subr.bf16.mxu0 %v13407_v10  ;;  %v6685_v6 = vmul.f32 %v6613_v45, %v6472_v26  ;;  %v6525_v26 = vld [vmem:[#allocation10 + $0x70] sm:$0xff]  ;;  %v6530_v45 = vld [vmem:[#allocation10 + $0x98] sm:$0xff] }
 0x997   :  { %v6475_v36 = vpop.f32.mrb[106].mxu1  ;;  %13410 = vmatpush3.bf16.msra.mxu0 %v16759_v11  ;;  %v6545_v56 = vld [vmem:[#allocation10 + $0x110] sm:$0xff] }
 0x998   :  { %v6686_v12 = vmul.f32 %v6614_v13, %v6475_v36  ;;  %6827 = vmatmul.mubr.f32.gmra.mrb[138].mxu1 %v6546_v17  ;;  %v6477_v27 = vpop.f32.mrb[107].mxu1  ;;  %v6535_v13 = vld [vmem:[#allocation10 + $0xc0] sm:$0xff]  ;;  %v6540_v17 = vld [vmem:[#allocation10 + $0xe8] sm:$0xff]  ;;  %v14457_v36 = vld [vmem:[%s18118_s28] ss:$8 sps:$4 sm:$0xff]  }
 0x999   :  { %6901 = vmatprep.mubr.f32.mxu1 %v6519_v0  ;;  %v6550_v0 = vld [vmem:[#allocation10 + $0x138] sm:$0xff]  ;;  %v14462_v27 = vld [vmem:[%s18118_s28 + $0x14] ss:$8 sps:$4 sm:$0xff]  }
 0x99a   :  { %v13411_v55 = vpack.c.bf16 %v6686_v12, %v6685_v6  ;;  %v14459_v6 = vld [vmem:[%s18118_s28 + $0x4] ss:$8 sps:$4 sm:$0xff]   ;;  %v14460_v12 = vld [vmem:[%s18118_s28 + $0x10] ss:$8 sps:$4 sm:$0xff]  }
 0x99c   :  { %13554 = vmatprep.subr.bf16.mxu1 %v13411_v55  ;;  %13412 = vmatprep.subr.bf16.mxu0 %v13411_v55  ;;  %v14463_v55 = vld [vmem:[%s18118_s28 + $0x20] ss:$8 sps:$4 sm:$0xff]  }
 0x99d   :  { %13562 = vmatpush3.bf16.msra.mxu1 %v16764_v1  ;;  %v6480_v52 = vpop.f32.mrb[108].mxu1  ;;  %13414 = vmatpush3.bf16.msra.mxu0 %v16764_v1 }
 0x99e   :  { %v6482_v33 = vpop.f32.mrb[109].mxu1  ;;  %v6687_v25 = vmul.f32 %v6615_v54, %v6480_v52  ;;  %v14466_v52 = vld [vmem:[%s18118_s28 + $0x30] ss:$8 sps:$4 sm:$0xff]   ;;  %v14468_v54 = vld [vmem:[%s18118_s28 + $0x34] ss:$8 sps:$4 sm:$0xff]  }
 0x99f   :  { %v6483_v11 = vpop.f32.mrb[110].mxu1  ;;  %v14474_v33 = vld [vmem:[%s18118_s28 + $0x54] ss:$8 sps:$4 sm:$0xff]  }
 0x9a0   :  { %6902 = vmatmul.mubr.f32.vlgmr.msra.gmra.mrb[140].mxu1 %v6518_v21  ;;  %v6688_v62 = vmul.f32 %v6616_v28, %v6483_v11  ;;  %v6485_v34 = vpop.f32.mrb[111].mxu1  ;;  %6897 = vmatmul.mubr.f32.vlgmr.msra.gmra.mrb[116].mxu0 %v6513_v23  ;;  %v14465_v21 = vld [vmem:[%s18118_s28 + $0x24] ss:$8 sps:$4 sm:$0xff]   ;;  %v14469_v28 = vld [vmem:[%s18118_s28 + $0x40] ss:$8 sps:$4 sm:$0xff]  }
 0x9a1   :  { %6906 = vmatprep.mubr.f32.mxu1 %v6524_v53  ;;  %8310 = vmatprep.mubr.bf16.mxu0 %v18117_v16  ;;  %v14471_v23 = vld [vmem:[%s18118_s28 + $0x44] ss:$8 sps:$4 sm:$0xff]   ;;  %v14472_v53 = vld [vmem:[%s18118_s28 + $0x50] ss:$8 sps:$4 sm:$0xff]  }
 0x9a2   :  { %v13415_v42 = vpack.c.bf16 %v6688_v62, %v6687_v25  ;;  %v14477_v11 = vld [vmem:[%s18118_s28 + $0x64] ss:$8 sps:$4 sm:$0xff]   ;;  %v14475_v25 = vld [vmem:[%s18118_s28 + $0x60] ss:$8 sps:$4 sm:$0xff]   ;;  %v14480_v62 = vld [vmem:[%s18118_s28 + $0x74] ss:$8 sps:$4 sm:$0xff]  }
 0x9a3   :  { %v14478_v34 = vld [vmem:[%s18118_s28 + $0x70] ss:$8 sps:$4 sm:$0xff]  }
 0x9a4   :  { %6907 = vmatmul.mubr.f32.gmra.mrb[142].mxu1 %v6523_v24  ;;  %13416 = vmatprep.subr.bf16.mxu1 %v13415_v42 }
 0x9a5   :  { %6911 = vmatprep.mubr.f32.mxu1 %v6529_v43  ;;  %v6488_v1 = vpop.f32.mrb[112].mxu1  ;;  %13418 = vmatpush3.bf16.msra.mxu1 %v13415_v42 }
 0x9a6   :  { %v6490_v30 = vpop.f32.mrb[113].mxu1  ;;  %v6689_v63 = vmul.f32 %v6617_v5, %v6488_v1 }
 0x9a7   :  { %v6491_v49 = vpop.f32.mrb[114].mxu1 }
 0x9a8   :  { %6912 = vmatmul.mubr.f32.gmra.mrb[144].mxu1 %v6528_v60  ;;  %v6690_v57 = vmul.f32 %v6618_v50, %v6491_v49  ;;  %v6493_v15 = vpop.f32.mrb[115].mxu1 }
 0x9a9   :  { %6916 = vmatprep.mubr.f32.mxu1 %v6534_v2 }
 0x9aa   :  { %v13419_v3 = vpack.c.bf16 %v6690_v57, %v6689_v63 }
 0x9ac   :  { %6917 = vmatmul.mubr.f32.gmra.mrb[146].mxu1 %v6533_v9  ;;  %13420 = vmatprep.subr.bf16.mxu1 %v13419_v3 }
 0x9ad   :  { %v6496_v19 = vpop.f32.mrb[116].mxu1  ;;  %6921 = vmatprep.mubr.f32.mxu1 %v6539_v14  ;;  %13422 = vmatpush3.bf16.msra.mxu1 %v13419_v3 }
 0x9ae   :  { %v6498_v44 = vpop.f32.mrb[117].mxu1  ;;  %v6691_v32 = vmul.f32 %v6619_v37, %v6496_v19 }
 0x9af   :  { %v6499_v7 = vpop.f32.mrb[118].mxu1 }
 0x9b0   :  { %v6692_v38 = vmul.f32 %v6620_v46, %v6499_v7  ;;  %v6501_v51 = vpop.f32.mrb[119].mxu1  ;;  %6922 = vmatmul.mubr.f32.gmra.mrb[148].mxu1 %v6538_v4 }
 0x9b1   :  { %6926 = vmatprep.mubr.f32.mxu1 %v6544_v61 }
 0x9b2   :  { %v13423_v41 = vpack.c.bf16 %v6692_v38, %v6691_v32  ;;  %v12166_v38 = vld [vmem:[#allocation12] ss:$0 sm:$0xff] }
 0x9b4   :  { %6927 = vmatmul.mubr.f32.gmra.mrb[150].mxu1 %v6543_v22  ;;  %13424 = vmatprep.subr.bf16.mxu1 %v13423_v41 }
 0x9b5   :  { %v6504_v58 = vpop.f32.mrb[120].mxu1  ;;  %13426 = vmatpush3.bf16.msra.mxu1 %v13423_v41  ;;  %6931 = vmatprep.mubr.f32.mxu1 %v6549_v20 }
 0x9b6   :  { %v6506_v8 = vpop.f32.mrb[121].mxu1  ;;  %v6693_v40 = vmul.f32 %v6621_v35, %v6504_v58 }
 0x9b7   :  { %v6507_v29 = vpop.f32.mrb[122].mxu1 }
 0x9b8   :  { %v6694_v31 = vmul.f32 %v6622_v18, %v6507_v29  ;;  %6932 = vmatmul.mubr.f32.gmra.mrb[152].mxu1 %v6548_v48  ;;  %v6509_v47 = vpop.f32.mrb[123].mxu1 }
 0x9b9   :  { %13339 = vmatprep.mubr.msk.f32.mxu1 %vm6702_vm2, %v6515_v39 }
 0x9ba   :  { %v13427_v10 = vpack.c.bf16 %v6694_v31, %v6693_v40 }
 0x9bc   :  { %13428 = vmatprep.subr.bf16.mxu1 %v13427_v10 }
 0x9bd   :  { %13430 = vmatpush3.bf16.msra.mxu1 %v13427_v10 }
 0x9be   :  { %7170 = vmatprep.subr.bf16.mxu1 %v14459_v6 }
 0x9c0   :  { %13340 = vmatmul.mubr.msk.f32.vlgmr.msra.gmra.mrb[154].mxu1 %vm6702_vm2, %v6520_v59 }
 0x9c1   :  { %13342 = vmatprep.mubr.msk.f32.mxu1 %vm6702_vm2, %v6525_v26  ;;  %7171 = vmatpush1.bf16.msra.mxu1 %v14457_v36 }
 0x9c2   :  { %7172 = vmatprep.subr.bf16.mxu1 %v14462_v27 }
 0x9c4   :  { %13343 = vmatmul.mubr.msk.f32.gmra.mrb[156].mxu1 %vm6702_vm2, %v6530_v45 }
 0x9c5   :  { %13345 = vmatprep.mubr.msk.f32.mxu1 %vm6702_vm2, %v6535_v13  ;;  %7173 = vmatpush1.bf16.msra.mxu1 %v14460_v12 }
 0x9c6   :  { %7174 = vmatprep.subr.bf16.mxu1 %v14465_v21 }
 0x9c8   :  { %13346 = vmatmul.mubr.msk.f32.gmra.mrb[158].mxu1 %vm6702_vm2, %v6540_v17 }
 0x9c9   :  { %13348 = vmatprep.mubr.msk.f32.mxu1 %vm6702_vm2, %v6545_v56  ;;  %7175 = vmatpush1.bf16.msra.mxu1 %v14463_v55 }
 0x9ca   :  { %7176 = vmatprep.subr.bf16.mxu1 %v14468_v54 }
 0x9cc   :  { %13349 = vmatmul.mubr.msk.f32.gmra.mrb[160].mxu1 %vm6702_vm2, %v6550_v0 }
 0x9cd   :  { %7202 = vmatprep.mubr.bf16.mxu1 %v18117_v16  ;;  %7177 = vmatpush1.bf16.msra.mxu1 %v14466_v52 }
 0x9ce   :  { %7178 = vmatprep.subr.bf16.mxu1 %v14471_v23 }
 0x9d1   :  { %7179 = vmatpush1.bf16.msra.mxu1 %v14469_v28 }
 0x9d2   :  { %7180 = vmatprep.subr.bf16.mxu1 %v14474_v33 }
 0x9d5   :  { %7181 = vmatpush1.bf16.msra.mxu1 %v14472_v53 }
 0x9d6   :  { %7182 = vmatprep.subr.bf16.mxu1 %v14477_v11 }
 0x9d9   :  { %7183 = vmatpush1.bf16.msra.mxu1 %v14475_v25 }
 0x9da   :  { %7184 = vmatprep.subr.bf16.mxu1 %v14480_v62 }
 0x9dd   :  { %7185 = vmatpush1.bf16.msra.mxu1 %v14478_v34 }
 0xa4f   :  { %v12868_v24 = vpop.f32.mrb[124].mxu1 }
 0xa50   :  { %v12869_v42 = vpop.f32.mrb[125].mxu1 }
 0xa51   :  { %v12870_v43 = vadd.f32 %v12869_v42, %v12868_v24 }
 0xa53   :  { %v12871_v60 = vpop.f32.mrb[126].mxu1  ;;  %v6794_v58 = vadd.f32 %v12870_v43, %v12166_v38 }
 0xa54   :  { %v12872_v1 = vpop.f32.mrb[127].mxu1 }
 0xa55   :  { %v12873_v5 = vadd.f32 %v12872_v1, %v12871_v60 }
 0xa57   :  { %v12874_v50 = vpop.f32.mrb[128].mxu1  ;;  %v6799_v35 = vadd.f32 %v12873_v5, %v12166_v38 }
 0xa58   :  { %v12875_v30 = vpop.f32.mrb[129].mxu1 }
 0xa59   :  { %v12876_v2 = vadd.f32 %v12875_v30, %v12874_v50 }
 0xa5b   :  { %v12877_v49 = vpop.f32.mrb[130].mxu1  ;;  %v6804_v31 = vadd.f32 %v12876_v2, %v12166_v38 }
 0xa5c   :  { %v12878_v63 = vpop.f32.mrb[131].mxu1 }
 0xa5d   :  { %v12879_v57 = vadd.f32 %v12878_v63, %v12877_v49 }
 0xa5f   :  { %v12880_v15 = vpop.f32.mrb[132].mxu1  ;;  %v6809_v45 = vadd.f32 %v12879_v57, %v12166_v38 }
 0xa60   :  { %v12881_v9 = vpop.f32.mrb[133].mxu1 }
 0xa61   :  { %v12882_v3 = vadd.f32 %v12881_v9, %v12880_v15 }
 0xa63   :  { %v12883_v14 = vpop.f32.mrb[134].mxu1  ;;  %v6814_v36 = vadd.f32 %v12882_v3, %v12166_v38 }
 0xa64   :  { %v12884_v19 = vpop.f32.mrb[135].mxu1 }
 0xa65   :  { %v12885_v37 = vadd.f32 %v12884_v19, %v12883_v14 }
 0xa67   :  { %v12886_v46 = vpop.f32.mrb[136].mxu1  ;;  %v6819_v21 = vadd.f32 %v12885_v37, %v12166_v38 }
 0xa68   :  { %v12887_v4 = vpop.f32.mrb[137].mxu1 }
 0xa69   :  { %v12888_v44 = vadd.f32 %v12887_v4, %v12886_v46 }
 0xa6b   :  { %v12889_v61 = vpop.f32.mrb[138].mxu1  ;;  %v6824_v53 = vadd.f32 %v12888_v44, %v12166_v38 }
 0xa6c   :  { %v12890_v7 = vpop.f32.mrb[139].mxu1 }
 0xa6d   :  { %v12891_v32 = vadd.f32 %v12890_v7, %v12889_v61 }
 0xa6f   :  { %v6829_v34 = vadd.f32 %v12891_v32, %v12166_v38 }
 0xa73   :  { %v12927_v51 = vpop.f32.mrb[140].mxu1  ;;  %v12924_v22 = vpop.f32.mrb[116].mxu0 }
 0xa74   :  { %v12928_v41 = vpop.f32.mrb[141].mxu1  ;;  %v12925_v20 = vpop.f32.mrb[117].mxu0 }
 0xa75   :  { %v12929_v18 = vadd.f32 %v12928_v41, %v12927_v51  ;;  %v12926_v48 = vadd.f32 %v12925_v20, %v12924_v22 }
 0xa77   :  { %v12930_v8 = vpop.f32.mrb[142].mxu1  ;;  %v6904_v39 = vadd.f32 %v12929_v18, %v6799_v35  ;;  %v6899_v29 = vadd.f32 %v12926_v48, %v6794_v58 }
 0xa78   :  { %v12931_v40 = vpop.f32.mrb[143].mxu1 }
 0xa79   :  { %v12932_v47 = vadd.f32 %v12931_v40, %v12930_v8 }
 0xa7b   :  { %v12933_v10 = vpop.f32.mrb[144].mxu1  ;;  %v6909_v59 = vadd.f32 %v12932_v47, %v6804_v31  ;;  %v7080_v47 = vlaneseq }
 0xa7c   :  { %v12934_v26 = vpop.f32.mrb[145].mxu1 }
 0xa7d   :  { %v12935_v13 = vadd.f32 %v12934_v26, %v12933_v10  ;;  %v16871_v10 = vshrl.u32 %v7080_v47, 7  ;;  %v7078_v26 = vld [vmem:[#allocation13] sm:$0x3] }
 0xa7f   :  { %v12936_v17 = vpop.f32.mrb[146].mxu1  ;;  %v6914_v56 = vadd.f32 %v12935_v13, %v6809_v45  ;;  %v16877_v45 = vsub.s32 1, %v16871_v10 }
 0xa80   :  { %v12937_v0 = vpop.f32.mrb[147].mxu1 }
 0xa81   :  { %v12938_v6 = vadd.f32 %v12937_v0, %v12936_v17  ;;  %v16883_v17 = vrot.slane %v7078_v26, %v16877_v45 }
 0xa83   :  { %v12939_v12 = vpop.f32.mrb[148].mxu1  ;;  %v6919_v27 = vadd.f32 %v12938_v6, %v6814_v36 }
 0xa84   :  { %v12940_v55 = vpop.f32.mrb[149].mxu1 }
 0xa85   :  { %v12941_v52 = vadd.f32 %v12940_v55, %v12939_v12 }
 0xa87   :  { %v12942_v54 = vpop.f32.mrb[150].mxu1  ;;  %v6924_v28 = vadd.f32 %v12941_v52, %v6819_v21 }
 0xa88   :  { %v12943_v23 = vpop.f32.mrb[151].mxu1 }
 0xa89   :  { %v12944_v33 = vadd.f32 %v12943_v23, %v12942_v54 }
 0xa8b   :  { %v12945_v11 = vpop.f32.mrb[152].mxu1  ;;  %v6929_v25 = vadd.f32 %v12944_v33, %v6824_v53 }
 0xa8c   :  { %v12946_v62 = vpop.f32.mrb[153].mxu1 }
 0xa8d   :  { %v12947_v24 = vadd.f32 %v12946_v62, %v12945_v11 }
 0xa8f   :  { %v6934_v42 = vadd.f32 %v12947_v24, %v6829_v34 }
 0xa93   :  { %v13341_v43 = vpop.f32.mrb[154].mxu1 }
 0xa94   :  { %v7009_v60 = vadd.f32 %v13341_v43, %v6904_v39  ;;  %v7003_v1 = vpop.f32.mrb[155].mxu1 }
 0xa95   :  { %v7004_v5 = vadd.f32 %v7003_v1, %v6899_v29 }
 0xa96   :  { %v7043_v50 = vmax.f32 %v7009_v60, 0.0 }
 0xa97   :  { %v7042_v30 = vmax.f32 %v7004_v5, 0.0  ;;  %v13344_v2 = vpop.f32.mrb[156].mxu1 }
 0xa98   :  { %v7051_v49 = vmin.f32 %v7043_v50, 6.0  ;;  %v7019_v63 = vadd.f32 %v13344_v2, %v6914_v56  ;;  %v7013_v57 = vpop.f32.mrb[157].mxu1 }
 0xa99   :  { %v7050_v15 = vmin.f32 %v7042_v30, 6.0  ;;  %v7014_v9 = vadd.f32 %v7013_v57, %v6909_v59  ;;  %v16874_v59 = vsub.s32 0, %v16871_v10 }
 0xa9a   :  { %v7045_v3 = vmax.f32 %v7019_v63, 0.0 }
 0xa9b   :  { %v7058_v14 = vpack.c.bf16 %v7051_v49, %v7050_v15  ;;  %v7044_v19 = vmax.f32 %v7014_v9, 0.0  ;;  %v13347_v37 = vpop.f32.mrb[158].mxu1  ;;  %v16880_v13 = vrot.slane %v7078_v26, %v16874_v59 }
 0xa9c   :  { %v7053_v46 = vmin.f32 %v7045_v3, 6.0  ;;  %v7029_v4 = vadd.f32 %v13347_v37, %v6924_v28  ;;  %v7023_v44 = vpop.f32.mrb[159].mxu1 }
 0xa9d   :  { %v7052_v61 = vmin.f32 %v7044_v19, 6.0  ;;  %7203 = vmatmul.mubr.bf16.vlgmr.msra.gmra.mrb[164].mxu1 %v7058_v14  ;;  %v7024_v7 = vadd.f32 %v7023_v44, %v6919_v27 }
 0xa9e   :  { %v7047_v32 = vmax.f32 %v7029_v4, 0.0  ;;  %7212 = vmatprep.mubr.bf16.mxu1 %v18117_v16 }
 0xa9f   :  { %v7059_v38 = vpack.c.bf16 %v7053_v46, %v7052_v61  ;;  %v7046_v51 = vmax.f32 %v7024_v7, 0.0  ;;  %v13350_v22 = vpop.f32.mrb[160].mxu1 }
 0xaa0   :  { %v7055_v41 = vmin.f32 %v7047_v32, 6.0  ;;  %v7039_v20 = vadd.f32 %v13350_v22, %v6934_v42  ;;  %v7033_v58 = vpop.f32.mrb[161].mxu1 }
 0xaa1   :  { %v7054_v35 = vmin.f32 %v7046_v51, 6.0  ;;  %v7034_v18 = vadd.f32 %v7033_v58, %v6929_v25 }
 0xaa2   :  { %v7049_v48 = vmax.f32 %v7039_v20, 0.0 }
 0xaa3   :  { %v7060_v8 = vpack.c.bf16 %v7055_v41, %v7054_v35  ;;  %v7048_v39 = vmax.f32 %v7034_v18, 0.0 }
 0xaa4   :  { %v7057_v29 = vmin.f32 %v7049_v48, 6.0 }
 0xaa5   :  { %7213 = vmatmul.mubr.bf16.gmra.mrb[168].mxu1 %v7059_v38  ;;  %v7056_v40 = vmin.f32 %v7048_v39, 6.0 }
 0xaa6   :  { %7222 = vmatprep.mubr.bf16.mxu1 %v18117_v16 }
 0xaa7   :  { %v7061_v31 = vpack.c.bf16 %v7057_v29, %v7056_v40 }
 0xaad   :  { %7223 = vmatmul.mubr.bf16.gmra.mrb[172].mxu1 %v7060_v8 }
 0xaae   :  { %7232 = vmatprep.mubr.bf16.mxu1 %v18117_v16 }
 0xab5   :  { %7233 = vmatmul.mubr.bf16.gmra.mrb[176].mxu1 %v7061_v31 }
 0xab6   :  { %7405 = vmatprep.mubr.bf16.mxu1 %v18117_v16 }
 0xb70   :  { %v7204_v56 = vpop.f32.mrb[164].mxu1 }
 0xb71   :  { %v7205_v0 = vadd.f32 %v7204_v56, %v16880_v13  ;;  %v7206_v36 = vpop.f32.mrb[165].mxu1 }
 0xb72   :  { %v7207_v6 = vadd.f32 %v7206_v36, %v16883_v17  ;;  %v7208_v12 = vpop.f32.mrb[166].mxu1 }
 0xb73   :  { %v7243_v27 = vmax.f32 %v7205_v0, 0.0  ;;  %v7209_v55 = vadd.f32 %v7208_v12, %v16880_v13  ;;  %v7210_v21 = vpop.f32.mrb[167].mxu1 }
 0xb74   :  { %v7244_v52 = vmax.f32 %v7207_v6, 0.0  ;;  %v7211_v54 = vadd.f32 %v7210_v21, %v16883_v17 }
 0xb75   :  { %v7245_v28 = vmax.f32 %v7209_v55, 0.0  ;;  %v7259_v53 = vmin.f32 %v7243_v27, 6.0 }
 0xb76   :  { %v7246_v23 = vmax.f32 %v7211_v54, 0.0  ;;  %v7260_v11 = vmin.f32 %v7244_v52, 6.0 }
 0xb77   :  { %v7261_v33 = vmin.f32 %v7245_v28, 6.0 }
 0xb78   :  { %v7262_v25 = vmin.f32 %v7246_v23, 6.0  ;;  %v7214_v62 = vpop.f32.mrb[168].mxu1 }
 0xb79   :  { %v7293_v34 = vpack.c.bf16 %v7261_v33, %v7259_v53  ;;  %v7215_v24 = vadd.f32 %v7214_v62, %v16880_v13  ;;  %v7216_v42 = vpop.f32.mrb[169].mxu1  ;;  %v14485_v62 = vld [vmem:[%s18119_s13 + $0x20] sm:$0xff]  }
 0xb7a   :  { %v7294_v43 = vpack.c.bf16 %v7262_v25, %v7260_v11  ;;  %v7217_v60 = vadd.f32 %v7216_v42, %v16883_v17  ;;  %v7218_v1 = vpop.f32.mrb[170].mxu1  ;;  %v14481_v11 = vld [vmem:[%s18119_s13] sm:$0xff]   ;;  %v14484_v25 = vld [vmem:[%s18119_s13 + $0x18] sm:$0xff]  }
 0xb7b   :  { %v7247_v5 = vmax.f32 %v7215_v24, 0.0  ;;  %v7219_v50 = vadd.f32 %v7218_v1, %v16880_v13  ;;  %v7220_v30 = vpop.f32.mrb[171].mxu1  ;;  %v14487_v24 = vld [vmem:[%s18119_s13 + $0x30] sm:$0xff]   ;;  %v14488_v42 = vld [vmem:[%s18119_s13 + $0x38] sm:$0xff]  }
 0xb7c   :  { %v7248_v2 = vmax.f32 %v7217_v60, 0.0  ;;  %v7221_v49 = vadd.f32 %v7220_v30, %v16883_v17  ;;  %7373 = vmatprep.subr.bf16.mxu1 %v7294_v43  ;;  %v14489_v43 = vld [vmem:[%s18119_s13 + $0x40] sm:$0xff]  }
 0xb7d   :  { %v7249_v63 = vmax.f32 %v7219_v50, 0.0  ;;  %7374 = vmatpush1.bf16.msra.mxu1 %v7293_v34  ;;  %v7263_v15 = vmin.f32 %v7247_v5, 6.0  ;;  %v14486_v34 = vld [vmem:[%s18119_s13 + $0x28] sm:$0xff]   ;;  %v7497_v60 = vld [vmem:[#allocation16 + $0x8] sm:$0xff]  ;;  %v7500_v5 = vld [vmem:[#allocation15] sm:$0xff] }
 0xb7e   :  { %v7250_v57 = vmax.f32 %v7221_v49, 0.0  ;;  %v7264_v3 = vmin.f32 %v7248_v2, 6.0  ;;  %v7502_v50 = vld [vmem:[#allocation15 + $0x10] sm:$0xff]  ;;  %v7501_v2 = vld [vmem:[#allocation15 + $0x8] sm:$0xff]  ;;  %v7503_v49 = vld [vmem:[#allocation15 + $0x18] sm:$0xff] }
 0xb7f   :  { %v7265_v9 = vmin.f32 %v7249_v63, 6.0 }
 0xb80   :  { %v7266_v14 = vmin.f32 %v7250_v57, 6.0  ;;  %v7224_v19 = vpop.f32.mrb[172].mxu1 }
 0xb81   :  { %v7295_v37 = vpack.c.bf16 %v7265_v9, %v7263_v15  ;;  %v7225_v46 = vadd.f32 %v7224_v19, %v16880_v13  ;;  %v7226_v4 = vpop.f32.mrb[173].mxu1 }
 0xb82   :  { %v7296_v44 = vpack.c.bf16 %v7266_v14, %v7264_v3  ;;  %v7227_v61 = vadd.f32 %v7226_v4, %v16883_v17  ;;  %v7228_v7 = vpop.f32.mrb[174].mxu1  ;;  %v7504_v4 = vld [vmem:[#allocation15 + $0x20] sm:$0xff] }
 0xb83   :  { %v7251_v32 = vmax.f32 %v7225_v46, 0.0  ;;  %v7229_v38 = vadd.f32 %v7228_v7, %v16880_v13  ;;  %v7230_v51 = vpop.f32.mrb[175].mxu1  ;;  %v7505_v7 = vld [vmem:[#allocation15 + $0x28] sm:$0xff] }
 0xb84   :  { %v7252_v22 = vmax.f32 %v7227_v61, 0.0  ;;  %v7231_v41 = vadd.f32 %v7230_v51, %v16883_v17  ;;  %7375 = vmatprep.subr.bf16.mxu1 %v7296_v44  ;;  %v7506_v44 = vld [vmem:[#allocation15 + $0x30] sm:$0xff] }
 0xb85   :  { %v7253_v20 = vmax.f32 %v7229_v38, 0.0  ;;  %7376 = vmatpush1.bf16.msra.mxu1 %v7295_v37  ;;  %v7267_v35 = vmin.f32 %v7251_v32, 6.0  ;;  %v7507_v32 = vld [vmem:[#allocation15 + $0x38] sm:$0xff] }
 0xb86   :  { %v7254_v58 = vmax.f32 %v7231_v41, 0.0  ;;  %v7268_v48 = vmin.f32 %v7252_v22, 6.0 }
 0xb87   :  { %v7269_v18 = vmin.f32 %v7253_v20, 6.0 }
 0xb88   :  { %v7270_v8 = vmin.f32 %v7254_v58, 6.0  ;;  %v7234_v39 = vpop.f32.mrb[176].mxu1 }
 0xb89   :  { %v7297_v29 = vpack.c.bf16 %v7269_v18, %v7267_v35  ;;  %v7235_v40 = vadd.f32 %v7234_v39, %v16880_v13  ;;  %v7236_v31 = vpop.f32.mrb[177].mxu1  ;;  %v7510_v39 = vld [vmem:[#allocation15 + $0x50] sm:$0xff] }
 0xb8a   :  { %v7298_v47 = vpack.c.bf16 %v7270_v8, %v7268_v48  ;;  %v7237_v26 = vadd.f32 %v7236_v31, %v16883_v17  ;;  %v7238_v56 = vpop.f32.mrb[178].mxu1  ;;  %v7508_v8 = vld [vmem:[#allocation15 + $0x40] sm:$0xff]  ;;  %v7511_v31 = vld [vmem:[#allocation15 + $0x58] sm:$0xff] }
 0xb8b   :  { %v7255_v0 = vmax.f32 %v7235_v40, 0.0  ;;  %v7239_v36 = vadd.f32 %v7238_v56, %v16880_v13  ;;  %v7240_v6 = vpop.f32.mrb[179].mxu1  ;;  %v14482_v13 = vld [vmem:[%s18119_s13 + $0x8] sm:$0xff]   ;;  %v7509_v40 = vld [vmem:[#allocation15 + $0x48] sm:$0xff] }
 0xb8c   :  { %v7256_v12 = vmax.f32 %v7237_v26, 0.0  ;;  %v7241_v27 = vadd.f32 %v7240_v6, %v16883_v17  ;;  %7377 = vmatprep.subr.bf16.mxu1 %v7298_v47  ;;  %v14483_v17 = vld [vmem:[%s18119_s13 + $0x10] sm:$0xff]  }
 0xb8d   :  { %v7257_v55 = vmax.f32 %v7239_v36, 0.0  ;;  %7378 = vmatpush1.bf16.msra.mxu1 %v7297_v29  ;;  %v7271_v52 = vmin.f32 %v7255_v0, 6.0 }
 0xb8e   :  { %v7258_v21 = vmax.f32 %v7241_v27, 0.0  ;;  %v7272_v28 = vmin.f32 %v7256_v12, 6.0 }
 0xb8f   :  { %v7273_v54 = vmin.f32 %v7257_v55, 6.0 }
 0xb90   :  { %v7274_v23 = vmin.f32 %v7258_v21, 6.0  ;;  %v7512_v21 = vld [vmem:[#allocation15 + $0x60] sm:$0xff] }
 0xb91   :  { %v7299_v53 = vpack.c.bf16 %v7273_v54, %v7271_v52  ;;  %v7514_v52 = vld [vmem:[#allocation15 + $0x70] sm:$0xff] }
 0xb92   :  { %v7300_v33 = vpack.c.bf16 %v7274_v23, %v7272_v28  ;;  %v7513_v28 = vld [vmem:[#allocation15 + $0x68] sm:$0xff]  ;;  %v7515_v23 = vld [vmem:[#allocation15 + $0x78] sm:$0xff] }
 0xb94   :  { %7379 = vmatprep.subr.bf16.mxu1 %v7300_v33 }
 0xb95   :  { %7380 = vmatpush1.bf16.msra.mxu1 %v7299_v53 }
 0xb98   :  { %12200 = vmatmul.mubr.msk.bf16.vlgmr.msra.gmra.mrb[180].mxu1 %vm6702_vm2, %v14481_v11 }
 0xb99   :  { %7415 = vmatprep.mubr.bf16.mxu1 %v18117_v16 }
 0xba0   :  { %12201 = vmatmul.mubr.msk.bf16.gmra.mrb[184].mxu1 %vm6702_vm2, %v14482_v13 }
 0xba1   :  { %7425 = vmatprep.mubr.bf16.mxu1 %v18117_v16 }
 0xba8   :  { %12202 = vmatmul.mubr.msk.bf16.gmra.mrb[188].mxu1 %vm6702_vm2, %v14483_v17 }
 0xba9   :  { %7435 = vmatprep.mubr.bf16.mxu1 %v18117_v16 }
 0xbb0   :  { %12203 = vmatmul.mubr.msk.bf16.gmra.mrb[192].mxu1 %vm6702_vm2, %v14484_v25 }
 0xbb1   :  { %7445 = vmatprep.mubr.bf16.mxu1 %v18117_v16 }
 0xbb8   :  { %12204 = vmatmul.mubr.msk.bf16.gmra.mrb[196].mxu1 %vm6702_vm2, %v14485_v62 }
 0xbb9   :  { %7455 = vmatprep.mubr.bf16.mxu1 %v18117_v16 }
 0xbc0   :  { %12205 = vmatmul.mubr.msk.bf16.gmra.mrb[200].mxu1 %vm6702_vm2, %v14486_v34 }
 0xbc1   :  { %7465 = vmatprep.mubr.bf16.mxu1 %v18117_v16 }
 0xbc8   :  { %12206 = vmatmul.mubr.msk.bf16.gmra.mrb[204].mxu1 %vm6702_vm2, %v14487_v24 }
 0xbc9   :  { %7475 = vmatprep.mubr.bf16.mxu1 %v18117_v16 }
 0xbd0   :  { %12207 = vmatmul.mubr.msk.bf16.gmra.mrb[208].mxu1 %vm6702_vm2, %v14488_v42  ;;  %v7516_v42 = vld [vmem:[#allocation15 + $0x80] sm:$0xff] }
 0xbd1   :  { %7485 = vmatprep.mubr.bf16.mxu1 %v18117_v16 }
 0xbd8   :  { %12208 = vmatmul.mubr.msk.bf16.gmra.mrb[212].mxu1 %vm6702_vm2, %v14489_v43  ;;  %v7518_v43 = vld [vmem:[#allocation15 + $0x90] sm:$0xff] }
 0xbd9   :  { %12209 = vmatprep.mubr.msk.f32.mxu1 %vm7584_vm3, %v7497_v60 }
 0xc6b   :  { %v7407_v1 = vpop.f32.mrb[180].mxu1 }
 0xc6c   :  { %v7409_v30 = vpop.f32.mrb[181].mxu1  ;;  %v7536_v57 = vmul.f32 %v7500_v5, %v7407_v1  ;;  %v7517_v1 = vld [vmem:[#allocation15 + $0x88] sm:$0xff]  ;;  %v7519_v5 = vld [vmem:[#allocation15 + $0x98] sm:$0xff] }
 0xc6d   :  { %v7411_v63 = vpop.f32.mrb[182].mxu1  ;;  %v7537_v3 = vmul.f32 %v7501_v2, %v7409_v30 }
 0xc6e   :  { %v7538_v15 = vmul.f32 %v7502_v50, %v7411_v63  ;;  %v7413_v9 = vpop.f32.mrb[183].mxu1 }
 0xc6f   :  { %v7539_v14 = vmul.f32 %v7503_v49, %v7413_v9 }
 0xc70   :  { %v13433_v19 = vpack.c.bf16 %v7538_v15, %v7536_v57 }
 0xc71   :  { %v13431_v37 = vpack.c.bf16 %v7539_v14, %v7537_v3  ;;  %v7520_v14 = vld [vmem:[#allocation15 + $0xa0] sm:$0xff] }
 0xc73   :  { %v7417_v46 = vpop.f32.mrb[184].mxu1  ;;  %13432 = vmatprep.subr.bf16.mxu1 %v13431_v37 }
 0xc74   :  { %v7419_v61 = vpop.f32.mrb[185].mxu1  ;;  %13434 = vmatpush1.bf16.msra.mxu1 %v13433_v19  ;;  %v7540_v51 = vmul.f32 %v7504_v4, %v7417_v46  ;;  %v7522_v19 = vld [vmem:[#allocation15 + $0xb0] sm:$0xff]  ;;  %v7521_v46 = vld [vmem:[#allocation15 + $0xa8] sm:$0xff]  ;;  %v7523_v4 = vld [vmem:[#allocation15 + $0xb8] sm:$0xff] }
 0xc75   :  { %v7421_v38 = vpop.f32.mrb[186].mxu1  ;;  %v7541_v20 = vmul.f32 %v7505_v7, %v7419_v61 }
 0xc76   :  { %v7542_v22 = vmul.f32 %v7506_v44, %v7421_v38  ;;  %v7423_v41 = vpop.f32.mrb[187].mxu1 }
 0xc77   :  { %v7543_v58 = vmul.f32 %v7507_v32, %v7423_v41 }
 0xc78   :  { %v13437_v35 = vpack.c.bf16 %v7542_v22, %v7540_v51 }
 0xc79   :  { %v13435_v18 = vpack.c.bf16 %v7543_v58, %v7541_v20  ;;  %v7524_v58 = vld [vmem:[#allocation15 + $0xc0] sm:$0xff] }
 0xc7b   :  { %v7427_v48 = vpop.f32.mrb[188].mxu1  ;;  %13436 = vmatprep.subr.bf16.mxu1 %v13435_v18 }
 0xc7c   :  { %v7429_v29 = vpop.f32.mrb[189].mxu1  ;;  %13438 = vmatpush1.bf16.msra.mxu1 %v13437_v35  ;;  %v7544_v26 = vmul.f32 %v7508_v8, %v7427_v48  ;;  %v7526_v35 = vld [vmem:[#allocation15 + $0xd0] sm:$0xff]  ;;  %v7525_v48 = vld [vmem:[#allocation15 + $0xc8] sm:$0xff]  ;;  %v7527_v8 = vld [vmem:[#allocation15 + $0xd8] sm:$0xff] }
 0xc7d   :  { %v7431_v47 = vpop.f32.mrb[190].mxu1  ;;  %v7545_v36 = vmul.f32 %v7509_v40, %v7429_v29 }
 0xc7e   :  { %v7546_v56 = vmul.f32 %v7510_v39, %v7431_v47  ;;  %v7433_v0 = vpop.f32.mrb[191].mxu1 }
 0xc7f   :  { %v7547_v6 = vmul.f32 %v7511_v31, %v7433_v0 }
 0xc80   :  { %v13441_v12 = vpack.c.bf16 %v7546_v56, %v7544_v26 }
 0xc81   :  { %v13439_v27 = vpack.c.bf16 %v7547_v6, %v7545_v36  ;;  %v7528_v6 = vld [vmem:[#allocation15 + $0xe0] sm:$0xff] }
 0xc83   :  { %v7437_v55 = vpop.f32.mrb[192].mxu1  ;;  %13440 = vmatprep.subr.bf16.mxu1 %v13439_v27 }
 0xc84   :  { %v7439_v54 = vpop.f32.mrb[193].mxu1  ;;  %13442 = vmatpush1.bf16.msra.mxu1 %v13441_v12  ;;  %v7548_v33 = vmul.f32 %v7512_v21, %v7437_v55  ;;  %v7530_v12 = vld [vmem:[#allocation15 + $0xf0] sm:$0xff]  ;;  %v7529_v55 = vld [vmem:[#allocation15 + $0xe8] sm:$0xff]  ;;  %v7531_v21 = vld [vmem:[#allocation15 + $0xf8] sm:$0xff] }
 0xc85   :  { %v7441_v53 = vpop.f32.mrb[194].mxu1  ;;  %v7549_v17 = vmul.f32 %v7513_v28, %v7439_v54 }
 0xc86   :  { %v7550_v11 = vmul.f32 %v7514_v52, %v7441_v53  ;;  %v7443_v13 = vpop.f32.mrb[195].mxu1 }
 0xc87   :  { %v7551_v25 = vmul.f32 %v7515_v23, %v7443_v13 }
 0xc88   :  { %v13445_v62 = vpack.c.bf16 %v7550_v11, %v7548_v33 }
 0xc89   :  { %v13443_v34 = vpack.c.bf16 %v7551_v25, %v7549_v17  ;;  %v7532_v25 = vld [vmem:[#allocation15 + $0x100] sm:$0xff] }
 0xc8b   :  { %v7447_v24 = vpop.f32.mrb[196].mxu1  ;;  %13444 = vmatprep.subr.bf16.mxu1 %v13443_v34 }
 0xc8c   :  { %v7449_v60 = vpop.f32.mrb[197].mxu1  ;;  %13446 = vmatpush1.bf16.msra.mxu1 %v13445_v62  ;;  %v7552_v30 = vmul.f32 %v7516_v42, %v7447_v24  ;;  %v7534_v62 = vld [vmem:[#allocation15 + $0x110] sm:$0xff]  ;;  %v7533_v24 = vld [vmem:[#allocation15 + $0x108] sm:$0xff]  ;;  %v7535_v42 = vld [vmem:[#allocation15 + $0x118] sm:$0xff] }
 0xc8d   :  { %v7451_v50 = vpop.f32.mrb[198].mxu1  ;;  %v7553_v63 = vmul.f32 %v7517_v1, %v7449_v60 }
 0xc8e   :  { %v7554_v2 = vmul.f32 %v7518_v43, %v7451_v50  ;;  %v7453_v49 = vpop.f32.mrb[199].mxu1 }
 0xc8f   :  { %v7555_v57 = vmul.f32 %v7519_v5, %v7453_v49 }
 0xc90   :  { %v13449_v15 = vpack.c.bf16 %v7554_v2, %v7552_v30 }
 0xc91   :  { %v13447_v9 = vpack.c.bf16 %v7555_v57, %v7553_v63  ;;  %v14492_v63 = vld [vmem:[#allocation19 + $0x4] ss:$16 sps:$4 sm:$0xff]  }
 0xc92   :  { %v7496_v57 = vld [vmem:[#allocation16] sm:$0xff] }
 0xc93   :  { %v7457_v3 = vpop.f32.mrb[200].mxu1  ;;  %13448 = vmatprep.subr.bf16.mxu1 %v13447_v9  ;;  %v7499_v9 = vld [vmem:[#allocation16 + $0x18] sm:$0xff] }
 0xc94   :  { %v7459_v37 = vpop.f32.mrb[201].mxu1  ;;  %13450 = vmatpush1.bf16.msra.mxu1 %v13449_v15  ;;  %v7556_v61 = vmul.f32 %v7520_v14, %v7457_v3  ;;  %v14490_v15 = vld [vmem:[#allocation19] ss:$16 sps:$4 sm:$0xff]   ;;  %v14495_v3 = vld [vmem:[#allocation19 + $0x24] ss:$16 sps:$4 sm:$0xff]  }
 0xc95   :  { %v7461_v44 = vpop.f32.mrb[202].mxu1  ;;  %v7557_v38 = vmul.f32 %v7521_v46, %v7459_v37  ;;  %v7498_v14 = vld [vmem:[#allocation16 + $0x10] sm:$0xff] }
 0xc96   :  { %v7558_v7 = vmul.f32 %v7522_v19, %v7461_v44  ;;  %v7463_v32 = vpop.f32.mrb[203].mxu1  ;;  %v14493_v19 = vld [vmem:[#allocation19 + $0x20] ss:$16 sps:$4 sm:$0xff]   ;;  %v14498_v37 = vld [vmem:[#allocation19 + $0x44] ss:$16 sps:$4 sm:$0xff]  }
 0xc97   :  { %v7559_v51 = vmul.f32 %v7523_v4, %v7463_v32  ;;  %v14496_v46 = vld [vmem:[#allocation19 + $0x40] ss:$16 sps:$4 sm:$0xff]   ;;  %v14501_v4 = vld [vmem:[#allocation19 + $0x64] ss:$16 sps:$4 sm:$0xff]  }
 0xc98   :  { %v13453_v22 = vpack.c.bf16 %v7558_v7, %v7556_v61  ;;  %v14499_v44 = vld [vmem:[#allocation19 + $0x60] ss:$16 sps:$4 sm:$0xff]   ;;  %v14504_v61 = vld [vmem:[#allocation19 + $0x84] ss:$16 sps:$4 sm:$0xff]  }
 0xc99   :  { %v13451_v41 = vpack.c.bf16 %v7559_v51, %v7557_v38  ;;  %v14502_v7 = vld [vmem:[#allocation19 + $0x80] ss:$16 sps:$4 sm:$0xff]   ;;  %v14507_v32 = vld [vmem:[#allocation19 + $0xa4] ss:$16 sps:$4 sm:$0xff]  }
 0xc9a   :  { %v14505_v38 = vld [vmem:[#allocation19 + $0xa0] ss:$16 sps:$4 sm:$0xff]   ;;  %v14510_v51 = vld [vmem:[#allocation19 + $0xc4] ss:$16 sps:$4 sm:$0xff]  }
 0xc9b   :  { %v7467_v20 = vpop.f32.mrb[204].mxu1  ;;  %13452 = vmatprep.subr.bf16.mxu1 %v13451_v41  ;;  %v14513_v41 = vld [vmem:[#allocation19 + $0xe4] ss:$16 sps:$4 sm:$0xff]  }
 0xc9c   :  { %v7469_v18 = vpop.f32.mrb[205].mxu1  ;;  %13454 = vmatpush1.bf16.msra.mxu1 %v13453_v22  ;;  %v7560_v29 = vmul.f32 %v7524_v58, %v7467_v20  ;;  %v14508_v22 = vld [vmem:[#allocation19 + $0xc0] ss:$16 sps:$4 sm:$0xff]   ;;  %v14516_v58 = vld [vmem:[#allocation19 + $0x104] ss:$16 sps:$4 sm:$0xff]  }
 0xc9d   :  { %v7471_v39 = vpop.f32.mrb[206].mxu1  ;;  %v7561_v47 = vmul.f32 %v7525_v48, %v7469_v18  ;;  %v14511_v20 = vld [vmem:[#allocation19 + $0xe0] ss:$16 sps:$4 sm:$0xff]   ;;  %v14519_v18 = vld [vmem:[#allocation19 + $0x124] ss:$16 sps:$4 sm:$0xff]  }
 0xc9e   :  { %v7562_v40 = vmul.f32 %v7526_v35, %v7471_v39  ;;  %v7473_v31 = vpop.f32.mrb[207].mxu1  ;;  %v14514_v35 = vld [vmem:[#allocation19 + $0x100] ss:$16 sps:$4 sm:$0xff]  }
 0xc9f   :  { %v7563_v26 = vmul.f32 %v7527_v8, %v7473_v31  ;;  %v14517_v48 = vld [vmem:[#allocation19 + $0x120] ss:$16 sps:$4 sm:$0xff]   ;;  %v14522_v8 = vld [vmem:[#allocation19 + $0x144] ss:$16 sps:$4 sm:$0xff]  }
 0xca0   :  { %v13457_v56 = vpack.c.bf16 %v7562_v40, %v7560_v29  ;;  %v14520_v39 = vld [vmem:[#allocation19 + $0x140] ss:$16 sps:$4 sm:$0xff]   ;;  %v14525_v29 = vld [vmem:[#allocation19 + $0x164] ss:$16 sps:$4 sm:$0xff]  }
 0xca1   :  { %v13455_v0 = vpack.c.bf16 %v7563_v26, %v7561_v47  ;;  %v14523_v40 = vld [vmem:[#allocation19 + $0x160] ss:$16 sps:$4 sm:$0xff]   ;;  %v14528_v31 = vld [vmem:[#allocation19 + $0x184] ss:$16 sps:$4 sm:$0xff]  }
 0xca2   :  { %v14526_v47 = vld [vmem:[#allocation19 + $0x180] ss:$16 sps:$4 sm:$0xff]   ;;  %v14531_v26 = vld [vmem:[#allocation19 + $0x1a4] ss:$16 sps:$4 sm:$0xff]  }
 0xca3   :  { %v7477_v36 = vpop.f32.mrb[208].mxu1  ;;  %13456 = vmatprep.subr.bf16.mxu1 %v13455_v0  ;;  %v14534_v0 = vld [vmem:[#allocation19 + $0x1c4] ss:$16 sps:$4 sm:$0xff]  }
 0xca4   :  { %v7479_v27 = vpop.f32.mrb[209].mxu1  ;;  %13458 = vmatpush1.bf16.msra.mxu1 %v13457_v56  ;;  %v7564_v54 = vmul.f32 %v7528_v6, %v7477_v36  ;;  %v14529_v56 = vld [vmem:[#allocation19 + $0x1a0] ss:$16 sps:$4 sm:$0xff]   ;;  %v14537_v6 = vld [vmem:[#allocation19 + $0x1e4] ss:$16 sps:$4 sm:$0xff]  }
 0xca5   :  { %v7481_v52 = vpop.f32.mrb[210].mxu1  ;;  %v7565_v53 = vmul.f32 %v7529_v55, %v7479_v27  ;;  %v14532_v36 = vld [vmem:[#allocation19 + $0x1c0] ss:$16 sps:$4 sm:$0xff]   ;;  %v14540_v27 = vld [vmem:[#allocation19 + $0xc] ss:$16 sps:$4 sm:$0xff]  }
 0xca6   :  { %v7566_v28 = vmul.f32 %v7530_v12, %v7481_v52  ;;  %v7483_v23 = vpop.f32.mrb[211].mxu1  ;;  %v14535_v12 = vld [vmem:[#allocation19 + $0x1e0] ss:$16 sps:$4 sm:$0xff]   ;;  %v7572_v55 = vld [vmem:[#allocation18] sm:$0x3] }
 0xca7   :  { %v7567_v33 = vmul.f32 %v7531_v21, %v7483_v23  ;;  %v7577_v21 = vrot.slane %v7572_v55, %v16874_v59  ;;  %v7581_v52 = vrot.slane %v7572_v55, %v16877_v45 }
 0xca8   :  { %v13461_v11 = vpack.c.bf16 %v7566_v28, %v7564_v54 }
 0xca9   :  { %v13459_v13 = vpack.c.bf16 %v7567_v33, %v7565_v53 }
 0xcab   :  { %v7487_v17 = vpop.f32.mrb[212].mxu1  ;;  %13460 = vmatprep.subr.bf16.mxu1 %v13459_v13 }
 0xcac   :  { %v7489_v34 = vpop.f32.mrb[213].mxu1  ;;  %13462 = vmatpush1.bf16.msra.mxu1 %v13461_v11  ;;  %v7568_v60 = vmul.f32 %v7532_v25, %v7487_v17 }
 0xcad   :  { %v7491_v43 = vpop.f32.mrb[214].mxu1  ;;  %v7569_v50 = vmul.f32 %v7533_v24, %v7489_v34 }
 0xcae   :  { %v7570_v1 = vmul.f32 %v7534_v62, %v7491_v43  ;;  %v7493_v5 = vpop.f32.mrb[215].mxu1 }
 0xcaf   :  { %v7571_v30 = vmul.f32 %v7535_v42, %v7493_v5 }
 0xcb0   :  { %v13465_v2 = vpack.c.bf16 %v7570_v1, %v7568_v60 }
 0xcb1   :  { %v13463_v49 = vpack.c.bf16 %v7571_v30, %v7569_v50  ;;  %v14538_v30 = vld [vmem:[#allocation19 + $0x8] ss:$16 sps:$4 sm:$0xff]  }
 0xcb3   :  { %13464 = vmatprep.subr.bf16.mxu1 %v13463_v49  ;;  %v14541_v49 = vld [vmem:[#allocation19 + $0x28] ss:$16 sps:$4 sm:$0xff]  }
 0xcb4   :  { %13466 = vmatpush1.bf16.msra.mxu1 %v13465_v2  ;;  %v14543_v2 = vld [vmem:[#allocation19 + $0x2c] ss:$16 sps:$4 sm:$0xff]  }
 0xcb5   :  { %8084 = vmatprep.subr.bf16.mxu1 %v14492_v63  ;;  %v14546_v63 = vld [vmem:[#allocation19 + $0x4c] ss:$16 sps:$4 sm:$0xff]  }
 0xcb7   :  { %7656 = vmatmul.mubr.f32.vlgmr.msra.gmra.mrb[162].mxu1 %v7496_v57  ;;  %v14544_v57 = vld [vmem:[#allocation19 + $0x48] ss:$16 sps:$4 sm:$0xff]  }
 0xcb8   :  { %12210 = vmatprep.mubr.msk.f32.mxu1 %vm7584_vm3, %v7499_v9  ;;  %8085 = vmatpush1.bf16.msra.mxu1 %v14490_v15  ;;  %v14549_v15 = vld [vmem:[#allocation19 + $0x6c] ss:$16 sps:$4 sm:$0xff]   ;;  %v14547_v9 = vld [vmem:[#allocation19 + $0x68] ss:$16 sps:$4 sm:$0xff]  }
 0xcb9   :  { %8086 = vmatprep.subr.bf16.mxu1 %v14495_v3  ;;  %v14552_v3 = vld [vmem:[#allocation19 + $0x8c] ss:$16 sps:$4 sm:$0xff]  }
 0xcbb   :  { %7662 = vmatmul.mubr.f32.gmra.mrb[216].mxu1 %v7498_v14  ;;  %v14550_v14 = vld [vmem:[#allocation19 + $0x88] ss:$16 sps:$4 sm:$0xff]  }
 0xcbc   :  { %8087 = vmatpush1.bf16.msra.mxu1 %v14493_v19  ;;  %v14555_v19 = vld [vmem:[#allocation19 + $0xac] ss:$16 sps:$4 sm:$0xff]  }
 0xcbd   :  { %8088 = vmatprep.subr.bf16.mxu1 %v14498_v37  ;;  %v14553_v37 = vld [vmem:[#allocation19 + $0xa8] ss:$16 sps:$4 sm:$0xff]  }
 0xcc0   :  { %8089 = vmatpush1.bf16.msra.mxu1 %v14496_v46  ;;  %v14558_v46 = vld [vmem:[#allocation19 + $0xcc] ss:$16 sps:$4 sm:$0xff]  }
 0xcc1   :  { %8090 = vmatprep.subr.bf16.mxu1 %v14501_v4  ;;  %v14556_v4 = vld [vmem:[#allocation19 + $0xc8] ss:$16 sps:$4 sm:$0xff]  }
 0xcc4   :  { %8091 = vmatpush1.bf16.msra.mxu1 %v14499_v44  ;;  %v14561_v44 = vld [vmem:[#allocation19 + $0xec] ss:$16 sps:$4 sm:$0xff]  }
 0xcc5   :  { %8092 = vmatprep.subr.bf16.mxu1 %v14504_v61  ;;  %v14559_v61 = vld [vmem:[#allocation19 + $0xe8] ss:$16 sps:$4 sm:$0xff]  }
 0xcc8   :  { %8093 = vmatpush1.bf16.msra.mxu1 %v14502_v7  ;;  %v14564_v7 = vld [vmem:[#allocation19 + $0x10c] ss:$16 sps:$4 sm:$0xff]  }
 0xcc9   :  { %8094 = vmatprep.subr.bf16.mxu1 %v14507_v32  ;;  %v14562_v32 = vld [vmem:[#allocation19 + $0x108] ss:$16 sps:$4 sm:$0xff]  }
 0xccc   :  { %8095 = vmatpush1.bf16.msra.mxu1 %v14505_v38  ;;  %v14567_v38 = vld [vmem:[#allocation19 + $0x12c] ss:$16 sps:$4 sm:$0xff]  }
 0xccd   :  { %8096 = vmatprep.subr.bf16.mxu1 %v14510_v51  ;;  %v14565_v51 = vld [vmem:[#allocation19 + $0x128] ss:$16 sps:$4 sm:$0xff]  }
 0xcd0   :  { %8097 = vmatpush1.bf16.msra.mxu1 %v14508_v22  ;;  %v14570_v22 = vld [vmem:[#allocation19 + $0x14c] ss:$16 sps:$4 sm:$0xff]  }
 0xcd1   :  { %8098 = vmatprep.subr.bf16.mxu1 %v14513_v41  ;;  %v14568_v41 = vld [vmem:[#allocation19 + $0x148] ss:$16 sps:$4 sm:$0xff]  }
 0xcd4   :  { %8099 = vmatpush1.bf16.msra.mxu1 %v14511_v20  ;;  %v14573_v20 = vld [vmem:[#allocation19 + $0x16c] ss:$16 sps:$4 sm:$0xff]  }
 0xcd5   :  { %8100 = vmatprep.subr.bf16.mxu1 %v14516_v58  ;;  %v14571_v58 = vld [vmem:[#allocation19 + $0x168] ss:$16 sps:$4 sm:$0xff]  }
 0xcd8   :  { %8101 = vmatpush1.bf16.msra.mxu1 %v14514_v35  ;;  %v14576_v35 = vld [vmem:[#allocation19 + $0x18c] ss:$16 sps:$4 sm:$0xff]  }
 0xcd9   :  { %8102 = vmatprep.subr.bf16.mxu1 %v14519_v18  ;;  %v14574_v18 = vld [vmem:[#allocation19 + $0x188] ss:$16 sps:$4 sm:$0xff]  }
 0xcdc   :  { %8103 = vmatpush1.bf16.msra.mxu1 %v14517_v48  ;;  %v14579_v48 = vld [vmem:[#allocation19 + $0x1ac] ss:$16 sps:$4 sm:$0xff]  }
 0xcdd   :  { %8104 = vmatprep.subr.bf16.mxu1 %v14522_v8  ;;  %v14577_v8 = vld [vmem:[#allocation19 + $0x1a8] ss:$16 sps:$4 sm:$0xff]  }
 0xce0   :  { %8105 = vmatpush1.bf16.msra.mxu1 %v14520_v39  ;;  %v14582_v39 = vld [vmem:[#allocation19 + $0x1cc] ss:$16 sps:$4 sm:$0xff]  }
 0xce1   :  { %8106 = vmatprep.subr.bf16.mxu1 %v14525_v29  ;;  %v14580_v29 = vld [vmem:[#allocation19 + $0x1c8] ss:$16 sps:$4 sm:$0xff]  }
 0xce4   :  { %8107 = vmatpush1.bf16.msra.mxu1 %v14523_v40  ;;  %v14585_v40 = vld [vmem:[#allocation19 + $0x1ec] ss:$16 sps:$4 sm:$0xff]  }
 0xce5   :  { %8108 = vmatprep.subr.bf16.mxu1 %v14528_v31  ;;  %v14583_v31 = vld [vmem:[#allocation19 + $0x1e8] ss:$16 sps:$4 sm:$0xff]  }
 0xce8   :  { %8109 = vmatpush1.bf16.msra.mxu1 %v14526_v47  ;;  %v7742_v47 = vld [vmem:[#allocation21] sm:$0xf] }
 0xce9   :  { %8110 = vmatprep.subr.bf16.mxu1 %v14531_v26  ;;  %v7747_v26 = vrot.slane %v7742_v47, %v16874_v59 }
 0xcec   :  { %8111 = vmatpush1.bf16.msra.mxu1 %v14529_v56  ;;  %v7751_v56 = vrot.slane %v7742_v47, %v16877_v45 }
 0xced   :  { %8112 = vmatprep.subr.bf16.mxu1 %v14534_v0 }
 0xcf0   :  { %8113 = vmatpush1.bf16.msra.mxu1 %v14532_v36 }
 0xcf1   :  { %8114 = vmatprep.subr.bf16.mxu1 %v14537_v6 }
 0xcf4   :  { %8115 = vmatpush1.bf16.msra.mxu1 %v14535_v12 }
 0xcf5   :  { %8127 = vmatprep.subr.bf16.mxu1 %v14540_v27 }
 0xd8a   :  { %v7657_v54 = vpop.f32.mrb[162].mxu1 }
 0xd8b   :  { %v7658_v28 = vadd.f32 %v7657_v54, %v7577_v21  ;;  %v7659_v23 = vpop.f32.mrb[163].mxu1 }
 0xd8c   :  { %v7660_v53 = vadd.f32 %v7659_v23, %v7581_v52 }
 0xd8d   :  { %v7668_v11 = vmax.f32 %v7658_v28, 0.0 }
 0xd8e   :  { %v7663_v33 = vpop.f32.mrb[216].mxu1  ;;  %v7669_v25 = vmax.f32 %v7660_v53, 0.0 }
 0xd8f   :  { %v7664_v13 = vadd.f32 %v7663_v33, %v7577_v21  ;;  %v7665_v17 = vpop.f32.mrb[217].mxu1  ;;  %v7672_v42 = vmin.f32 %v7668_v11, 6.0 }
 0xd90   :  { %v7666_v62 = vadd.f32 %v7665_v17, %v7581_v52  ;;  %v7673_v60 = vmin.f32 %v7669_v25, 6.0 }
 0xd91   :  { %v7670_v34 = vmax.f32 %v7664_v13, 0.0 }
 0xd92   :  { %v7671_v24 = vmax.f32 %v7666_v62, 0.0 }
 0xd93   :  { %v7674_v43 = vmin.f32 %v7670_v34, 6.0  ;;  %v14586_v34 = vld [vmem:[%s18120_s0] sm:$0xff]  }
 0xd94   :  { %v7675_v1 = vmin.f32 %v7671_v24, 6.0  ;;  %v14587_v24 = vld [vmem:[%s18120_s0 + $0x8] sm:$0xff]  }
 0xd95   :  { %v16949_v5 = vpack.c.bf16 %v7674_v43, %v7672_v42  ;;  %v14588_v42 = vld [vmem:[%s18120_s0 + $0x10] ss:$0 sps:$4 sm:$0x33]   ;;  %v16971_v43 = vsub.s32 2, %v16871_v10 }
 0xd96   :  { %v7677_v50 = vpack.c.bf16 %v7675_v1, %v7673_v60  ;;  %v16974_v60 = vsub.s32 3, %v16871_v10 }
 0xd97   :  { %v7755_v1 = vrot.slane %v7742_v47, %v16971_v43 }
 0xd98   :  { %8116 = vmatprep.mubr.bf16.mxu1 %v7677_v50 }
 0xd99   :  { %8117 = vmatmul.mubr.bf16.vlgmr.msra.gmra.mrb[220].mxu1 %v16949_v5 }
 0xd9a   :  { %8128 = vmatpush1.bf16.msra.mxu1 %v14538_v30  ;;  %8159 = vmatprep.mubr.bf16.mxu1 %v7677_v50 }
 0xd9b   :  { %8129 = vmatprep.subr.bf16.mxu1 %v14543_v2 }
 0xd9e   :  { %8130 = vmatpush1.bf16.msra.mxu1 %v14541_v49 }
 0xd9f   :  { %8131 = vmatprep.subr.bf16.mxu1 %v14546_v63 }
 0xda2   :  { %8132 = vmatpush1.bf16.msra.mxu1 %v14544_v57 }
 0xda3   :  { %8133 = vmatprep.subr.bf16.mxu1 %v14549_v15 }
 0xda6   :  { %8134 = vmatpush1.bf16.msra.mxu1 %v14547_v9 }
 0xda7   :  { %8135 = vmatprep.subr.bf16.mxu1 %v14552_v3 }
 0xdaa   :  { %8136 = vmatpush1.bf16.msra.mxu1 %v14550_v14 }
 0xdab   :  { %8137 = vmatprep.subr.bf16.mxu1 %v14555_v19 }
 0xdae   :  { %8138 = vmatpush1.bf16.msra.mxu1 %v14553_v37 }
 0xdaf   :  { %8139 = vmatprep.subr.bf16.mxu1 %v14558_v46 }
 0xdb2   :  { %8140 = vmatpush1.bf16.msra.mxu1 %v14556_v4 }
 0xdb3   :  { %8141 = vmatprep.subr.bf16.mxu1 %v14561_v44 }
 0xdb6   :  { %8142 = vmatpush1.bf16.msra.mxu1 %v14559_v61 }
 0xdb7   :  { %8143 = vmatprep.subr.bf16.mxu1 %v14564_v7 }
 0xdba   :  { %8144 = vmatpush1.bf16.msra.mxu1 %v14562_v32 }
 0xdbb   :  { %8145 = vmatprep.subr.bf16.mxu1 %v14567_v38  ;;  %v15301_v38 = vmov 0.0  }
 0xdbe   :  { %8146 = vmatpush1.bf16.msra.mxu1 %v14565_v51 }
 0xdbf   :  { %8147 = vmatprep.subr.bf16.mxu1 %v14570_v22  ;;  %v8340_v22 = vld [vmem:[#allocation22] sm:$0xff] }
 0xdc2   :  { %8148 = vmatpush1.bf16.msra.mxu1 %v14568_v41  ;;  %v8344_v41 = vld [vmem:[#allocation22 + $0x20] sm:$0xff] }
 0xdc3   :  { %8149 = vmatprep.subr.bf16.mxu1 %v14573_v20 }
 0xdc6   :  { %8150 = vmatpush1.bf16.msra.mxu1 %v14571_v58  ;;  %v8341_v58 = vld [vmem:[#allocation22 + $0x8] sm:$0xff] }
 0xdc7   :  { %8151 = vmatprep.subr.bf16.mxu1 %v14576_v35  ;;  %v8345_v35 = vld [vmem:[#allocation22 + $0x28] sm:$0xff] }
 0xdca   :  { %8152 = vmatpush1.bf16.msra.mxu1 %v14574_v18 }
 0xdcb   :  { %8153 = vmatprep.subr.bf16.mxu1 %v14579_v48 }
 0xdce   :  { %8154 = vmatpush1.bf16.msra.mxu1 %v14577_v8 }
 0xdcf   :  { %8155 = vmatprep.subr.bf16.mxu1 %v14582_v39 }
 0xdd2   :  { %8156 = vmatpush1.bf16.msra.mxu1 %v14580_v29 }
 0xdd3   :  { %8157 = vmatprep.subr.bf16.mxu1 %v14585_v40 }
 0xdd6   :  { %8158 = vmatpush1.bf16.msra.mxu1 %v14583_v31 }
 0xdd9   :  { %8160 = vmatmul.mubr.bf16.vlgmr.msra.gmra.mrb[224].mxu1 %v16949_v5  ;;  %v7759_v5 = vrot.slane %v7742_v47, %v16974_v60 }
 0xdda   :  { %8249 = vmatprep.mubr.bf16.mxu1 %v18117_v16 }
 0xe6c   :  { %v8118_v0 = vpop.f32.mrb[220].mxu1 }
 0xe6d   :  { %v8119_v36 = vadd.f32 %v8118_v0, %v7747_v26  ;;  %v8120_v6 = vpop.f32.mrb[221].mxu1 }
 0xe6e   :  { %v8121_v12 = vadd.f32 %v8120_v6, %v7751_v56  ;;  %v8122_v27 = vpop.f32.mrb[222].mxu1  ;;  %v8353_v6 = vld [vmem:[#allocation22 + $0x68] sm:$0xff] }
 0xe6f   :  { %v8170_v55 = vmax.f32 %v8119_v36, 0.0  ;;  %v8123_v21 = vadd.f32 %v8122_v27, %v7747_v26  ;;  %v8124_v52 = vpop.f32.mrb[223].mxu1  ;;  %v8348_v26 = vld [vmem:[#allocation22 + $0x40] sm:$0xff]  ;;  %v8349_v36 = vld [vmem:[#allocation22 + $0x48] sm:$0xff] }
 0xe70   :  { %v8171_v54 = vmax.f32 %v8121_v12, 0.0  ;;  %v8125_v28 = vadd.f32 %v8124_v52, %v7751_v56  ;;  %v8352_v56 = vld [vmem:[#allocation22 + $0x60] sm:$0xff] }
 0xe71   :  { %v8174_v23 = vmax.f32 %v8123_v21, 0.0  ;;  %v8178_v33 = vmin.f32 %v8170_v55, 6.0 }
 0xe72   :  { %v8175_v53 = vmax.f32 %v8125_v28, 0.0  ;;  %v8179_v13 = vmin.f32 %v8171_v54, 6.0 }
 0xe73   :  { %v8182_v11 = vmin.f32 %v8174_v23, 6.0 }
 0xe74   :  { %v8183_v17 = vmin.f32 %v8175_v53, 6.0  ;;  %v8357_v53 = vld [vmem:[#allocation22 + $0x88] sm:$0xf] }
 0xe75   :  { %v8191_v25 = vpack.c.bf16 %v8182_v11, %v8178_v33  ;;  %v8572_v33 = vld [vmem:[%s18121_s18] sm:$0xff] }
 0xe76   :  { %v8192_v62 = vpack.c.bf16 %v8183_v17, %v8179_v13  ;;  %v8576_v11 = vld [vmem:[%s18121_s18 + $0x20] sm:$0xff]  ;;  %v8356_v17 = vld [vmem:[#allocation22 + $0x80] sm:$0xf] }
 0xe78   :  { %8217 = vmatprep.subr.bf16.mxu1 %v8192_v62  ;;  %v8580_v62 = vld [vmem:[%s18121_s18 + $0x40] sm:$0xff] }
 0xe79   :  { %8218 = vmatpush1.bf16.msra.mxu1 %v8191_v25 }
 0xe7c   :  { %12278 = vmatmul.mubr.msk.bf16.vlgmr.msra.gmra.mrb[228].mxu1 %vm7584_vm3, %v14586_v34 }
 0xe7d   :  { %8259 = vmatprep.mubr.bf16.mxu1 %v18117_v16 }
 0xe84   :  { %12279 = vmatmul.mubr.msk.bf16.gmra.mrb[232].mxu1 %vm7584_vm3, %v14587_v24 }
 0xe85   :  { %8269 = vmatprep.mubr.bf16.mxu1 %v18117_v16 }
 0xe8c   :  { %12280 = vmatmul.mubr.msk.bf16.gmra.mrb[236].mxu1 %vm7584_vm3, %v14588_v42 }
 0xe8d   :  { %8482 = vmatprep.mubr.f32.mxu1 %v15301_v38 }
 0xeac   :  { %v8161_v50 = vpop.f32.mrb[224].mxu1 }
 0xead   :  { %v8162_v30 = vadd.f32 %v8161_v50, %v7755_v1  ;;  %v8163_v2 = vpop.f32.mrb[225].mxu1  ;;  %v16995_v50 = vld [vmem:[#allocation24] sm:$0xf] }
 0xeae   :  { %v8164_v49 = vadd.f32 %v8163_v2, %v7759_v5  ;;  %v8165_v63 = vpop.f32.mrb[226].mxu1 }
 0xeaf   :  { %v8172_v57 = vmax.f32 %v8162_v30, 0.0  ;;  %v8166_v15 = vadd.f32 %v8165_v63, %v7755_v1  ;;  %v8167_v9 = vpop.f32.mrb[227].mxu1  ;;  %v12290_v30 = vcombine.low %v8572_v33, %v8576_v11  ;;  %v8588_v63 = vld [vmem:[%s18121_s18 + $0x80] sm:$0xff] }
 0xeb0   :  { %v8173_v3 = vmax.f32 %v8164_v49, 0.0  ;;  %v8168_v14 = vadd.f32 %v8167_v9, %v7759_v5 }
 0xeb1   :  { %v8176_v19 = vmax.f32 %v8166_v15, 0.0  ;;  %v8180_v46 = vmin.f32 %v8172_v57, 6.0  ;;  %v8592_v57 = vld [vmem:[%s18121_s18 + $0xa0] sm:$0xff] }
 0xeb2   :  { %v8177_v37 = vmax.f32 %v8168_v14, 0.0  ;;  %v8181_v44 = vmin.f32 %v8173_v3, 6.0  ;;  %v12307_v9 = vcombine.high %v8588_v63, %v8592_v57  ;;  %v8596_v3 = vld [vmem:[%s18121_s18 + $0xc0] sm:$0xff] }
 0xeb3   :  { %v8184_v4 = vmin.f32 %v8176_v19, 6.0  ;;  %v8600_v14 = vld [vmem:[%s18121_s18 + $0xe0] sm:$0xff]  ;;  %v12306_v19 = vcombine.low %v8588_v63, %v8592_v57 }
 0xeb4   :  { %v8185_v61 = vmin.f32 %v8177_v37, 6.0  ;;  %v12315_v37 = vcombine.high %v8596_v3, %v8600_v14 }
 0xeb5   :  { %v8193_v7 = vpack.c.bf16 %v8184_v4, %v8180_v46  ;;  %v8604_v46 = vld [vmem:[%s18121_s18 + $0x100] sm:$0xff] }
 0xeb6   :  { %v8194_v32 = vpack.c.bf16 %v8185_v61, %v8181_v44  ;;  %v8608_v4 = vld [vmem:[%s18121_s18 + $0x120] sm:$0xff]  ;;  %v12314_v44 = vcombine.low %v8596_v3, %v8600_v14 }
 0xeb7   :  { %v12323_v61 = vcombine.high %v8604_v46, %v8608_v4 }
 0xeb8   :  { %8278 = vmatprep.subr.bf16.mxu0 %v8194_v32  ;;  %v8616_v32 = vld [vmem:[%s18121_s18 + $0x160] sm:$0xff] }
 0xeb9   :  { %8279 = vmatpush1.bf16.msra.mxu0 %v8193_v7  ;;  %v8612_v7 = vld [vmem:[%s18121_s18 + $0x140] sm:$0xff] }
 0xebc   :  { %12281 = vmatmul.mubr.msk.bf16.vlgmr.msra.gmra.mrb[120].mxu0 %vm7584_vm3, %v14586_v34  ;;  %v8584_v34 = vld [vmem:[%s18121_s18 + $0x60] sm:$0xff] }
 0xebd   :  { %8320 = vmatprep.mubr.bf16.mxu0 %v18117_v16  ;;  %v12299_v49 = vcombine.high %v8580_v62, %v8584_v34  ;;  %v12298_v15 = vcombine.low %v8580_v62, %v8584_v34  ;;  %v8347_v62 = vld [vmem:[#allocation22 + $0x38] sm:$0xff]  ;;  %v8676_v34 = vld [vmem:[%s18121_s18 + $0x340] sm:$0xff] }
 0xec4   :  { %12282 = vmatmul.mubr.msk.bf16.gmra.mrb[124].mxu0 %vm7584_vm3, %v14587_v24 }
 0xec5   :  { %8330 = vmatprep.mubr.bf16.mxu0 %v18117_v16 }
 0xecc   :  { %12283 = vmatmul.mubr.msk.bf16.gmra.mrb[128].mxu0 %vm7584_vm3, %v14588_v42  ;;  %v12291_v42 = vcombine.high %v8572_v33, %v8576_v11  ;;  %v8342_v33 = vld [vmem:[#allocation22 + $0x10] sm:$0xff]  ;;  %v8343_v11 = vld [vmem:[#allocation22 + $0x18] sm:$0xff] }
 0xecd   :  { %8553 = vmatprep.mubr.f32.mxu0 %v15301_v38  ;;  %v12322_v38 = vcombine.low %v8604_v46, %v8608_v4  ;;  %v8351_v4 = vld [vmem:[#allocation22 + $0x58] sm:$0xff] }
 0xf4f   :  { %v8251_v51 = vpop.f32.mrb[228].mxu1 }
 0xf50   :  { %v8253_v20 = vpop.f32.mrb[229].mxu1  ;;  %v8360_v48 = vmul.f32 %v8340_v22, %v8251_v51  ;;  %v12331_v51 = vcombine.high %v8612_v7, %v8616_v32  ;;  %v8620_v22 = vld [vmem:[%s18121_s18 + $0x180] sm:$0xff] }
 0xf51   :  { %v8255_v18 = vpop.f32.mrb[230].mxu1  ;;  %v8361_v29 = vmul.f32 %v8341_v58, %v8253_v20  ;;  %v12330_v20 = vcombine.low %v8612_v7, %v8616_v32 }
 0xf52   :  { %v8364_v8 = vmul.f32 %v8344_v41, %v8255_v18  ;;  %v8257_v39 = vpop.f32.mrb[231].mxu1  ;;  %v8624_v41 = vld [vmem:[%s18121_s18 + $0x1a0] sm:$0xff] }
 0xf53   :  { %v8365_v40 = vmul.f32 %v8345_v35, %v8257_v39  ;;  %v12339_v58 = vcombine.high %v8620_v22, %v8624_v41  ;;  %v8628_v35 = vld [vmem:[%s18121_s18 + $0x1c0] sm:$0xff] }
 0xf54   :  { %v13469_v31 = vpack.c.bf16 %v8364_v8, %v8360_v48  ;;  %v8632_v18 = vld [vmem:[%s18121_s18 + $0x1e0] sm:$0xff]  ;;  %v12338_v48 = vcombine.low %v8620_v22, %v8624_v41 }
 0xf55   :  { %v13467_v47 = vpack.c.bf16 %v8365_v40, %v8361_v29  ;;  %v12347_v8 = vcombine.high %v8628_v35, %v8632_v18  ;;  %v8636_v39 = vld [vmem:[%s18121_s18 + $0x200] sm:$0xff]  ;;  %v12346_v40 = vcombine.low %v8628_v35, %v8632_v18  ;;  %v8573_v35 = vld [vmem:[%s18121_s18 + $0x8] sm:$0xff] }
 0xf56   :  { %v8640_v29 = vld [vmem:[%s18121_s18 + $0x220] sm:$0xff]  ;;  %v8577_v18 = vld [vmem:[%s18121_s18 + $0x28] sm:$0xff] }
 0xf57   :  { %v8261_v16 = vpop.f32.mrb[232].mxu1  ;;  %13468 = vmatprep.subr.bf16.mxu1 %v13467_v47  ;;  %v8644_v47 = vld [vmem:[%s18121_s18 + $0x240] sm:$0xff] }
 0xf58   :  { %v8263_v0 = vpop.f32.mrb[233].mxu1  ;;  %13470 = vmatpush1.bf16.msra.mxu1 %v13469_v31  ;;  %v8368_v27 = vmul.f32 %v8348_v26, %v8261_v16  ;;  %v12355_v31 = vcombine.high %v8636_v39, %v8640_v29  ;;  %v8648_v16 = vld [vmem:[%s18121_s18 + $0x260] sm:$0xff]  ;;  %v12354_v26 = vcombine.low %v8636_v39, %v8640_v29  ;;  %v8581_v29 = vld [vmem:[%s18121_s18 + $0x48] sm:$0xff] }
 0xf59   :  { %v8265_v12 = vpop.f32.mrb[234].mxu1  ;;  %v8369_v52 = vmul.f32 %v8349_v36, %v8263_v0  ;;  %v8652_v0 = vld [vmem:[%s18121_s18 + $0x280] sm:$0xff] }
 0xf5a   :  { %v8372_v55 = vmul.f32 %v8352_v56, %v8265_v12  ;;  %v8267_v21 = vpop.f32.mrb[235].mxu1  ;;  %v12363_v56 = vcombine.high %v8644_v47, %v8648_v16  ;;  %v8656_v36 = vld [vmem:[%s18121_s18 + $0x2a0] sm:$0xff] }
 0xf5b   :  { %v8373_v54 = vmul.f32 %v8353_v6, %v8267_v21  ;;  %v12362_v6 = vcombine.low %v8644_v47, %v8648_v16  ;;  %v12371_v12 = vcombine.high %v8652_v0, %v8656_v36  ;;  %v12370_v21 = vcombine.low %v8652_v0, %v8656_v36 }
 0xf5c   :  { %v13473_v28 = vpack.c.bf16 %v8372_v55, %v8368_v27  ;;  %v8660_v27 = vld [vmem:[%s18121_s18 + $0x2c0] sm:$0xff]  ;;  %v12293_v47 = vcombine.high %v8573_v35, %v8577_v18 }
 0xf5d   :  { %v13471_v23 = vpack.c.bf16 %v8373_v54, %v8369_v52  ;;  %v8664_v55 = vld [vmem:[%s18121_s18 + $0x2e0] sm:$0xff] }
 0xf5e   :  { %v12379_v52 = vcombine.high %v8660_v27, %v8664_v55  ;;  %v8668_v54 = vld [vmem:[%s18121_s18 + $0x300] sm:$0xff] }
 0xf5f   :  { %v8271_v13 = vpop.f32.mrb[236].mxu1  ;;  %13472 = vmatprep.subr.bf16.mxu1 %v13471_v23  ;;  %v12378_v23 = vcombine.low %v8660_v27, %v8664_v55 }
 0xf60   :  { %v8273_v25 = vpop.f32.mrb[237].mxu1  ;;  %13474 = vmatpush1.bf16.msra.mxu1 %v13473_v28  ;;  %v8376_v5 = vmul.f32 %v8356_v17, %v8271_v13  ;;  %v8672_v28 = vld [vmem:[%s18121_s18 + $0x320] sm:$0xff]  ;;  %v8346_v13 = vld [vmem:[#allocation22 + $0x30] sm:$0xff] }
 0xf61   :  { %v8377_v24 = vmul.f32 %v8357_v53, %v8273_v25  ;;  %v8275_v1 = vpop.f32.mrb[238].mxu1  ;;  %v12387_v17 = vcombine.high %v8668_v54, %v8672_v28 }
 0xf62   :  { %v8276_v2 = vpop.f32.mrb[239].mxu1 }
 0xf63   :  { %12284 = vmatprep.subr.msk.mxu1 %vm3446_vm0, %v8377_v24  ;;  %v8680_v24 = vld [vmem:[%s18121_s18 + $0x360] sm:$0xff]  ;;  %v12386_v2 = vcombine.low %v8668_v54, %v8672_v28 }
 0xf64   :  { %12285 = vmatpush1.msk.msra.mxu1 %vm3446_vm0, %v8376_v5  ;;  %v12395_v57 = vcombine.high %v8676_v34, %v8680_v24  ;;  %v12394_v3 = vcombine.low %v8676_v34, %v8680_v24  ;;  %v8625_v34 = vld [vmem:[%s18121_s18 + $0x1a8] sm:$0xff] }
 0xf65   :  { %12286 = vmatmul.mubr.msk.f32.vlgmr.msra.gmra.mrb[218].mxu1 %vm8402_vm4, %v16995_v50  ;;  %10150 = vmatprep.subr.bf16.mxu1 %v12291_v42 }
 0xf66   :  { %10151 = vmatpush1.bf16.msra.mxu1 %v12290_v30 }
 0xf67   :  { %10152 = vmatprep.subr.bf16.mxu1 %v12299_v49 }
 0xf6a   :  { %10153 = vmatpush1.bf16.msra.mxu1 %v12298_v15 }
 0xf6b   :  { %10154 = vmatprep.subr.bf16.mxu1 %v12307_v9 }
 0xf6e   :  { %10155 = vmatpush1.bf16.msra.mxu1 %v12306_v19  ;;  %v8350_v19 = vld [vmem:[#allocation22 + $0x50] sm:$0xff] }
 0xf6f   :  { %10156 = vmatprep.subr.bf16.mxu1 %v12315_v37  ;;  %v8354_v37 = vld [vmem:[#allocation22 + $0x70] sm:$0xff] }
 0xf72   :  { %10157 = vmatpush1.bf16.msra.mxu1 %v12314_v44  ;;  %v8355_v44 = vld [vmem:[#allocation22 + $0x78] sm:$0xff] }
 0xf73   :  { %10158 = vmatprep.subr.bf16.mxu1 %v12323_v61 }
 0xf76   :  { %10159 = vmatpush1.bf16.msra.mxu1 %v12322_v38 }
 0xf77   :  { %10160 = vmatprep.subr.bf16.mxu1 %v12331_v51 }
 0xf7a   :  { %10161 = vmatpush1.bf16.msra.mxu1 %v12330_v20 }
 0xf7b   :  { %10162 = vmatprep.subr.bf16.mxu1 %v12339_v58  ;;  %v8359_v58 = vld [vmem:[#allocation22 + $0x98] sm:$0xf] }
 0xf7e   :  { %10163 = vmatpush1.bf16.msra.mxu1 %v12338_v48 }
 0xf7f   :  { %10164 = vmatprep.subr.bf16.mxu1 %v12347_v8  ;;  %v8358_v8 = vld [vmem:[#allocation22 + $0x90] sm:$0xf] }
 0xf82   :  { %10165 = vmatpush1.bf16.msra.mxu1 %v12346_v40  ;;  %v8585_v40 = vld [vmem:[%s18121_s18 + $0x68] sm:$0xff] }
 0xf83   :  { %10166 = vmatprep.subr.bf16.mxu1 %v12355_v31  ;;  %v12301_v36 = vcombine.high %v8581_v29, %v8585_v40  ;;  %v12300_v27 = vcombine.low %v8581_v29, %v8585_v40  ;;  %v8661_v40 = vld [vmem:[%s18121_s18 + $0x2c8] sm:$0xff] }
 0xf86   :  { %10167 = vmatpush1.bf16.msra.mxu1 %v12354_v26 }
 0xf87   :  { %10168 = vmatprep.subr.bf16.mxu1 %v12363_v56  ;;  %v12292_v56 = vcombine.low %v8573_v35, %v8577_v18 }
 0xf8a   :  { %10169 = vmatpush1.bf16.msra.mxu1 %v12362_v6  ;;  %v8589_v6 = vld [vmem:[%s18121_s18 + $0x88] sm:$0xff] }
 0xf8b   :  { %10170 = vmatprep.subr.bf16.mxu1 %v12371_v12  ;;  %v8593_v12 = vld [vmem:[%s18121_s18 + $0xa8] sm:$0xff] }
 0xf8c   :  { %v12309_v55 = vcombine.high %v8589_v6, %v8593_v12  ;;  %v12308_v54 = vcombine.low %v8589_v6, %v8593_v12  ;;  %v8677_v6 = vld [vmem:[%s18121_s18 + $0x348] sm:$0xff] }
 0xf8d   :  { %v8681_v12 = vld [vmem:[%s18121_s18 + $0x368] sm:$0xff] }
 0xf8e   :  { %10171 = vmatpush1.bf16.msra.mxu1 %v12370_v21  ;;  %v8597_v21 = vld [vmem:[%s18121_s18 + $0xc8] sm:$0xff] }
 0xf8f   :  { %v8312_v53 = vpop.f32.mrb[120].mxu0  ;;  %10172 = vmatprep.subr.bf16.mxu1 %v12379_v52  ;;  %v8601_v52 = vld [vmem:[%s18121_s18 + $0xe8] sm:$0xff] }
 0xf90   :  { %v8314_v25 = vpop.f32.mrb[121].mxu0  ;;  %v8362_v1 = vmul.f32 %v8342_v33, %v8312_v53  ;;  %v12317_v28 = vcombine.high %v8597_v21, %v8601_v52  ;;  %v12316_v53 = vcombine.low %v8597_v21, %v8601_v52  ;;  %v8685_v21 = vld [vmem:[%s18121_s18 + $0x388] sm:$0xff] }
 0xf91   :  { %v8316_v42 = vpop.f32.mrb[122].mxu0  ;;  %v8363_v49 = vmul.f32 %v8343_v11, %v8314_v25  ;;  %v8613_v11 = vld [vmem:[%s18121_s18 + $0x148] sm:$0xff] }
 0xf92   :  { %v8366_v5 = vmul.f32 %v8346_v13, %v8316_v42  ;;  %v8318_v30 = vpop.f32.mrb[123].mxu0  ;;  %10173 = vmatpush1.bf16.msra.mxu1 %v12378_v23  ;;  %v8609_v23 = vld [vmem:[%s18121_s18 + $0x128] sm:$0xff] }
 0xf93   :  { %v8367_v63 = vmul.f32 %v8347_v62, %v8318_v30  ;;  %10174 = vmatprep.subr.bf16.mxu1 %v12387_v17  ;;  %v8617_v13 = vld [vmem:[%s18121_s18 + $0x168] sm:$0xff]  ;;  %v8684_v30 = vld [vmem:[%s18121_s18 + $0x380] sm:$0xff] }
 0xf94   :  { %v13477_v15 = vpack.c.bf16 %v8366_v5, %v8362_v1  ;;  %v12333_v25 = vcombine.high %v8613_v11, %v8617_v13  ;;  %v8621_v62 = vld [vmem:[%s18121_s18 + $0x188] sm:$0xff]  ;;  %v12332_v24 = vcombine.low %v8613_v11, %v8617_v13 }
 0xf95   :  { %v13475_v9 = vpack.c.bf16 %v8367_v63, %v8363_v49  ;;  %v12341_v42 = vcombine.high %v8621_v62, %v8625_v34  ;;  %v8629_v1 = vld [vmem:[%s18121_s18 + $0x1c8] sm:$0xff]  ;;  %v12340_v63 = vcombine.low %v8621_v62, %v8625_v34 }
 0xf96   :  { %10175 = vmatpush1.bf16.msra.mxu1 %v12386_v2  ;;  %v8633_v5 = vld [vmem:[%s18121_s18 + $0x1e8] sm:$0xff]  ;;  %v8688_v2 = vld [vmem:[%s18121_s18 + $0x3a0] sm:$0xff] }
 0xf97   :  { %v8322_v14 = vpop.f32.mrb[124].mxu0  ;;  %13476 = vmatprep.subr.bf16.mxu0 %v13475_v9  ;;  %10176 = vmatprep.subr.bf16.mxu1 %v12395_v57  ;;  %v12403_v49 = vcombine.high %v8684_v30, %v8688_v2  ;;  %v12402_v57 = vcombine.low %v8684_v30, %v8688_v2  ;;  %v8637_v9 = vld [vmem:[%s18121_s18 + $0x208] sm:$0xff] }
 0xf98   :  { %v8324_v46 = vpop.f32.mrb[125].mxu0  ;;  %13478 = vmatpush1.bf16.msra.mxu0 %v13477_v15  ;;  %v8370_v7 = vmul.f32 %v8350_v19, %v8322_v14  ;;  %v12349_v15 = vcombine.high %v8629_v1, %v8633_v5  ;;  %v8692_v14 = vld [vmem:[%s18121_s18 + $0x3c0] sm:$0xff]  ;;  %v8689_v52 = vld [vmem:[%s18121_s18 + $0x3a8] sm:$0xff] }
 0xf99   :  { %v8326_v61 = vpop.f32.mrb[126].mxu0  ;;  %v8371_v51 = vmul.f32 %v8351_v4, %v8324_v46  ;;  %v8696_v19 = vld [vmem:[%s18121_s18 + $0x3e0] sm:$0xff]  ;;  %v12348_v46 = vcombine.low %v8629_v1, %v8633_v5 }
 0xf9a   :  { %v8374_v32 = vmul.f32 %v8354_v37, %v8326_v61  ;;  %v8328_v38 = vpop.f32.mrb[127].mxu0  ;;  %10177 = vmatpush1.bf16.msra.mxu1 %v12394_v3  ;;  %v8641_v3 = vld [vmem:[%s18121_s18 + $0x228] sm:$0xff]  ;;  %v12411_v37 = vcombine.high %v8692_v14, %v8696_v19  ;;  %v12410_v4 = vcombine.low %v8692_v14, %v8696_v19 }
 0xf9b   :  { %v8375_v22 = vmul.f32 %v8355_v44, %v8328_v38  ;;  %10178 = vmatprep.subr.bf16.mxu1 %v12403_v49  ;;  %v12357_v44 = vcombine.high %v8637_v9, %v8641_v3  ;;  %v8645_v61 = vld [vmem:[%s18121_s18 + $0x248] sm:$0xff]  ;;  %v17157_v38 = vld [vmem:[%s18121_s18 + $0x420] sm:$0xff] }
 0xf9c   :  { %v13481_v41 = vpack.c.bf16 %v8374_v32, %v8370_v7  ;;  %v8649_v7 = vld [vmem:[%s18121_s18 + $0x268] sm:$0xff]  ;;  %v17152_v32 = vld [vmem:[%s18121_s18 + $0x400] sm:$0xff] }
 0xf9d   :  { %v13479_v20 = vpack.c.bf16 %v8375_v22, %v8371_v51  ;;  %v17162_v51 = vld [vmem:[%s18121_s18 + $0x408] sm:$0xff]  ;;  %v12418_v22 = vcombine.low %v17152_v32, %v17157_v38  ;;  %v12365_v35 = vcombine.high %v8645_v61, %v8649_v7  ;;  %v8708_v49 = vld [vmem:[%s18121_s18 + $0x440] sm:$0xff] }
 0xf9e   :  { %10179 = vmatpush1.bf16.msra.mxu1 %v12402_v57  ;;  %v8712_v57 = vld [vmem:[%s18121_s18 + $0x460] sm:$0xff] }
 0xf9f   :  { %v8332_v48 = vpop.f32.mrb[128].mxu0  ;;  %13480 = vmatprep.subr.bf16.mxu0 %v13479_v20  ;;  %10180 = vmatprep.subr.bf16.mxu1 %v12411_v37  ;;  %v12356_v20 = vcombine.low %v8637_v9, %v8641_v3  ;;  %v8713_v9 = vld [vmem:[%s18121_s18 + $0x468] sm:$0xff]  ;;  %v12427_v19 = vcombine.high %v8708_v49, %v8712_v57  ;;  %v8716_v37 = vld [vmem:[%s18121_s18 + $0x480] sm:$0xff] }
 0xfa0   :  { %v8334_v39 = vpop.f32.mrb[129].mxu0  ;;  %13482 = vmatpush1.bf16.msra.mxu0 %v13481_v41  ;;  %v8378_v26 = vmul.f32 %v8358_v8, %v8332_v48  ;;  %v12419_v41 = vcombine.high %v17152_v32, %v17157_v38  ;;  %v8653_v48 = vld [vmem:[%s18121_s18 + $0x288] sm:$0xff] }
 0xfa1   :  { %v8379_v31 = vmul.f32 %v8359_v58, %v8334_v39  ;;  %v8336_v16 = vpop.f32.mrb[130].mxu0  ;;  %v17171_v58 = vld [vmem:[%s18121_s18 + $0x428] sm:$0xff]  ;;  %v12364_v39 = vcombine.low %v8645_v61, %v8649_v7  ;;  %v12426_v7 = vcombine.low %v8708_v49, %v8712_v57  ;;  %v8768_v49 = vld [vmem:[%s18121_s18 + $0x620] sm:$0xff] }
 0xfa2   :  { %v8337_v0 = vpop.f32.mrb[131].mxu0  ;;  %10181 = vmatpush1.bf16.msra.mxu1 %v12410_v4  ;;  %v12420_v18 = vcombine.low %v17162_v51, %v17171_v58  ;;  %v8657_v8 = vld [vmem:[%s18121_s18 + $0x2a8] sm:$0xff]  ;;  %v12421_v13 = vcombine.high %v17162_v51, %v17171_v58  ;;  %v8720_v4 = vld [vmem:[%s18121_s18 + $0x4a0] sm:$0xff] }
 0xfa3   :  { %12287 = vmatprep.subr.msk.mxu0 %vm3446_vm0, %v8379_v31  ;;  %10191 = vmatprep.subr.bf16.mxu1 %v12419_v41  ;;  %v12373_v29 = vcombine.high %v8653_v48, %v8657_v8  ;;  %v8665_v31 = vld [vmem:[%s18121_s18 + $0x2e8] sm:$0xff]  ;;  %v12434_v51 = vcombine.low %v8716_v37, %v8720_v4 }
 0xfa4   :  { %12288 = vmatpush1.msk.msra.mxu0 %vm3446_vm0, %v8378_v26  ;;  %v12381_v16 = vcombine.high %v8661_v40, %v8665_v31  ;;  %v8669_v26 = vld [vmem:[%s18121_s18 + $0x308] sm:$0xff]  ;;  %v12380_v0 = vcombine.low %v8661_v40, %v8665_v31 }
 0xfa5   :  { %12289 = vmatmul.mubr.msk.f32.vlgmr.msra.gmra.mrb[118].mxu0 %vm8402_vm4, %v16995_v50  ;;  %10232 = vmatprep.subr.bf16.mxu0 %v12293_v47  ;;  %v8605_v50 = vld [vmem:[%s18121_s18 + $0x108] sm:$0xff]  ;;  %v12372_v47 = vcombine.low %v8653_v48, %v8657_v8  ;;  %v8728_v8 = vld [vmem:[%s18121_s18 + $0x4e0] sm:$0xff] }
 0xfa6   :  { %10233 = vmatpush1.bf16.msra.mxu0 %v12292_v56  ;;  %v12325_v33 = vcombine.high %v8605_v50, %v8609_v23  ;;  %v12324_v17 = vcombine.low %v8605_v50, %v8609_v23  ;;  %v8673_v56 = vld [vmem:[%s18121_s18 + $0x328] sm:$0xff] }
 0xfa7   :  { %10234 = vmatprep.subr.bf16.mxu0 %v12301_v36  ;;  %v12389_v36 = vcombine.high %v8669_v26, %v8673_v56  ;;  %v8693_v50 = vld [vmem:[%s18121_s18 + $0x3c8] sm:$0xff] }
 0xfa8   :  { %v8697_v23 = vld [vmem:[%s18121_s18 + $0x3e8] sm:$0xff] }
 0xfa9   :  { %v12412_v11 = vcombine.low %v8693_v50, %v8697_v23  ;;  %v8721_v61 = vld [vmem:[%s18121_s18 + $0x4a8] sm:$0xff] }
 0xfaa   :  { %10235 = vmatpush1.bf16.msra.mxu0 %v12300_v27  ;;  %v12388_v27 = vcombine.low %v8669_v26, %v8673_v56  ;;  %v8725_v32 = vld [vmem:[%s18121_s18 + $0x4c8] sm:$0xff]  ;;  %v8740_v56 = vld [vmem:[%s18121_s18 + $0x540] sm:$0xff] }
 0xfab   :  { %10236 = vmatprep.subr.bf16.mxu0 %v12309_v55  ;;  %v12397_v55 = vcombine.high %v8677_v6, %v8681_v12  ;;  %v8729_v38 = vld [vmem:[%s18121_s18 + $0x4e8] sm:$0xff] }
 0xfac   :  { %v8733_v40 = vld [vmem:[%s18121_s18 + $0x508] sm:$0xff] }
 0xfad   :  { %v8737_v31 = vld [vmem:[%s18121_s18 + $0x528] sm:$0xff] }
 0xfae   :  { %10237 = vmatpush1.bf16.msra.mxu0 %v12308_v54  ;;  %v12396_v54 = vcombine.low %v8677_v6, %v8681_v12  ;;  %v8741_v6 = vld [vmem:[%s18121_s18 + $0x548] sm:$0xff] }
 0xfaf   :  { %10238 = vmatprep.subr.bf16.mxu0 %v12317_v28  ;;  %v12405_v28 = vcombine.high %v8685_v21, %v8689_v52  ;;  %v8745_v12 = vld [vmem:[%s18121_s18 + $0x568] sm:$0xff] }
 0xfb0   :  { %v8769_v57 = vld [vmem:[%s18121_s18 + $0x628] sm:$0xff] }
 0xfb2   :  { %10239 = vmatpush1.bf16.msra.mxu0 %v12316_v53  ;;  %v12404_v53 = vcombine.low %v8685_v21, %v8689_v52  ;;  %v8748_v52 = vld [vmem:[%s18121_s18 + $0x580] sm:$0xff] }
 0xfb3   :  { %10240 = vmatprep.subr.bf16.mxu0 %v12325_v33  ;;  %v12413_v33 = vcombine.high %v8693_v50, %v8697_v23  ;;  %v8749_v50 = vld [vmem:[%s18121_s18 + $0x588] sm:$0xff] }
 0xfb4   :  { %v8753_v23 = vld [vmem:[%s18121_s18 + $0x5a8] sm:$0xff] }
 0xfb6   :  { %10241 = vmatpush1.bf16.msra.mxu0 %v12324_v17  ;;  %v17213_v17 = vld [vmem:[#allocation25] sm:$0xf] }
 0xfb7   :  { %10242 = vmatprep.subr.bf16.mxu0 %v12333_v25  ;;  %v8385_v25 = vrot.slane %v17213_v17, %v16874_v59  ;;  %v8389_v62 = vrot.slane %v17213_v17, %v16877_v45 }
 0xfba   :  { %10243 = vmatpush1.bf16.msra.mxu0 %v12332_v24 }
 0xfbb   :  { %10244 = vmatprep.subr.bf16.mxu0 %v12341_v42 }
 0xfbe   :  { %10245 = vmatpush1.bf16.msra.mxu0 %v12340_v63 }
 0xfbf   :  { %10246 = vmatprep.subr.bf16.mxu0 %v12349_v15  ;;  %v8709_v15 = vld [vmem:[%s18121_s18 + $0x448] sm:$0xff] }
 0xfc0   :  { %v12428_v41 = vcombine.low %v8709_v15, %v8713_v9 }
 0xfc2   :  { %10247 = vmatpush1.bf16.msra.mxu0 %v12348_v46  ;;  %v12429_v46 = vcombine.high %v8709_v15, %v8713_v9 }
 0xfc3   :  { %10248 = vmatprep.subr.bf16.mxu0 %v12357_v44  ;;  %v8717_v44 = vld [vmem:[%s18121_s18 + $0x488] sm:$0xff] }
 0xfc4   :  { %v12437_v48 = vcombine.high %v8717_v44, %v8721_v61 }
 0xfc6   :  { %10249 = vmatpush1.bf16.msra.mxu0 %v12356_v20  ;;  %v12435_v20 = vcombine.high %v8716_v37, %v8720_v4  ;;  %v8772_v37 = vld [vmem:[%s18121_s18 + $0x640] sm:$0xff] }
 0xfc7   :  { %10250 = vmatprep.subr.bf16.mxu0 %v12365_v35  ;;  %v8724_v35 = vld [vmem:[%s18121_s18 + $0x4c0] sm:$0xff] }
 0xfc8   :  { %v12443_v58 = vcombine.high %v8724_v35, %v8728_v8  ;;  %v8776_v4 = vld [vmem:[%s18121_s18 + $0x660] sm:$0xff] }
 0xfca   :  { %10251 = vmatpush1.bf16.msra.mxu0 %v12364_v39  ;;  %v12445_v39 = vcombine.high %v8725_v32, %v8729_v38 }
 0xfcb   :  { %10252 = vmatprep.subr.bf16.mxu0 %v12373_v29  ;;  %v8736_v29 = vld [vmem:[%s18121_s18 + $0x520] sm:$0xff] }
 0xfce   :  { %10253 = vmatpush1.bf16.msra.mxu0 %v12372_v47  ;;  %v12442_v47 = vcombine.low %v8724_v35, %v8728_v8  ;;  %v8780_v35 = vld [vmem:[%s18121_s18 + $0x680] sm:$0xff] }
 0xfcf   :  { %10254 = vmatprep.subr.bf16.mxu0 %v12381_v16  ;;  %v12444_v16 = vcombine.low %v8725_v32, %v8729_v38  ;;  %v8784_v8 = vld [vmem:[%s18121_s18 + $0x6a0] sm:$0xff]  ;;  %v8781_v32 = vld [vmem:[%s18121_s18 + $0x688] sm:$0xff] }
 0xfd0   :  { %v8785_v38 = vld [vmem:[%s18121_s18 + $0x6a8] sm:$0xff] }
 0xfd2   :  { %10255 = vmatpush1.bf16.msra.mxu0 %v12380_v0  ;;  %v12453_v0 = vcombine.high %v8733_v40, %v8737_v31 }
 0xfd3   :  { %10256 = vmatprep.subr.bf16.mxu0 %v12389_v36  ;;  %v8744_v36 = vld [vmem:[%s18121_s18 + $0x560] sm:$0xff] }
 0xfd4   :  { %v12459_v21 = vcombine.high %v8740_v56, %v8744_v36 }
 0xfd6   :  { %10257 = vmatpush1.bf16.msra.mxu0 %v12388_v27 }
 0xfd7   :  { %10258 = vmatprep.subr.bf16.mxu0 %v12397_v55  ;;  %v12452_v55 = vcombine.low %v8733_v40, %v8737_v31  ;;  %v8789_v40 = vld [vmem:[%s18121_s18 + $0x6c8] sm:$0xff] }
 0xfd8   :  { %v8793_v31 = vld [vmem:[%s18121_s18 + $0x6e8] sm:$0xff] }
 0xfda   :  { %10259 = vmatpush1.bf16.msra.mxu0 %v12396_v54  ;;  %v12461_v54 = vcombine.high %v8741_v6, %v8745_v12 }
 0xfdb   :  { %10260 = vmatprep.subr.bf16.mxu0 %v12405_v28  ;;  %v8752_v28 = vld [vmem:[%s18121_s18 + $0x5a0] sm:$0xff] }
 0xfde   :  { %10261 = vmatpush1.bf16.msra.mxu0 %v12404_v53  ;;  %v12458_v53 = vcombine.low %v8740_v56, %v8744_v36  ;;  %v8796_v56 = vld [vmem:[%s18121_s18 + $0x700] sm:$0xff] }
 0xfdf   :  { %10262 = vmatprep.subr.bf16.mxu0 %v12413_v33  ;;  %v12460_v33 = vcombine.low %v8741_v6, %v8745_v12  ;;  %v8800_v36 = vld [vmem:[%s18121_s18 + $0x720] sm:$0xff]  ;;  %v8797_v6 = vld [vmem:[%s18121_s18 + $0x708] sm:$0xff] }
 0xfe0   :  { %v8801_v12 = vld [vmem:[%s18121_s18 + $0x728] sm:$0xff] }
 0xfe2   :  { %10263 = vmatpush1.bf16.msra.mxu0 %v12412_v11  ;;  %v12467_v11 = vcombine.high %v8748_v52, %v8752_v28 }
 0xfe3   :  { %10273 = vmatprep.subr.bf16.mxu0 %v12421_v13  ;;  %v8756_v13 = vld [vmem:[%s18121_s18 + $0x5c0] sm:$0xff] }
0x1038   :  { %v8484_v34 = vpop.f32.mrb[218].mxu1 }
0x1039   :  { %v8485_v24 = vadd.f32 %v8484_v34, %v8385_v25  ;;  %v8486_v42 = vpop.f32.mrb[219].mxu1  ;;  %v12469_v25 = vcombine.high %v8749_v50, %v8753_v23  ;;  %v8757_v34 = vld [vmem:[%s18121_s18 + $0x5c8] sm:$0xff] }
0x103a   :  { %v8487_v1 = vadd.f32 %v8486_v42, %v8389_v62  ;;  %v8760_v62 = vld [vmem:[%s18121_s18 + $0x5e0] sm:$0xff]  ;;  %v12466_v42 = vcombine.low %v8748_v52, %v8752_v28 }
0x103b   :  { %v8560_v5 = vmax.f32 %v8485_v24, 0.0  ;;  %v8761_v24 = vld [vmem:[%s18121_s18 + $0x5e8] sm:$0xff]  ;;  %v12474_v15 = vcombine.low %v8756_v13, %v8760_v62  ;;  %v8804_v52 = vld [vmem:[%s18121_s18 + $0x740] sm:$0xff] }
0x103c   :  { %v8561_v30 = vmax.f32 %v8487_v1, 0.0  ;;  %v12468_v1 = vcombine.low %v8749_v50, %v8753_v23  ;;  %v12476_v9 = vcombine.low %v8757_v34, %v8761_v24  ;;  %v8808_v28 = vld [vmem:[%s18121_s18 + $0x760] sm:$0xff]  ;;  %v8805_v50 = vld [vmem:[%s18121_s18 + $0x748] sm:$0xff] }
0x103d   :  { %v8564_v2 = vmin.f32 %v8560_v5, 6.0  ;;  %v12475_v5 = vcombine.high %v8756_v13, %v8760_v62  ;;  %v8809_v23 = vld [vmem:[%s18121_s18 + $0x768] sm:$0xff]  ;;  %v8812_v13 = vld [vmem:[%s18121_s18 + $0x780] sm:$0xff] }
0x103e   :  { %v8565_v63 = vmin.f32 %v8561_v30, 6.0  ;;  %v8764_v30 = vld [vmem:[%s18121_s18 + $0x600] sm:$0xff] }
0x103f   :  { %v17233_v14 = vpack.c.bf16 %v8564_v2, %v8564_v2  ;;  %v12477_v2 = vcombine.high %v8757_v34, %v8761_v24  ;;  %v8816_v62 = vld [vmem:[%s18121_s18 + $0x7a0] sm:$0xff]  ;;  %v8813_v34 = vld [vmem:[%s18121_s18 + $0x788] sm:$0xff] }
0x1040   :  { %v17231_v3 = vpack.c.bf16 %v8565_v63, %v8565_v63  ;;  %v8765_v63 = vld [vmem:[%s18121_s18 + $0x608] sm:$0xff] }
0x1041   :  { %v8817_v24 = vld [vmem:[%s18121_s18 + $0x7a8] sm:$0xff] }
0x1042   :  { %10182 = vmatprep.mubr.bf16.mxu1 %v17231_v3  ;;  %10264 = vmatprep.mubr.bf16.mxu0 %v17231_v3 }
0x1043   :  { %10183 = vmatmul.mubr.bf16.vlgmr.msra.gmra.mrb[240].mxu1 %v17233_v14  ;;  %10265 = vmatmul.mubr.bf16.vlgmr.msra.gmra.mrb[132].mxu0 %v17233_v14 }
0x1044   :  { %10192 = vmatpush1.bf16.msra.mxu1 %v12418_v22  ;;  %10274 = vmatpush1.bf16.msra.mxu0 %v12420_v18  ;;  %v12436_v22 = vcombine.low %v8717_v44, %v8721_v61  ;;  %v8732_v18 = vld [vmem:[%s18121_s18 + $0x500] sm:$0xff]  ;;  %v8773_v44 = vld [vmem:[%s18121_s18 + $0x648] sm:$0xff] }
0x1045   :  { %10193 = vmatprep.subr.bf16.mxu1 %v12427_v19  ;;  %10275 = vmatprep.subr.bf16.mxu0 %v12429_v46  ;;  %v12451_v26 = vcombine.high %v8732_v18, %v8736_v29  ;;  %v12450_v27 = vcombine.low %v8732_v18, %v8736_v29  ;;  %v12483_v19 = vcombine.high %v8764_v30, %v8768_v49  ;;  %v8777_v61 = vld [vmem:[%s18121_s18 + $0x668] sm:$0xff]  ;;  %v8788_v18 = vld [vmem:[%s18121_s18 + $0x6c0] sm:$0xff] }
0x1046   :  { %v12485_v46 = vcombine.high %v8765_v63, %v8769_v57  ;;  %v8792_v29 = vld [vmem:[%s18121_s18 + $0x6e0] sm:$0xff] }
0x1048   :  { %10194 = vmatpush1.bf16.msra.mxu1 %v12426_v7  ;;  %10276 = vmatpush1.bf16.msra.mxu0 %v12428_v41  ;;  %v12482_v7 = vcombine.low %v8764_v30, %v8768_v49  ;;  %v12484_v41 = vcombine.low %v8765_v63, %v8769_v57  ;;  %v12531_v30 = vcombine.high %v8812_v13, %v8816_v62  ;;  %v8824_v57 = vld [vmem:[%s18121_s18 + $0x7e0] sm:$0xff] }
0x1049   :  { %10195 = vmatprep.subr.bf16.mxu1 %v12435_v20  ;;  %10277 = vmatprep.subr.bf16.mxu0 %v12437_v48  ;;  %v12491_v20 = vcombine.high %v8772_v37, %v8776_v4  ;;  %v12493_v48 = vcombine.high %v8773_v44, %v8777_v61  ;;  %v12533_v49 = vcombine.high %v8813_v34, %v8817_v24 }
0x104a   :  { %v8397_v63 = vrot.slane %v17213_v17, %v16974_v60 }
0x104c   :  { %10196 = vmatpush1.bf16.msra.mxu1 %v12434_v51  ;;  %10278 = vmatpush1.bf16.msra.mxu0 %v12436_v22  ;;  %v12490_v51 = vcombine.low %v8772_v37, %v8776_v4  ;;  %v12492_v22 = vcombine.low %v8773_v44, %v8777_v61  ;;  %v12530_v37 = vcombine.low %v8812_v13, %v8816_v62  ;;  %v8574_v61 = vld [vmem:[%s18121_s18 + $0x10] sm:$0xff] }
0x104d   :  { %10197 = vmatprep.subr.bf16.mxu1 %v12443_v58  ;;  %10279 = vmatprep.subr.bf16.mxu0 %v12445_v39  ;;  %v12499_v58 = vcombine.high %v8780_v35, %v8784_v8  ;;  %v12501_v39 = vcombine.high %v8781_v32, %v8785_v38 }
0x1050   :  { %10198 = vmatpush1.bf16.msra.mxu1 %v12442_v47  ;;  %10280 = vmatpush1.bf16.msra.mxu0 %v12444_v16  ;;  %v12498_v47 = vcombine.low %v8780_v35, %v8784_v8  ;;  %v12500_v16 = vcombine.low %v8781_v32, %v8785_v38  ;;  %v8575_v35 = vld [vmem:[%s18121_s18 + $0x18] sm:$0xff] }
0x1051   :  { %10199 = vmatprep.subr.bf16.mxu1 %v12451_v26  ;;  %10281 = vmatprep.subr.bf16.mxu0 %v12453_v0  ;;  %v12507_v26 = vcombine.high %v8788_v18, %v8792_v29  ;;  %v12509_v0 = vcombine.high %v8789_v40, %v8793_v31 }
0x1054   :  { %10200 = vmatpush1.bf16.msra.mxu1 %v12450_v27  ;;  %10282 = vmatpush1.bf16.msra.mxu0 %v12452_v55  ;;  %v12506_v27 = vcombine.low %v8788_v18, %v8792_v29  ;;  %v12508_v55 = vcombine.low %v8789_v40, %v8793_v31  ;;  %v8582_v29 = vld [vmem:[%s18121_s18 + $0x50] sm:$0xff]  ;;  %v8583_v31 = vld [vmem:[%s18121_s18 + $0x58] sm:$0xff] }
0x1055   :  { %10201 = vmatprep.subr.bf16.mxu1 %v12459_v21  ;;  %10283 = vmatprep.subr.bf16.mxu0 %v12461_v54  ;;  %v12515_v21 = vcombine.high %v8796_v56, %v8800_v36  ;;  %v12517_v54 = vcombine.high %v8797_v6, %v8801_v12  ;;  %v8586_v40 = vld [vmem:[%s18121_s18 + $0x70] sm:$0xff] }
0x1058   :  { %10202 = vmatpush1.bf16.msra.mxu1 %v12458_v53  ;;  %10284 = vmatpush1.bf16.msra.mxu0 %v12460_v33  ;;  %v12514_v53 = vcombine.low %v8796_v56, %v8800_v36  ;;  %v12516_v33 = vcombine.low %v8797_v6, %v8801_v12  ;;  %v8590_v6 = vld [vmem:[%s18121_s18 + $0x90] sm:$0xff] }
0x1059   :  { %10203 = vmatprep.subr.bf16.mxu1 %v12467_v11  ;;  %10285 = vmatprep.subr.bf16.mxu0 %v12469_v25  ;;  %v12523_v11 = vcombine.high %v8804_v52, %v8808_v28  ;;  %v12525_v25 = vcombine.high %v8805_v50, %v8809_v23  ;;  %v8594_v12 = vld [vmem:[%s18121_s18 + $0xb0] sm:$0xff] }
0x105a   :  { %v12310_v13 = vcombine.low %v8590_v6, %v8594_v12 }
0x105c   :  { %10204 = vmatpush1.bf16.msra.mxu1 %v12466_v42  ;;  %10286 = vmatpush1.bf16.msra.mxu0 %v12468_v1  ;;  %v12522_v42 = vcombine.low %v8804_v52, %v8808_v28  ;;  %v12524_v1 = vcombine.low %v8805_v50, %v8809_v23  ;;  %v12302_v52 = vcombine.low %v8582_v29, %v8586_v40  ;;  %v8598_v50 = vld [vmem:[%s18121_s18 + $0xd0] sm:$0xff] }
0x105d   :  { %10205 = vmatprep.subr.bf16.mxu1 %v12475_v5  ;;  %10287 = vmatprep.subr.bf16.mxu0 %v12477_v2  ;;  %v8393_v5 = vrot.slane %v17213_v17, %v16971_v43  ;;  %v8820_v2 = vld [vmem:[%s18121_s18 + $0x7c0] sm:$0xff]  ;;  %v8602_v23 = vld [vmem:[%s18121_s18 + $0xf0] sm:$0xff] }
0x105e   :  { %v12539_v17 = vcombine.high %v8820_v2, %v8824_v57  ;;  %v12538_v38 = vcombine.low %v8820_v2, %v8824_v57 }
0x1060   :  { %10206 = vmatpush1.bf16.msra.mxu1 %v12474_v15  ;;  %10288 = vmatpush1.bf16.msra.mxu0 %v12476_v9  ;;  %v8821_v15 = vld [vmem:[%s18121_s18 + $0x7c8] sm:$0xff] }
0x1061   :  { %10207 = vmatprep.subr.bf16.mxu1 %v12483_v19  ;;  %10289 = vmatprep.subr.bf16.mxu0 %v12485_v46  ;;  %v8825_v9 = vld [vmem:[%s18121_s18 + $0x7e8] sm:$0xff]  ;;  %v12532_v46 = vcombine.low %v8813_v34, %v8817_v24  ;;  %v8606_v34 = vld [vmem:[%s18121_s18 + $0x110] sm:$0xff] }
0x1064   :  { %10208 = vmatpush1.bf16.msra.mxu1 %v12482_v7  ;;  %10290 = vmatpush1.bf16.msra.mxu0 %v12484_v41  ;;  %v12541_v7 = vcombine.high %v8821_v15, %v8825_v9 }
0x1065   :  { %10209 = vmatprep.subr.bf16.mxu1 %v12491_v20  ;;  %10291 = vmatprep.subr.bf16.mxu0 %v12493_v48  ;;  %v8578_v20 = vld [vmem:[%s18121_s18 + $0x30] sm:$0xff]  ;;  %v8579_v48 = vld [vmem:[%s18121_s18 + $0x38] sm:$0xff] }
0x1066   :  { %v12297_v18 = vcombine.high %v8575_v35, %v8579_v48  ;;  %v12296_v36 = vcombine.low %v8575_v35, %v8579_v48  ;;  %v8630_v48 = vld [vmem:[%s18121_s18 + $0x1d0] sm:$0xff] }
0x1068   :  { %10210 = vmatpush1.bf16.msra.mxu1 %v12490_v51  ;;  %10292 = vmatpush1.bf16.msra.mxu0 %v12492_v22  ;;  %v12540_v51 = vcombine.low %v8821_v15, %v8825_v9  ;;  %v8615_v15 = vld [vmem:[%s18121_s18 + $0x158] sm:$0xff] }
0x1069   :  { %10211 = vmatprep.subr.bf16.mxu1 %v12499_v58  ;;  %10293 = vmatprep.subr.bf16.mxu0 %v12501_v39  ;;  %v12295_v58 = vcombine.high %v8574_v61, %v8578_v20  ;;  %v8619_v9 = vld [vmem:[%s18121_s18 + $0x178] sm:$0xff] }
0x106a   :  { %v12336_v35 = vcombine.low %v8615_v15, %v8619_v9 }
0x106c   :  { %10212 = vmatpush1.bf16.msra.mxu1 %v12498_v47  ;;  %10294 = vmatpush1.bf16.msra.mxu0 %v12500_v16  ;;  %v8587_v47 = vld [vmem:[%s18121_s18 + $0x78] sm:$0xff] }
0x106d   :  { %10213 = vmatprep.subr.bf16.mxu1 %v12507_v26  ;;  %10295 = vmatprep.subr.bf16.mxu0 %v12509_v0  ;;  %v12294_v26 = vcombine.low %v8574_v61, %v8578_v20  ;;  %v12303_v0 = vcombine.high %v8582_v29, %v8586_v40  ;;  %v12304_v28 = vcombine.low %v8583_v31, %v8587_v47  ;;  %v8623_v61 = vld [vmem:[%s18121_s18 + $0x198] sm:$0xff]  ;;  %v8642_v29 = vld [vmem:[%s18121_s18 + $0x230] sm:$0xff] }
0x1070   :  { %10214 = vmatpush1.bf16.msra.mxu1 %v12506_v27  ;;  %10296 = vmatpush1.bf16.msra.mxu0 %v12508_v55  ;;  %v12305_v27 = vcombine.high %v8583_v31, %v8587_v47  ;;  %v8591_v55 = vld [vmem:[%s18121_s18 + $0x98] sm:$0xff] }
0x1071   :  { %10215 = vmatprep.subr.bf16.mxu1 %v12515_v21  ;;  %10297 = vmatprep.subr.bf16.mxu0 %v12517_v54  ;;  %v8595_v21 = vld [vmem:[%s18121_s18 + $0xb8] sm:$0xff]  ;;  %v12311_v54 = vcombine.high %v8590_v6, %v8594_v12  ;;  %v8646_v6 = vld [vmem:[%s18121_s18 + $0x250] sm:$0xff] }
0x1072   :  { %v12312_v62 = vcombine.low %v8591_v55, %v8595_v21  ;;  %v8639_v31 = vld [vmem:[%s18121_s18 + $0x218] sm:$0xff]  ;;  %v8650_v12 = vld [vmem:[%s18121_s18 + $0x270] sm:$0xff] }
0x1073   :  { %v8643_v47 = vld [vmem:[%s18121_s18 + $0x238] sm:$0xff] }
0x1074   :  { %10216 = vmatpush1.bf16.msra.mxu1 %v12514_v53  ;;  %10298 = vmatpush1.bf16.msra.mxu0 %v12516_v33  ;;  %v12313_v53 = vcombine.high %v8591_v55, %v8595_v21  ;;  %v8599_v33 = vld [vmem:[%s18121_s18 + $0xd8] sm:$0xff] }
0x1075   :  { %10217 = vmatprep.subr.bf16.mxu1 %v12523_v11  ;;  %10299 = vmatprep.subr.bf16.mxu0 %v12525_v25  ;;  %v8603_v11 = vld [vmem:[%s18121_s18 + $0xf8] sm:$0xff]  ;;  %v12319_v25 = vcombine.high %v8598_v50, %v8602_v23 }
0x1076   :  { %v12321_v24 = vcombine.high %v8599_v33, %v8603_v11  ;;  %v12320_v2 = vcombine.low %v8599_v33, %v8603_v11  ;;  %v8647_v55 = vld [vmem:[%s18121_s18 + $0x258] sm:$0xff] }
0x1077   :  { %v8651_v21 = vld [vmem:[%s18121_s18 + $0x278] sm:$0xff] }
0x1078   :  { %v8555_v19 = vpop.f32.mrb[118].mxu0  ;;  %10218 = vmatpush1.bf16.msra.mxu1 %v12522_v42  ;;  %10300 = vmatpush1.bf16.msra.mxu0 %v12524_v1  ;;  %v8607_v42 = vld [vmem:[%s18121_s18 + $0x118] sm:$0xff] }
0x1079   :  { %v8556_v4 = vadd.f32 %v8555_v19, %v8393_v5  ;;  %v8557_v44 = vpop.f32.mrb[119].mxu0  ;;  %10219 = vmatprep.subr.bf16.mxu1 %v12531_v30  ;;  %10301 = vmatprep.subr.bf16.mxu0 %v12533_v49  ;;  %v8611_v1 = vld [vmem:[%s18121_s18 + $0x138] sm:$0xff]  ;;  %v12318_v5 = vcombine.low %v8598_v50, %v8602_v23  ;;  %v8614_v49 = vld [vmem:[%s18121_s18 + $0x150] sm:$0xff] }
0x107a   :  { %v8558_v41 = vadd.f32 %v8557_v44, %v8397_v63  ;;  %v8618_v63 = vld [vmem:[%s18121_s18 + $0x170] sm:$0xff]  ;;  %v12329_v57 = vcombine.high %v8607_v42, %v8611_v1  ;;  %v8655_v33 = vld [vmem:[%s18121_s18 + $0x298] sm:$0xff] }
0x107b   :  { %v8562_v8 = vmax.f32 %v8556_v4, 0.0  ;;  %v8622_v4 = vld [vmem:[%s18121_s18 + $0x190] sm:$0xff]  ;;  %v8659_v11 = vld [vmem:[%s18121_s18 + $0x2b8] sm:$0xff] }
0x107c   :  { %v8563_v32 = vmax.f32 %v8558_v41, 0.0  ;;  %10220 = vmatpush1.bf16.msra.mxu1 %v12530_v37  ;;  %10302 = vmatpush1.bf16.msra.mxu0 %v12532_v46  ;;  %v12335_v37 = vcombine.high %v8614_v49, %v8618_v63  ;;  %v12328_v46 = vcombine.low %v8607_v42, %v8611_v1  ;;  %v8626_v44 = vld [vmem:[%s18121_s18 + $0x1b0] sm:$0xff]  ;;  %v12334_v41 = vcombine.low %v8614_v49, %v8618_v63  ;;  %v8663_v42 = vld [vmem:[%s18121_s18 + $0x2d8] sm:$0xff] }
0x107d   :  { %v8566_v22 = vmin.f32 %v8562_v8, 6.0  ;;  %10221 = vmatprep.subr.bf16.mxu1 %v12539_v17  ;;  %10303 = vmatprep.subr.bf16.mxu0 %v12541_v7  ;;  %v12337_v17 = vcombine.high %v8615_v15, %v8619_v9  ;;  %v8627_v7 = vld [vmem:[%s18121_s18 + $0x1b8] sm:$0xff]  ;;  %v12343_v20 = vcombine.high %v8622_v4, %v8626_v44  ;;  %v8634_v8 = vld [vmem:[%s18121_s18 + $0x1f0] sm:$0xff] }
0x107e   :  { %v8567_v39 = vmin.f32 %v8563_v32, 6.0  ;;  %v12345_v32 = vcombine.high %v8623_v61, %v8627_v7  ;;  %v8654_v50 = vld [vmem:[%s18121_s18 + $0x290] sm:$0xff]  ;;  %v8667_v1 = vld [vmem:[%s18121_s18 + $0x2f8] sm:$0xff] }
0x107f   :  { %v17443_v56 = vpack.c.bf16 %v8566_v22, %v8566_v22  ;;  %v12342_v22 = vcombine.low %v8622_v4, %v8626_v44  ;;  %v8658_v23 = vld [vmem:[%s18121_s18 + $0x2b0] sm:$0xff]  ;;  %v8671_v15 = vld [vmem:[%s18121_s18 + $0x318] sm:$0xff] }
0x1080   :  { %v17441_v16 = vpack.c.bf16 %v8567_v39, %v8567_v39  ;;  %10222 = vmatpush1.bf16.msra.mxu1 %v12538_v38  ;;  %10304 = vmatpush1.bf16.msra.mxu0 %v12540_v51  ;;  %v8631_v38 = vld [vmem:[%s18121_s18 + $0x1d8] sm:$0xff]  ;;  %v8638_v39 = vld [vmem:[%s18121_s18 + $0x210] sm:$0xff] }
0x1081   :  { %10314 = vmatprep.subr.bf16.mxu1 %v12295_v58  ;;  %10396 = vmatprep.subr.bf16.mxu0 %v12297_v18  ;;  %v8635_v51 = vld [vmem:[%s18121_s18 + $0x1f8] sm:$0xff]  ;;  %v12351_v58 = vcombine.high %v8630_v48, %v8634_v8  ;;  %v12344_v18 = vcombine.low %v8623_v61, %v8627_v7  ;;  %v8670_v49 = vld [vmem:[%s18121_s18 + $0x310] sm:$0xff] }
0x1082   :  { %10223 = vmatprep.mubr.bf16.mxu1 %v17441_v16  ;;  %10305 = vmatprep.mubr.bf16.mxu0 %v17441_v16  ;;  %v12353_v40 = vcombine.high %v8631_v38, %v8635_v51  ;;  %v8674_v63 = vld [vmem:[%s18121_s18 + $0x330] sm:$0xff]  ;;  %v8675_v9 = vld [vmem:[%s18121_s18 + $0x338] sm:$0xff] }
0x1083   :  { %10224 = vmatmul.mubr.bf16.vlgmr.msra.gmra.mrb[240].mxu1 %v17443_v56  ;;  %10306 = vmatmul.mubr.bf16.vlgmr.msra.gmra.mrb[132].mxu0 %v17443_v56  ;;  %v8678_v4 = vld [vmem:[%s18121_s18 + $0x350] sm:$0xff]  ;;  %v8679_v61 = vld [vmem:[%s18121_s18 + $0x358] sm:$0xff] }
0x1084   :  { %10315 = vmatpush1.bf16.msra.mxu1 %v12294_v26  ;;  %10346 = vmatprep.mubr.bf16.mxu1 %v17231_v3  ;;  %v12350_v26 = vcombine.low %v8630_v48, %v8634_v8  ;;  %v8682_v44 = vld [vmem:[%s18121_s18 + $0x370] sm:$0xff]  ;;  %v8683_v7 = vld [vmem:[%s18121_s18 + $0x378] sm:$0xff] }
0x1085   :  { %10316 = vmatprep.subr.bf16.mxu1 %v12303_v0  ;;  %10397 = vmatpush1.bf16.msra.mxu0 %v12296_v36  ;;  %v12359_v0 = vcombine.high %v8638_v39, %v8642_v29  ;;  %v12352_v36 = vcombine.low %v8631_v38, %v8635_v51  ;;  %v8686_v48 = vld [vmem:[%s18121_s18 + $0x390] sm:$0xff]  ;;  %v8687_v38 = vld [vmem:[%s18121_s18 + $0x398] sm:$0xff] }
0x1086   :  { %10398 = vmatprep.subr.bf16.mxu0 %v12305_v27  ;;  %10428 = vmatprep.mubr.bf16.mxu0 %v17231_v3  ;;  %v8610_v3 = vld [vmem:[%s18121_s18 + $0x130] sm:$0xff]  ;;  %v12361_v27 = vcombine.high %v8639_v31, %v8643_v47  ;;  %v8691_v51 = vld [vmem:[%s18121_s18 + $0x3b8] sm:$0xff] }
0x1087   :  { %v12327_v30 = vcombine.high %v8606_v34, %v8610_v3  ;;  %v12326_v19 = vcombine.low %v8606_v34, %v8610_v3  ;;  %v8662_v34 = vld [vmem:[%s18121_s18 + $0x2d0] sm:$0xff] }
0x1088   :  { %10317 = vmatpush1.bf16.msra.mxu1 %v12302_v52  ;;  %v12358_v52 = vcombine.low %v8638_v39, %v8642_v29  ;;  %v8666_v3 = vld [vmem:[%s18121_s18 + $0x2f0] sm:$0xff] }
0x1089   :  { %10318 = vmatprep.subr.bf16.mxu1 %v12311_v54  ;;  %10399 = vmatpush1.bf16.msra.mxu0 %v12304_v28  ;;  %v12367_v54 = vcombine.high %v8646_v6, %v8650_v12  ;;  %v12360_v28 = vcombine.low %v8639_v31, %v8643_v47  ;;  %v8690_v8 = vld [vmem:[%s18121_s18 + $0x3b0] sm:$0xff]  ;;  %v8695_v31 = vld [vmem:[%s18121_s18 + $0x3d8] sm:$0xff] }
0x108a   :  { %10400 = vmatprep.subr.bf16.mxu0 %v12313_v53  ;;  %v12369_v53 = vcombine.high %v8647_v55, %v8651_v21  ;;  %v8694_v39 = vld [vmem:[%s18121_s18 + $0x3d0] sm:$0xff]  ;;  %v8699_v47 = vld [vmem:[%s18121_s18 + $0x3f8] sm:$0xff] }
0x108b   :  { %v8698_v29 = vld [vmem:[%s18121_s18 + $0x3f0] sm:$0xff] }
0x108c   :  { %10319 = vmatpush1.bf16.msra.mxu1 %v12310_v13  ;;  %v12366_v13 = vcombine.low %v8646_v6, %v8650_v12  ;;  %v8702_v6 = vld [vmem:[%s18121_s18 + $0x410] sm:$0xff] }
0x108d   :  { %10320 = vmatprep.subr.bf16.mxu1 %v12319_v25  ;;  %10401 = vmatpush1.bf16.msra.mxu0 %v12312_v62  ;;  %v12375_v25 = vcombine.high %v8654_v50, %v8658_v23  ;;  %v12368_v62 = vcombine.low %v8647_v55, %v8651_v21  ;;  %v8706_v12 = vld [vmem:[%s18121_s18 + $0x430] sm:$0xff]  ;;  %v8703_v55 = vld [vmem:[%s18121_s18 + $0x418] sm:$0xff] }
0x108e   :  { %10402 = vmatprep.subr.bf16.mxu0 %v12321_v24  ;;  %v12377_v24 = vcombine.high %v8655_v33, %v8659_v11  ;;  %v8707_v21 = vld [vmem:[%s18121_s18 + $0x438] sm:$0xff] }
0x1090   :  { %10321 = vmatpush1.bf16.msra.mxu1 %v12318_v5  ;;  %v12374_v5 = vcombine.low %v8654_v50, %v8658_v23  ;;  %v8710_v50 = vld [vmem:[%s18121_s18 + $0x450] sm:$0xff] }
0x1091   :  { %10322 = vmatprep.subr.bf16.mxu1 %v12327_v30  ;;  %10403 = vmatpush1.bf16.msra.mxu0 %v12320_v2  ;;  %v12383_v30 = vcombine.high %v8662_v34, %v8666_v3  ;;  %v12376_v2 = vcombine.low %v8655_v33, %v8659_v11  ;;  %v8714_v23 = vld [vmem:[%s18121_s18 + $0x470] sm:$0xff]  ;;  %v12422_v33 = vcombine.low %v8702_v6, %v8706_v12  ;;  %v8711_v11 = vld [vmem:[%s18121_s18 + $0x458] sm:$0xff] }
0x1092   :  { %10404 = vmatprep.subr.bf16.mxu0 %v12329_v57  ;;  %v12385_v57 = vcombine.high %v8663_v42, %v8667_v1 }
0x1094   :  { %10323 = vmatpush1.bf16.msra.mxu1 %v12326_v19  ;;  %v12382_v19 = vcombine.low %v8662_v34, %v8666_v3  ;;  %v8722_v34 = vld [vmem:[%s18121_s18 + $0x4b0] sm:$0xff]  ;;  %v12424_v3 = vcombine.low %v8703_v55, %v8707_v21 }
0x1095   :  { %10324 = vmatprep.subr.bf16.mxu1 %v12335_v37  ;;  %10405 = vmatpush1.bf16.msra.mxu0 %v12328_v46  ;;  %v12391_v37 = vcombine.high %v8670_v49, %v8674_v63  ;;  %v12384_v46 = vcombine.low %v8663_v42, %v8667_v1  ;;  %v12430_v42 = vcombine.low %v8710_v50, %v8714_v23  ;;  %v8719_v1 = vld [vmem:[%s18121_s18 + $0x498] sm:$0xff] }
0x1096   :  { %10406 = vmatprep.subr.bf16.mxu0 %v12337_v17  ;;  %v12393_v17 = vcombine.high %v8671_v15, %v8675_v9 }
0x1098   :  { %10325 = vmatpush1.bf16.msra.mxu1 %v12334_v41  ;;  %v12390_v41 = vcombine.low %v8670_v49, %v8674_v63  ;;  %v8730_v49 = vld [vmem:[%s18121_s18 + $0x4f0] sm:$0xff] }
0x1099   :  { %10326 = vmatprep.subr.bf16.mxu1 %v12343_v20  ;;  %10407 = vmatpush1.bf16.msra.mxu0 %v12336_v35  ;;  %v12399_v20 = vcombine.high %v8678_v4, %v8682_v44  ;;  %v12392_v35 = vcombine.low %v8671_v15, %v8675_v9  ;;  %v8731_v9 = vld [vmem:[%s18121_s18 + $0x4f8] sm:$0xff] }
0x109a   :  { %10408 = vmatprep.subr.bf16.mxu0 %v12345_v32  ;;  %v12401_v32 = vcombine.high %v8679_v61, %v8683_v7 }
0x109c   :  { %10327 = vmatpush1.bf16.msra.mxu1 %v12342_v22  ;;  %v12398_v22 = vcombine.low %v8678_v4, %v8682_v44 }
0x109d   :  { %10328 = vmatprep.subr.bf16.mxu1 %v12351_v58  ;;  %10409 = vmatpush1.bf16.msra.mxu0 %v12344_v18  ;;  %v12407_v58 = vcombine.high %v8686_v48, %v8690_v8  ;;  %v12400_v18 = vcombine.low %v8679_v61, %v8683_v7  ;;  %v8739_v61 = vld [vmem:[%s18121_s18 + $0x538] sm:$0xff] }
0x109e   :  { %10410 = vmatprep.subr.bf16.mxu0 %v12353_v40  ;;  %v12409_v40 = vcombine.high %v8687_v38, %v8691_v51 }
0x10a0   :  { %10329 = vmatpush1.bf16.msra.mxu1 %v12350_v26  ;;  %v12406_v26 = vcombine.low %v8686_v48, %v8690_v8 }
0x10a1   :  { %10330 = vmatprep.subr.bf16.mxu1 %v12359_v0  ;;  %10411 = vmatpush1.bf16.msra.mxu0 %v12352_v36  ;;  %v12415_v0 = vcombine.high %v8694_v39, %v8698_v29  ;;  %v12408_v36 = vcombine.low %v8687_v38, %v8691_v51  ;;  %v8747_v38 = vld [vmem:[%s18121_s18 + $0x578] sm:$0xff] }
0x10a2   :  { %10412 = vmatprep.subr.bf16.mxu0 %v12361_v27  ;;  %v12417_v27 = vcombine.high %v8695_v31, %v8699_v47 }
0x10a4   :  { %10331 = vmatpush1.bf16.msra.mxu1 %v12358_v52  ;;  %v12414_v52 = vcombine.low %v8694_v39, %v8698_v29 }
0x10a5   :  { %10332 = vmatprep.subr.bf16.mxu1 %v12367_v54  ;;  %10413 = vmatpush1.bf16.msra.mxu0 %v12360_v28  ;;  %v12423_v54 = vcombine.high %v8702_v6, %v8706_v12  ;;  %v12416_v28 = vcombine.low %v8695_v31, %v8699_v47  ;;  %v8755_v31 = vld [vmem:[%s18121_s18 + $0x5b8] sm:$0xff] }
0x10a6   :  { %10414 = vmatprep.subr.bf16.mxu0 %v12369_v53  ;;  %v12425_v53 = vcombine.high %v8703_v55, %v8707_v21  ;;  %v8763_v55 = vld [vmem:[%s18121_s18 + $0x5f8] sm:$0xff] }
0x10a8   :  { %10333 = vmatpush1.bf16.msra.mxu1 %v12366_v13  ;;  %v8715_v13 = vld [vmem:[%s18121_s18 + $0x478] sm:$0xff] }
0x10a9   :  { %10334 = vmatprep.subr.bf16.mxu1 %v12375_v25  ;;  %10415 = vmatpush1.bf16.msra.mxu0 %v12368_v62  ;;  %v12431_v25 = vcombine.high %v8710_v50, %v8714_v23  ;;  %v8718_v62 = vld [vmem:[%s18121_s18 + $0x490] sm:$0xff]  ;;  %v12432_v63 = vcombine.low %v8711_v11, %v8715_v13 }
0x10aa   :  { %10416 = vmatprep.subr.bf16.mxu0 %v12377_v24  ;;  %v12433_v24 = vcombine.high %v8711_v11, %v8715_v13  ;;  %v12438_v15 = vcombine.low %v8718_v62, %v8722_v34  ;;  %v8774_v13 = vld [vmem:[%s18121_s18 + $0x650] sm:$0xff] }
0x10ac   :  { %10335 = vmatpush1.bf16.msra.mxu1 %v12374_v5  ;;  %v8723_v5 = vld [vmem:[%s18121_s18 + $0x4b8] sm:$0xff] }
0x10ad   :  { %10336 = vmatprep.subr.bf16.mxu1 %v12383_v30  ;;  %10417 = vmatpush1.bf16.msra.mxu0 %v12376_v2  ;;  %v12439_v30 = vcombine.high %v8718_v62, %v8722_v34  ;;  %v8726_v2 = vld [vmem:[%s18121_s18 + $0x4d0] sm:$0xff] }
0x10ae   :  { %10418 = vmatprep.subr.bf16.mxu0 %v12385_v57  ;;  %v12441_v57 = vcombine.high %v8719_v1, %v8723_v5  ;;  %v12446_v44 = vcombine.low %v8726_v2, %v8730_v49 }
0x10b0   :  { %10337 = vmatpush1.bf16.msra.mxu1 %v12382_v19  ;;  %v12447_v19 = vcombine.high %v8726_v2, %v8730_v49 }
0x10b1   :  { %10338 = vmatprep.subr.bf16.mxu1 %v12391_v37  ;;  %10419 = vmatpush1.bf16.msra.mxu0 %v12384_v46  ;;  %v8734_v37 = vld [vmem:[%s18121_s18 + $0x510] sm:$0xff]  ;;  %v12440_v46 = vcombine.low %v8719_v1, %v8723_v5 }
0x10b2   :  { %10420 = vmatprep.subr.bf16.mxu0 %v12393_v17  ;;  %v8735_v17 = vld [vmem:[%s18121_s18 + $0x518] sm:$0xff]  ;;  %v8782_v5 = vld [vmem:[%s18121_s18 + $0x690] sm:$0xff] }
0x10b3   :  { %v12457_v48 = vcombine.high %v8735_v17, %v8739_v61 }
0x10b4   :  { %10339 = vmatpush1.bf16.msra.mxu1 %v12390_v41  ;;  %v8742_v41 = vld [vmem:[%s18121_s18 + $0x550] sm:$0xff] }
0x10b5   :  { %10340 = vmatprep.subr.bf16.mxu1 %v12399_v20  ;;  %10421 = vmatpush1.bf16.msra.mxu0 %v12392_v35  ;;  %v8746_v20 = vld [vmem:[%s18121_s18 + $0x570] sm:$0xff] }
0x10b6   :  { %10422 = vmatprep.subr.bf16.mxu0 %v12401_v32  ;;  %v8743_v32 = vld [vmem:[%s18121_s18 + $0x558] sm:$0xff]  ;;  %v12463_v51 = vcombine.high %v8742_v41, %v8746_v20  ;;  %v12462_v29 = vcombine.low %v8742_v41, %v8746_v20 }
0x10b7   :  { %v12465_v39 = vcombine.high %v8743_v32, %v8747_v38 }
0x10b8   :  { %10341 = vmatpush1.bf16.msra.mxu1 %v12398_v22  ;;  %v8750_v22 = vld [vmem:[%s18121_s18 + $0x590] sm:$0xff] }
0x10b9   :  { %10342 = vmatprep.subr.bf16.mxu1 %v12407_v58  ;;  %10423 = vmatpush1.bf16.msra.mxu0 %v12400_v18  ;;  %v8754_v58 = vld [vmem:[%s18121_s18 + $0x5b0] sm:$0xff]  ;;  %v12456_v18 = vcombine.low %v8735_v17, %v8739_v61 }
0x10ba   :  { %10424 = vmatprep.subr.bf16.mxu0 %v12409_v40  ;;  %v8751_v40 = vld [vmem:[%s18121_s18 + $0x598] sm:$0xff]  ;;  %v12471_v47 = vcombine.high %v8750_v22, %v8754_v58  ;;  %v12470_v12 = vcombine.low %v8750_v22, %v8754_v58  ;;  %v8798_v61 = vld [vmem:[%s18121_s18 + $0x710] sm:$0xff] }
0x10bb   :  { %v12473_v6 = vcombine.high %v8751_v40, %v8755_v31 }
0x10bc   :  { %10343 = vmatpush1.bf16.msra.mxu1 %v12406_v26  ;;  %v8758_v26 = vld [vmem:[%s18121_s18 + $0x5d0] sm:$0xff] }
0x10bd   :  { %10344 = vmatprep.subr.bf16.mxu1 %v12415_v0  ;;  %10425 = vmatpush1.bf16.msra.mxu0 %v12408_v36  ;;  %v8762_v0 = vld [vmem:[%s18121_s18 + $0x5f0] sm:$0xff]  ;;  %v12464_v36 = vcombine.low %v8743_v32, %v8747_v38 }
0x10be   :  { %10426 = vmatprep.subr.bf16.mxu0 %v12417_v27  ;;  %v8759_v27 = vld [vmem:[%s18121_s18 + $0x5d8] sm:$0xff]  ;;  %v12479_v21 = vcombine.high %v8758_v26, %v8762_v0  ;;  %v12478_v23 = vcombine.low %v8758_v26, %v8762_v0  ;;  %v8806_v38 = vld [vmem:[%s18121_s18 + $0x750] sm:$0xff] }
0x10bf   :  { %v12481_v50 = vcombine.high %v8759_v27, %v8763_v55  ;;  %v12480_v62 = vcombine.low %v8759_v27, %v8763_v55  ;;  %v8822_v55 = vld [vmem:[%s18121_s18 + $0x7d0] sm:$0xff] }
0x10c0   :  { %10345 = vmatpush1.bf16.msra.mxu1 %v12414_v52  ;;  %v8766_v52 = vld [vmem:[%s18121_s18 + $0x610] sm:$0xff] }
0x10c1   :  { %10355 = vmatprep.subr.bf16.mxu1 %v12423_v54  ;;  %10427 = vmatpush1.bf16.msra.mxu0 %v12416_v28  ;;  %v8770_v54 = vld [vmem:[%s18121_s18 + $0x630] sm:$0xff]  ;;  %v12472_v28 = vcombine.low %v8751_v40, %v8755_v31 }
0x10c2   :  { %10437 = vmatprep.subr.bf16.mxu0 %v12425_v53  ;;  %v8767_v53 = vld [vmem:[%s18121_s18 + $0x618] sm:$0xff]  ;;  %v12487_v11 = vcombine.high %v8766_v52, %v8770_v54  ;;  %v8814_v31 = vld [vmem:[%s18121_s18 + $0x790] sm:$0xff] }
0x10c3   :  { %10347 = vmatmul.mubr.bf16.vlgmr.msra.gmra.mrb[244].mxu1 %v17233_v14 }
0x10c4   :  { %10356 = vmatpush1.bf16.msra.mxu1 %v12422_v33  ;;  %10387 = vmatprep.mubr.bf16.mxu1 %v17441_v16  ;;  %v8771_v33 = vld [vmem:[%s18121_s18 + $0x638] sm:$0xff] }
0x10c5   :  { %10357 = vmatprep.subr.bf16.mxu1 %v12431_v25  ;;  %10429 = vmatmul.mubr.bf16.vlgmr.msra.gmra.mrb[136].mxu0 %v17233_v14  ;;  %v8727_v14 = vld [vmem:[%s18121_s18 + $0x4d8] sm:$0xff]  ;;  %v8778_v25 = vld [vmem:[%s18121_s18 + $0x670] sm:$0xff]  ;;  %v12489_v34 = vcombine.high %v8767_v53, %v8771_v33  ;;  %v12488_v2 = vcombine.low %v8767_v53, %v8771_v33 }
0x10c6   :  { %10438 = vmatpush1.bf16.msra.mxu0 %v12424_v3  ;;  %10469 = vmatprep.mubr.bf16.mxu0 %v17441_v16  ;;  %v8738_v16 = vld [vmem:[%s18121_s18 + $0x530] sm:$0xff]  ;;  %v12449_v4 = vcombine.high %v8727_v14, %v8731_v9  ;;  %v12448_v35 = vcombine.low %v8727_v14, %v8731_v9  ;;  %v12486_v3 = vcombine.low %v8766_v52, %v8770_v54 }
0x10c7   :  { %10439 = vmatprep.subr.bf16.mxu0 %v12433_v24  ;;  %v12455_v7 = vcombine.high %v8734_v37, %v8738_v16  ;;  %v12454_v8 = vcombine.low %v8734_v37, %v8738_v16  ;;  %v8775_v24 = vld [vmem:[%s18121_s18 + $0x658] sm:$0xff]  ;;  %v12495_v1 = vcombine.high %v8774_v13, %v8778_v25  ;;  %v8790_v9 = vld [vmem:[%s18121_s18 + $0x6d0] sm:$0xff] }
0x10c8   :  { %10358 = vmatpush1.bf16.msra.mxu1 %v12430_v42  ;;  %v8779_v42 = vld [vmem:[%s18121_s18 + $0x678] sm:$0xff] }
0x10c9   :  { %10359 = vmatprep.subr.bf16.mxu1 %v12439_v30  ;;  %v8786_v30 = vld [vmem:[%s18121_s18 + $0x6b0] sm:$0xff]  ;;  %v12497_v49 = vcombine.high %v8775_v24, %v8779_v42  ;;  %v12496_v37 = vcombine.low %v8775_v24, %v8779_v42  ;;  %v14592_v24 = vld [vmem:[#allocation28 + $0x10] ss:$8 sps:$4 sm:$0xff]  }
0x10ca   :  { %10440 = vmatpush1.bf16.msra.mxu0 %v12432_v63  ;;  %v12494_v63 = vcombine.low %v8774_v13, %v8778_v25  ;;  %v12503_v14 = vcombine.high %v8782_v5, %v8786_v30  ;;  %v14591_v25 = vld [vmem:[#allocation28 + $0x4] ss:$8 sps:$4 sm:$0xff]  }
0x10cb   :  { %10441 = vmatprep.subr.bf16.mxu0 %v12441_v57  ;;  %v8783_v57 = vld [vmem:[%s18121_s18 + $0x698] sm:$0xff]  ;;  %v14597_v42 = vld [vmem:[#allocation28 + $0x24] ss:$8 sps:$4 sm:$0xff]  }
0x10cc   :  { %10360 = vmatpush1.bf16.msra.mxu1 %v12438_v15  ;;  %v8787_v15 = vld [vmem:[%s18121_s18 + $0x6b8] sm:$0xff] }
0x10cd   :  { %10361 = vmatprep.subr.bf16.mxu1 %v12447_v19  ;;  %v8794_v19 = vld [vmem:[%s18121_s18 + $0x6f0] sm:$0xff]  ;;  %v12505_v16 = vcombine.high %v8783_v57, %v8787_v15  ;;  %v12504_v41 = vcombine.low %v8783_v57, %v8787_v15  ;;  %v14604_v57 = vld [vmem:[#allocation28 + $0x50] ss:$8 sps:$4 sm:$0xff]  }
0x10ce   :  { %10442 = vmatpush1.bf16.msra.mxu0 %v12440_v46  ;;  %v12502_v46 = vcombine.low %v8782_v5, %v8786_v30  ;;  %v12511_v17 = vcombine.high %v8790_v9, %v8794_v19  ;;  %v14600_v5 = vld [vmem:[#allocation28 + $0x34] ss:$8 sps:$4 sm:$0xff]   ;;  %v14598_v30 = vld [vmem:[#allocation28 + $0x30] ss:$8 sps:$4 sm:$0xff]   ;;  %v14609_v15 = vld [vmem:[#allocation28 + $0x64] ss:$8 sps:$4 sm:$0xff]  }
0x10cf   :  { %10443 = vmatprep.subr.bf16.mxu0 %v12449_v4  ;;  %v8791_v4 = vld [vmem:[%s18121_s18 + $0x6d8] sm:$0xff] }
0x10d0   :  { %10362 = vmatpush1.bf16.msra.mxu1 %v12446_v44  ;;  %v8795_v44 = vld [vmem:[%s18121_s18 + $0x6f8] sm:$0xff] }
0x10d1   :  { %10363 = vmatprep.subr.bf16.mxu1 %v12455_v7  ;;  %v8802_v7 = vld [vmem:[%s18121_s18 + $0x730] sm:$0xff]  ;;  %v12513_v20 = vcombine.high %v8791_v4, %v8795_v44  ;;  %v12512_v22 = vcombine.low %v8791_v4, %v8795_v44 }
0x10d2   :  { %10444 = vmatpush1.bf16.msra.mxu0 %v12448_v35  ;;  %v12510_v35 = vcombine.low %v8790_v9, %v8794_v19  ;;  %v12519_v32 = vcombine.high %v8798_v61, %v8802_v7  ;;  %v14610_v9 = vld [vmem:[#allocation28 + $0x70] ss:$8 sps:$4 sm:$0xff]   ;;  %v14615_v19 = vld [vmem:[#allocation28 + $0x84] ss:$8 sps:$4 sm:$0xff]   ;;  %v14619_v44 = vld [vmem:[#allocation28 + $0xa0] ss:$8 sps:$4 sm:$0xff]  }
0x10d3   :  { %10445 = vmatprep.subr.bf16.mxu0 %v12457_v48  ;;  %v8799_v48 = vld [vmem:[%s18121_s18 + $0x718] sm:$0xff]  ;;  %v14621_v4 = vld [vmem:[#allocation28 + $0xa4] ss:$8 sps:$4 sm:$0xff]  }
0x10d4   :  { %10364 = vmatpush1.bf16.msra.mxu1 %v12454_v8  ;;  %v8803_v8 = vld [vmem:[%s18121_s18 + $0x738] sm:$0xff] }
0x10d5   :  { %10365 = vmatprep.subr.bf16.mxu1 %v12463_v51  ;;  %v8810_v51 = vld [vmem:[%s18121_s18 + $0x770] sm:$0xff]  ;;  %v12521_v58 = vcombine.high %v8799_v48, %v8803_v8  ;;  %v12520_v26 = vcombine.low %v8799_v48, %v8803_v8 }
0x10d6   :  { %10446 = vmatpush1.bf16.msra.mxu0 %v12456_v18  ;;  %v12518_v18 = vcombine.low %v8798_v61, %v8802_v7  ;;  %v12527_v40 = vcombine.high %v8806_v38, %v8810_v51  ;;  %v14622_v61 = vld [vmem:[#allocation28 + $0xb0] ss:$8 sps:$4 sm:$0xff]   ;;  %v14627_v7 = vld [vmem:[#allocation28 + $0xc4] ss:$8 sps:$4 sm:$0xff]   ;;  %v14631_v8 = vld [vmem:[#allocation28 + $0xe0] ss:$8 sps:$4 sm:$0xff]  }
0x10d7   :  { %10447 = vmatprep.subr.bf16.mxu0 %v12465_v39  ;;  %v8807_v39 = vld [vmem:[%s18121_s18 + $0x758] sm:$0xff]  ;;  %v14633_v48 = vld [vmem:[#allocation28 + $0xe4] ss:$8 sps:$4 sm:$0xff]  }
0x10d8   :  { %10366 = vmatpush1.bf16.msra.mxu1 %v12462_v29  ;;  %v8811_v29 = vld [vmem:[%s18121_s18 + $0x778] sm:$0xff] }
0x10d9   :  { %10367 = vmatprep.subr.bf16.mxu1 %v12471_v47  ;;  %v8818_v47 = vld [vmem:[%s18121_s18 + $0x7b0] sm:$0xff]  ;;  %v12529_v0 = vcombine.high %v8807_v39, %v8811_v29  ;;  %v12528_v52 = vcombine.low %v8807_v39, %v8811_v29 }
0x10da   :  { %10448 = vmatpush1.bf16.msra.mxu0 %v12464_v36  ;;  %v12526_v36 = vcombine.low %v8806_v38, %v8810_v51  ;;  %v12535_v27 = vcombine.high %v8814_v31, %v8818_v47  ;;  %v14634_v38 = vld [vmem:[#allocation28 + $0xf0] ss:$8 sps:$4 sm:$0xff]   ;;  %v14639_v51 = vld [vmem:[#allocation28 + $0x104] ss:$8 sps:$4 sm:$0xff]  }
0x10db   :  { %10449 = vmatprep.subr.bf16.mxu0 %v12473_v6  ;;  %v8815_v6 = vld [vmem:[%s18121_s18 + $0x798] sm:$0xff] }
0x10dc   :  { %10368 = vmatpush1.bf16.msra.mxu1 %v12470_v12  ;;  %v8819_v12 = vld [vmem:[%s18121_s18 + $0x7b8] sm:$0xff] }
0x10dd   :  { %10369 = vmatprep.subr.bf16.mxu1 %v12479_v21  ;;  %v8826_v21 = vld [vmem:[%s18121_s18 + $0x7f0] sm:$0xff]  ;;  %v12537_v54 = vcombine.high %v8815_v6, %v8819_v12  ;;  %v12536_v33 = vcombine.low %v8815_v6, %v8819_v12 }
0x10de   :  { %10450 = vmatpush1.bf16.msra.mxu0 %v12472_v28  ;;  %v12534_v28 = vcombine.low %v8814_v31, %v8818_v47  ;;  %v12543_v53 = vcombine.high %v8822_v55, %v8826_v21  ;;  %v12542_v13 = vcombine.low %v8822_v55, %v8826_v21 }
0x10df   :  { %10451 = vmatprep.subr.bf16.mxu0 %v12481_v50  ;;  %v8823_v50 = vld [vmem:[%s18121_s18 + $0x7d8] sm:$0xff] }
0x10e0   :  { %10370 = vmatpush1.bf16.msra.mxu1 %v12478_v23  ;;  %v8827_v23 = vld [vmem:[%s18121_s18 + $0x7f8] sm:$0xff] }
0x10e1   :  { %10371 = vmatprep.subr.bf16.mxu1 %v12487_v11  ;;  %v12545_v11 = vcombine.high %v8823_v50, %v8827_v23 }
0x10e2   :  { %10452 = vmatpush1.bf16.msra.mxu0 %v12480_v62  ;;  %v12544_v62 = vcombine.low %v8823_v50, %v8827_v23 }
0x10e3   :  { %10453 = vmatprep.subr.bf16.mxu0 %v12489_v34  ;;  %v14589_v34 = vld [vmem:[#allocation28] ss:$8 sps:$4 sm:$0xff]  }
0x10e4   :  { %10372 = vmatpush1.bf16.msra.mxu1 %v12486_v3  ;;  %v14594_v3 = vld [vmem:[#allocation28 + $0x14] ss:$8 sps:$4 sm:$0xff]  }
0x10e5   :  { %10373 = vmatprep.subr.bf16.mxu1 %v12495_v1  ;;  %v14595_v1 = vld [vmem:[#allocation28 + $0x20] ss:$8 sps:$4 sm:$0xff]  }
0x10e6   :  { %10454 = vmatpush1.bf16.msra.mxu0 %v12488_v2  ;;  %v14603_v2 = vld [vmem:[#allocation28 + $0x44] ss:$8 sps:$4 sm:$0xff]  }
0x10e7   :  { %10455 = vmatprep.subr.bf16.mxu0 %v12497_v49  ;;  %v14601_v49 = vld [vmem:[#allocation28 + $0x40] ss:$8 sps:$4 sm:$0xff]  }
0x10e8   :  { %10374 = vmatpush1.bf16.msra.mxu1 %v12494_v63  ;;  %v14606_v63 = vld [vmem:[#allocation28 + $0x54] ss:$8 sps:$4 sm:$0xff]  }
0x10e9   :  { %10375 = vmatprep.subr.bf16.mxu1 %v12503_v14  ;;  %v14607_v14 = vld [vmem:[#allocation28 + $0x60] ss:$8 sps:$4 sm:$0xff]  }
0x10ea   :  { %10456 = vmatpush1.bf16.msra.mxu0 %v12496_v37  ;;  %v14613_v37 = vld [vmem:[#allocation28 + $0x80] ss:$8 sps:$4 sm:$0xff]  }
0x10eb   :  { %10457 = vmatprep.subr.bf16.mxu0 %v12505_v16  ;;  %v14618_v16 = vld [vmem:[#allocation28 + $0x94] ss:$8 sps:$4 sm:$0xff]  }
0x10ec   :  { %10376 = vmatpush1.bf16.msra.mxu1 %v12502_v46  ;;  %v14616_v46 = vld [vmem:[#allocation28 + $0x90] ss:$8 sps:$4 sm:$0xff]  }
0x10ed   :  { %10377 = vmatprep.subr.bf16.mxu1 %v12511_v17  ;;  %v14624_v17 = vld [vmem:[#allocation28 + $0xb4] ss:$8 sps:$4 sm:$0xff]  }
0x10ee   :  { %10458 = vmatpush1.bf16.msra.mxu0 %v12504_v41  ;;  %v14625_v41 = vld [vmem:[#allocation28 + $0xc0] ss:$8 sps:$4 sm:$0xff]  }
0x10ef   :  { %10459 = vmatprep.subr.bf16.mxu0 %v12513_v20  ;;  %v14630_v20 = vld [vmem:[#allocation28 + $0xd4] ss:$8 sps:$4 sm:$0xff]  }
0x10f0   :  { %10378 = vmatpush1.bf16.msra.mxu1 %v12510_v35  ;;  %v14628_v35 = vld [vmem:[#allocation28 + $0xd0] ss:$8 sps:$4 sm:$0xff]  }
0x10f1   :  { %10379 = vmatprep.subr.bf16.mxu1 %v12519_v32  ;;  %v14636_v32 = vld [vmem:[#allocation28 + $0xf4] ss:$8 sps:$4 sm:$0xff]  }
0x10f2   :  { %10460 = vmatpush1.bf16.msra.mxu0 %v12512_v22  ;;  %v17817_v22 = vld [vmem:[#allocation27] sm:$0xff] }
0x10f3   :  { %10461 = vmatprep.subr.bf16.mxu0 %v12521_v58  ;;  %v8833_v58 = vrot.slane %v17817_v22, %v16874_v59  ;;  %v8845_v39 = vrot.slane %v17817_v22, %v16974_v60 }
0x10f4   :  { %10380 = vmatpush1.bf16.msra.mxu1 %v12518_v18  ;;  %v8837_v18 = vrot.slane %v17817_v22, %v16877_v45 }
0x10f5   :  { %10381 = vmatprep.subr.bf16.mxu1 %v12527_v40 }
0x10f6   :  { %10462 = vmatpush1.bf16.msra.mxu0 %v12520_v26 }
0x10f7   :  { %10463 = vmatprep.subr.bf16.mxu0 %v12529_v0 }
0x10f8   :  { %10382 = vmatpush1.bf16.msra.mxu1 %v12526_v36 }
0x10f9   :  { %10383 = vmatprep.subr.bf16.mxu1 %v12535_v27 }
0x10fa   :  { %10464 = vmatpush1.bf16.msra.mxu0 %v12528_v52 }
0x10fb   :  { %10465 = vmatprep.subr.bf16.mxu0 %v12537_v54 }
0x10fc   :  { %10384 = vmatpush1.bf16.msra.mxu1 %v12534_v28 }
0x10fd   :  { %10385 = vmatprep.subr.bf16.mxu1 %v12543_v53 }
0x10fe   :  { %10466 = vmatpush1.bf16.msra.mxu0 %v12536_v33 }
0x10ff   :  { %10467 = vmatprep.subr.bf16.mxu0 %v12545_v11 }
0x1100   :  { %10386 = vmatpush1.bf16.msra.mxu1 %v12542_v13 }
0x1101   :  { %11347 = vmatprep.subr.bf16.mxu1 %v14591_v25 }
0x1102   :  { %10468 = vmatpush1.bf16.msra.mxu0 %v12544_v62 }
0x1103   :  { %10388 = vmatmul.mubr.bf16.vlgmr.msra.gmra.mrb[244].mxu1 %v17443_v56 }
0x1104   :  { %11348 = vmatpush1.bf16.msra.mxu1 %v14589_v34 }
0x1105   :  { %11349 = vmatprep.subr.bf16.mxu1 %v14594_v3  ;;  %10470 = vmatmul.mubr.bf16.vlgmr.msra.gmra.mrb[136].mxu0 %v17443_v56  ;;  %v14612_v56 = vld [vmem:[#allocation28 + $0x74] ss:$8 sps:$4 sm:$0xff]  }
0x1108   :  { %11350 = vmatpush1.bf16.msra.mxu1 %v14592_v24 }
0x1109   :  { %11351 = vmatprep.subr.bf16.mxu1 %v14597_v42 }
0x110c   :  { %11352 = vmatpush1.bf16.msra.mxu1 %v14595_v1 }
0x110d   :  { %11353 = vmatprep.subr.bf16.mxu1 %v14600_v5 }
0x1110   :  { %11354 = vmatpush1.bf16.msra.mxu1 %v14598_v30 }
0x1111   :  { %11355 = vmatprep.subr.bf16.mxu1 %v14603_v2 }
0x1114   :  { %11356 = vmatpush1.bf16.msra.mxu1 %v14601_v49 }
0x1115   :  { %11357 = vmatprep.subr.bf16.mxu1 %v14606_v63 }
0x1118   :  { %11358 = vmatpush1.bf16.msra.mxu1 %v14604_v57 }
0x1119   :  { %11359 = vmatprep.subr.bf16.mxu1 %v14609_v15 }
0x111c   :  { %11360 = vmatpush1.bf16.msra.mxu1 %v14607_v14 }
0x111d   :  { %11361 = vmatprep.subr.bf16.mxu1 %v14612_v56 }
0x1120   :  { %11362 = vmatpush1.bf16.msra.mxu1 %v14610_v9 }
0x1121   :  { %11363 = vmatprep.subr.bf16.mxu1 %v14615_v19 }
0x1124   :  { %11364 = vmatpush1.bf16.msra.mxu1 %v14613_v37 }
0x1125   :  { %11365 = vmatprep.subr.bf16.mxu1 %v14618_v16 }
0x1128   :  { %11366 = vmatpush1.bf16.msra.mxu1 %v14616_v46  ;;  %v14637_v46 = vld [vmem:[#allocation28 + $0x100] ss:$8 sps:$4 sm:$0xff]  }
0x1129   :  { %11367 = vmatprep.subr.bf16.mxu1 %v14621_v4 }
0x112c   :  { %11368 = vmatpush1.bf16.msra.mxu1 %v14619_v44  ;;  %v14642_v44 = vld [vmem:[#allocation28 + $0x114] ss:$8 sps:$4 sm:$0xff]  }
0x112d   :  { %11369 = vmatprep.subr.bf16.mxu1 %v14624_v17 }
0x1130   :  { %11370 = vmatpush1.bf16.msra.mxu1 %v14622_v61  ;;  %v14640_v61 = vld [vmem:[#allocation28 + $0x110] ss:$8 sps:$4 sm:$0xff]  }
0x1131   :  { %11371 = vmatprep.subr.bf16.mxu1 %v14627_v7  ;;  %v14645_v7 = vld [vmem:[#allocation28 + $0x124] ss:$8 sps:$4 sm:$0xff]  }
0x1134   :  { %11372 = vmatpush1.bf16.msra.mxu1 %v14625_v41  ;;  %v14643_v41 = vld [vmem:[#allocation28 + $0x120] ss:$8 sps:$4 sm:$0xff]  }
0x1135   :  { %11373 = vmatprep.subr.bf16.mxu1 %v14630_v20  ;;  %v14648_v20 = vld [vmem:[#allocation28 + $0x134] ss:$8 sps:$4 sm:$0xff]  }
0x1138   :  { %11374 = vmatpush1.bf16.msra.mxu1 %v14628_v35  ;;  %v14646_v35 = vld [vmem:[#allocation28 + $0x130] ss:$8 sps:$4 sm:$0xff]  }
0x1139   :  { %11375 = vmatprep.subr.bf16.mxu1 %v14633_v48  ;;  %v14651_v48 = vld [vmem:[#allocation28 + $0x144] ss:$8 sps:$4 sm:$0xff]  }
0x113c   :  { %11376 = vmatpush1.bf16.msra.mxu1 %v14631_v8  ;;  %v14649_v8 = vld [vmem:[#allocation28 + $0x140] ss:$8 sps:$4 sm:$0xff]  }
0x113d   :  { %11377 = vmatprep.subr.bf16.mxu1 %v14636_v32  ;;  %v14654_v32 = vld [vmem:[#allocation28 + $0x154] ss:$8 sps:$4 sm:$0xff]  }
0x1140   :  { %11378 = vmatpush1.bf16.msra.mxu1 %v14634_v38  ;;  %v8841_v38 = vrot.slane %v17817_v22, %v16971_v43  ;;  %v14666_v43 = vld [vmem:[#allocation28 + $0x194] ss:$8 sps:$4 sm:$0xff]  }
0x1141   :  { %11388 = vmatprep.subr.bf16.mxu1 %v14639_v51  ;;  %v14652_v51 = vld [vmem:[#allocation28 + $0x150] ss:$8 sps:$4 sm:$0xff]  }
0x1156   :  { %v10225_v29 = vpop.f32.mrb[240].mxu1  ;;  %v17825_v40 = vpop.f32.mrb[132].mxu0 }
0x1157   :  { %v13563_v31 = vadd.f32 %v10225_v29, %v8833_v58  ;;  %v10227_v47 = vpop.f32.mrb[241].mxu1  ;;  %v10309_v26 = vpop.f32.mrb[133].mxu0  ;;  %v14657_v58 = vld [vmem:[#allocation28 + $0x164] ss:$8 sps:$4 sm:$0xff]   ;;  %v14660_v29 = vld [vmem:[#allocation28 + $0x174] ss:$8 sps:$4 sm:$0xff]  }
0x1158   :  { %v13564_v0 = vadd.f32 %v10227_v47, %v8837_v18  ;;  %v13566_v36 = vadd.f32 %v10309_v26, %v8845_v39  ;;  %v10229_v6 = vpop.f32.mrb[242].mxu1  ;;  %v10311_v12 = vpop.f32.mrb[134].mxu0  ;;  %v13565_v18 = vadd.f32 %v17825_v40, %v8841_v38  ;;  %v14655_v39 = vld [vmem:[#allocation28 + $0x160] ss:$8 sps:$4 sm:$0xff]   ;;  %v14658_v47 = vld [vmem:[#allocation28 + $0x170] ss:$8 sps:$4 sm:$0xff]  }
0x1159   :  { %v10478_v27 = vmax.f32 %v13563_v31, 0.0  ;;  %v10230_v55 = vpop.f32.mrb[243].mxu1  ;;  %v10312_v21 = vpop.f32.mrb[135].mxu0  ;;  %v14663_v26 = vld [vmem:[#allocation28 + $0x184] ss:$8 sps:$4 sm:$0xff]  }
0x115a   :  { %v10479_v52 = vmax.f32 %v13564_v0, 0.0  ;;  %v10481_v54 = vmax.f32 %v13566_v36, 0.0  ;;  %v10480_v31 = vmax.f32 %v13565_v18, 0.0  ;;  %v14661_v36 = vld [vmem:[#allocation28 + $0x180] ss:$8 sps:$4 sm:$0xff]   ;;  %v11521_v18 = vld [vmem:[#allocation31 + $0x30] sm:$0xff] }
0x115b   :  { %v10486_v28 = vmin.f32 %v10478_v27, 6.0  ;;  %v14664_v12 = vld [vmem:[#allocation28 + $0x190] ss:$8 sps:$4 sm:$0xff]   ;;  %v14669_v27 = vld [vmem:[#allocation28 + $0x1a4] ss:$8 sps:$4 sm:$0xff]  }
0x115c   :  { %v10487_v50 = vmin.f32 %v10479_v52, 6.0  ;;  %v10489_v23 = vmin.f32 %v10481_v54, 6.0  ;;  %v10488_v0 = vmin.f32 %v10480_v31, 6.0  ;;  %v14667_v55 = vld [vmem:[#allocation28 + $0x1a0] ss:$8 sps:$4 sm:$0xff]  }
0x115d   :  { %v10494_v60 = vsel %vm3446_vm0, %v10486_v28, 0.0  ;;  %v14672_v52 = vld [vmem:[#allocation28 + $0x1b4] ss:$8 sps:$4 sm:$0xff]   ;;  %v14670_v54 = vld [vmem:[#allocation28 + $0x1b0] ss:$8 sps:$4 sm:$0xff]   ;;  %v11539_v31 = vld [vmem:[#allocation31 + $0xc0] sm:$0xff] }
0x115e   :  { %v10495_v53 = vrot.slane %v10494_v60, 4  ;;  %v10501_v33 = vsel %vm3446_vm0, %v10487_v50, 0.0  ;;  %v10515_v11 = vsel %vm3446_vm0, %v10489_v23, 0.0  ;;  %v10508_v6 = vsel %vm3446_vm0, %v10488_v0, 0.0  ;;  %v14675_v50 = vld [vmem:[#allocation28 + $0x1c4] ss:$8 sps:$4 sm:$0xff]  }
0x115f   :  { %v10502_v13 = vrot.slane %v10501_v33, 4  ;;  %v10516_v25 = vrot.slane %v10515_v11, 4  ;;  %v10509_v40 = vrot.slane %v10508_v6, 4  ;;  %v14673_v23 = vld [vmem:[#allocation28 + $0x1c0] ss:$8 sps:$4 sm:$0xff]  }
0x1160   :  { %v10496_v62 = vadd.f32 %v10495_v53, %v10494_v60  ;;  %v14678_v53 = vld [vmem:[#allocation28 + $0x1d4] ss:$8 sps:$4 sm:$0xff]   ;;  %v14697_v0 = vld [vmem:[#allocation28 + $0x240] ss:$8 sps:$4 sm:$0xff]  }
0x1161   :  { %v10503_v34 = vadd.f32 %v10502_v13, %v10501_v33  ;;  %v10517_v3 = vadd.f32 %v10516_v25, %v10515_v11  ;;  %v10510_v21 = vadd.f32 %v10509_v40, %v10508_v6  ;;  %v14676_v33 = vld [vmem:[#allocation28 + $0x1d0] ss:$8 sps:$4 sm:$0xff]   ;;  %v14681_v13 = vld [vmem:[#allocation28 + $0x1e4] ss:$8 sps:$4 sm:$0xff]   ;;  %v14679_v25 = vld [vmem:[#allocation28 + $0x1e0] ss:$8 sps:$4 sm:$0xff]  }
0x1162   :  { %v10497_v24 = vrot.slane %v10496_v62, 2  ;;  %v11524_v6 = vld [vmem:[#allocation31 + $0x48] sm:$0xff]  ;;  %v11541_v40 = vld [vmem:[#allocation31 + $0xd0] sm:$0xff] }
0x1163   :  { %v10504_v42 = vrot.slane %v10503_v34, 2  ;;  %v10518_v1 = vrot.slane %v10517_v3, 2  ;;  %v10511_v28 = vrot.slane %v10510_v21, 2 }
0x1164   :  { %v10498_v5 = vadd.f32 %v10497_v24, %v10496_v62  ;;  %v14684_v62 = vld [vmem:[#allocation28 + $0x1f4] ss:$8 sps:$4 sm:$0xff]   ;;  %v14687_v24 = vld [vmem:[#allocation28 + $0x204] ss:$8 sps:$4 sm:$0xff]  }
0x1165   :  { %v10505_v30 = vadd.f32 %v10504_v42, %v10503_v34  ;;  %v10519_v2 = vadd.f32 %v10518_v1, %v10517_v3  ;;  %v10512_v60 = vadd.f32 %v10511_v28, %v10510_v21  ;;  %v14682_v3 = vld [vmem:[#allocation28 + $0x1f0] ss:$8 sps:$4 sm:$0xff]   ;;  %v14685_v1 = vld [vmem:[#allocation28 + $0x200] ss:$8 sps:$4 sm:$0xff]  }
0x1166   :  { %v10499_v49 = vrot.slane %v10498_v5, 1  ;;  %v14700_v21 = vld [vmem:[#allocation28 + $0x250] ss:$8 sps:$4 sm:$0xff]  }
0x1167   :  { %v10506_v63 = vrot.slane %v10505_v30, 1  ;;  %v10520_v57 = vrot.slane %v10519_v2, 1  ;;  %v10513_v11 = vrot.slane %v10512_v60, 1  ;;  %v11526_v28 = vld [vmem:[#allocation31 + $0x58] sm:$0xff] }
0x1168   :  { %v10500_v15 = vadd.f32 %v10499_v49, %v10498_v5  ;;  %v14693_v49 = vld [vmem:[#allocation28 + $0x224] ss:$8 sps:$4 sm:$0xff]  }
0x1169   :  { %v10507_v14 = vadd.f32 %v10506_v63, %v10505_v30  ;;  %v10521_v56 = vadd.f32 %v10520_v57, %v10519_v2  ;;  %v10514_v34 = vadd.f32 %v10513_v11, %v10512_v60  ;;  %v14690_v30 = vld [vmem:[#allocation28 + $0x214] ss:$8 sps:$4 sm:$0xff]   ;;  %v14688_v2 = vld [vmem:[#allocation28 + $0x210] ss:$8 sps:$4 sm:$0xff]   ;;  %v11531_v63 = vld [vmem:[#allocation31 + $0x80] sm:$0xff] }
0x116a   :  { %v10551_v9 = vmul.f32 0.25, %v10500_v15  ;;  %v11532_v57 = vld [vmem:[#allocation31 + $0x88] sm:$0xff]  ;;  %v11515_v15 = vld [vmem:[#allocation31] sm:$0xff] }
0x116b   :  { %v10552_v19 = vmul.f32 0.25, %v10507_v14  ;;  %v10554_v37 = vmul.f32 0.25, %v10521_v56  ;;  %v10553_v42 = vmul.f32 0.25, %v10514_v34  ;;  %v13483_v14 = vpack.c.bf16 %v11532_v57, %v11531_v63  ;;  %v11516_v56 = vld [vmem:[#allocation31 + $0x8] sm:$0xff] }
0x116c   :  { %v10559_v4 = vpack.c.bf16 %v10551_v9, %v10551_v9  ;;  %v11533_v9 = vld [vmem:[#allocation31 + $0x90] sm:$0xff]  ;;  %v14703_v60 = vld [vmem:[#allocation28 + $0x260] ss:$8 sps:$4 sm:$0xff]   ;;  %v14711_v11 = vld [vmem:[#allocation28 + $0x284] ss:$8 sps:$4 sm:$0xff]   ;;  %v8852_v34 = vsub.s32 5, %v16871_v10 }
0x116d   :  { %v10560_v16 = vpack.c.bf16 %v10552_v19, %v10552_v19  ;;  %v10562_v17 = vpack.c.bf16 %v10554_v37, %v10554_v37  ;;  %v10561_v5 = vpack.c.bf16 %v10553_v42, %v10553_v42  ;;  %v11534_v19 = vld [vmem:[#allocation31 + $0x98] sm:$0xff]  ;;  %v13485_v37 = vpack.c.bf16 %v11516_v56, %v11515_v15  ;;  %13484 = vmatprep.subr.bf16.mxu0 %v13483_v14 }
0x116e   :  { %v8860_v42 = vsub.s32 7, %v16871_v10 }
0x116f   :  { %11379 = vmatprep.mubr.bf16.mxu1 %v10560_v16  ;;  %v13487_v16 = vpack.c.bf16 %v11534_v19, %v11533_v9  ;;  %13486 = vmatpush3.bf16.msra.mxu0 %v13485_v37  ;;  %v14718_v37 = vld [vmem:[#allocation28 + $0x2b0] ss:$8 sps:$4 sm:$0xff]  }
0x1170   :  { %11380 = vmatmul.mubr.bf16.vlgmr.msra.gmra.mrb[248].mxu1 %v10559_v4  ;;  %v11518_v4 = vld [vmem:[#allocation31 + $0x18] sm:$0xff]  ;;  %v8861_v63 = vrot.slane %v17817_v22, %v8860_v42 }
0x1171   :  { %11389 = vmatpush1.bf16.msra.mxu1 %v14637_v46  ;;  %11420 = vmatprep.mubr.bf16.mxu1 %v10562_v17  ;;  %v11517_v46 = vld [vmem:[#allocation31 + $0x10] sm:$0xff]  ;;  %v11536_v17 = vld [vmem:[#allocation31 + $0xa8] sm:$0xff] }
0x1172   :  { %11390 = vmatprep.subr.bf16.mxu1 %v14642_v44  ;;  %v11535_v44 = vld [vmem:[#allocation31 + $0xa0] sm:$0xff]  ;;  %13488 = vmatprep.subr.bf16.mxu0 %v13487_v16  ;;  %v14738_v42 = vld [vmem:[#allocation28 + $0x314] ss:$8 sps:$4 sm:$0xff]  }
0x1175   :  { %11391 = vmatpush1.bf16.msra.mxu1 %v14640_v61  ;;  %v13489_v61 = vpack.c.bf16 %v11518_v4, %v11517_v46 }
0x1176   :  { %11392 = vmatprep.subr.bf16.mxu1 %v14645_v7  ;;  %v14691_v7 = vld [vmem:[#allocation28 + $0x220] ss:$8 sps:$4 sm:$0xff]  }
0x1177   :  { %13490 = vmatpush3.bf16.msra.mxu0 %v13489_v61 }
0x1179   :  { %11393 = vmatpush1.bf16.msra.mxu1 %v14643_v41  ;;  %v13491_v41 = vpack.c.bf16 %v11536_v17, %v11535_v44  ;;  %v14723_v44 = vld [vmem:[#allocation28 + $0x2c4] ss:$8 sps:$4 sm:$0xff]  }
0x117a   :  { %11394 = vmatprep.subr.bf16.mxu1 %v14648_v20  ;;  %v11519_v20 = vld [vmem:[#allocation31 + $0x20] sm:$0xff] }
0x117b   :  { %13492 = vmatprep.subr.bf16.mxu0 %v13491_v41 }
0x117d   :  { %11395 = vmatpush1.bf16.msra.mxu1 %v14646_v35  ;;  %v11520_v35 = vld [vmem:[#allocation31 + $0x28] sm:$0xff] }
0x117e   :  { %11396 = vmatprep.subr.bf16.mxu1 %v14651_v48  ;;  %v14696_v48 = vld [vmem:[#allocation28 + $0x234] ss:$8 sps:$4 sm:$0xff]   ;;  %v13493_v38 = vpack.c.bf16 %v11520_v35, %v11519_v20 }
0x1180   :  { %13494 = vmatpush3.bf16.msra.mxu0 %v13493_v38 }
0x1181   :  { %11397 = vmatpush1.bf16.msra.mxu1 %v14649_v8  ;;  %v11537_v8 = vld [vmem:[#allocation31 + $0xb0] sm:$0xff] }
0x1182   :  { %11398 = vmatprep.subr.bf16.mxu1 %v14654_v32  ;;  %v11538_v32 = vld [vmem:[#allocation31 + $0xb8] sm:$0xff] }
0x1185   :  { %11399 = vmatpush1.bf16.msra.mxu1 %v14652_v51  ;;  %v14694_v51 = vld [vmem:[#allocation28 + $0x230] ss:$8 sps:$4 sm:$0xff]  }
0x1186   :  { %11400 = vmatprep.subr.bf16.mxu1 %v14657_v58  ;;  %v13495_v58 = vpack.c.bf16 %v11538_v32, %v11537_v8  ;;  %v14721_v8 = vld [vmem:[#allocation28 + $0x2c0] ss:$8 sps:$4 sm:$0xff]  }
0x1188   :  { %13496 = vmatprep.subr.bf16.mxu0 %v13495_v58 }
0x1189   :  { %11401 = vmatpush1.bf16.msra.mxu1 %v14655_v39  ;;  %v11522_v39 = vld [vmem:[#allocation31 + $0x38] sm:$0xff] }
0x118a   :  { %11402 = vmatprep.subr.bf16.mxu1 %v14660_v29  ;;  %v14699_v29 = vld [vmem:[#allocation28 + $0x244] ss:$8 sps:$4 sm:$0xff]  }
0x118d   :  { %11403 = vmatpush1.bf16.msra.mxu1 %v14658_v47  ;;  %v11540_v47 = vld [vmem:[#allocation31 + $0xc8] sm:$0xff] }
0x118e   :  { %11404 = vmatprep.subr.bf16.mxu1 %v14663_v26  ;;  %v13497_v26 = vpack.c.bf16 %v11522_v39, %v11521_v18 }
0x1190   :  { %13498 = vmatpush3.bf16.msra.mxu0 %v13497_v26 }
0x1191   :  { %11405 = vmatpush1.bf16.msra.mxu1 %v14661_v36  ;;  %v13499_v36 = vpack.c.bf16 %v11540_v47, %v11539_v31  ;;  %v14724_v47 = vld [vmem:[#allocation28 + $0x2d0] ss:$8 sps:$4 sm:$0xff]  }
0x1192   :  { %11406 = vmatprep.subr.bf16.mxu1 %v14666_v43  ;;  %v11523_v43 = vld [vmem:[#allocation31 + $0x40] sm:$0xff] }
0x1193   :  { %13500 = vmatprep.subr.bf16.mxu0 %v13499_v36  ;;  %v14729_v36 = vld [vmem:[#allocation28 + $0x2e4] ss:$8 sps:$4 sm:$0xff]  }
0x1195   :  { %11407 = vmatpush1.bf16.msra.mxu1 %v14664_v12  ;;  %v14702_v12 = vld [vmem:[#allocation28 + $0x254] ss:$8 sps:$4 sm:$0xff]  }
0x1196   :  { %11408 = vmatprep.subr.bf16.mxu1 %v14669_v27  ;;  %v11542_v27 = vld [vmem:[#allocation31 + $0xd8] sm:$0xff] }
0x1199   :  { %11409 = vmatpush1.bf16.msra.mxu1 %v14667_v55  ;;  %v13501_v55 = vpack.c.bf16 %v11524_v6, %v11523_v43 }
0x119a   :  { %11410 = vmatprep.subr.bf16.mxu1 %v14672_v52  ;;  %v13503_v52 = vpack.c.bf16 %v11542_v27, %v11541_v40  ;;  %v14727_v27 = vld [vmem:[#allocation28 + $0x2e0] ss:$8 sps:$4 sm:$0xff]  }
0x119b   :  { %13502 = vmatpush3.bf16.msra.mxu0 %v13501_v55 }
0x119c   :  { %13504 = vmatprep.subr.bf16.mxu0 %v13503_v52  ;;  %v14732_v52 = vld [vmem:[#allocation28 + $0x2f4] ss:$8 sps:$4 sm:$0xff]  }
0x119d   :  { %11411 = vmatpush1.bf16.msra.mxu1 %v14670_v54  ;;  %v11525_v54 = vld [vmem:[#allocation31 + $0x50] sm:$0xff] }
0x119e   :  { %11412 = vmatprep.subr.bf16.mxu1 %v14675_v50  ;;  %v14705_v50 = vld [vmem:[#allocation28 + $0x264] ss:$8 sps:$4 sm:$0xff]  }
0x11a1   :  { %11413 = vmatpush1.bf16.msra.mxu1 %v14673_v23  ;;  %v13505_v23 = vpack.c.bf16 %v11526_v28, %v11525_v54 }
0x11a2   :  { %11414 = vmatprep.subr.bf16.mxu1 %v14678_v53  ;;  %v14708_v53 = vld [vmem:[#allocation28 + $0x274] ss:$8 sps:$4 sm:$0xff]  }
0x11a3   :  { %13506 = vmatpush3.bf16.msra.mxu0 %v13505_v23  ;;  %v14730_v23 = vld [vmem:[#allocation28 + $0x2f0] ss:$8 sps:$4 sm:$0xff]  }
0x11a5   :  { %11415 = vmatpush1.bf16.msra.mxu1 %v14676_v33  ;;  %v14706_v33 = vld [vmem:[#allocation28 + $0x270] ss:$8 sps:$4 sm:$0xff]  }
0x11a6   :  { %11416 = vmatprep.subr.bf16.mxu1 %v14681_v13  ;;  %v14709_v13 = vld [vmem:[#allocation28 + $0x280] ss:$8 sps:$4 sm:$0xff]  }
0x11a9   :  { %11417 = vmatpush1.bf16.msra.mxu1 %v14679_v25  ;;  %v14714_v25 = vld [vmem:[#allocation28 + $0x294] ss:$8 sps:$4 sm:$0xff]  }
0x11aa   :  { %11418 = vmatprep.subr.bf16.mxu1 %v14684_v62  ;;  %v8848_v62 = vsub.s32 4, %v16871_v10 }
0x11ad   :  { %11419 = vmatpush1.bf16.msra.mxu1 %v14682_v3  ;;  %v14712_v3 = vld [vmem:[#allocation28 + $0x290] ss:$8 sps:$4 sm:$0xff]  }
0x11ae   :  { %11429 = vmatprep.subr.bf16.mxu1 %v14687_v24  ;;  %v14717_v24 = vld [vmem:[#allocation28 + $0x2a4] ss:$8 sps:$4 sm:$0xff]  }
0x11b0   :  { %11421 = vmatmul.mubr.bf16.vlgmr.msra.gmra.mrb[248].mxu1 %v10561_v5  ;;  %v8853_v5 = vrot.slane %v17817_v22, %v8852_v34  ;;  %v14733_v34 = vld [vmem:[#allocation28 + $0x300] ss:$8 sps:$4 sm:$0xff]  }
0x11b1   :  { %11430 = vmatpush1.bf16.msra.mxu1 %v14685_v1  ;;  %v8849_v1 = vrot.slane %v17817_v22, %v8848_v62 }
0x11b2   :  { %11431 = vmatprep.subr.bf16.mxu1 %v14690_v30  ;;  %v14715_v30 = vld [vmem:[#allocation28 + $0x2a0] ss:$8 sps:$4 sm:$0xff]  }
0x11b5   :  { %11432 = vmatpush1.bf16.msra.mxu1 %v14688_v2 }
0x11b6   :  { %11433 = vmatprep.subr.bf16.mxu1 %v14693_v49  ;;  %v14720_v49 = vld [vmem:[#allocation28 + $0x2b4] ss:$8 sps:$4 sm:$0xff]  }
0x11b9   :  { %11434 = vmatpush1.bf16.msra.mxu1 %v14691_v7 }
0x11ba   :  { %11435 = vmatprep.subr.bf16.mxu1 %v14696_v48 }
0x11bd   :  { %11436 = vmatpush1.bf16.msra.mxu1 %v14694_v51  ;;  %v14726_v51 = vld [vmem:[#allocation28 + $0x2d4] ss:$8 sps:$4 sm:$0xff]  }
0x11be   :  { %11437 = vmatprep.subr.bf16.mxu1 %v14699_v29 }
0x11c1   :  { %11438 = vmatpush1.bf16.msra.mxu1 %v14697_v0 }
0x11c2   :  { %11439 = vmatprep.subr.bf16.mxu1 %v14702_v12 }
0x11c5   :  { %11440 = vmatpush1.bf16.msra.mxu1 %v14700_v21 }
0x11c6   :  { %11441 = vmatprep.subr.bf16.mxu1 %v14705_v50 }
0x11c9   :  { %11442 = vmatpush1.bf16.msra.mxu1 %v14703_v60 }
0x11ca   :  { %11443 = vmatprep.subr.bf16.mxu1 %v14708_v53 }
0x11cd   :  { %11444 = vmatpush1.bf16.msra.mxu1 %v14706_v33  ;;  %v14735_v33 = vld [vmem:[#allocation28 + $0x304] ss:$8 sps:$4 sm:$0xff]  }
0x11ce   :  { %11445 = vmatprep.subr.bf16.mxu1 %v14711_v11 }
0x11d1   :  { %11446 = vmatpush1.bf16.msra.mxu1 %v14709_v13 }
0x11d2   :  { %11447 = vmatprep.subr.bf16.mxu1 %v14714_v25 }
0x11d5   :  { %11448 = vmatpush1.bf16.msra.mxu1 %v14712_v3 }
0x11d6   :  { %v10389_v2 = vpop.f32.mrb[244].mxu1  ;;  %11449 = vmatprep.subr.bf16.mxu1 %v14717_v24 }
0x11d7   :  { %v13567_v57 = vadd.f32 %v10389_v2, %v8849_v1  ;;  %v10391_v15 = vpop.f32.mrb[245].mxu1  ;;  %v14739_v2 = vld [vmem:[#allocation28 + $0x320] ss:$8 sps:$4 sm:$0xff]  }
0x11d8   :  { %v13568_v14 = vadd.f32 %v10391_v15, %v8853_v5  ;;  %v17840_v56 = vpop.f32.mrb[136].mxu0  ;;  %v10393_v9 = vpop.f32.mrb[246].mxu1  ;;  %v14736_v5 = vld [vmem:[#allocation28 + $0x310] ss:$8 sps:$4 sm:$0xff]   ;;  %v8856_v15 = vsub.s32 6, %v16871_v10 }
0x11d9   :  { %v10482_v19 = vmax.f32 %v13567_v57, 0.0  ;;  %11450 = vmatpush1.bf16.msra.mxu1 %v14715_v30  ;;  %v10473_v16 = vpop.f32.mrb[137].mxu0  ;;  %v10394_v46 = vpop.f32.mrb[247].mxu1  ;;  %v14741_v30 = vld [vmem:[#allocation28 + $0x324] ss:$8 sps:$4 sm:$0xff]  }
0x11da   :  { %v10483_v4 = vmax.f32 %v13568_v14, 0.0  ;;  %11451 = vmatprep.subr.bf16.mxu1 %v14720_v49  ;;  %v13570_v17 = vadd.f32 %v10473_v16, %v8861_v63  ;;  %v10475_v61 = vpop.f32.mrb[138].mxu0  ;;  %v14744_v49 = vld [vmem:[#allocation28 + $0x334] ss:$8 sps:$4 sm:$0xff]   ;;  %v14742_v63 = vld [vmem:[#allocation28 + $0x330] ss:$8 sps:$4 sm:$0xff]  }
0x11db   :  { %v10490_v7 = vmin.f32 %v10482_v19, 6.0  ;;  %v10476_v41 = vpop.f32.mrb[139].mxu0  ;;  %v14747_v57 = vld [vmem:[#allocation28 + $0x344] ss:$8 sps:$4 sm:$0xff]   ;;  %v14745_v14 = vld [vmem:[#allocation28 + $0x340] ss:$8 sps:$4 sm:$0xff]   ;;  %v8857_v19 = vrot.slane %v17817_v22, %v8856_v15 }
0x11dc   :  { %v10491_v20 = vmin.f32 %v10483_v4, 6.0  ;;  %v10485_v35 = vmax.f32 %v13570_v17, 0.0  ;;  %v14750_v9 = vld [vmem:[#allocation28 + $0x354] ss:$8 sps:$4 sm:$0xff]   ;;  %v14753_v16 = vld [vmem:[#allocation28 + $0x364] ss:$8 sps:$4 sm:$0xff]  }
0x11dd   :  { %v10522_v48 = vsel %vm3446_vm0, %v10490_v7, 0.0  ;;  %11452 = vmatpush1.bf16.msra.mxu1 %v14718_v37  ;;  %v14748_v37 = vld [vmem:[#allocation28 + $0x350] ss:$8 sps:$4 sm:$0xff]   ;;  %v13569_v46 = vadd.f32 %v17840_v56, %v8857_v19  ;;  %v14751_v4 = vld [vmem:[#allocation28 + $0x360] ss:$8 sps:$4 sm:$0xff]  }
0x11de   :  { %v10523_v32 = vrot.slane %v10522_v48, 4  ;;  %v10529_v38 = vsel %vm3446_vm0, %v10491_v20, 0.0  ;;  %11453 = vmatprep.subr.bf16.mxu1 %v14723_v44  ;;  %v10493_v58 = vmin.f32 %v10485_v35, 6.0  ;;  %v14756_v44 = vld [vmem:[#allocation28 + $0x374] ss:$8 sps:$4 sm:$0xff]  }
0x11df   :  { %v10530_v18 = vrot.slane %v10529_v38, 4  ;;  %v10484_v17 = vmax.f32 %v13569_v46, 0.0  ;;  %v14754_v61 = vld [vmem:[#allocation28 + $0x370] ss:$8 sps:$4 sm:$0xff]   ;;  %v14759_v10 = vld [vmem:[#allocation28 + $0x384] ss:$8 sps:$4 sm:$0xff]  }
0x11e0   :  { %v10524_v39 = vadd.f32 %v10523_v32, %v10522_v48  ;;  %v10543_v29 = vsel %vm3446_vm0, %v10493_v58, 0.0  ;;  %v14757_v41 = vld [vmem:[#allocation28 + $0x380] ss:$8 sps:$4 sm:$0xff]   ;;  %v14762_v22 = vld [vmem:[#allocation28 + $0x394] ss:$8 sps:$4 sm:$0xff]  }
0x11e1   :  { %v10531_v31 = vadd.f32 %v10530_v18, %v10529_v38  ;;  %11454 = vmatpush1.bf16.msra.mxu1 %v14721_v8  ;;  %v10544_v26 = vrot.slane %v10543_v29, 4  ;;  %v10492_v7 = vmin.f32 %v10484_v17, 6.0  ;;  %v14760_v35 = vld [vmem:[#allocation28 + $0x390] ss:$8 sps:$4 sm:$0xff]   ;;  %v14765_v48 = vld [vmem:[#allocation28 + $0x3a4] ss:$8 sps:$4 sm:$0xff]  }
0x11e2   :  { %v10525_v0 = vrot.slane %v10524_v39, 2  ;;  %11455 = vmatprep.subr.bf16.mxu1 %v14726_v51  ;;  %v14763_v8 = vld [vmem:[#allocation28 + $0x3a0] ss:$8 sps:$4 sm:$0xff]   ;;  %v14768_v38 = vld [vmem:[#allocation28 + $0x3b4] ss:$8 sps:$4 sm:$0xff]  }
0x11e3   :  { %v10532_v43 = vrot.slane %v10531_v31, 2  ;;  %v10545_v6 = vadd.f32 %v10544_v26, %v10543_v29  ;;  %v10536_v20 = vsel %vm3446_vm0, %v10492_v7, 0.0  ;;  %v14766_v51 = vld [vmem:[#allocation28 + $0x3b0] ss:$8 sps:$4 sm:$0xff]   ;;  %v14771_v18 = vld [vmem:[#allocation28 + $0x3c4] ss:$8 sps:$4 sm:$0xff]  }
0x11e4   :  { %v10526_v12 = vadd.f32 %v10525_v0, %v10524_v39  ;;  %v10537_v56 = vrot.slane %v10536_v20, 4  ;;  %v14769_v39 = vld [vmem:[#allocation28 + $0x3c0] ss:$8 sps:$4 sm:$0xff]   ;;  %v14777_v0 = vld [vmem:[#allocation28 + $0x3e4] ss:$8 sps:$4 sm:$0xff]  }
0x11e5   :  { %v10533_v40 = vadd.f32 %v10532_v43, %v10531_v31  ;;  %11456 = vmatpush1.bf16.msra.mxu1 %v14724_v47  ;;  %v10546_v55 = vrot.slane %v10545_v6, 2  ;;  %v14774_v31 = vld [vmem:[#allocation28 + $0x3d4] ss:$8 sps:$4 sm:$0xff]   ;;  %v14772_v47 = vld [vmem:[#allocation28 + $0x3d0] ss:$8 sps:$4 sm:$0xff]  }
0x11e6   :  { %v10527_v21 = vrot.slane %v10526_v12, 1  ;;  %11457 = vmatprep.subr.bf16.mxu1 %v14729_v36  ;;  %v10538_v32 = vadd.f32 %v10537_v56, %v10536_v20  ;;  %v14775_v36 = vld [vmem:[#allocation28 + $0x3e0] ss:$8 sps:$4 sm:$0xff]   ;;  %v14780_v43 = vld [vmem:[#allocation28 + $0x3f4] ss:$8 sps:$4 sm:$0xff]  }
0x11e7   :  { %v10534_v54 = vrot.slane %v10533_v40, 1  ;;  %v10547_v28 = vadd.f32 %v10546_v55, %v10545_v6  ;;  %v11543_v55 = vld [vmem:[#allocation31 + $0xe0] sm:$0xff] }
0x11e8   :  { %v10528_v50 = vadd.f32 %v10527_v21, %v10526_v12  ;;  %v10539_v58 = vrot.slane %v10538_v32, 2  ;;  %v14778_v12 = vld [vmem:[#allocation28 + $0x3f0] ss:$8 sps:$4 sm:$0xff]  }
0x11e9   :  { %11458 = vmatpush1.bf16.msra.mxu1 %v14727_v27  ;;  %v10535_v60 = vadd.f32 %v10534_v54, %v10533_v40  ;;  %v10548_v53 = vrot.slane %v10547_v28, 1  ;;  %v11544_v21 = vld [vmem:[#allocation31 + $0xe8] sm:$0xff]  ;;  %v11527_v54 = vld [vmem:[#allocation31 + $0x60] sm:$0xff] }
0x11ea   :  { %11459 = vmatprep.subr.bf16.mxu1 %v14732_v52  ;;  %v10555_v11 = vmul.f32 0.25, %v10528_v50  ;;  %v10540_v29 = vadd.f32 %v10539_v58, %v10538_v32  ;;  %v13507_v52 = vpack.c.bf16 %v11544_v21, %v11543_v55 }
0x11eb   :  { %v10556_v13 = vmul.f32 0.25, %v10535_v60  ;;  %v10549_v25 = vadd.f32 %v10548_v53, %v10547_v28  ;;  %v11528_v28 = vld [vmem:[#allocation31 + $0x68] sm:$0xff]  ;;  %v11546_v60 = vld [vmem:[#allocation31 + $0xf8] sm:$0xff] }
0x11ec   :  { %v10563_v24 = vpack.c.bf16 %v10555_v11, %v10555_v11  ;;  %v10541_v26 = vrot.slane %v10540_v29, 1  ;;  %v13509_v50 = vpack.c.bf16 %v11528_v28, %v11527_v54  ;;  %13508 = vmatprep.subr.bf16.mxu0 %v13507_v52  ;;  %v11530_v11 = vld [vmem:[#allocation31 + $0x78] sm:$0xff] }
0x11ed   :  { %11460 = vmatpush1.bf16.msra.mxu1 %v14730_v23  ;;  %v10564_v62 = vpack.c.bf16 %v10556_v13, %v10556_v13  ;;  %v10558_v3 = vmul.f32 0.25, %v10549_v25  ;;  %v11545_v23 = vld [vmem:[#allocation31 + $0xf0] sm:$0xff]  ;;  %v10695_v25 = vld [vmem:[#allocation30] sm:$0x3] }
0x11ee   :  { %11470 = vmatprep.subr.bf16.mxu1 %v14735_v33  ;;  %v10542_v6 = vadd.f32 %v10541_v26, %v10540_v29  ;;  %13510 = vmatpush3.bf16.msra.mxu0 %v13509_v50  ;;  %v13511_v53 = vpack.c.bf16 %v11546_v60, %v11545_v23  ;;  %v11529_v33 = vld [vmem:[#allocation31 + $0x70] sm:$0xff] }
0x11ef   :  { %11461 = vmatprep.mubr.bf16.mxu1 %v10564_v62  ;;  %v10566_v1 = vpack.c.bf16 %v10558_v3, %v10558_v3  ;;  %v13513_v13 = vpack.c.bf16 %v11530_v11, %v11529_v33  ;;  %v11340_v62 = vrot.slane %v10695_v25, %v16874_v59 }
0x11f0   :  { %11462 = vmatmul.mubr.bf16.vlgmr.msra.gmra.mrb[248].mxu1 %v10563_v24  ;;  %v10557_v40 = vmul.f32 0.25, %v10542_v6  ;;  %13512 = vmatprep.subr.bf16.mxu0 %v13511_v53 }
0x11f1   :  { %11471 = vmatpush1.bf16.msra.mxu1 %v14733_v34  ;;  %11502 = vmatprep.mubr.bf16.mxu1 %v10566_v1  ;;  %v11344_v34 = vrot.slane %v10695_v25, %v16877_v45 }
0x11f2   :  { %11472 = vmatprep.subr.bf16.mxu1 %v14738_v42  ;;  %v10565_v27 = vpack.c.bf16 %v10557_v40, %v10557_v40  ;;  %13514 = vmatpush3.bf16.msra.mxu0 %v13513_v13 }
0x11f5   :  { %11473 = vmatpush1.bf16.msra.mxu1 %v14736_v5 }
0x11f6   :  { %11474 = vmatprep.subr.bf16.mxu1 %v14741_v30 }
0x11f9   :  { %11475 = vmatpush1.bf16.msra.mxu1 %v14739_v2 }
0x11fa   :  { %11476 = vmatprep.subr.bf16.mxu1 %v14744_v49 }
0x11fd   :  { %11477 = vmatpush1.bf16.msra.mxu1 %v14742_v63 }
0x11fe   :  { %11478 = vmatprep.subr.bf16.mxu1 %v14747_v57 }
0x1201   :  { %11479 = vmatpush1.bf16.msra.mxu1 %v14745_v14  ;;  %v11547_v14 = vld [vmem:[#allocation33] sm:$0x1] }
0x1202   :  { %11480 = vmatprep.subr.bf16.mxu1 %v14750_v9 }
0x1205   :  { %11481 = vmatpush1.bf16.msra.mxu1 %v14748_v37 }
0x1206   :  { %11482 = vmatprep.subr.bf16.mxu1 %v14753_v16 }
0x1209   :  { %11483 = vmatpush1.bf16.msra.mxu1 %v14751_v4 }
0x120a   :  { %11484 = vmatprep.subr.bf16.mxu1 %v14756_v44 }
0x120d   :  { %11485 = vmatpush1.bf16.msra.mxu1 %v14754_v61 }
0x120e   :  { %11486 = vmatprep.subr.bf16.mxu1 %v14759_v10 }
0x1211   :  { %11487 = vmatpush1.bf16.msra.mxu1 %v14757_v41 }
0x1212   :  { %11488 = vmatprep.subr.bf16.mxu1 %v14762_v22 }
0x1215   :  { %11489 = vmatpush1.bf16.msra.mxu1 %v14760_v35 }
0x1216   :  { %11490 = vmatprep.subr.bf16.mxu1 %v14765_v48 }
0x1219   :  { %11491 = vmatpush1.bf16.msra.mxu1 %v14763_v8 }
0x121a   :  { %11492 = vmatprep.subr.bf16.mxu1 %v14768_v38 }
0x121d   :  { %11493 = vmatpush1.bf16.msra.mxu1 %v14766_v51 }
0x121e   :  { %11494 = vmatprep.subr.bf16.mxu1 %v14771_v18 }
0x1221   :  { %11495 = vmatpush1.bf16.msra.mxu1 %v14769_v39 }
0x1222   :  { %11496 = vmatprep.subr.bf16.mxu1 %v14774_v31 }
0x1225   :  { %11497 = vmatpush1.bf16.msra.mxu1 %v14772_v47 }
0x1226   :  { %11498 = vmatprep.subr.bf16.mxu1 %v14777_v0 }
0x1229   :  { %11499 = vmatpush1.bf16.msra.mxu1 %v14775_v36 }
0x122a   :  { %11500 = vmatprep.subr.bf16.mxu1 %v14780_v43 }
0x122d   :  { %11501 = vmatpush1.bf16.msra.mxu1 %v14778_v12 }
0x1230   :  { %11503 = vmatmul.mubr.bf16.vlgmr.msra.gmra.mrb[248].mxu1 %v10565_v27 }
0x1303   :  { %v11504_v3 = vpop.f32.mrb[248].mxu1 }
0x1304   :  { %v13571_v24 = vadd.f32 %v11504_v3, %v11340_v62  ;;  %v11506_v42 = vpop.f32.mrb[249].mxu1 }
0x1305   :  { %v13572_v1 = vadd.f32 %v11506_v42, %v11344_v34  ;;  %v11508_v5 = vpop.f32.mrb[250].mxu1 }
0x1306   :  { %v11511_v30 = vmax.f32 %v13571_v24, 0.0  ;;  %v11509_v2 = vpop.f32.mrb[251].mxu1 }
0x1307   :  { %v11512_v49 = vmax.f32 %v13572_v1, 0.0 }
0x1308   :  { %v11513_v57 = vmin.f32 %v11511_v30, 6.0 }
0x1309   :  { %v11514_v63 = vmin.f32 %v11512_v49, 6.0 }
0x130b   :  { %11612 = vmatprep.mubr.f32.mxu0 %v11514_v63 }
0x130c   :  { %11613 = vmatmul.mubr.f32.vlgmr.msra.gmra.mrb[140].mxu0 %v11513_v57 }
0x13df   :  { %v12996_v15 = vpop.f32.mrb[140].mxu0 }
0x13e0   :  { %v12997_v9 = vpop.f32.mrb[141].mxu0 }
0x13e1   :  { %v12998_v19 = vadd.f32 %v12997_v9, %v12996_v15 }
0x13e3   :  { %v11615_v37 = vadd.f32 %v12998_v19, %v11547_v14 }
0x13e5   :  { %v11618_v59 = vand.u32 2147483647, %v11615_v37  ;;  %vm11622_vm5 = vcmp.ge.f32.partialorder %v11615_v37, 0.0 }
0x13e7   :  { %v11619_v16 = vsub.f32 0.0, %v11618_v59 }
0x13e9   :  { %v11620_v45 = vmul.f32 1.442695, %v11619_v16 }
0x13eb   :  { %14781 = vpow2.f32 %v11620_v45 }
0x13f5   :  { %v14782_v46 = vpop.eup %14781 }
0x13f6   :  { %v11624_v4 = vadd.f32 1.0, %v14782_v46  ;;  %v11623_v17 = vsel %vm11622_vm5, 1.0, %v14782_v46 }
0x13f8   :  { %14783 = vrcp.f32 %v11624_v4 }
0x1402   :  { %v14784_v44 = vpop.eup %14783 }
0x1403   :  { %v11626_v61 = vmul.f32 %v14784_v44, %v11623_v17 }
0x1405   :  { %11627 = vst [vmem:[%s18122_s14] sm:$0x1] %v11626_v61 }
0x1406   :  { %11632 = vsyncpa [#allocation3], 1 }
0x1407   :  { %11633 = vsyncpa [#allocation5], 1 }
0x1408   :  { %11634 = vsyncpa [#allocation8], 1 }
0x1409   :  { %11635 = vsyncpa [#allocation11], 1 }
0x140a   :  { %11636 = vsyncpa [#allocation14], 1 }
0x140b   :  { %11637 = vsyncpa [#allocation17], 1 }
0x140c   :  { %11638 = vsyncpa [#allocation20], 1 }
0x140d   :  { %11639 = vsyncpa [#allocation23], 1 }
0x140e   :  { %11640 = vsyncpa [#allocation26], 1 }
0x140f   :  { %11641 = vsyncpa [#allocation29], 1 }
0x1410   :  { %11642 = vsyncpa [#allocation32], 1 }

</bundles_post_ra>
